<compile_context>
chip_gen: v6e
topology: v6e:2x2x1
jax: 0.10.0
libtpu: 0.0.40
codegen_flags: <defaults>
</compile_context>

<pallas_src>
import functools

import jax
import jax.numpy as jnp
from jax.experimental import pallas as pl
from jax.experimental.pallas import tpu as pltpu


# ----------------------------------------------------------------------------
# Fused Pallas kernel: conv3x3+ReLU -> conv3x3+ReLU -> global avg pool -> linear
# ----------------------------------------------------------------------------
def _fused_resnet2_kernel(x_ref, mask_ref, w1_ref, b1_ref, w2_ref, b2_ref,
                          wc_ref, bc_ref, out_ref, a1_ref,
                          *, m_pad, wp, ext, inv_hw):
    """One grid step == one image.

    Shapes:
      x_ref    (M_ext, Cin)   bf16  zero-extended, flattened, spatially-padded NHWC image
      mask_ref (M_pad, 1)     f32   1.0 at interior (valid) spatial positions
      w1_ref   (9, Cin, C1)   bf16  conv1 weights, one (Cin, C1) slab per 3x3 tap
      b1_ref   (1, C1)        f32
      w2_ref   (9, C1, C2)    bf16
      b2_ref   (1, C2)        f32
      wc_ref   (C2, 128)      f32   classifier weight, padded to 128 output lanes
      bc_ref   (1, 128)       f32
      out_ref  (1, 128)       f32   logits (lane-dense)
      a1_ref   (M_ext, C1)    bf16  VMEM scratch: conv1 activations, zero-extended
    """
    c1 = w1_ref.shape[2]
    c2 = w2_ref.shape[2]
    mask = mask_ref[...]                                     # (M_pad, 1) f32

    # ---- conv1: 3x3 / pad=1 as 9 shifted matmuls, f32 accumulation ----------
    acc1 = jnp.zeros((m_pad, c1), jnp.float32)
    for ki in range(3):
        for kj in range(3):
            t = ki * 3 + kj
            s = ext + (ki - 1) * wp + (kj - 1)               # static row offset
            xt = x_ref[pl.ds(s, m_pad), :]                   # (M_pad, Cin) bf16
            acc1 = acc1 + jnp.dot(xt, w1_ref[t],
                                  preferred_element_type=jnp.float32)
    # bias + ReLU in f32; zero the padded-border rows so they act as conv2's
    # zero padding.
    y1 = jnp.maximum(acc1 + b1_ref[...], 0.0) * mask         # (M_pad, C1) f32

    # stash conv1 activations in VMEM scratch (zero-extended); never hits HBM.
    a1_ref[...] = jnp.zeros_like(a1_ref)
    a1_ref[pl.ds(ext, m_pad), :] = y1.astype(a1_ref.dtype)

    # ---- conv2 + fused global average pool ----------------------------------
    acc2 = jnp.zeros((m_pad, c2), jnp.float32)
    for ki in range(3):
        for kj in range(3):
            t = ki * 3 + kj
            s = ext + (ki - 1) * wp + (kj - 1)
            ht = a1_ref[pl.ds(s, m_pad), :]                  # (M_pad, C1) bf16
            acc2 = acc2 + jnp.dot(ht, w2_ref[t],
                                  preferred_element_type=jnp.float32)
    y2 = jnp.maximum(acc2 + b2_ref[...], 0.0) * mask         # (M_pad, C2) f32
    pooled = jnp.sum(y2, axis=0, keepdims=True) * inv_hw     # (1, C2) == avgpool+flatten

    # ---- classifier (output padded to 128 lanes -> lane-dense store) --------
    logits = jnp.dot(pooled, wc_ref[...], preferred_element_type=jnp.float32)
    out_ref[...] = (logits + bc_ref[...]).astype(out_ref.dtype)


# ----------------------------------------------------------------------------
# Wrapper: layout prep (cheap XLA, no 9x im2col expansion) + pallas_call
# ----------------------------------------------------------------------------
def resnet2_forward(x, params, *, num_classes_pad=128):
    """Forward pass equivalent to ResNet2.forward (x: NCHW float32)."""
    N, C, H, W = x.shape
    c1 = params["w1"].shape[0]
    c2 = params["w2"].shape[0]
    num_classes = params["wc"].shape[0]

    hp, wp = H + 2, W + 2
    m_pad = hp * wp
    ext = ((wp + 1 + 7) // 8) * 8        # >= wp+1, 8-aligned start of the center
    m_ext = m_pad + 2 * ext

    # --- single NCHW -> NHWC layout change at the model boundary, flatten ----
    x_nhwc = jnp.transpose(x, (0, 2, 3, 1))                                  # (N,H,W,C)
    x_flat = jnp.pad(x_nhwc, ((0, 0), (1, 1), (1, 1), (0, 0))).reshape(N, m_pad, C)
    x_ext = jnp.pad(x_flat, ((0, 0), (ext, ext), (0, 0))).astype(jnp.bfloat16)

    # interior (valid output) mask over the padded flattened spatial index
    hh = jnp.arange(hp).reshape(hp, 1)
    ww = jnp.arange(wp).reshape(1, wp)
    interior = (hh >= 1) & (hh <= H) & (ww >= 1) & (ww <= W)
    mask = interior.astype(jnp.float32).reshape(m_pad, 1)

    # per-tap weight slabs: [ki*3+kj, cin, cout] = W_torch[cout, cin, ki, kj]
    w1_taps = jnp.transpose(params["w1"], (2, 3, 1, 0)).reshape(9, C, c1).astype(jnp.bfloat16)
    w2_taps = jnp.transpose(params["w2"], (2, 3, 1, 0)).reshape(9, c1, c2).astype(jnp.bfloat16)
    b1r = params["b1"].reshape(1, c1).astype(jnp.float32)
    b2r = params["b2"].reshape(1, c2).astype(jnp.float32)

    # classifier weight/bias padded to a lane-dense 128-wide output
    wc_pad = jnp.zeros((c2, num_classes_pad), jnp.float32).at[:, :num_classes].set(
        params["wc"].T.astype(jnp.float32))
    bc_pad = jnp.zeros((1, num_classes_pad), jnp.float32).at[:, :num_classes].set(
        params["bc"].reshape(1, -1).astype(jnp.float32))

    kernel = functools.partial(_fused_resnet2_kernel,
                               m_pad=m_pad, wp=wp, ext=ext, inv_hw=1.0 / (H * W))

    flops = N * (2 * m_pad * 9 * C * c1 + 2 * m_pad * 9 * c1 * c2
                 + 2 * c2 * num_classes_pad)
    bytes_accessed = (x_ext.size * 2 + mask.size * 4
                      + w1_taps.size * 2 + w2_taps.size * 2
                      + (b1r.size + b2r.size + wc_pad.size + bc_pad.size) * 4
                      + N * num_classes_pad * 4)

    const3 = lambda n: (0, 0, 0)
    const2 = lambda n: (0, 0)

    out = pl.pallas_call(
        kernel,
        out_shape=jax.ShapeDtypeStruct((N, 1, num_classes_pad), jnp.float32),
        grid_spec=pltpu.PrefetchScalarGridSpec(
            num_scalar_prefetch=0,
            grid=(N,),
            in_specs=[
                pl.BlockSpec((None, m_ext, C), lambda n: (n, 0, 0)),   # x (one image)
                pl.BlockSpec((m_pad, 1), const2),                      # interior mask
                pl.BlockSpec((9, C, c1), const3),                      # conv1 weights
                pl.BlockSpec((1, c1), const2),                         # conv1 bias
                pl.BlockSpec((9, c1, c2), const3),                     # conv2 weights
                pl.BlockSpec((1, c2), const2),                         # conv2 bias
                pl.BlockSpec((c2, num_classes_pad), const2),           # classifier W
                pl.BlockSpec((1, num_classes_pad), const2),            # classifier b
            ],
            out_specs=pl.BlockSpec((None, 1, num_classes_pad), lambda n: (n, 0, 0)),
            scratch_shapes=[pltpu.VMEM((m_ext, c1), jnp.bfloat16)],
        ),
        compiler_params=pltpu.CompilerParams(
            dimension_semantics=("parallel",),
            vmem_limit_bytes=32 * 1024 * 1024,
        ),
        cost_estimate=pl.CostEstimate(flops=flops, transcendentals=0,
                                      bytes_accessed=bytes_accessed),
    )(x_ext, mask, w1_taps, b1r, w2_taps, b2r, wc_pad, bc_pad)

    return out[:, 0, :num_classes]


# ----------------------------------------------------------------------------
# Parameters + pure-JAX reference (for a sanity check only)
# ----------------------------------------------------------------------------
def init_params(key, c_in=4, c1=16, c2=32, num_classes=8):
    k1, k2, k3, k4, k5, k6 = jax.random.split(key, 6)
    w1 = jax.random.normal(k1, (c1, c_in, 3, 3), jnp.float32) * 0.1   # PyTorch conv layout
    b1 = jax.random.normal(k2, (c1,), jnp.float32) * 0.01
    w2 = jax.random.normal(k3, (c2, c1, 3, 3), jnp.float32) * 0.1
    b2 = jax.random.normal(k4, (c2,), jnp.float32) * 0.01
    wc = jax.random.normal(k5, (num_classes, c2), jnp.float32) * 0.1  # PyTorch Linear layout
    bc = jax.random.normal(k6, (num_classes,), jnp.float32) * 0.01
    return {"w1": w1, "b1": b1, "w2": w2, "b2": b2, "wc": wc, "bc": bc}


def _reference_forward(x, params):
    dn = ("NCHW", "OIHW", "NCHW")
    y = jax.lax.conv_general_dilated(x, params["w1"], (1, 1), ((1, 1), (1, 1)),
                                     dimension_numbers=dn)
    y = jax.nn.relu(y + params["b1"].reshape(1, -1, 1, 1))
    y = jax.lax.conv_general_dilated(y, params["w2"], (1, 1), ((1, 1), (1, 1)),
                                     dimension_numbers=dn)
    y = jax.nn.relu(y + params["b2"].reshape(1, -1, 1, 1))
    pooled = jnp.mean(y, axis=(2, 3))
    return pooled @ params["wc"].T + params["bc"]


if __name__ == "__main__":
    key = jax.random.PRNGKey(0)
    kx, kp = jax.random.split(key)

    N, C, H, W = 2, 4, 16, 16
    x = jax.random.normal(kx, (N, C, H, W), jnp.float32)
    params = init_params(kp, c_in=C, c1=16, c2=32, num_classes=8)

    fwd = jax.jit(resnet2_forward)
    out = jax.block_until_ready(fwd(x, params))
    assert out.shape == (N, 8) and out.dtype == jnp.float32

    ref = jax.block_until_ready(_reference_forward(x, params))
    max_err = float(jnp.max(jnp.abs(out - ref)))
    assert jnp.allclose(out, ref, rtol=1e-1, atol=1e-1), f"max abs err {max_err:.4f}"

    print("KERNEL_OK")
</pallas_src>

<mosaic_0001>
module attributes {stable_mosaic.version = 11 : i64} {
  func.func @_fused_resnet2_kernel(%arg0: i32, %arg1: memref<1x372x4xbf16, #tpu.memory_space<vmem>>, %arg2: memref<324x1xf32, #tpu.memory_space<vmem>>, %arg3: memref<9x4x16xbf16, #tpu.memory_space<vmem>>, %arg4: memref<1x16xf32, #tpu.memory_space<vmem>>, %arg5: memref<9x16x32xbf16, #tpu.memory_space<vmem>>, %arg6: memref<1x32xf32, #tpu.memory_space<vmem>>, %arg7: memref<32x128xf32, #tpu.memory_space<vmem>>, %arg8: memref<1x128xf32, #tpu.memory_space<vmem>>, %arg9: memref<1x1x128xf32, #tpu.memory_space<vmem>>, %arg10: memref<372x16xbf16, #tpu.memory_space<vmem>>) attributes {dimension_semantics = [#tpu.dimension_semantics<parallel>], iteration_bounds = array<i64: 2>, scalar_prefetch = 0 : i64, scratch_operands = 1 : i64, tpu.core_type = #tpu.core_type<tc>, window_params = [{transform_indices = @transform_0, window_bounds = array<i64: 1, 372, 4>}, {pipeline_mode = #tpu.pipeline_mode<synchronous>, transform_indices = @transform_1, window_bounds = array<i64: 324, 1>}, {pipeline_mode = #tpu.pipeline_mode<synchronous>, transform_indices = @transform_2, window_bounds = array<i64: 9, 4, 16>}, {pipeline_mode = #tpu.pipeline_mode<synchronous>, transform_indices = @transform_3, window_bounds = array<i64: 1, 16>}, {pipeline_mode = #tpu.pipeline_mode<synchronous>, transform_indices = @transform_4, window_bounds = array<i64: 9, 16, 32>}, {pipeline_mode = #tpu.pipeline_mode<synchronous>, transform_indices = @transform_5, window_bounds = array<i64: 1, 32>}, {pipeline_mode = #tpu.pipeline_mode<synchronous>, transform_indices = @transform_6, window_bounds = array<i64: 32, 128>}, {pipeline_mode = #tpu.pipeline_mode<synchronous>, transform_indices = @transform_7, window_bounds = array<i64: 1, 128>}, {transform_indices = @transform_8, window_bounds = array<i64: 1, 1, 128>}]} {
    %c0 = arith.constant 0 : index
    %c0_0 = arith.constant 0 : index
    %0 = vector.load %arg2[%c0, %c0_0] : memref<324x1xf32, #tpu.memory_space<vmem>>, vector<324x1xf32>
    %cst = arith.constant 0.000000e+00 : f32
    %1 = vector.broadcast %cst : f32 to vector<324x16xf32>
    %c0_1 = arith.constant 0 : index
    %c5 = arith.constant 5 : index
    %c0_2 = arith.constant 0 : index
    %2 = vector.load %arg1[%c0_1, %c5, %c0_2] : memref<1x372x4xbf16, #tpu.memory_space<vmem>>, vector<1x324x4xbf16>
    %3 = vector.shape_cast %2 : vector<1x324x4xbf16> to vector<324x4xbf16>
    %c0_3 = arith.constant 0 : index
    %c0_4 = arith.constant 0 : index
    %c0_5 = arith.constant 0 : index
    %4 = vector.load %arg3[%c0_3, %c0_4, %c0_5] : memref<9x4x16xbf16, #tpu.memory_space<vmem>>, vector<1x4x16xbf16>
    %5 = vector.shape_cast %4 : vector<1x4x16xbf16> to vector<4x16xbf16>
    %cst_6 = arith.constant dense<0.000000e+00> : vector<324x16xf32>
    %6 = tpu.matmul %3, %5, %cst_6 {dimension_numbers = #tpu.dot_dimension_numbers<[1], [0], [0], [1], [0, 0, 1, 1], [], []>} : vector<324x4xbf16>, vector<4x16xbf16>, vector<324x16xf32> -> vector<324x16xf32>
    %7 = arith.addf %1, %6 : vector<324x16xf32>
    %c0_7 = arith.constant 0 : index
    %c6 = arith.constant 6 : index
    %c0_8 = arith.constant 0 : index
    %8 = vector.load %arg1[%c0_7, %c6, %c0_8] : memref<1x372x4xbf16, #tpu.memory_space<vmem>>, vector<1x324x4xbf16>
    %9 = vector.shape_cast %8 : vector<1x324x4xbf16> to vector<324x4xbf16>
    %c1 = arith.constant 1 : index
    %c0_9 = arith.constant 0 : index
    %c0_10 = arith.constant 0 : index
    %10 = vector.load %arg3[%c1, %c0_9, %c0_10] : memref<9x4x16xbf16, #tpu.memory_space<vmem>>, vector<1x4x16xbf16>
    %11 = vector.shape_cast %10 : vector<1x4x16xbf16> to vector<4x16xbf16>
    %cst_11 = arith.constant dense<0.000000e+00> : vector<324x16xf32>
    %12 = tpu.matmul %9, %11, %cst_11 {dimension_numbers = #tpu.dot_dimension_numbers<[1], [0], [0], [1], [0, 0, 1, 1], [], []>} : vector<324x4xbf16>, vector<4x16xbf16>, vector<324x16xf32> -> vector<324x16xf32>
    %13 = arith.addf %7, %12 : vector<324x16xf32>
    %c0_12 = arith.constant 0 : index
    %c7 = arith.constant 7 : index
    %c0_13 = arith.constant 0 : index
    %14 = vector.load %arg1[%c0_12, %c7, %c0_13] : memref<1x372x4xbf16, #tpu.memory_space<vmem>>, vector<1x324x4xbf16>
    %15 = vector.shape_cast %14 : vector<1x324x4xbf16> to vector<324x4xbf16>
    %c2 = arith.constant 2 : index
    %c0_14 = arith.constant 0 : index
    %c0_15 = arith.constant 0 : index
    %16 = vector.load %arg3[%c2, %c0_14, %c0_15] : memref<9x4x16xbf16, #tpu.memory_space<vmem>>, vector<1x4x16xbf16>
    %17 = vector.shape_cast %16 : vector<1x4x16xbf16> to vector<4x16xbf16>
    %cst_16 = arith.constant dense<0.000000e+00> : vector<324x16xf32>
    %18 = tpu.matmul %15, %17, %cst_16 {dimension_numbers = #tpu.dot_dimension_numbers<[1], [0], [0], [1], [0, 0, 1, 1], [], []>} : vector<324x4xbf16>, vector<4x16xbf16>, vector<324x16xf32> -> vector<324x16xf32>
    %19 = arith.addf %13, %18 : vector<324x16xf32>
    %c0_17 = arith.constant 0 : index
    %c23 = arith.constant 23 : index
    %c0_18 = arith.constant 0 : index
    %20 = vector.load %arg1[%c0_17, %c23, %c0_18] : memref<1x372x4xbf16, #tpu.memory_space<vmem>>, vector<1x324x4xbf16>
    %21 = vector.shape_cast %20 : vector<1x324x4xbf16> to vector<324x4xbf16>
    %c3 = arith.constant 3 : index
    %c0_19 = arith.constant 0 : index
    %c0_20 = arith.constant 0 : index
    %22 = vector.load %arg3[%c3, %c0_19, %c0_20] : memref<9x4x16xbf16, #tpu.memory_space<vmem>>, vector<1x4x16xbf16>
    %23 = vector.shape_cast %22 : vector<1x4x16xbf16> to vector<4x16xbf16>
    %cst_21 = arith.constant dense<0.000000e+00> : vector<324x16xf32>
    %24 = tpu.matmul %21, %23, %cst_21 {dimension_numbers = #tpu.dot_dimension_numbers<[1], [0], [0], [1], [0, 0, 1, 1], [], []>} : vector<324x4xbf16>, vector<4x16xbf16>, vector<324x16xf32> -> vector<324x16xf32>
    %25 = arith.addf %19, %24 : vector<324x16xf32>
    %c0_22 = arith.constant 0 : index
    %c24 = arith.constant 24 : index
    %c0_23 = arith.constant 0 : index
    %26 = vector.load %arg1[%c0_22, %c24, %c0_23] : memref<1x372x4xbf16, #tpu.memory_space<vmem>>, vector<1x324x4xbf16>
    %27 = vector.shape_cast %26 : vector<1x324x4xbf16> to vector<324x4xbf16>
    %c4 = arith.constant 4 : index
    %c0_24 = arith.constant 0 : index
    %c0_25 = arith.constant 0 : index
    %28 = vector.load %arg3[%c4, %c0_24, %c0_25] : memref<9x4x16xbf16, #tpu.memory_space<vmem>>, vector<1x4x16xbf16>
    %29 = vector.shape_cast %28 : vector<1x4x16xbf16> to vector<4x16xbf16>
    %cst_26 = arith.constant dense<0.000000e+00> : vector<324x16xf32>
    %30 = tpu.matmul %27, %29, %cst_26 {dimension_numbers = #tpu.dot_dimension_numbers<[1], [0], [0], [1], [0, 0, 1, 1], [], []>} : vector<324x4xbf16>, vector<4x16xbf16>, vector<324x16xf32> -> vector<324x16xf32>
    %31 = arith.addf %25, %30 : vector<324x16xf32>
    %c0_27 = arith.constant 0 : index
    %c25 = arith.constant 25 : index
    %c0_28 = arith.constant 0 : index
    %32 = vector.load %arg1[%c0_27, %c25, %c0_28] : memref<1x372x4xbf16, #tpu.memory_space<vmem>>, vector<1x324x4xbf16>
    %33 = vector.shape_cast %32 : vector<1x324x4xbf16> to vector<324x4xbf16>
    %c5_29 = arith.constant 5 : index
    %c0_30 = arith.constant 0 : index
    %c0_31 = arith.constant 0 : index
    %34 = vector.load %arg3[%c5_29, %c0_30, %c0_31] : memref<9x4x16xbf16, #tpu.memory_space<vmem>>, vector<1x4x16xbf16>
    %35 = vector.shape_cast %34 : vector<1x4x16xbf16> to vector<4x16xbf16>
    %cst_32 = arith.constant dense<0.000000e+00> : vector<324x16xf32>
    %36 = tpu.matmul %33, %35, %cst_32 {dimension_numbers = #tpu.dot_dimension_numbers<[1], [0], [0], [1], [0, 0, 1, 1], [], []>} : vector<324x4xbf16>, vector<4x16xbf16>, vector<324x16xf32> -> vector<324x16xf32>
    %37 = arith.addf %31, %36 : vector<324x16xf32>
    %c0_33 = arith.constant 0 : index
    %c41 = arith.constant 41 : index
    %c0_34 = arith.constant 0 : index
    %38 = vector.load %arg1[%c0_33, %c41, %c0_34] : memref<1x372x4xbf16, #tpu.memory_space<vmem>>, vector<1x324x4xbf16>
    %39 = vector.shape_cast %38 : vector<1x324x4xbf16> to vector<324x4xbf16>
    %c6_35 = arith.constant 6 : index
    %c0_36 = arith.constant 0 : index
    %c0_37 = arith.constant 0 : index
    %40 = vector.load %arg3[%c6_35, %c0_36, %c0_37] : memref<9x4x16xbf16, #tpu.memory_space<vmem>>, vector<1x4x16xbf16>
    %41 = vector.shape_cast %40 : vector<1x4x16xbf16> to vector<4x16xbf16>
    %cst_38 = arith.constant dense<0.000000e+00> : vector<324x16xf32>
    %42 = tpu.matmul %39, %41, %cst_38 {dimension_numbers = #tpu.dot_dimension_numbers<[1], [0], [0], [1], [0, 0, 1, 1], [], []>} : vector<324x4xbf16>, vector<4x16xbf16>, vector<324x16xf32> -> vector<324x16xf32>
    %43 = arith.addf %37, %42 : vector<324x16xf32>
    %c0_39 = arith.constant 0 : index
    %c42 = arith.constant 42 : index
    %c0_40 = arith.constant 0 : index
    %44 = vector.load %arg1[%c0_39, %c42, %c0_40] : memref<1x372x4xbf16, #tpu.memory_space<vmem>>, vector<1x324x4xbf16>
    %45 = vector.shape_cast %44 : vector<1x324x4xbf16> to vector<324x4xbf16>
    %c7_41 = arith.constant 7 : index
    %c0_42 = arith.constant 0 : index
    %c0_43 = arith.constant 0 : index
    %46 = vector.load %arg3[%c7_41, %c0_42, %c0_43] : memref<9x4x16xbf16, #tpu.memory_space<vmem>>, vector<1x4x16xbf16>
    %47 = vector.shape_cast %46 : vector<1x4x16xbf16> to vector<4x16xbf16>
    %cst_44 = arith.constant dense<0.000000e+00> : vector<324x16xf32>
    %48 = tpu.matmul %45, %47, %cst_44 {dimension_numbers = #tpu.dot_dimension_numbers<[1], [0], [0], [1], [0, 0, 1, 1], [], []>} : vector<324x4xbf16>, vector<4x16xbf16>, vector<324x16xf32> -> vector<324x16xf32>
    %49 = arith.addf %43, %48 : vector<324x16xf32>
    %c0_45 = arith.constant 0 : index
    %c43 = arith.constant 43 : index
    %c0_46 = arith.constant 0 : index
    %50 = vector.load %arg1[%c0_45, %c43, %c0_46] : memref<1x372x4xbf16, #tpu.memory_space<vmem>>, vector<1x324x4xbf16>
    %51 = vector.shape_cast %50 : vector<1x324x4xbf16> to vector<324x4xbf16>
    %c8 = arith.constant 8 : index
    %c0_47 = arith.constant 0 : index
    %c0_48 = arith.constant 0 : index
    %52 = vector.load %arg3[%c8, %c0_47, %c0_48] : memref<9x4x16xbf16, #tpu.memory_space<vmem>>, vector<1x4x16xbf16>
    %53 = vector.shape_cast %52 : vector<1x4x16xbf16> to vector<4x16xbf16>
    %cst_49 = arith.constant dense<0.000000e+00> : vector<324x16xf32>
    %54 = tpu.matmul %51, %53, %cst_49 {dimension_numbers = #tpu.dot_dimension_numbers<[1], [0], [0], [1], [0, 0, 1, 1], [], []>} : vector<324x4xbf16>, vector<4x16xbf16>, vector<324x16xf32> -> vector<324x16xf32>
    %55 = arith.addf %49, %54 : vector<324x16xf32>
    %c0_50 = arith.constant 0 : index
    %c0_51 = arith.constant 0 : index
    %56 = vector.load %arg4[%c0_50, %c0_51] : memref<1x16xf32, #tpu.memory_space<vmem>>, vector<1x16xf32>
    %57 = vector.broadcast %56 : vector<1x16xf32> to vector<324x16xf32>
    %58 = arith.addf %55, %57 : vector<324x16xf32>
    %cst_52 = arith.constant 0.000000e+00 : f32
    %59 = vector.broadcast %cst_52 : f32 to vector<324x16xf32>
    %60 = arith.maximumf %58, %59 : vector<324x16xf32>
    %61 = vector.broadcast %0 : vector<324x1xf32> to vector<324x16xf32>
    %62 = arith.mulf %60, %61 : vector<324x16xf32>
    %cst_53 = arith.constant 0.000000e+00 : bf16
    %63 = vector.broadcast %cst_53 : bf16 to vector<372x16xbf16>
    %c0_54 = arith.constant 0 : index
    %c0_55 = arith.constant 0 : index
    %64 = vector.load %arg10[%c0_54, %c0_55] : memref<372x16xbf16, #tpu.memory_space<vmem>>, vector<372x16xbf16>
    tpu.vector_store %arg10[%c0_54, %c0_55], %63 {strides = array<i32>} : memref<372x16xbf16, #tpu.memory_space<vmem>>, vector<372x16xbf16>,
    %65 = arith.truncf %62 : vector<324x16xf32> to vector<324x16xbf16>
    %c24_56 = arith.constant 24 : index
    %c0_57 = arith.constant 0 : index
    %66 = vector.load %arg10[%c24_56, %c0_57] : memref<372x16xbf16, #tpu.memory_space<vmem>>, vector<324x16xbf16>
    tpu.vector_store %arg10[%c24_56, %c0_57], %65 {strides = array<i32>} : memref<372x16xbf16, #tpu.memory_space<vmem>>, vector<324x16xbf16>,
    %cst_58 = arith.constant 0.000000e+00 : f32
    %67 = vector.broadcast %cst_58 : f32 to vector<324x32xf32>
    %c5_59 = arith.constant 5 : index
    %c0_60 = arith.constant 0 : index
    %68 = vector.load %arg10[%c5_59, %c0_60] : memref<372x16xbf16, #tpu.memory_space<vmem>>, vector<324x16xbf16>
    %c0_61 = arith.constant 0 : index
    %c0_62 = arith.constant 0 : index
    %c0_63 = arith.constant 0 : index
    %69 = vector.load %arg5[%c0_61, %c0_62, %c0_63] : memref<9x16x32xbf16, #tpu.memory_space<vmem>>, vector<1x16x32xbf16>
    %70 = vector.shape_cast %69 : vector<1x16x32xbf16> to vector<16x32xbf16>
    %cst_64 = arith.constant dense<0.000000e+00> : vector<324x32xf32>
    %71 = tpu.matmul %68, %70, %cst_64 {dimension_numbers = #tpu.dot_dimension_numbers<[1], [0], [0], [1], [0, 0, 1, 1], [], []>} : vector<324x16xbf16>, vector<16x32xbf16>, vector<324x32xf32> -> vector<324x32xf32>
    %72 = arith.addf %67, %71 : vector<324x32xf32>
    %c6_65 = arith.constant 6 : index
    %c0_66 = arith.constant 0 : index
    %73 = vector.load %arg10[%c6_65, %c0_66] : memref<372x16xbf16, #tpu.memory_space<vmem>>, vector<324x16xbf16>
    %c1_67 = arith.constant 1 : index
    %c0_68 = arith.constant 0 : index
    %c0_69 = arith.constant 0 : index
    %74 = vector.load %arg5[%c1_67, %c0_68, %c0_69] : memref<9x16x32xbf16, #tpu.memory_space<vmem>>, vector<1x16x32xbf16>
    %75 = vector.shape_cast %74 : vector<1x16x32xbf16> to vector<16x32xbf16>
    %cst_70 = arith.constant dense<0.000000e+00> : vector<324x32xf32>
    %76 = tpu.matmul %73, %75, %cst_70 {dimension_numbers = #tpu.dot_dimension_numbers<[1], [0], [0], [1], [0, 0, 1, 1], [], []>} : vector<324x16xbf16>, vector<16x32xbf16>, vector<324x32xf32> -> vector<324x32xf32>
    %77 = arith.addf %72, %76 : vector<324x32xf32>
    %c7_71 = arith.constant 7 : index
    %c0_72 = arith.constant 0 : index
    %78 = vector.load %arg10[%c7_71, %c0_72] : memref<372x16xbf16, #tpu.memory_space<vmem>>, vector<324x16xbf16>
    %c2_73 = arith.constant 2 : index
    %c0_74 = arith.constant 0 : index
    %c0_75 = arith.constant 0 : index
    %79 = vector.load %arg5[%c2_73, %c0_74, %c0_75] : memref<9x16x32xbf16, #tpu.memory_space<vmem>>, vector<1x16x32xbf16>
    %80 = vector.shape_cast %79 : vector<1x16x32xbf16> to vector<16x32xbf16>
    %cst_76 = arith.constant dense<0.000000e+00> : vector<324x32xf32>
    %81 = tpu.matmul %78, %80, %cst_76 {dimension_numbers = #tpu.dot_dimension_numbers<[1], [0], [0], [1], [0, 0, 1, 1], [], []>} : vector<324x16xbf16>, vector<16x32xbf16>, vector<324x32xf32> -> vector<324x32xf32>
    %82 = arith.addf %77, %81 : vector<324x32xf32>
    %c23_77 = arith.constant 23 : index
    %c0_78 = arith.constant 0 : index
    %83 = vector.load %arg10[%c23_77, %c0_78] : memref<372x16xbf16, #tpu.memory_space<vmem>>, vector<324x16xbf16>
    %c3_79 = arith.constant 3 : index
    %c0_80 = arith.constant 0 : index
    %c0_81 = arith.constant 0 : index
    %84 = vector.load %arg5[%c3_79, %c0_80, %c0_81] : memref<9x16x32xbf16, #tpu.memory_space<vmem>>, vector<1x16x32xbf16>
    %85 = vector.shape_cast %84 : vector<1x16x32xbf16> to vector<16x32xbf16>
    %cst_82 = arith.constant dense<0.000000e+00> : vector<324x32xf32>
    %86 = tpu.matmul %83, %85, %cst_82 {dimension_numbers = #tpu.dot_dimension_numbers<[1], [0], [0], [1], [0, 0, 1, 1], [], []>} : vector<324x16xbf16>, vector<16x32xbf16>, vector<324x32xf32> -> vector<324x32xf32>
    %87 = arith.addf %82, %86 : vector<324x32xf32>
    %c24_83 = arith.constant 24 : index
    %c0_84 = arith.constant 0 : index
    %88 = vector.load %arg10[%c24_83, %c0_84] : memref<372x16xbf16, #tpu.memory_space<vmem>>, vector<324x16xbf16>
    %c4_85 = arith.constant 4 : index
    %c0_86 = arith.constant 0 : index
    %c0_87 = arith.constant 0 : index
    %89 = vector.load %arg5[%c4_85, %c0_86, %c0_87] : memref<9x16x32xbf16, #tpu.memory_space<vmem>>, vector<1x16x32xbf16>
    %90 = vector.shape_cast %89 : vector<1x16x32xbf16> to vector<16x32xbf16>
    %cst_88 = arith.constant dense<0.000000e+00> : vector<324x32xf32>
    %91 = tpu.matmul %88, %90, %cst_88 {dimension_numbers = #tpu.dot_dimension_numbers<[1], [0], [0], [1], [0, 0, 1, 1], [], []>} : vector<324x16xbf16>, vector<16x32xbf16>, vector<324x32xf32> -> vector<324x32xf32>
    %92 = arith.addf %87, %91 : vector<324x32xf32>
    %c25_89 = arith.constant 25 : index
    %c0_90 = arith.constant 0 : index
    %93 = vector.load %arg10[%c25_89, %c0_90] : memref<372x16xbf16, #tpu.memory_space<vmem>>, vector<324x16xbf16>
    %c5_91 = arith.constant 5 : index
    %c0_92 = arith.constant 0 : index
    %c0_93 = arith.constant 0 : index
    %94 = vector.load %arg5[%c5_91, %c0_92, %c0_93] : memref<9x16x32xbf16, #tpu.memory_space<vmem>>, vector<1x16x32xbf16>
    %95 = vector.shape_cast %94 : vector<1x16x32xbf16> to vector<16x32xbf16>
    %cst_94 = arith.constant dense<0.000000e+00> : vector<324x32xf32>
    %96 = tpu.matmul %93, %95, %cst_94 {dimension_numbers = #tpu.dot_dimension_numbers<[1], [0], [0], [1], [0, 0, 1, 1], [], []>} : vector<324x16xbf16>, vector<16x32xbf16>, vector<324x32xf32> -> vector<324x32xf32>
    %97 = arith.addf %92, %96 : vector<324x32xf32>
    %c41_95 = arith.constant 41 : index
    %c0_96 = arith.constant 0 : index
    %98 = vector.load %arg10[%c41_95, %c0_96] : memref<372x16xbf16, #tpu.memory_space<vmem>>, vector<324x16xbf16>
    %c6_97 = arith.constant 6 : index
    %c0_98 = arith.constant 0 : index
    %c0_99 = arith.constant 0 : index
    %99 = vector.load %arg5[%c6_97, %c0_98, %c0_99] : memref<9x16x32xbf16, #tpu.memory_space<vmem>>, vector<1x16x32xbf16>
    %100 = vector.shape_cast %99 : vector<1x16x32xbf16> to vector<16x32xbf16>
    %cst_100 = arith.constant dense<0.000000e+00> : vector<324x32xf32>
    %101 = tpu.matmul %98, %100, %cst_100 {dimension_numbers = #tpu.dot_dimension_numbers<[1], [0], [0], [1], [0, 0, 1, 1], [], []>} : vector<324x16xbf16>, vector<16x32xbf16>, vector<324x32xf32> -> vector<324x32xf32>
    %102 = arith.addf %97, %101 : vector<324x32xf32>
    %c42_101 = arith.constant 42 : index
    %c0_102 = arith.constant 0 : index
    %103 = vector.load %arg10[%c42_101, %c0_102] : memref<372x16xbf16, #tpu.memory_space<vmem>>, vector<324x16xbf16>
    %c7_103 = arith.constant 7 : index
    %c0_104 = arith.constant 0 : index
    %c0_105 = arith.constant 0 : index
    %104 = vector.load %arg5[%c7_103, %c0_104, %c0_105] : memref<9x16x32xbf16, #tpu.memory_space<vmem>>, vector<1x16x32xbf16>
    %105 = vector.shape_cast %104 : vector<1x16x32xbf16> to vector<16x32xbf16>
    %cst_106 = arith.constant dense<0.000000e+00> : vector<324x32xf32>
    %106 = tpu.matmul %103, %105, %cst_106 {dimension_numbers = #tpu.dot_dimension_numbers<[1], [0], [0], [1], [0, 0, 1, 1], [], []>} : vector<324x16xbf16>, vector<16x32xbf16>, vector<324x32xf32> -> vector<324x32xf32>
    %107 = arith.addf %102, %106 : vector<324x32xf32>
    %c43_107 = arith.constant 43 : index
    %c0_108 = arith.constant 0 : index
    %108 = vector.load %arg10[%c43_107, %c0_108] : memref<372x16xbf16, #tpu.memory_space<vmem>>, vector<324x16xbf16>
    %c8_109 = arith.constant 8 : index
    %c0_110 = arith.constant 0 : index
    %c0_111 = arith.constant 0 : index
    %109 = vector.load %arg5[%c8_109, %c0_110, %c0_111] : memref<9x16x32xbf16, #tpu.memory_space<vmem>>, vector<1x16x32xbf16>
    %110 = vector.shape_cast %109 : vector<1x16x32xbf16> to vector<16x32xbf16>
    %cst_112 = arith.constant dense<0.000000e+00> : vector<324x32xf32>
    %111 = tpu.matmul %108, %110, %cst_112 {dimension_numbers = #tpu.dot_dimension_numbers<[1], [0], [0], [1], [0, 0, 1, 1], [], []>} : vector<324x16xbf16>, vector<16x32xbf16>, vector<324x32xf32> -> vector<324x32xf32>
    %112 = arith.addf %107, %111 : vector<324x32xf32>
    %c0_113 = arith.constant 0 : index
    %c0_114 = arith.constant 0 : index
    %113 = vector.load %arg6[%c0_113, %c0_114] : memref<1x32xf32, #tpu.memory_space<vmem>>, vector<1x32xf32>
    %114 = vector.broadcast %113 : vector<1x32xf32> to vector<324x32xf32>
    %115 = arith.addf %112, %114 : vector<324x32xf32>
    %cst_115 = arith.constant 0.000000e+00 : f32
    %116 = vector.broadcast %cst_115 : f32 to vector<324x32xf32>
    %117 = arith.maximumf %115, %116 : vector<324x32xf32>
    %118 = vector.broadcast %0 : vector<324x1xf32> to vector<324x32xf32>
    %119 = arith.mulf %117, %118 : vector<324x32xf32>
    %cst_116 = arith.constant dense<0.000000e+00> : vector<32xf32>
    %120 = vector.multi_reduction <add>, %119, %cst_116 [0] : vector<324x32xf32> to vector<32xf32>
    %121 = vector.shape_cast %120 : vector<32xf32> to vector<1x32xf32>
    %cst_117 = arith.constant 3.906250e-03 : f32
    %122 = vector.broadcast %cst_117 : f32 to vector<1x32xf32>
    %123 = arith.mulf %121, %122 : vector<1x32xf32>
    %c0_118 = arith.constant 0 : index
    %c0_119 = arith.constant 0 : index
    %124 = vector.load %arg7[%c0_118, %c0_119] : memref<32x128xf32, #tpu.memory_space<vmem>>, vector<32x128xf32>
    %cst_120 = arith.constant dense<0.000000e+00> : vector<1x128xf32>
    %125 = tpu.matmul %123, %124, %cst_120 {dimension_numbers = #tpu.dot_dimension_numbers<[1], [0], [0], [1], [0, 0, 1, 1], [], []>} : vector<1x32xf32>, vector<32x128xf32>, vector<1x128xf32> -> vector<1x128xf32>
    %c0_121 = arith.constant 0 : index
    %c0_122 = arith.constant 0 : index
    %126 = vector.load %arg8[%c0_121, %c0_122] : memref<1x128xf32, #tpu.memory_space<vmem>>, vector<1x128xf32>
    %127 = arith.addf %125, %126 : vector<1x128xf32>
    %c0_123 = arith.constant 0 : index
    %c0_124 = arith.constant 0 : index
    %c0_125 = arith.constant 0 : index
    %128 = vector.load %arg9[%c0_123, %c0_124, %c0_125] : memref<1x1x128xf32, #tpu.memory_space<vmem>>, vector<1x1x128xf32>
    %129 = vector.shape_cast %128 : vector<1x1x128xf32> to vector<1x128xf32>
    %130 = vector.shape_cast %127 : vector<1x128xf32> to vector<1x1x128xf32>
    tpu.vector_store %arg9[%c0_123, %c0_124, %c0_125], %130 {strides = array<i32>} : memref<1x1x128xf32, #tpu.memory_space<vmem>>, vector<1x1x128xf32>,
    return
  }
  func.func @transform_0(%arg0: i32) -> (i32, i32, i32) {
    %c0_i32 = arith.constant 0 : i32
    %c0_i32_0 = arith.constant 0 : i32
    %c0_i32_1 = arith.constant 0 : i32
    return %arg0, %c0_i32, %c0_i32_0 : i32, i32, i32
  }
  func.func @transform_1(%arg0: i32) -> (i32, i32) {
    %c0_i32 = arith.constant 0 : i32
    %c0_i32_0 = arith.constant 0 : i32
    %c0_i32_1 = arith.constant 0 : i32
    return %c0_i32, %c0_i32_0 : i32, i32
  }
  func.func @transform_2(%arg0: i32) -> (i32, i32, i32) {
    %c0_i32 = arith.constant 0 : i32
    %c0_i32_0 = arith.constant 0 : i32
    %c0_i32_1 = arith.constant 0 : i32
    %c0_i32_2 = arith.constant 0 : i32
    return %c0_i32, %c0_i32_0, %c0_i32_1 : i32, i32, i32
  }
  func.func @transform_3(%arg0: i32) -> (i32, i32) {
    %c0_i32 = arith.constant 0 : i32
    %c0_i32_0 = arith.constant 0 : i32
    %c0_i32_1 = arith.constant 0 : i32
    return %c0_i32, %c0_i32_0 : i32, i32
  }
  func.func @transform_4(%arg0: i32) -> (i32, i32, i32) {
    %c0_i32 = arith.constant 0 : i32
    %c0_i32_0 = arith.constant 0 : i32
    %c0_i32_1 = arith.constant 0 : i32
    %c0_i32_2 = arith.constant 0 : i32
    return %c0_i32, %c0_i32_0, %c0_i32_1 : i32, i32, i32
  }
  func.func @transform_5(%arg0: i32) -> (i32, i32) {
    %c0_i32 = arith.constant 0 : i32
    %c0_i32_0 = arith.constant 0 : i32
    %c0_i32_1 = arith.constant 0 : i32
    return %c0_i32, %c0_i32_0 : i32, i32
  }
  func.func @transform_6(%arg0: i32) -> (i32, i32) {
    %c0_i32 = arith.constant 0 : i32
    %c0_i32_0 = arith.constant 0 : i32
    %c0_i32_1 = arith.constant 0 : i32
    return %c0_i32, %c0_i32_0 : i32, i32
  }
  func.func @transform_7(%arg0: i32) -> (i32, i32) {
    %c0_i32 = arith.constant 0 : i32
    %c0_i32_0 = arith.constant 0 : i32
    %c0_i32_1 = arith.constant 0 : i32
    return %c0_i32, %c0_i32_0 : i32, i32
  }
  func.func @transform_8(%arg0: i32) -> (i32, i32, i32) {
    %c0_i32 = arith.constant 0 : i32
    %c0_i32_0 = arith.constant 0 : i32
    %c0_i32_1 = arith.constant 0 : i32
    return %arg0, %c0_i32, %c0_i32_0 : i32, i32, i32
  }
}

</mosaic_0001>

<bundles_post_ra>
// kernel: resnet2_forward.1
= control target key start
LH: loop header
LB: loop body
LE: loop exit
PB: predicated region body
PF: predicated region fallthrough
CT: control target
= control target key end

     0   :  { %13 = vsyncpa [#allocation4], 0  ;;  %s17378_s0 = inlined_call_operand.vmem [shape: bf16[2,372,4], index: 0, kind: input, shape index: {}]   ;;  %s17379_s1 = inlined_call_operand.vmem [shape: f32[324,1], index: 1, kind: input, shape index: {}]   ;;  %s17380_s2 = inlined_call_operand.vmem [shape: bf16[9,4,16], index: 2, kind: input, shape index: {}]   ;;  %s17381_s3 = inlined_call_operand.vmem [shape: f32[1,16], index: 3, kind: input, shape index: {}]   ;;  %s17382_s4 = inlined_call_operand.vmem [shape: bf16[9,16,32], index: 4, kind: input, shape index: {}]   ;;  %s17383_s5 = inlined_call_operand.vmem [shape: f32[1,32], index: 5, kind: input, shape index: {}]   ;;  %s17384_s6 = inlined_call_operand.vmem [shape: f32[32,128], index: 6, kind: input, shape index: {}]   ;;  %s17385_s7 = inlined_call_operand.vmem [shape: f32[1,128], index: 7, kind: input, shape index: {}]   ;;  %s17386_s8 = inlined_call_operand.hbm [shape: f32[2,1,128], index: 8, kind: output, shape index: {}]  }
   0x1   :  { %15 = vsyncpa [#allocation4 + $0x1], 0  ;;  %s12645_s27 = smov 0   ;;  %s12647_s28 = smov 0  }
   0x2   :  { %s12649_s29 = smov 0   ;;  %s12651_s30 = smov 0  }
   0x3 LB: > { %s12666_s9 = sadd.s32 4294967295, %s12594_s30   ;;  %s9617_s10 = sadd.s32 4294967294, %s12594_s30   ;;  %s12594_s30 = sphi %s12651_s30, %s18070_s30   ;;  %s12590_s29 = sphi %s12649_s29, %s18069_s29   ;;  %s12586_s28 = sphi %s12647_s28, %s18068_s28   ;;  %s12582_s27 = sphi %s12645_s27, %s18067_s27  }
   0x4   : > { %s12670_s11 = sadd.s32 1, %s12594_s30   ;;  %s201_s12 = sadd.s32 1, %s12590_s29 }
   0x5   : > { %s198_s13 = ssub.s32 %s12594_s30, %s12670_s11  ;;  %p211_p0 = scmp.ne.s32.totalorder %s12590_s29, %s12586_s28 }
   0x6   : > { %p199_p1 = scmp.eq.s32.totalorder %s198_s13, 0  ;;  %p212_p2 = scmp.eq.s32.totalorder %s12666_s9, 1 }
   0x7   : > { %p217_p3 = scmp.ne.s32.totalorder %s12586_s28, %s12582_s27  ;;  %p218_p4 = scmp.eq.s32.totalorder %s9617_s10, 1 }
   0x8   : > { %s12681_s14 = scalar_select %p199_p1, %s12590_s29, %s201_s12  }
   0x9   : > { %p12683_p5 = por %p212_p2, %p211_p0  ;;  %p12687_p6 = por %p218_p4, %p217_p3 }
   0xa   : > { %p9620_p7 = scmp.ge.s32.totalorder %s12594_s30, 1  ;;  %p265_p8 = scmp.lt.s32.totalorder %s12594_s30, 3 }
   0xc   : > { %p266_p9 = pnand %p9620_p7, %p265_p8 }
   0xe   : > { %269 = sbr.rel (%p266_p9) target bundleno = 2182 (0x886), region = 52 }
  0x13   : > { %v9622_v0 = vld [vmem:[%s17380_s2 + $0x2] sm:$0x3]  ;;  %vm602_vm0 = vcmask 1041408   ;;  %p298_p10 = scmp.lt.s32.totalorder %s12666_s9, 1  ;;  %v17413_v1 = vmov 0.0   ;;  %vm12597_vm1 = vmmov 0  }
  0x14   : > { %10700 = vmatprep.subr.bf16.mxu0 %v17413_v1  ;;  %v604_v2 = vsel %vm602_vm0, %v9622_v0, 0  ;;  %10702 = vmatprep.mubr.msk.bf16.mxu0 %vm12597_vm1, %v17413_v1  ;;  %v387_v3 = vld [vmem:[%s17380_s2] sm:$0x3]  ;;  %vm496_vm2 = vcmask 1044480   ;;  %v9687_v10 = vld [vmem:[%s17380_s2 + $0x4] sm:$0x3] }
  0x15   : > { %10701 = vmatpush3.bf16.msra.mxu0 %v604_v2  ;;  %s299_s19 = scalar_select %p298_p10, %s12666_s9, 1  ;;  %10786 = vmatprep.subr.bf16.mxu1 %v17413_v1  ;;  %v1062_v4 = vsel %vm602_vm0, %v387_v3, 0  ;;  %vm538_vm3 = vcmask 31744   ;;  %v1428_v19 = vsel %vm602_vm0, %v9687_v10, 0  ;;  %vm809_vm4 = vsmask.f32 5376 }
  0x16   : > { %10872 = vmatprep.subr.bf16.mxu0 %v17413_v1  ;;  %10788 = vmatprep.mubr.msk.bf16.mxu1 %vm12597_vm1, %v17413_v1  ;;  %vm1270_vm5 = vsmask.f32 4352  ;;  %vm2651_vm6 = vsmask.f32 7424  ;;  %vm3732_vm7 = vcmask 1046528   ;;  %vm4823_vm9 = vcmask 125952  }
  0x17   : > { %s12259_s22 = smul.u32 188, %s299_s19  ;;  %10787 = vmatpush3.bf16.msra.mxu1 %v1062_v4  ;;  %vm4087_vm8 = vsmask.f32 6400  ;;  %vm5278_vm10 = vcmask 130048   ;;  %vm4870_vm11 = vcmask 123904   ;;  %vm9380_vm12 = vcmask 261120  }
  0x18   : > { %10958 = vmatprep.subr.bf16.mxu1 %v17413_v1  ;;  %vm9460_vm13 = vcmask 257024   ;;  %s296_s18 = sand.u32 1, %s12586_s28   ;;  %s10255_s21 = sshll.u32 %s12666_s9, 4 }
  0x19   : > { %s12714_s25 = scalar_lea.vmem %s17378_s0, %s12259_s22  ;;  %s297_s22 = scalar_lea.vmem [#allocation3], %s296_s18 }
  0x1a   : > { %v346_v5 = vld [vmem:[%s12714_s25 + $0x4] sm:$0xf]  ;;  %v388_v6 = vld [vmem:[%s12714_s25] sm:$0x8]  ;;  %v12719_v7 = vld [vmem:[%s12714_s25 + $0x8] sm:$0xff]   ;;  %s9562_s23 = sshll.u32 %s297_s22, 4  ;;  %s17343_s10 = scalar_lea.hbm %s17386_s8, %s10255_s21  ;;  %s9563_s23 = int_to_ptr.vmem [resolvable:$true] %s9562_s23 }
  0x1b   : > { %v345_v8 = vld [vmem:[%s12714_s25] sm:$0xc]  ;;  %v12722_v9 = vcombine.low %v388_v6, %v346_v5  ;;  %v498_v12 = vrot.slane %v12719_v7, 3  ;;  %v819_v13 = vshrl.u32 %v12719_v7, 16  ;;  %v822_v14 = vshll.u32 %v12719_v7, 16  ;;  %v12731_v15 = vld [vmem:[%s12714_s25 + $0x10] sm:$0xff]  }
  0x1c   : > { %v9665_v11 = vcombine.low %v345_v8, %v346_v5  ;;  %v828_v26 = vshrl.u32 %v12731_v15, 16  ;;  %v831_v27 = vshll.u32 %v12731_v15, 16  ;;  %v500_v29 = vrot.slane %v12731_v15, 3  ;;  %v12747_v30 = vld [vmem:[%s12714_s25 + $0x18] sm:$0xff]   ;;  %v12771_v42 = vld [vmem:[%s12714_s25 + $0x20] sm:$0xff]   ;;  %v12789_v51 = vld [vmem:[%s12714_s25 + $0x28] sm:$0xff]  }
  0x1d   : > { %v497_v16 = vrot.slane %v12722_v9, 3  ;;  %v821_v20 = vrot.slane %v819_v13, 2  ;;  %v824_v21 = vrot.slane %v822_v14, 3  ;;  %v837_v36 = vshrl.u32 %v12747_v30, 16  ;;  %v12807_v60 = vld [vmem:[%s12714_s25 + $0x30] sm:$0xff]   ;;  %v12818_v3 = vld [vmem:[%s12714_s25 + $0x38] sm:$0xff]  }
  0x1e   : > { %v811_v17 = vshrl.u32 %v9665_v11, 16  ;;  %v814_v18 = vshll.u32 %v9665_v11, 16  ;;  %v830_v31 = vrot.slane %v828_v26, 2  ;;  %v833_v32 = vrot.slane %v831_v27, 3  ;;  %s9550_s12 = scalar_lea.sflag [#allocation4], %s296_s18  ;;  %s12534_s13 = scalar_lea.vmem %s9563_s23, 16 }
  0x1f   : > { %v499_v22 = vsel %vm496_vm2, %v497_v16, %v498_v12  ;;  %v825_v25 = vor.u32 %v824_v21, %v821_v20  ;;  %v501_v34 = vsel %vm496_vm2, %v498_v12, %v500_v29  ;;  %v840_v37 = vshll.u32 %v12747_v30, 16  ;;  %v9710_v16 = vld [vmem:[%s17380_s2 + $0x6] sm:$0x3]  ;;  %p12535_p11 = scmp.ne.s32.totalorder %s9563_s23, %s12534_s13 }
  0x20   : > { %v813_v23 = vrot.slane %v811_v17, 2  ;;  %v816_v24 = vrot.slane %v814_v18, 3  ;;  %10703 = vmatmul.mubr.msk.bf16.vlgmr.msra.gmra.mxu0 %vm538_vm3, %v499_v22  ;;  %v834_v35 = vor.u32 %v833_v32, %v830_v31  ;;  %v502_v39 = vrot.slane %v12747_v30, 3  ;;  %v12847_v22 = vld [vmem:[%s12714_s25 + $0x40] sm:$0xff]   ;;  %v12860_v31 = vld [vmem:[%s12714_s25 + $0x10] sm:$0xf] }
  0x21   : > { %10873 = vmatpush3.bf16.msra.mxu0 %v1428_v19  ;;  %10706 = vmatprep.mubr.msk.bf16.mxu0 %vm12597_vm1, %v17413_v1  ;;  %v839_v40 = vrot.slane %v837_v36, 2  ;;  %v842_v41 = vrot.slane %v840_v37, 3  ;;  %v846_v45 = vshrl.u32 %v12771_v42, 16  ;;  %v849_v46 = vshll.u32 %v12771_v42, 16  ;;  %p12536_p12 = pnand %p12535_p11, %p12683_p5 }
  0x22   : > { %v817_v28 = vor.u32 %v816_v24, %v813_v23  ;;  %11044 = vmatprep.subr.bf16.mxu0 %v17413_v1  ;;  %v835_v38 = vsel %vm809_vm4, %v825_v25, %v834_v35  ;;  %v503_v43 = vsel %vm496_vm2, %v500_v29, %v502_v39  ;;  %v504_v48 = vrot.slane %v12771_v42, 3  ;;  %v12857_v29 = vld [vmem:[%s12714_s25 + $0xc] sm:$0xf] }
  0x23   : > { %v843_v44 = vor.u32 %v842_v41, %v839_v40  ;;  %v848_v49 = vrot.slane %v846_v45, 2  ;;  %v851_v50 = vrot.slane %v849_v46, 3  ;;  %v855_v54 = vshrl.u32 %v12789_v51, 16  ;;  %v12881_v41 = vld [vmem:[%s12714_s25 + $0x48] sm:$0xff]   ;;  %p12537_p13 = pneg %p12536_p12 }
  0x24   : > { %v826_v33 = vsel %vm809_vm4, %v817_v28, %v825_v25  ;;  %v505_v52 = vsel %vm496_vm2, %v502_v39, %v504_v48  ;;  %v858_v55 = vshll.u32 %v12789_v51, 16  ;;  %v506_v57 = vrot.slane %v12789_v51, 3 }
  0x25   : > { %10789 = vmatmul.mubr.msk.bf16.vlgmr.msra.gmra.mxu1 %vm538_vm3, %v826_v33  ;;  %v844_v47 = vsel %vm809_vm4, %v834_v35, %v843_v44  ;;  %v852_v53 = vor.u32 %v851_v50, %v848_v49  ;;  %v857_v58 = vrot.slane %v855_v54, 2  ;;  %v864_v63 = vshrl.u32 %v12807_v60, 16  ;;  %v12895_v49 = vld [vmem:[%s12714_s25 + $0x14] sm:$0xf]  ;;  %v12898_v50 = vld [vmem:[%s12714_s25 + $0x18] sm:$0xf] }
  0x26   : > { %10792 = vmatprep.mubr.msk.bf16.mxu1 %vm12597_vm1, %v17413_v1  ;;  %v860_v59 = vrot.slane %v858_v55, 3  ;;  %v507_v61 = vsel %vm496_vm2, %v504_v48, %v506_v57  ;;  %v867_v0 = vshll.u32 %v12807_v60, 16  ;;  %v508_v2 = vrot.slane %v12807_v60, 3 }
  0x27   : > { %v853_v56 = vsel %vm809_vm4, %v843_v44, %v852_v53  ;;  %v866_v5 = vrot.slane %v864_v63, 2  ;;  %v1279_v8 = vrot.slane %v819_v13, 3  ;;  %v1280_v10 = vrot.slane %v822_v14, 4 }
  0x28   : > { %10707 = vmatmul.mubr.msk.bf16.gmra.mxu0 %vm538_vm3, %v501_v34  ;;  %v861_v62 = vor.u32 %v860_v59, %v857_v58  ;;  %v869_v6 = vrot.slane %v867_v0, 3  ;;  %v509_v11 = vsel %vm496_vm2, %v506_v57, %v508_v2  ;;  %v873_v12 = vshrl.u32 %v12818_v3, 16 }
  0x29   : > { %10710 = vmatprep.mubr.msk.bf16.mxu0 %vm12597_vm1, %v17413_v1  ;;  %v17411_v13 = vshll.u32 %v12818_v3, 16  ;;  %v2072_v7 = vsel %vm602_vm0, %v9710_v16, 0  ;;  %v1272_v14 = vshrl.u32 %v12722_v9, 16  ;;  %v1275_v18 = vshll.u32 %v12722_v9, 16 }
  0x2a   : > { %v862_v4 = vsel %vm809_vm4, %v852_v53, %v861_v62  ;;  %v870_v17 = vor.u32 %v869_v6, %v866_v5  ;;  %10959 = vmatpush3.bf16.msra.mxu1 %v2072_v7  ;;  %v1281_v20 = vor.u32 %v1280_v10, %v1279_v8  ;;  %v510_v21 = vrot.slane %v12818_v3, 3  ;;  %v12927_v5 = vld [vmem:[%s12714_s25 + $0x50] sm:$0xff]   ;;  %v12930_v6 = vld [vmem:[%s12714_s25 + $0x1c] sm:$0xf]  ;;  %v12933_v8 = vld [vmem:[%s12714_s25 + $0x20] sm:$0xf] }
  0x2b   : > { %v1274_v19 = vrot.slane %v1272_v14, 3  ;;  %11130 = vmatprep.subr.bf16.mxu1 %v17413_v1  ;;  %v1277_v23 = vrot.slane %v1275_v18, 4  ;;  %v875_v25 = vrot.slane %v873_v12, 2  ;;  %v878_v9 = vrot.slane %v17411_v13, 3 }
  0x2c   : > { %v871_v24 = vsel %vm809_vm4, %v861_v62, %v870_v17  ;;  %v1283_v32 = vrot.slane %v828_v26, 3  ;;  %v1284_v33 = vrot.slane %v831_v27, 4  ;;  %v17408_v34 = vshrl.u32 %v12847_v22, 16 }
  0x2d   : > { %10793 = vmatmul.mubr.msk.bf16.gmra.mxu1 %vm538_vm3, %v835_v38  ;;  %v1278_v28 = vor.u32 %v1277_v23, %v1274_v19  ;;  %v17407_v35 = vshll.u32 %v12847_v22, 16  ;;  %v12874_v39 = vcombine.low %v12857_v29, %v12860_v31  ;;  %v511_v26 = vsel %vm496_vm2, %v508_v2, %v510_v21  ;;  %v12955_v19 = vld [vmem:[%s12714_s25 + $0x58] sm:$0xff]  }
  0x2e   : > { %10796 = vmatprep.mubr.msk.bf16.mxu1 %vm12597_vm1, %v17413_v1  ;;  %v879_v15 = vor.u32 %v878_v9, %v875_v25  ;;  %v1285_v27 = vor.u32 %v1284_v33, %v1283_v32  ;;  %v512_v40 = vrot.slane %v12847_v22, 3  ;;  %v1288_v53 = vrot.slane %v840_v37, 4  ;;  %v12972_v32 = vld [vmem:[%s12714_s25 + $0x24] sm:$0xf]  ;;  %v12975_v33 = vld [vmem:[%s12714_s25 + $0x28] sm:$0xf] }
  0x2f   : > { %v12870_v38 = vsel %vm1270_vm5, %v1278_v28, %v1281_v20  ;;  %v887_v48 = vrot.slane %v17407_v35, 3  ;;  %v12908_v57 = vcombine.low %v12895_v49, %v12898_v50  ;;  %v17403_v30 = vshll.u32 %v12881_v41, 16 }
  0x30   : > { %10711 = vmatmul.mubr.msk.bf16.gmra.mxu0 %vm538_vm3, %v503_v43  ;;  %v12884_v43 = vsel %vm1270_vm5, %v1281_v20, %v1285_v27  ;;  %v880_v44 = vsel %vm809_vm4, %v870_v17, %v879_v15  ;;  %v1291_v10 = vrot.slane %v846_v45, 3  ;;  %v12943_v17 = vcombine.low %v12930_v6, %v12933_v8 }
  0x31   : > { %10714 = vmatprep.mubr.msk.bf16.mxu0 %vm12597_vm1, %v17413_v1  ;;  %v17400_v14 = vshrl.u32 %v12927_v5, 16  ;;  %v17397_v45 = vshll.u32 %v12927_v5, 16  ;;  %v516_v18 = vrot.slane %v12927_v5, 3  ;;  %v1296_v25 = vrot.slane %v858_v55, 4 }
  0x32   : > { %v17394_v28 = vshrl.u32 %v12955_v19, 16  ;;  %v17391_v51 = vshll.u32 %v12955_v19, 16  ;;  %v12982_v55 = vcombine.low %v12972_v32, %v12975_v33 }
  0x33   : > { %v905_v23 = vrot.slane %v17397_v45, 3 }
  0x35   : > { %10797 = vmatmul.mubr.msk.bf16.gmra.mxu1 %vm538_vm3, %v844_v47  ;;  %v884_v47 = vrot.slane %v17408_v34, 2 }
  0x36   : > { %10800 = vmatprep.mubr.msk.bf16.mxu1 %vm12597_vm1, %v17413_v1 }
  0x37   : > { %v888_v58 = vor.u32 %v887_v48, %v884_v47  ;;  %v914_v47 = vrot.slane %v17391_v51, 3  ;;  %v13000_v48 = vld [vmem:[%s12714_s25 + $0x60] sm:$0xff]  }
  0x38   : > { %10715 = vmatmul.mubr.msk.bf16.gmra.mxu0 %vm538_vm3, %v505_v52  ;;  %v1287_v52 = vrot.slane %v837_v36, 3  ;;  %v17404_v36 = vshrl.u32 %v12881_v41, 16 }
  0x39   : > { %10718 = vmatprep.mubr.msk.bf16.mxu0 %vm12597_vm1, %v17413_v1  ;;  %v889_v62 = vsel %vm809_vm4, %v879_v15, %v888_v58 }
  0x3a   : > { %v1289_v37 = vor.u32 %v1288_v53, %v1287_v52  ;;  %v893_v2 = vrot.slane %v17404_v36, 2  ;;  %v13005_v53 = vld [vmem:[%s12714_s25 + $0x2c] sm:$0xf]  ;;  %v13175_v36 = vld [vmem:[%s12714_s25 + $0xa0] sm:$0xf] }
  0x3c   : > { %v12915_v59 = vsel %vm1270_vm5, %v1285_v27, %v1289_v37  ;;  %v518_v27 = vrot.slane %v12955_v19, 3 }
  0x3d   : > { %10801 = vmatmul.mubr.msk.bf16.gmra.mxu1 %vm538_vm3, %v853_v56  ;;  %v513_v56 = vsel %vm496_vm2, %v510_v21, %v512_v40  ;;  %v902_v21 = vrot.slane %v17400_v14, 2 }
  0x3e   : > { %10804 = vmatprep.mubr.msk.bf16.mxu1 %vm12597_vm1, %v17413_v1  ;;  %v519_v52 = vsel %vm496_vm2, %v516_v18, %v518_v27 }
  0x40   : > { %10719 = vmatmul.mubr.msk.bf16.gmra.mxu0 %vm538_vm3, %v507_v61  ;;  %v514_v61 = vrot.slane %v12881_v41, 3 }
  0x41   : > { %10722 = vmatprep.mubr.msk.bf16.mxu0 %vm12597_vm1, %v17413_v1 }
  0x42   : > { %v515_v16 = vsel %vm496_vm2, %v512_v40, %v514_v61  ;;  %v517_v9 = vsel %vm496_vm2, %v514_v61, %v516_v18  ;;  %v17389_v61 = vshll.u32 %v13000_v48, 16  ;;  %v13036_v18 = vld [vmem:[%s12714_s25 + $0x38] sm:$0xf] }
  0x45   : > { %10805 = vmatmul.mubr.msk.bf16.gmra.mxu1 %vm538_vm3, %v862_v4  ;;  %v896_v4 = vrot.slane %v17403_v30, 3 }
  0x46   : > { %10808 = vmatprep.mubr.msk.bf16.mxu1 %vm12597_vm1, %v17413_v1 }
  0x47   : > { %v897_v7 = vor.u32 %v896_v4, %v893_v2  ;;  %v520_v2 = vrot.slane %v13000_v48, 3 }
  0x48   : > { %10723 = vmatmul.mubr.msk.bf16.gmra.mxu0 %vm538_vm3, %v509_v11  ;;  %v1292_v11 = vrot.slane %v849_v46, 4 }
  0x49   : > { %10726 = vmatprep.mubr.msk.bf16.mxu0 %vm12597_vm1, %v17413_v1  ;;  %v898_v20 = vsel %vm809_vm4, %v888_v58, %v897_v7 }
  0x4a   : > { %v1293_v42 = vor.u32 %v1292_v11, %v1291_v10  ;;  %v923_v11 = vrot.slane %v17389_v61, 3  ;;  %v13094_v61 = vld [vmem:[%s12714_s25 + $0x78] sm:$0xff]  }
  0x4b   : > { %v17396_v51 = vshll.u32 %v13094_v61, 16 }
  0x4c   : > { %v12950_v46 = vsel %vm1270_vm5, %v1289_v37, %v1293_v42  ;;  %v17390_v37 = vshrl.u32 %v13000_v48, 16 }
  0x4d   : > { %10809 = vmatmul.mubr.msk.bf16.gmra.mxu1 %vm538_vm3, %v871_v24  ;;  %v1295_v24 = vrot.slane %v855_v54, 3  ;;  %v906_v54 = vor.u32 %v905_v23, %v902_v21 }
  0x4e   : > { %10812 = vmatprep.mubr.msk.bf16.mxu1 %vm12597_vm1, %v17413_v1  ;;  %v920_v10 = vrot.slane %v17390_v37, 2  ;;  %v17395_v37 = vshrl.u32 %v13094_v61, 16 }
  0x4f   : > { %v907_v40 = vsel %vm809_vm4, %v897_v7, %v906_v54  ;;  %v521_v7 = vsel %vm496_vm2, %v518_v27, %v520_v2 }
  0x50   : > { %10727 = vmatmul.mubr.msk.bf16.gmra.mxu0 %vm538_vm3, %v511_v26  ;;  %v12984_v26 = vor.u32 %v1296_v25, %v1295_v24  ;;  %v13047_v25 = vld [vmem:[%s12714_s25 + $0x70] sm:$0xff]  }
  0x51   : > { %10730 = vmatprep.mubr.msk.bf16.mxu0 %vm12597_vm1, %v17413_v1 }
  0x52   : > { %v12988_v15 = vsel %vm1270_vm5, %v1293_v42, %v12984_v26  ;;  %v13033_v42 = vld [vmem:[%s12714_s25 + $0x34] sm:$0xf] }
  0x53   : > { %v13044_v24 = vcombine.low %v13033_v42, %v13036_v18 }
  0x55   : > { %10813 = vmatmul.mubr.msk.bf16.gmra.mxu1 %vm538_vm3, %v880_v44  ;;  %v911_v44 = vrot.slane %v17394_v28, 2 }
  0x56   : > { %10816 = vmatprep.mubr.msk.bf16.mxu1 %vm12597_vm1, %v17413_v1 }
  0x57   : > { %v915_v58 = vor.u32 %v914_v47, %v911_v44  ;;  %v17392_v44 = vshrl.u32 %v13047_v25, 16  ;;  %v13060_v47 = vld [vmem:[%s12714_s25 + $0x3c] sm:$0xf] }
  0x58   : > { %10731 = vmatmul.mubr.msk.bf16.gmra.mxu0 %vm538_vm3, %v513_v56  ;;  %v13008_v56 = vld [vmem:[%s12714_s25 + $0x30] sm:$0xf] }
  0x59   : > { %10734 = vmatprep.mubr.msk.bf16.mxu0 %vm12597_vm1, %v17413_v1  ;;  %v916_v4 = vsel %vm809_vm4, %v906_v54, %v915_v58 }
  0x5d   : > { %10817 = vmatmul.mubr.msk.bf16.gmra.mxu1 %vm538_vm3, %v889_v62  ;;  %v13016_v62 = vcombine.low %v13005_v53, %v13008_v56 }
  0x5e   : > { %10820 = vmatprep.mubr.msk.bf16.mxu1 %vm12597_vm1, %v17413_v1 }
  0x60   : > { %10735 = vmatmul.mubr.msk.bf16.gmra.mxu0 %vm538_vm3, %v515_v16  ;;  %v13028_v16 = vld [vmem:[%s12714_s25 + $0x68] sm:$0xff]  }
  0x61   : > { %10738 = vmatprep.mubr.msk.bf16.mxu0 %vm12597_vm1, %v17413_v1  ;;  %v17388_v21 = vshrl.u32 %v13028_v16, 16  ;;  %v17387_v23 = vshll.u32 %v13028_v16, 16 }
  0x63   : > { %v929_v27 = vrot.slane %v17388_v21, 2  ;;  %v524_v21 = vrot.slane %v13047_v25, 3 }
  0x65   : > { %10821 = vmatmul.mubr.msk.bf16.gmra.mxu1 %vm538_vm3, %v898_v20  ;;  %v924_v20 = vor.u32 %v923_v11, %v920_v10  ;;  %v13071_v10 = vld [vmem:[%s12714_s25 + $0x48] sm:$0xf] }
  0x66   : > { %10824 = vmatprep.mubr.msk.bf16.mxu1 %vm12597_vm1, %v17413_v1 }
  0x67   : > { %v925_v54 = vsel %vm809_vm4, %v915_v58, %v924_v20  ;;  %v13068_v58 = vld [vmem:[%s12714_s25 + $0x44] sm:$0xf] }
  0x68   : > { %10739 = vmatmul.mubr.msk.bf16.gmra.mxu0 %vm538_vm3, %v517_v9  ;;  %v522_v9 = vrot.slane %v13028_v16, 3 }
  0x69   : > { %10742 = vmatprep.mubr.msk.bf16.mxu0 %vm12597_vm1, %v17413_v1 }
  0x6d   : > { %10825 = vmatmul.mubr.msk.bf16.gmra.mxu1 %vm538_vm3, %v907_v40  ;;  %v932_v40 = vrot.slane %v17387_v23, 3 }
  0x6e   : > { %10828 = vmatprep.mubr.msk.bf16.mxu1 %vm12597_vm1, %v17413_v1 }
  0x6f   : > { %v933_v11 = vor.u32 %v932_v40, %v929_v27  ;;  %v938_v27 = vrot.slane %v17392_v44, 2 }
  0x70   : > { %10743 = vmatmul.mubr.msk.bf16.gmra.mxu0 %vm538_vm3, %v519_v52  ;;  %v523_v52 = vsel %vm496_vm2, %v520_v2, %v522_v9 }
  0x71   : > { %10746 = vmatprep.mubr.msk.bf16.mxu0 %vm12597_vm1, %v17413_v1  ;;  %v934_v2 = vsel %vm809_vm4, %v924_v20, %v933_v11 }
  0x75   : > { %10829 = vmatmul.mubr.msk.bf16.gmra.mxu1 %vm538_vm3, %v916_v4  ;;  %v13065_v4 = vld [vmem:[%s12714_s25 + $0x40] sm:$0xf] }
  0x76   : > { %10832 = vmatprep.mubr.msk.bf16.mxu1 %vm12597_vm1, %v17413_v1  ;;  %v13078_v23 = vcombine.low %v13060_v47, %v13065_v4  ;;  %v9718_v60 = vcombine.low %v13065_v4, %v13068_v58 }
  0x78   : > { %10747 = vmatmul.mubr.msk.bf16.gmra.mxu0 %vm538_vm3, %v521_v7  ;;  %v17393_v7 = vshll.u32 %v13047_v25, 16  ;;  %v1886_v4 = vshll.u32 %v9718_v60, 16 }
  0x79   : > { %10750 = vmatprep.mubr.msk.bf16.mxu0 %vm12597_vm1, %v17413_v1 }
  0x7a   : > { %v941_v40 = vrot.slane %v17393_v7, 3  ;;  %v526_v7 = vrot.slane %v13094_v61, 3 }
  0x7c   : > { %v942_v20 = vor.u32 %v941_v40, %v938_v27  ;;  %v13112_v27 = vld [vmem:[%s12714_s25 + $0x80] sm:$0xff]   ;;  %v527_v40 = vsel %vm496_vm2, %v524_v21, %v526_v7 }
  0x7d   : > { %10833 = vmatmul.mubr.msk.bf16.gmra.mxu1 %vm538_vm3, %v925_v54  ;;  %v13082_v54 = vcombine.low %v13068_v58, %v13071_v10  ;;  %v17399_v28 = vshll.u32 %v13112_v27, 16 }
  0x7e   : > { %10836 = vmatprep.mubr.msk.bf16.mxu1 %vm12597_vm1, %v17413_v1  ;;  %v943_v44 = vsel %vm809_vm4, %v933_v11, %v942_v20 }
  0x80   : > { %10751 = vmatmul.mubr.msk.bf16.gmra.mxu0 %vm538_vm3, %v523_v52  ;;  %v525_v52 = vsel %vm496_vm2, %v522_v9, %v524_v21  ;;  %v947_v9 = vrot.slane %v17395_v37, 2 }
  0x81   : > { %10754 = vmatprep.mubr.msk.bf16.mxu0 %vm12597_vm1, %v17413_v1 }
  0x85   : > { %10837 = vmatmul.mubr.msk.bf16.gmra.mxu1 %vm538_vm3, %v934_v2  ;;  %v950_v2 = vrot.slane %v17396_v51, 3  ;;  %v528_v51 = vrot.slane %v13112_v27, 3 }
  0x86   : > { %10840 = vmatprep.mubr.msk.bf16.mxu1 %vm12597_vm1, %v17413_v1 }
  0x87   : > { %v951_v11 = vor.u32 %v950_v2, %v947_v9  ;;  %v13130_v9 = vld [vmem:[%s12714_s25 + $0x88] sm:$0xff]   ;;  %v529_v2 = vsel %vm496_vm2, %v526_v7, %v528_v51 }
  0x88   : > { %10755 = vmatmul.mubr.msk.bf16.gmra.mxu0 %vm538_vm3, %v525_v52  ;;  %v17398_v52 = vshrl.u32 %v13112_v27, 16  ;;  %v17401_v45 = vshll.u32 %v13130_v9, 16 }
  0x89   : > { %10758 = vmatprep.mubr.msk.bf16.mxu0 %vm12597_vm1, %v17413_v1  ;;  %v952_v37 = vsel %vm809_vm4, %v942_v20, %v951_v11 }
  0x8a   : > { %v956_v21 = vrot.slane %v17398_v52, 2  ;;  %v968_v7 = vrot.slane %v17401_v45, 3 }
  0x8d   : > { %10841 = vmatmul.mubr.msk.bf16.gmra.mxu1 %vm538_vm3, %v943_v44  ;;  %v959_v44 = vrot.slane %v17399_v28, 3  ;;  %v530_v28 = vrot.slane %v13130_v9, 3 }
  0x8e   : > { %10844 = vmatprep.mubr.msk.bf16.mxu1 %vm12597_vm1, %v17413_v1 }
  0x8f   : > { %v960_v20 = vor.u32 %v959_v44, %v956_v21  ;;  %v13148_v21 = vld [vmem:[%s12714_s25 + $0x90] sm:$0xff]   ;;  %v531_v44 = vsel %vm496_vm2, %v528_v51, %v530_v28 }
  0x90   : > { %10759 = vmatmul.mubr.msk.bf16.gmra.mxu0 %vm538_vm3, %v527_v40  ;;  %v17402_v40 = vshrl.u32 %v13130_v9, 16  ;;  %v17406_v14 = vshll.u32 %v13148_v21, 16 }
  0x91   : > { %10762 = vmatprep.mubr.msk.bf16.mxu0 %vm12597_vm1, %v17413_v1  ;;  %v961_v52 = vsel %vm809_vm4, %v951_v11, %v960_v20 }
  0x95   : > { %10845 = vmatmul.mubr.msk.bf16.gmra.mxu1 %vm538_vm3, %v952_v37  ;;  %v965_v37 = vrot.slane %v17402_v40, 2 }
  0x96   : > { %10848 = vmatprep.mubr.msk.bf16.mxu1 %vm12597_vm1, %v17413_v1 }
  0x97   : > { %v969_v11 = vor.u32 %v968_v7, %v965_v37  ;;  %v977_v37 = vrot.slane %v17406_v14, 3  ;;  %v13166_v7 = vld [vmem:[%s12714_s25 + $0x98] sm:$0xff]  }
  0x98   : > { %10763 = vmatmul.mubr.msk.bf16.gmra.mxu0 %vm538_vm3, %v529_v2  ;;  %v17405_v2 = vshrl.u32 %v13148_v21, 16  ;;  %v17410_v30 = vshll.u32 %v13166_v7, 16  ;;  %v534_v14 = vrot.slane %v13166_v7, 3 }
  0x99   : > { %10766 = vmatprep.mubr.msk.bf16.mxu0 %vm12597_vm1, %v17413_v1  ;;  %v970_v45 = vsel %vm809_vm4, %v960_v20, %v969_v11 }
  0x9a   : > { %v974_v51 = vrot.slane %v17405_v2, 2  ;;  %v386_v2 = vld [vmem:[%s12714_s25 + $0xa4] sm:$0x1] }
  0x9c   : > { %v978_v20 = vor.u32 %v977_v37, %v974_v51  ;;  %v9643_v51 = vcombine.low %v13175_v36, %v386_v2 }
  0x9d   : > { %10849 = vmatmul.mubr.msk.bf16.gmra.mxu1 %vm538_vm3, %v961_v52  ;;  %v532_v52 = vrot.slane %v13148_v21, 3 }
  0x9e   : > { %10852 = vmatprep.mubr.msk.bf16.mxu1 %vm12597_vm1, %v17413_v1  ;;  %v979_v35 = vsel %vm809_vm4, %v969_v11, %v978_v20  ;;  %v990_v37 = vshrl.u32 %v9643_v51, 16  ;;  %v993_v34 = vshll.u32 %v9643_v51, 16 }
  0x9f   : > { %v533_v40 = vsel %vm496_vm2, %v530_v28, %v532_v52  ;;  %v986_v28 = vrot.slane %v17410_v30, 3  ;;  %v536_v30 = vrot.slane %v9643_v51, 3 }
  0xa0   : > { %10767 = vmatmul.mubr.msk.bf16.gmra.mxu0 %vm538_vm3, %v531_v44  ;;  %v17409_v44 = vshrl.u32 %v13166_v7, 16  ;;  %v992_v2 = vrot.slane %v990_v37, 2  ;;  %v995_v13 = vrot.slane %v993_v34, 3  ;;  %v9712_v34 = vcombine.low %v12860_v31, %v12895_v49  ;;  %v9753_v49 = vld [vmem:[%s17380_s2 + $0x8] sm:$0x3] }
  0xa1   : > { %10770 = vmatprep.mubr.msk.bf16.mxu0 %vm12597_vm1, %v17413_v1  ;;  %v9713_v31 = vcombine.low %v12898_v50, %v12930_v6 }
  0xa2   : > { %v1832_v51 = vshll.u32 %v9712_v34, 16 }
  0xa4   : > { %v1834_v37 = vrot.slane %v1832_v51, 4 }
  0xa5   : > { %10853 = vmatmul.mubr.msk.bf16.gmra.mxu1 %vm538_vm3, %v970_v45  ;;  %v983_v45 = vrot.slane %v17409_v44, 2 }
  0xa6   : > { %10856 = vmatprep.mubr.msk.bf16.mxu1 %vm12597_vm1, %v17413_v1 }
  0xa7   : > { %v987_v11 = vor.u32 %v986_v28, %v983_v45  ;;  %v1671_v45 = vld [vmem:[%s12714_s25 + $0x8] sm:$0x8] }
  0xa8   : > { %10771 = vmatmul.mubr.msk.bf16.gmra.mxu0 %vm538_vm3, %v533_v40  ;;  %v535_v40 = vsel %vm496_vm2, %v532_v52, %v534_v14  ;;  %v996_v52 = vor.u32 %v995_v13, %v992_v2  ;;  %v9711_v28 = vcombine.low %v1671_v45, %v12857_v29  ;;  %v1841_v45 = vshll.u32 %v9713_v31, 16 }
  0xa9   : > { %10774 = vmatprep.mubr.msk.bf16.mxu0 %vm12597_vm1, %v17413_v1  ;;  %v988_v44 = vsel %vm809_vm4, %v978_v20, %v987_v11 }
  0xaa   : > { %v997_v20 = vsel %vm809_vm4, %v987_v11, %v996_v52  ;;  %v1824_v13 = vshll.u32 %v9711_v28, 16 }
  0xad   : > { %10857 = vmatmul.mubr.msk.bf16.gmra.mxu1 %vm538_vm3, %v979_v35  ;;  %v537_v35 = vsel %vm496_vm2, %v534_v14, %v536_v30  ;;  %v1821_v14 = vshrl.u32 %v9711_v28, 16  ;;  %v2402_v28 = vsel %vm602_vm0, %v9753_v49, 0 }
  0xae   : > { %10860 = vmatprep.mubr.msk.bf16.mxu1 %vm12597_vm1, %v17413_v1 }
  0xaf   : > { %v1823_v29 = vrot.slane %v1821_v14, 3 }
  0xb0   : > { %10775 = vmatmul.mubr.msk.bf16.gmra.mxu0 %vm538_vm3, %v535_v40  ;;  %v1826_v40 = vrot.slane %v1824_v13, 4 }
  0xb1   : > { %10778 = vmatprep.mubr.msk.bf16.mxu0 %vm12597_vm1, %v17413_v1 }
  0xb5   : > { %10861 = vmatmul.mubr.msk.bf16.gmra.mxu1 %vm538_vm3, %v988_v44  ;;  %v1829_v44 = vshrl.u32 %v9712_v34, 16 }
  0xb6   : > { %10864 = vmatprep.mubr.msk.bf16.mxu1 %vm12597_vm1, %v17413_v1 }
  0xb7   : > { %v1831_v11 = vrot.slane %v1829_v44, 3 }
  0xb8   : > { %10779 = vmatmul.mubr.msk.bf16.gmra.mxu0 %vm538_vm3, %v537_v35  ;;  %v1838_v35 = vshrl.u32 %v9713_v31, 16 }
  0xb9   : > { %10782 = vmatprep.mubr.msk.bf16.mxu0 %vm12597_vm1, %v17413_v1  ;;  %v1835_v2 = vor.u32 %v1834_v37, %v1831_v11 }
  0xba   : > { %v1840_v6 = vrot.slane %v1838_v35, 3 }
  0xbd   : > { %10865 = vmatmul.mubr.msk.bf16.gmra.mxu1 %vm538_vm3, %v997_v20  ;;  %v9714_v20 = vcombine.low %v12933_v8, %v12972_v32  ;;  %v9715_v32 = vcombine.low %v12975_v33, %v13005_v53  ;;  %v9716_v33 = vcombine.low %v13008_v56, %v13033_v42 }
  0xbe   : > { %10868 = vmatprep.mubr.msk.bf16.mxu1 %vm12597_vm1, %v17413_v1 }
  0xbf   : > { %v1850_v14 = vshll.u32 %v9714_v20, 16  ;;  %v1865_v31 = vshrl.u32 %v9716_v33, 16  ;;  %v1868_v49 = vshll.u32 %v9716_v33, 16  ;;  %v17562_v33 = vshll.u32 %v12818_v3, 16 }
  0xc0   : > { %10783 = vmatmul.mubr.msk.bf16.gmra.mxu0 %vm538_vm3, %v536_v30  ;;  %v1827_v30 = vor.u32 %v1826_v40, %v1823_v29  ;;  %v1856_v29 = vshrl.u32 %v9715_v32, 16  ;;  %v1859_v40 = vshll.u32 %v9715_v32, 16 }
  0xc1   : > { %10874 = vmatprep.mubr.msk.bf16.mxu0 %vm12597_vm1, %v17413_v1  ;;  %v1852_v8 = vrot.slane %v1850_v14, 4  ;;  %v1867_v56 = vrot.slane %v1865_v31, 3  ;;  %v1870_v42 = vrot.slane %v1868_v49, 4  ;;  %v1688_v31 = vld [vmem:[%s12714_s25 + $0x4c] sm:$0xf]  ;;  %v2654_v49 = vshll.u32 %v12874_v39, 16 }
  0xc2   : > { %v1836_v50 = vsel %vm1270_vm5, %v1827_v30, %v1835_v2  ;;  %v1858_v11 = vrot.slane %v1856_v29, 3  ;;  %v1861_v37 = vrot.slane %v1859_v40, 4 }
  0xc4   : > { %v1862_v53 = vor.u32 %v1861_v37, %v1858_v11  ;;  %v1883_v11 = vshrl.u32 %v9718_v60, 16  ;;  %v1303_v37 = vrot.slane %v873_v12, 3 }
  0xc5   : > { %10869 = vmatmul.mubr.msk.bf16.gmra.mxu1 %vm538_vm3, %v996_v52  ;;  %v1843_v52 = vrot.slane %v1841_v45, 4 }
  0xc6   : > { %10960 = vmatprep.mubr.msk.bf16.mxu1 %vm12597_vm1, %v17413_v1 }
  0xc7   : > { %v1844_v34 = vor.u32 %v1843_v52, %v1840_v6  ;;  %v1871_v52 = vor.u32 %v1870_v42, %v1867_v56  ;;  %v2652_v56 = vshrl.u32 %v12874_v39, 16  ;;  %v2656_v42 = vrot.slane %v2654_v49, 1 }
  0xc8   : > { %10875 = vmatmul.mubr.msk.bf16.vlgmr.msra.gmra.mxu0 %vm538_vm3, %v12870_v38  ;;  %v1847_v38 = vshrl.u32 %v9714_v20, 16  ;;  %v2665_v49 = vshll.u32 %v12943_v17, 16 }
  0xc9   : > { %11045 = vmatpush3.bf16.msra.mxu0 %v2402_v28  ;;  %10878 = vmatprep.mubr.msk.bf16.mxu0 %vm12597_vm1, %v17413_v1  ;;  %v1845_v13 = vsel %vm1270_vm5, %v1835_v2, %v1844_v34 }
  0xca   : > { %11216 = vmatprep.subr.bf16.mxu0 %v17413_v1  ;;  %v1849_v44 = vrot.slane %v1847_v38, 3 }
  0xcc   : > { %v1853_v51 = vor.u32 %v1852_v8, %v1849_v44  ;;  %v1872_v8 = vsel %vm1270_vm5, %v1862_v53, %v1871_v52 }
  0xcd   : > { %10961 = vmatmul.mubr.msk.bf16.vlgmr.msra.gmra.mxu1 %vm538_vm3, %v1836_v50  ;;  %v1299_v50 = vrot.slane %v864_v63, 3 }
  0xce   : > { %10964 = vmatprep.mubr.msk.bf16.mxu1 %vm12597_vm1, %v17413_v1  ;;  %v1863_v2 = vsel %vm1270_vm5, %v1853_v51, %v1862_v53  ;;  %v1304_v53 = vrot.slane %v17562_v33, 4 }
  0xd0   : > { %10879 = vmatmul.mubr.msk.bf16.gmra.mxu0 %vm538_vm3, %v12884_v43  ;;  %v1854_v43 = vsel %vm1270_vm5, %v1844_v34, %v1853_v51 }
  0xd1   : > { %10882 = vmatprep.mubr.msk.bf16.mxu0 %vm12597_vm1, %v17413_v1 }
  0xd5   : > { %10965 = vmatmul.mubr.msk.bf16.gmra.mxu1 %vm538_vm3, %v1845_v13 }
  0xd6   : > { %10968 = vmatprep.mubr.msk.bf16.mxu1 %vm12597_vm1, %v17413_v1 }
  0xd8   : > { %10883 = vmatmul.mubr.msk.bf16.gmra.mxu0 %vm538_vm3, %v12915_v59  ;;  %v9717_v59 = vcombine.low %v13036_v18, %v13060_v47 }
  0xd9   : > { %10886 = vmatprep.mubr.msk.bf16.mxu0 %vm12597_vm1, %v17413_v1 }
  0xda   : > { %v1874_v6 = vshrl.u32 %v9717_v59, 16  ;;  %v1877_v18 = vshll.u32 %v9717_v59, 16 }
  0xdc   : > { %v1876_v63 = vrot.slane %v1874_v6, 3  ;;  %v1879_v44 = vrot.slane %v1877_v18, 4  ;;  %v1305_v18 = vor.u32 %v1304_v53, %v1303_v37  ;;  %v1690_v37 = vld [vmem:[%s12714_s25 + $0x54] sm:$0xf] }
  0xdd   : > { %10969 = vmatmul.mubr.msk.bf16.gmra.mxu1 %vm538_vm3, %v1854_v43 }
  0xde   : > { %10972 = vmatprep.mubr.msk.bf16.mxu1 %vm12597_vm1, %v17413_v1  ;;  %v1880_v43 = vor.u32 %v1879_v44, %v1876_v63 }
  0xe0   : > { %v640_v30 = vpop.f32.mrf.mxu0  ;;  %10887 = vmatmul.mubr.msk.bf16.gmra.mxu0 %vm538_vm3, %v12950_v46  ;;  %v1300_v46 = vrot.slane %v867_v0, 4  ;;  %v1881_v3 = vsel %vm1270_vm5, %v1871_v52, %v1880_v43 }
  0xe1   : > { %10890 = vmatprep.mubr.msk.bf16.mxu0 %vm12597_vm1, %v17413_v1 }
  0xe2   : > { %v10704_v35 = vpop.f32.mrf.mxu0  ;;  %v1301_v13 = vor.u32 %v1300_v46, %v1299_v50  ;;  %v1888_v50 = vrot.slane %v1886_v4, 4  ;;  %v9719_v46 = vcombine.low %v13071_v10, %v1688_v31  ;;  %v13320_v4 = vld [vmem:[%s12714_s25 + $0x50] sm:$0xf]  ;;  %v2662_v31 = vshrl.u32 %v12908_v57, 16 }
  0xe3   : > { %v2658_v35 = vshll.u32 %v12908_v57, 16 }
  0xe4   : > { %v643_v45 = vpop.f32.mrf.mxu0  ;;  %v1892_v60 = vshrl.u32 %v9719_v46, 16 }
  0xe5   : > { %v1098_v28 = vpop.f32.mrf.mxu1  ;;  %10973 = vmatmul.mubr.msk.bf16.gmra.mxu1 %vm538_vm3, %v1863_v2 }
  0xe6   : > { %v13266_v47 = vadd.f32 %v1098_v28, %v640_v30  ;;  %10976 = vmatprep.mubr.msk.bf16.mxu1 %vm12597_vm1, %v17413_v1  ;;  %v10705_v20 = vpop.f32.mrf.mxu0  ;;  %v1885_v28 = vrot.slane %v1883_v11, 3 }
  0xe7   : > { %v10790_v34 = vpop.f32.mrf.mxu1  ;;  %v2657_v20 = vor.u32 %v2656_v42, %v2652_v56 }
  0xe8   : > { %v648_v38 = vpop.f32.mrf.mxu0  ;;  %10891 = vmatmul.mubr.msk.bf16.gmra.mxu0 %vm538_vm3, %v12988_v15  ;;  %v1302_v15 = vsel %vm1270_vm5, %v12984_v26, %v1301_v13  ;;  %v9796_v26 = vld [vmem:[%s17380_s2 + $0xa] sm:$0x3]  ;;  %v2660_v34 = vrot.slane %v2658_v35, 1  ;;  %v1889_v44 = vor.u32 %v1888_v50, %v1885_v28 }
  0xe9   : > { %v1101_v14 = vpop.f32.mrf.mxu1  ;;  %10894 = vmatprep.mubr.msk.bf16.mxu0 %vm12597_vm1, %v17413_v1  ;;  %v2863_v2 = vsel %vm602_vm0, %v9796_v26, 0  ;;  %v1894_v26 = vrot.slane %v1892_v60, 3  ;;  %v17566_v60 = vshll.u32 %v12881_v41, 16 }
  0xea   : > { %v13274_v0 = vadd.f32 %v1101_v14, %v643_v45  ;;  %v10708_v32 = vpop.f32.mrf.mxu0  ;;  %11131 = vmatpush3.bf16.msra.mxu1 %v2863_v2  ;;  %v13307_v52 = vsel %vm2651_vm6, %v2657_v20, %v2660_v34  ;;  %v2664_v35 = vor.u32 %v2662_v31, %v2660_v34  ;;  %v17565_v34 = vshrl.u32 %v12881_v41, 16 }
  0xeb   : > { %v10791_v51 = vpop.f32.mrf.mxu1  ;;  %11302 = vmatprep.subr.bf16.mxu1 %v17413_v1 }
  0xec   : > { %v651_v29 = vpop.f32.mrf.mxu0  ;;  %v1306_v51 = vsel %vm1270_vm5, %v1301_v13, %v1305_v18 }
  0xed   : > { %v1106_v40 = vpop.f32.mrf.mxu1  ;;  %10977 = vmatmul.mubr.msk.bf16.gmra.mxu1 %vm538_vm3, %v1872_v8  ;;  %v1895_v8 = vshll.u32 %v9719_v46, 16 }
  0xee   : > { %v13282_v58 = vadd.f32 %v1106_v40, %v648_v38  ;;  %10980 = vmatprep.mubr.msk.bf16.mxu1 %vm12597_vm1, %v17413_v1  ;;  %v10709_v30 = vpop.f32.mrf.mxu0 }
  0xef   : > { %v10794_v59 = vpop.f32.mrf.mxu1  ;;  %v1897_v2 = vrot.slane %v1895_v8, 4  ;;  %v1312_v8 = vrot.slane %v17566_v60, 4  ;;  %v13372_v60 = vld [vmem:[%s12714_s25 + $0x60] sm:$0xf] }
  0xf0   : > { %v656_v12 = vpop.f32.mrf.mxu0  ;;  %10895 = vmatmul.mubr.msk.bf16.gmra.mxu0 %vm538_vm3, %v1302_v15  ;;  %v17564_v15 = vshll.u32 %v12847_v22, 16  ;;  %v1890_v59 = vsel %vm1270_vm5, %v1880_v43, %v1889_v44 }
  0xf1   : > { %v1109_v45 = vpop.f32.mrf.mxu1  ;;  %10898 = vmatprep.mubr.msk.bf16.mxu0 %vm12597_vm1, %v17413_v1  ;;  %v1898_v46 = vor.u32 %v1897_v2, %v1894_v26 }
  0xf2   : > { %v13301_v6 = vadd.f32 %v1109_v45, %v651_v29  ;;  %v10712_v38 = vpop.f32.mrf.mxu0  ;;  %v17563_v29 = vshrl.u32 %v12847_v22, 16  ;;  %v1308_v11 = vrot.slane %v17564_v15, 4  ;;  %v9720_v22 = vcombine.low %v13320_v4, %v1690_v37 }
  0xf3   : > { %v10795_v14 = vpop.f32.mrf.mxu1  ;;  %v2672_v37 = vshll.u32 %v12982_v55, 16 }
  0xf4   : > { %v659_v10 = vpop.f32.mrf.mxu0  ;;  %v1307_v40 = vrot.slane %v17563_v29, 3  ;;  %v1901_v20 = vshrl.u32 %v9720_v22, 16  ;;  %v1904_v38 = vshll.u32 %v9720_v22, 16  ;;  %v1692_v29 = vld [vmem:[%s12714_s25 + $0x5c] sm:$0xf] }
  0xf5   : > { %v1114_v63 = vpop.f32.mrf.mxu1  ;;  %10981 = vmatmul.mubr.msk.bf16.gmra.mxu1 %vm538_vm3, %v1881_v3  ;;  %v2674_v26 = vrot.slane %v2672_v37, 1 }
  0xf6   : > { %v13310_v32 = vadd.f32 %v1114_v63, %v656_v12  ;;  %10984 = vmatprep.mubr.msk.bf16.mxu1 %vm12597_vm1, %v17413_v1  ;;  %v10713_v33 = vpop.f32.mrf.mxu0  ;;  %v1309_v42 = vor.u32 %v1308_v11, %v1307_v40  ;;  %v2667_v12 = vrot.slane %v2665_v49, 1  ;;  %v1311_v63 = vrot.slane %v17565_v34, 3 }
  0xf7   : > { %v10798_v53 = vpop.f32.mrf.mxu1  ;;  %v2669_v11 = vshrl.u32 %v12943_v17, 16  ;;  %v1903_v31 = vrot.slane %v1901_v20, 3  ;;  %v1906_v49 = vrot.slane %v1904_v38, 4  ;;  %v17568_v34 = vshll.u32 %v12927_v5, 16 }
  0xf8   : > { %v664_v30 = vpop.f32.mrf.mxu0  ;;  %10899 = vmatmul.mubr.msk.bf16.gmra.mxu0 %vm538_vm3, %v1306_v51  ;;  %v13333_v28 = vsel %vm2651_vm6, %v2664_v35, %v2667_v12  ;;  %v13346_v51 = vld [vmem:[%s12714_s25 + $0x58] sm:$0xf]  ;;  %v1899_v53 = vsel %vm1270_vm5, %v1889_v44, %v1898_v46 }
  0xf9   : > { %v1117_v13 = vpop.f32.mrf.mxu1  ;;  %10902 = vmatprep.mubr.msk.bf16.mxu0 %vm12597_vm1, %v17413_v1  ;;  %v9721_v41 = vcombine.low %v13346_v51, %v1692_v29 }
  0xfa   : > { %v13328_v56 = vadd.f32 %v1117_v13, %v659_v10  ;;  %v10716_v45 = vpop.f32.mrf.mxu0  ;;  %v1310_v10 = vsel %vm1270_vm5, %v1305_v18, %v1309_v42  ;;  %v1313_v13 = vor.u32 %v1312_v8, %v1311_v63  ;;  %v1316_v63 = vrot.slane %v17568_v34, 4  ;;  %v13375_v8 = vld [vmem:[%s12714_s25 + $0x64] sm:$0xf] }
  0xfb   : > { %v10799_v3 = vpop.f32.mrf.mxu1 }
  0xfc   : > { %v667_v43 = vpop.f32.mrf.mxu0  ;;  %v1907_v3 = vor.u32 %v1906_v49, %v1903_v31  ;;  %v1314_v38 = vsel %vm1270_vm5, %v1309_v42, %v1313_v13 }
  0xfd   : > { %v1122_v50 = vpop.f32.mrf.mxu1  ;;  %10985 = vmatmul.mubr.msk.bf16.gmra.mxu1 %vm538_vm3, %v1890_v59  ;;  %v2671_v59 = vor.u32 %v2669_v11, %v2667_v12  ;;  %v17567_v12 = vshrl.u32 %v12927_v5, 16  ;;  %v2679_v11 = vshll.u32 %v13016_v62, 16  ;;  %v9722_v5 = vcombine.low %v13372_v60, %v13375_v8 }
  0xfe   : > { %v13336_v14 = vadd.f32 %v1122_v50, %v664_v30  ;;  %10988 = vmatprep.mubr.msk.bf16.mxu1 %vm12597_vm1, %v17413_v1  ;;  %v10717_v40 = vpop.f32.mrf.mxu0  ;;  %v1913_v50 = vshll.u32 %v9721_v41, 16 }
  0xff   : > { %v10802_v15 = vpop.f32.mrf.mxu1  ;;  %v13359_v35 = vsel %vm2651_vm6, %v2671_v59, %v2674_v26  ;;  %v2681_v59 = vrot.slane %v2679_v11, 1 }
 0x100   : > { %v672_v33 = vpop.f32.mrf.mxu0  ;;  %10903 = vmatmul.mubr.msk.bf16.gmra.mxu0 %vm538_vm3, %v1310_v10  ;;  %v1315_v10 = vrot.slane %v17567_v12, 3  ;;  %v2676_v15 = vshrl.u32 %v12982_v55, 16 }
 0x101   : > { %v1125_v18 = vpop.f32.mrf.mxu1  ;;  %10906 = vmatprep.mubr.msk.bf16.mxu0 %vm12597_vm1, %v17413_v1 }
 0x102   : > { %v13354_v30 = vadd.f32 %v1125_v18, %v667_v43  ;;  %v10720_v2 = vpop.f32.mrf.mxu0  ;;  %v1910_v43 = vshrl.u32 %v9721_v41, 16  ;;  %v1317_v49 = vor.u32 %v1316_v63, %v1315_v10  ;;  %v2678_v41 = vor.u32 %v2676_v15, %v2674_v26  ;;  %v13404_v15 = vld [vmem:[%s12714_s25 + $0x6c] sm:$0xf] }
 0x103   : > { %v10803_v22 = vpop.f32.mrf.mxu1  ;;  %v17569_v26 = vshrl.u32 %v12955_v19, 16  ;;  %v17570_v63 = vshll.u32 %v12955_v19, 16  ;;  %17571 = vst [vmem:[#allocation6_spill] sm:$0xff] %v13404_v15 }
 0x104   : > { %v675_v44 = vpop.f32.mrf.mxu0  ;;  %v1912_v18 = vrot.slane %v1910_v43, 3  ;;  %v1318_v10 = vsel %vm1270_vm5, %v1313_v13, %v1317_v49 }
 0x105   : > { %v1130_v45 = vpop.f32.mrf.mxu1  ;;  %10989 = vmatmul.mubr.msk.bf16.gmra.mxu1 %vm538_vm3, %v1899_v53  ;;  %v1915_v53 = vrot.slane %v1913_v50, 4  ;;  %v1319_v34 = vrot.slane %v17569_v26, 3 }
 0x106   : > { %v13362_v20 = vadd.f32 %v1130_v45, %v672_v33  ;;  %10992 = vmatprep.mubr.msk.bf16.mxu1 %vm12597_vm1, %v17413_v1  ;;  %v10721_v29 = vpop.f32.mrf.mxu0  ;;  %v1908_v33 = vsel %vm1270_vm5, %v1898_v46, %v1907_v3  ;;  %v13388_v45 = vsel %vm2651_vm6, %v2678_v41, %v2681_v59 }
 0x107   : > { %v10806_v40 = vpop.f32.mrf.mxu1  ;;  %v1916_v50 = vor.u32 %v1915_v53, %v1912_v18  ;;  %v1320_v29 = vrot.slane %v17570_v63, 4 }
 0x108   : > { %v680_v42 = vpop.f32.mrf.mxu0  ;;  %10907 = vmatmul.mubr.msk.bf16.gmra.mxu0 %vm538_vm3, %v1314_v38  ;;  %v1922_v38 = vshll.u32 %v9722_v5, 16  ;;  %v13401_v40 = vld [vmem:[%s12714_s25 + $0x68] sm:$0xf] }
 0x109   : > { %v1133_v37 = vpop.f32.mrf.mxu1  ;;  %10910 = vmatprep.mubr.msk.bf16.mxu0 %vm12597_vm1, %v17413_v1  ;;  %v1917_v53 = vsel %vm1270_vm5, %v1907_v3, %v1916_v50  ;;  %v9723_v19 = vcombine.low %v13401_v40, %v13404_v15 }
 0x10a   : > { %v13383_v31 = vadd.f32 %v1133_v37, %v675_v44  ;;  %v10724_v2 = vpop.f32.mrf.mxu0  ;;  %v1919_v44 = vshrl.u32 %v9722_v5, 16  ;;  %v1924_v41 = vrot.slane %v1922_v38, 4 }
 0x10b   : > { %v10807_v22 = vpop.f32.mrf.mxu1 }
 0x10c   : > { %v683_v46 = vpop.f32.mrf.mxu0  ;;  %v1921_v5 = vrot.slane %v1919_v44, 3  ;;  %v1321_v22 = vor.u32 %v1320_v29, %v1319_v34 }
 0x10d   : > { %v1138_v43 = vpop.f32.mrf.mxu1  ;;  %10993 = vmatmul.mubr.msk.bf16.gmra.mxu1 %vm538_vm3, %v1908_v33  ;;  %v2686_v33 = vshll.u32 %v13044_v24, 16 }
 0x10e   : > { %v13391_v12 = vadd.f32 %v1138_v43, %v680_v42  ;;  %10996 = vmatprep.mubr.msk.bf16.mxu1 %vm12597_vm1, %v17413_v1  ;;  %v10725_v11 = vpop.f32.mrf.mxu0  ;;  %v2683_v42 = vshrl.u32 %v13016_v62, 16  ;;  %v1925_v38 = vor.u32 %v1924_v41, %v1921_v5  ;;  %v1322_v34 = vsel %vm1270_vm5, %v1317_v49, %v1321_v22 }
 0x10f   : > { %v10810_v37 = vpop.f32.mrf.mxu1  ;;  %v2688_v26 = vrot.slane %v2686_v33, 1  ;;  %v2693_v41 = vshll.u32 %v13078_v23, 16 }
 0x110   : > { %v688_v13 = vpop.f32.mrf.mxu0  ;;  %10911 = vmatmul.mubr.msk.bf16.gmra.mxu0 %vm538_vm3, %v1318_v10  ;;  %v2685_v43 = vor.u32 %v2683_v42, %v2681_v59  ;;  %v1931_v37 = vshll.u32 %v9723_v19, 16  ;;  %v17574_v59 = vshrl.u32 %v13000_v48, 16  ;;  %v17575_v42 = vshll.u32 %v13000_v48, 16 }
 0x111   : > { %v1141_v18 = vpop.f32.mrf.mxu1  ;;  %10914 = vmatprep.mubr.msk.bf16.mxu0 %vm12597_vm1, %v17413_v1  ;;  %v2695_v15 = vrot.slane %v2693_v41, 1  ;;  %v13459_v41 = vld [vmem:[%s12714_s25 + $0x78] sm:$0xf] }
 0x112   : > { %v13412_v2 = vadd.f32 %v1141_v18, %v683_v46  ;;  %v10728_v63 = vpop.f32.mrf.mxu0  ;;  %v13417_v10 = vsel %vm2651_vm6, %v2685_v43, %v2688_v26  ;;  %v1928_v46 = vshrl.u32 %v9723_v19, 16  ;;  %v1323_v29 = vrot.slane %v17574_v59, 3  ;;  %v13430_v43 = vld [vmem:[%s12714_s25 + $0x70] sm:$0xf] }
 0x113   : > { %v10811_v11 = vpop.f32.mrf.mxu1  ;;  %v1324_v33 = vrot.slane %v17575_v42, 4  ;;  %17576 = vst [vmem:[#allocation9_spill] sm:$0xff] %v13430_v43  ;;  %v13433_v63 = vld [vmem:[%s12714_s25 + $0x74] sm:$0xf]  ;;  %v1933_v59 = vrot.slane %v1931_v37, 4 }
 0x114   : > { %17572 = vst [vmem:[#allocation7_spill] sm:$0xff] %v13412_v2  ;;  %v691_v3 = vpop.f32.mrf.mxu0  ;;  %17577 = vst [vmem:[#allocation10_spill] sm:$0xff] %v13433_v63  ;;  %v1926_v11 = vsel %vm1270_vm5, %v1916_v50, %v1925_v38  ;;  %v9724_v48 = vcombine.low %v13430_v43, %v13433_v63 }
 0x115   : > { %v1146_v44 = vpop.f32.mrf.mxu1  ;;  %10997 = vmatmul.mubr.msk.bf16.gmra.mxu1 %vm538_vm3, %v1917_v53 }
 0x116   : > { %v13420_v18 = vadd.f32 %v1146_v44, %v688_v13  ;;  %11000 = vmatprep.mubr.msk.bf16.mxu1 %vm12597_vm1, %v17413_v1  ;;  %v10729_v53 = vpop.f32.mrf.mxu0  ;;  %v2690_v13 = vshrl.u32 %v13044_v24, 16  ;;  %v1930_v44 = vrot.slane %v1928_v46, 3 }
 0x117   : > { %v10814_v5 = vpop.f32.mrf.mxu1  ;;  %v1325_v53 = vor.u32 %v1324_v33, %v1323_v29 }
 0x118   : > { %17573 = vst [vmem:[#allocation8_spill] sm:$0xff] %v13420_v18  ;;  %v696_v49 = vpop.f32.mrf.mxu0  ;;  %10915 = vmatmul.mubr.msk.bf16.gmra.mxu0 %vm538_vm3, %v1322_v34  ;;  %v2692_v5 = vor.u32 %v2690_v13, %v2688_v26  ;;  %v1934_v37 = vor.u32 %v1933_v59, %v1930_v44  ;;  %v1937_v26 = vshrl.u32 %v9724_v48, 16  ;;  %v1940_v13 = vshll.u32 %v9724_v48, 16 }
 0x119   : > { %v1149_v19 = vpop.f32.mrf.mxu1  ;;  %10918 = vmatprep.mubr.msk.bf16.mxu0 %vm12597_vm1, %v17413_v1  ;;  %v17580_v1 = vshll.u32 %v13028_v16, 16  ;;  %v2697_v59 = vshrl.u32 %v13078_v23, 16 }
 0x11a   : > { %v13441_v42 = vadd.f32 %v1149_v19, %v691_v3  ;;  %v10732_v18 = vpop.f32.mrf.mxu0  ;;  %v13446_v34 = vsel %vm2651_vm6, %v2692_v5, %v2695_v15  ;;  %v17579_v3 = vshrl.u32 %v13028_v16, 16  ;;  %v13462_v5 = vld [vmem:[%s12714_s25 + $0x7c] sm:$0xf]  ;;  %v2700_v16 = vshll.u32 %v13082_v54, 16 }
 0x11b   : > { %v10815_v2 = vpop.f32.mrf.mxu1  ;;  %v1328_v29 = vrot.slane %v17580_v1, 4  ;;  %v1326_v18 = vsel %vm1270_vm5, %v1321_v22, %v1325_v53  ;;  %17583 = vst [vmem:[#allocation13_spill] sm:$0xff] %v13462_v5  ;;  %v1935_v22 = vsel %vm1270_vm5, %v1925_v38, %v1934_v37  ;;  %v9725_v48 = vcombine.low %v13459_v41, %v13462_v5  ;;  %v13491_v5 = vld [vmem:[%s12714_s25 + $0x80] sm:$0xf] }
 0x11c   : > { %17578 = vst [vmem:[#allocation11_spill] sm:$0xff] %v13441_v42  ;;  %v699_v50 = vpop.f32.mrf.mxu0  ;;  %v1327_v19 = vrot.slane %v17579_v3, 3  ;;  %v17582_v2 = vmov 0.0   ;;  %17587 = vst [vmem:[#allocation15_spill] sm:$0xff] %v13491_v5 }
 0x11d   : > { %v1154_v46 = vpop.f32.mrf.mxu1  ;;  %11001 = vmatmul.mubr.msk.bf16.gmra.mxu1 %vm538_vm3, %v1926_v11 }
 0x11e   : > { %v13453_v33 = vadd.f32 %v1154_v46, %v696_v49  ;;  %11004 = vmatprep.mubr.msk.bf16.mxu1 %vm12597_vm1, %v17582_v2  ;;  %v10733_v11 = vpop.f32.mrf.mxu0  ;;  %v1329_v49 = vor.u32 %v1328_v29, %v1327_v19  ;;  %v1939_v46 = vrot.slane %v1937_v26, 3  ;;  %v1946_v26 = vshrl.u32 %v9725_v48, 16 }
 0x11f   : > { %v10818_v44 = vpop.f32.mrf.mxu1  ;;  %v1942_v11 = vrot.slane %v1940_v13, 4 }
 0x120   : > { %17581 = vst [vmem:[#allocation12_spill] sm:$0xff] %v13453_v33  ;;  %v704_v1 = vpop.f32.mrf.mxu0  ;;  %10919 = vmatmul.mubr.msk.bf16.gmra.mxu0 %vm538_vm3, %v1326_v18  ;;  %v2699_v44 = vor.u32 %v2697_v59, %v2695_v15  ;;  %v13474_v33 = vrot.slane %v2700_v16, 1  ;;  %v1949_v18 = vshll.u32 %v9725_v48, 16  ;;  %v17586_v59 = vshll.u32 %v13047_v25, 16 }
 0x121   : > { %v1157_v3 = vpop.f32.mrf.mxu1  ;;  %10922 = vmatprep.mubr.msk.bf16.mxu0 %vm12597_vm1, %v17582_v2  ;;  %v1943_v15 = vor.u32 %v1942_v11, %v1939_v46 }
 0x122   : > { %v13470_v63 = vadd.f32 %v1157_v3, %v699_v50  ;;  %v10736_v43 = vpop.f32.mrf.mxu0  ;;  %v13478_v38 = vsel %vm2651_vm6, %v2699_v44, %v13474_v33  ;;  %v1330_v50 = vsel %vm1270_vm5, %v1325_v53, %v1329_v49  ;;  %v1332_v16 = vrot.slane %v17586_v59, 4 }
 0x123   : > { %v10819_v42 = vpop.f32.mrf.mxu1  ;;  %v17585_v43 = vshrl.u32 %v13047_v25, 16  ;;  %v1944_v46 = vsel %vm1270_vm5, %v1934_v37, %v1943_v15  ;;  %v17590_v37 = vshll.u32 %v13094_v61, 16 }
 0x124   : > { %v707_v19 = vpop.f32.mrf.mxu0 }
 0x125   : > { %v1162_v29 = vpop.f32.mrf.mxu1  ;;  %11005 = vmatmul.mubr.msk.bf16.gmra.mxu1 %vm538_vm3, %v1935_v22  ;;  %v1331_v42 = vrot.slane %v17585_v43, 3  ;;  %v13494_v22 = vld [vmem:[%s12714_s25 + $0x84] sm:$0xf] }
 0x126   : > { %v13482_v13 = vadd.f32 %v1162_v29, %v704_v1  ;;  %11008 = vmatprep.mubr.msk.bf16.mxu1 %vm12597_vm1, %v17582_v2  ;;  %v10737_v3 = vpop.f32.mrf.mxu0  ;;  %17588 = vst [vmem:[#allocation16_spill] sm:$0xff] %v13494_v22  ;;  %v1948_v1 = vrot.slane %v1946_v26, 3  ;;  %v1951_v29 = vrot.slane %v1949_v18, 4  ;;  %v9726_v11 = vcombine.low %v13491_v5, %v13494_v22  ;;  %v13515_v5 = vld [vmem:[%s12714_s25 + $0x88] sm:$0xf] }
 0x127   : > { %v10822_v44 = vpop.f32.mrf.mxu1  ;;  %v1333_v25 = vor.u32 %v1332_v16, %v1331_v42  ;;  %v1336_v18 = vrot.slane %v17590_v37, 4  ;;  %17592 = vst [vmem:[#allocation18_spill] sm:$0xff] %v13515_v5 }
 0x128   : > { %17584 = vst [vmem:[#allocation14_spill] sm:$0xff] %v13482_v13  ;;  %v712_v53 = vpop.f32.mrf.mxu0  ;;  %10923 = vmatmul.mubr.msk.bf16.gmra.mxu0 %vm538_vm3, %v1330_v50  ;;  %v1952_v50 = vor.u32 %v1951_v29, %v1948_v1  ;;  %v1955_v16 = vshrl.u32 %v9726_v11, 16  ;;  %v13518_v1 = vld [vmem:[%s12714_s25 + $0x8c] sm:$0xf] }
 0x129   : > { %v1165_v48 = vpop.f32.mrf.mxu1  ;;  %10926 = vmatprep.mubr.msk.bf16.mxu0 %vm12597_vm1, %v17582_v2  ;;  %v1334_v42 = vsel %vm1270_vm5, %v1329_v49, %v1333_v25  ;;  %17593 = vst [vmem:[#allocation19_spill] sm:$0xff] %v13518_v1 }
 0x12a   : > { %v13497_v13 = vadd.f32 %v1165_v48, %v707_v19  ;;  %v10740_v43 = vpop.f32.mrf.mxu0  ;;  %v17589_v19 = vshrl.u32 %v13094_v61, 16  ;;  %v1953_v61 = vsel %vm1270_vm5, %v1943_v15, %v1952_v50  ;;  %v1957_v49 = vrot.slane %v1955_v16, 3 }
 0x12b   : > { %v10823_v59 = vpop.f32.mrf.mxu1  ;;  %v1958_v43 = vshll.u32 %v9726_v11, 16 }
 0x12c   : > { %v715_v3 = vpop.f32.mrf.mxu0  ;;  %v1335_v26 = vrot.slane %v17589_v19, 3 }
 0x12d   : > { %v1170_v44 = vpop.f32.mrf.mxu1  ;;  %11009 = vmatmul.mubr.msk.bf16.gmra.mxu1 %vm538_vm3, %v1944_v46  ;;  %v1960_v11 = vrot.slane %v1958_v43, 4 }
 0x12e   : > { %v13509_v48 = vadd.f32 %v1170_v44, %v712_v53  ;;  %11012 = vmatprep.mubr.msk.bf16.mxu1 %vm12597_vm1, %v17582_v2  ;;  %v10741_v59 = vpop.f32.mrf.mxu0  ;;  %v1337_v53 = vor.u32 %v1336_v18, %v1335_v26  ;;  %v17596_v18 = vshll.u32 %v13112_v27, 16 }
 0x12f   : > { %v10826_v22 = vpop.f32.mrf.mxu1  ;;  %v1961_v43 = vor.u32 %v1960_v11, %v1957_v49 }
 0x130   : > { %17591 = vst [vmem:[#allocation17_spill] sm:$0xff] %v13509_v48  ;;  %v720_v29 = vpop.f32.mrf.mxu0  ;;  %10927 = vmatmul.mubr.msk.bf16.gmra.mxu0 %vm538_vm3, %v1334_v42  ;;  %v9727_v22 = vcombine.low %v13515_v5, %v13518_v1  ;;  %v1338_v15 = vsel %vm1270_vm5, %v1333_v25, %v1337_v53  ;;  %v1340_v42 = vrot.slane %v17596_v18, 4  ;;  %v13542_v1 = vld [vmem:[%s12714_s25 + $0x94] sm:$0xf] }
 0x131   : > { %v1173_v46 = vpop.f32.mrf.mxu1  ;;  %10930 = vmatprep.mubr.msk.bf16.mxu0 %vm12597_vm1, %v17582_v2  ;;  %17598 = vst [vmem:[#allocation22_spill] sm:$0xff] %v13542_v1  ;;  %v1962_v49 = vsel %vm1270_vm5, %v1952_v50, %v1961_v43 }
 0x132   : > { %v13522_v44 = vadd.f32 %v1173_v46, %v715_v3  ;;  %v10744_v19 = vpop.f32.mrf.mxu0  ;;  %v17595_v3 = vshrl.u32 %v13112_v27, 16  ;;  %v1964_v46 = vshrl.u32 %v9727_v22, 16 }
 0x133   : > { %v10827_v37 = vpop.f32.mrf.mxu1  ;;  %v1967_v19 = vshll.u32 %v9727_v22, 16 }
 0x134   : > { %17594 = vst [vmem:[#allocation20_spill] sm:$0xff] %v13522_v44  ;;  %v723_v59 = vpop.f32.mrf.mxu0  ;;  %v1339_v26 = vrot.slane %v17595_v3, 3  ;;  %v13539_v37 = vld [vmem:[%s12714_s25 + $0x90] sm:$0xf]  ;;  %v1966_v11 = vrot.slane %v1964_v46, 3 }
 0x135   : > { %v1178_v48 = vpop.f32.mrf.mxu1  ;;  %11013 = vmatmul.mubr.msk.bf16.gmra.mxu1 %vm538_vm3, %v1953_v61  ;;  %17597 = vst [vmem:[#allocation21_spill] sm:$0xff] %v13539_v37  ;;  %v1969_v22 = vrot.slane %v1967_v19, 4  ;;  %v17601_v19 = vshll.u32 %v13130_v9, 16 }
 0x136   : > { %v13534_v16 = vadd.f32 %v1178_v48, %v720_v29  ;;  %11016 = vmatprep.mubr.msk.bf16.mxu1 %vm12597_vm1, %v17582_v2  ;;  %v10745_v61 = vpop.f32.mrf.mxu0  ;;  %v1341_v27 = vor.u32 %v1340_v42, %v1339_v26  ;;  %v9728_v48 = vcombine.low %v13539_v37, %v13542_v1  ;;  %v17600_v42 = vshrl.u32 %v13130_v9, 16  ;;  %v13563_v37 = vld [vmem:[%s12714_s25 + $0x98] sm:$0xf] }
 0x137   : > { %v10830_v25 = vpop.f32.mrf.mxu1  ;;  %v1970_v50 = vor.u32 %v1969_v22, %v1966_v11  ;;  %17602 = vst [vmem:[#allocation24_spill] sm:$0xff] %v13563_v37 }
 0x138   : > { %v728_v44 = vpop.f32.mrf.mxu0  ;;  %10931 = vmatmul.mubr.msk.bf16.gmra.mxu0 %vm538_vm3, %v1338_v15  ;;  %v1342_v15 = vsel %vm1270_vm5, %v1337_v53, %v1341_v27  ;;  %v1973_v26 = vshrl.u32 %v9728_v48, 16  ;;  %v1343_v46 = vrot.slane %v17600_v42, 3 }
 0x139   : > { %v1181_v5 = vpop.f32.mrf.mxu1  ;;  %10934 = vmatprep.mubr.msk.bf16.mxu0 %vm12597_vm1, %v17582_v2  ;;  %v1971_v11 = vsel %vm1270_vm5, %v1961_v43, %v1970_v50 }
 0x13a   : > { %v13547_v29 = vadd.f32 %v1181_v5, %v723_v59  ;;  %v10748_v3 = vpop.f32.mrf.mxu0  ;;  %v1976_v5 = vshll.u32 %v9728_v48, 16 }
 0x13b   : > { %v10831_v18 = vpop.f32.mrf.mxu1  ;;  %v1344_v3 = vrot.slane %v17601_v19, 4 }
 0x13c   : > { %v731_v61 = vpop.f32.mrf.mxu0 }
 0x13d   : > { %v1186_v25 = vpop.f32.mrf.mxu1  ;;  %11017 = vmatmul.mubr.msk.bf16.gmra.mxu1 %vm538_vm3, %v1962_v49  ;;  %v13566_v49 = vld [vmem:[%s12714_s25 + $0x9c] sm:$0xf]  ;;  %v1345_v9 = vor.u32 %v1344_v3, %v1343_v46 }
 0x13e   : > { %v13554_v59 = vadd.f32 %v1186_v25, %v728_v44  ;;  %11020 = vmatprep.mubr.msk.bf16.mxu1 %vm12597_vm1, %v17582_v2  ;;  %v10749_v18 = vpop.f32.mrf.mxu0  ;;  %17603 = vst [vmem:[#allocation25_spill] sm:$0xff] %v13566_v49  ;;  %v1975_v44 = vrot.slane %v1973_v26, 3  ;;  %v1978_v25 = vrot.slane %v1976_v5, 4  ;;  %v17605_v26 = vshrl.u32 %v13148_v21, 16 }
 0x13f   : > { %v10834_v1 = vpop.f32.mrf.mxu1  ;;  %v17606_v5 = vshll.u32 %v13148_v21, 16  ;;  %v1346_v46 = vsel %vm1270_vm5, %v1341_v27, %v1345_v9 }
 0x140   : > { %17599 = vst [vmem:[#allocation23_spill] sm:$0xff] %v13554_v59  ;;  %v736_v53 = vpop.f32.mrf.mxu0  ;;  %10935 = vmatmul.mubr.msk.bf16.gmra.mxu0 %vm538_vm3, %v1342_v15  ;;  %v9729_v1 = vcombine.low %v13563_v37, %v13566_v49  ;;  %v1347_v43 = vrot.slane %v17605_v26, 3  ;;  %v13590_v49 = vld [vmem:[%s12714_s25 + $0xa4] sm:$0xf] }
 0x141   : > { %v1189_v48 = vpop.f32.mrf.mxu1  ;;  %10938 = vmatprep.mubr.msk.bf16.mxu0 %vm12597_vm1, %v17582_v2  ;;  %v1348_v18 = vrot.slane %v17606_v5, 4  ;;  %17609 = vst [vmem:[#allocation29_spill] sm:$0xff] %v13590_v49 }
 0x142   : > { %v13569_v59 = vadd.f32 %v1189_v48, %v731_v61  ;;  %v10752_v22 = vpop.f32.mrf.mxu0  ;;  %v1979_v61 = vor.u32 %v1978_v25, %v1975_v44  ;;  %v1982_v3 = vshrl.u32 %v9729_v1, 16 }
 0x143   : > { %v10835_v42 = vpop.f32.mrf.mxu1  ;;  %v1985_v22 = vshll.u32 %v9729_v1, 16  ;;  %v1349_v1 = vor.u32 %v1348_v18, %v1347_v43 }
 0x144   : > { %17604 = vst [vmem:[#allocation26_spill] sm:$0xff] %v13569_v59  ;;  %v739_v19 = vpop.f32.mrf.mxu0  ;;  %v13587_v42 = vld [vmem:[%s12714_s25 + $0xa0] sm:$0xf]  ;;  %v1980_v21 = vsel %vm1270_vm5, %v1970_v50, %v1979_v61  ;;  %v17611_v50 = vshrl.u32 %v13166_v7, 16 }
 0x145   : > { %v1194_v15 = vpop.f32.mrf.mxu1  ;;  %11021 = vmatmul.mubr.msk.bf16.gmra.mxu1 %vm538_vm3, %v1971_v11  ;;  %17608 = vst [vmem:[#allocation28_spill] sm:$0xff] %v13587_v42  ;;  %v1264_v11 = vld [vmem:[%s12714_s25 + $0xa4] sm:$0x3]  ;;  %v9730_v27 = vcombine.low %v13587_v42, %v13590_v49  ;;  %v1987_v5 = vrot.slane %v1985_v22, 4 }
 0x146   : > { %v13581_v48 = vadd.f32 %v1194_v15, %v736_v53  ;;  %11024 = vmatprep.mubr.msk.bf16.mxu1 %vm12597_vm1, %v17582_v2  ;;  %v10753_v44 = vpop.f32.mrf.mxu0  ;;  %v1984_v15 = vrot.slane %v1982_v3, 3  ;;  %v1350_v3 = vsel %vm1270_vm5, %v1345_v9, %v1349_v1 }
 0x147   : > { %v10838_v25 = vpop.f32.mrf.mxu1  ;;  %v1991_v42 = vshrl.u32 %v9730_v27, 16  ;;  %v1994_v43 = vshll.u32 %v9730_v27, 16 }
 0x148   : > { %17607 = vst [vmem:[#allocation27_spill] sm:$0xff] %v13581_v48  ;;  %v744_v26 = vpop.f32.mrf.mxu0  ;;  %10939 = vmatmul.mubr.msk.bf16.gmra.mxu0 %vm538_vm3, %v1346_v46  ;;  %v9688_v48 = vcombine.low %v13175_v36, %v1264_v11  ;;  %v1988_v36 = vor.u32 %v1987_v5, %v1984_v15 }
 0x149   : > { %v1197_v59 = vpop.f32.mrf.mxu1  ;;  %10942 = vmatprep.mubr.msk.bf16.mxu0 %vm12597_vm1, %v17582_v2  ;;  %v1993_v27 = vrot.slane %v1991_v42, 3 }
 0x14a   : > { %v13597_v53 = vadd.f32 %v1197_v59, %v739_v19  ;;  %v10756_v44 = vpop.f32.mrf.mxu0  ;;  %v1351_v59 = vrot.slane %v17611_v50, 3  ;;  %v17612_v19 = vshll.u32 %v13166_v7, 16  ;;  %v1989_v9 = vsel %vm1270_vm5, %v1979_v61, %v1988_v36 }
 0x14b   : > { %v10839_v25 = vpop.f32.mrf.mxu1  ;;  %v13613_v44 = vld [vmem:[%s12714_s25 + $0xa8] sm:$0xf]  ;;  %v1359_v15 = vshll.u32 %v9688_v48, 16 }
 0x14c   : > { %17610 = vst [vmem:[#allocation30_spill] sm:$0xff] %v13597_v53  ;;  %v747_v46 = vpop.f32.mrf.mxu0  ;;  %v1352_v49 = vrot.slane %v17612_v19, 4 }
 0x14d   : > { %v1202_v37 = vpop.f32.mrf.mxu1  ;;  %11025 = vmatmul.mubr.msk.bf16.gmra.mxu1 %vm538_vm3, %v1980_v21  ;;  %v13616_v21 = vld [vmem:[%s12714_s25 + $0xac] sm:$0x3]  ;;  %v1361_v61 = vrot.slane %v1359_v15, 4 }
 0x14e   : > { %v13607_v18 = vadd.f32 %v1202_v37, %v744_v26  ;;  %11028 = vmatprep.mubr.msk.bf16.mxu1 %vm12597_vm1, %v17582_v2  ;;  %v10757_v22 = vpop.f32.mrf.mxu0  ;;  %17614 = vst [vmem:[#allocation32_spill] sm:$0xff] %v13616_v21  ;;  %v1353_v7 = vor.u32 %v1352_v49, %v1351_v59  ;;  %v1996_v37 = vrot.slane %v1994_v43, 4  ;;  %v1356_v26 = vshrl.u32 %v9688_v48, 16 }
 0x14f   : > { %v10842_v11 = vpop.f32.mrf.mxu1  ;;  %v9731_v5 = vcombine.low %v13613_v44, %v13616_v21 }
 0x150   : > { %17613 = vst [vmem:[#allocation31_spill] sm:$0xff] %v13607_v18  ;;  %v752_v25 = vpop.f32.mrf.mxu0  ;;  %10943 = vmatmul.mubr.msk.bf16.gmra.mxu0 %vm538_vm3, %v1350_v3  ;;  %v1354_v49 = vsel %vm1270_vm5, %v1349_v1, %v1353_v7  ;;  %v1997_v42 = vor.u32 %v1996_v37, %v1993_v27 }
 0x151   : > { %v1205_v50 = vpop.f32.mrf.mxu1  ;;  %10946 = vmatprep.mubr.msk.bf16.mxu0 %vm12597_vm1, %v17582_v2  ;;  %v2000_v48 = vshrl.u32 %v9731_v5, 16  ;;  %v2003_v43 = vshll.u32 %v9731_v5, 16 }
 0x152   : > { %v13619_v19 = vadd.f32 %v1205_v50, %v747_v46  ;;  %v10760_v22 = vpop.f32.mrf.mxu0  ;;  %v1358_v46 = vrot.slane %v1356_v26, 3 }
 0x153   : > { %v10843_v11 = vpop.f32.mrf.mxu1  ;;  %v2002_v1 = vrot.slane %v2000_v48, 3 }
 0x154   : > { %v755_v18 = vpop.f32.mrf.mxu0 }
 0x155   : > { %v1210_v53 = vpop.f32.mrf.mxu1  ;;  %11029 = vmatmul.mubr.msk.bf16.gmra.mxu1 %vm538_vm3, %v1989_v9  ;;  %v1998_v9 = vsel %vm1270_vm5, %v1988_v36, %v1997_v42 }
 0x156   : > { %v13628_v59 = vadd.f32 %v1210_v53, %v752_v25  ;;  %11032 = vmatprep.mubr.msk.bf16.mxu1 %vm12597_vm1, %v17582_v2  ;;  %v10761_v3 = vpop.f32.mrf.mxu0  ;;  %v1362_v53 = vor.u32 %v1361_v61, %v1358_v46  ;;  %v2005_v25 = vrot.slane %v2003_v43, 4 }
 0x157   : > { %v10846_v50 = vpop.f32.mrf.mxu1 }
 0x158   : > { %v760_v22 = vpop.f32.mrf.mxu0  ;;  %10947 = vmatmul.mubr.msk.bf16.gmra.mxu0 %vm538_vm3, %v1354_v49  ;;  %v1363_v49 = vsel %vm1270_vm5, %v1353_v7, %v1362_v53 }
 0x159   : > { %v1213_v11 = vpop.f32.mrf.mxu1  ;;  %10950 = vmatprep.mubr.msk.bf16.mxu0 %vm12597_vm1, %v17582_v2 }
 0x15a   : > { %v13634_v21 = vadd.f32 %v1213_v11, %v755_v18  ;;  %v10764_v27 = vpop.f32.mrf.mxu0  ;;  %v2006_v18 = vor.u32 %v2005_v25, %v2002_v1 }
 0x15b   : > { %v10847_v37 = vpop.f32.mrf.mxu1 }
 0x15c   : > { %v763_v26 = vpop.f32.mrf.mxu0  ;;  %v2007_v48 = vsel %vm1270_vm5, %v1997_v42, %v2006_v18 }
 0x15d   : > { %v1218_v15 = vpop.f32.mrf.mxu1  ;;  %11033 = vmatmul.mubr.msk.bf16.gmra.mxu1 %vm538_vm3, %v1998_v9 }
 0x15e   : > { %v13639_v5 = vadd.f32 %v1218_v15, %v760_v22  ;;  %11036 = vmatprep.mubr.msk.bf16.mxu1 %vm12597_vm1, %v17582_v2  ;;  %v10765_v36 = vpop.f32.mrf.mxu0 }
 0x15f   : > { %v10850_v3 = vpop.f32.mrf.mxu1 }
 0x160   : > { %v768_v50 = vpop.f32.mrf.mxu0  ;;  %10951 = vmatmul.mubr.msk.bf16.gmra.mxu0 %vm538_vm3, %v1363_v49  ;;  %v9819_v49 = vld [vmem:[%s17380_s2 + $0xc] sm:$0x3] }
 0x161   : > { %v1221_v46 = vpop.f32.mrf.mxu1  ;;  %10954 = vmatprep.mubr.msk.bf16.mxu0 %vm12597_vm1, %v17582_v2 }
 0x162   : > { %v13645_v61 = vadd.f32 %v1221_v46, %v763_v26  ;;  %v10768_v43 = vpop.f32.mrf.mxu0 }
 0x163   : > { %v10851_v22 = vpop.f32.mrf.mxu1 }
 0x164   : > { %v771_v7 = vpop.f32.mrf.mxu0 }
 0x165   : > { %v1226_v11 = vpop.f32.mrf.mxu1  ;;  %11037 = vmatmul.mubr.msk.bf16.gmra.mxu1 %vm538_vm3, %v2007_v48  ;;  %v3483_v48 = vsel %vm602_vm0, %v9819_v49, 0 }
 0x166   : > { %v13651_v9 = vadd.f32 %v1226_v11, %v768_v50  ;;  %11040 = vmatprep.mubr.msk.bf16.mxu1 %vm12597_vm1, %v17582_v2  ;;  %v10769_v1 = vpop.f32.mrf.mxu0 }
 0x167   : > { %v10854_v25 = vpop.f32.mrf.mxu1 }
 0x168   : > { %v776_v27 = vpop.f32.mrf.mxu0  ;;  %10955 = vmatmul.mubr.msk.bf16.gmra.mxu0 %vm538_vm3, %v1362_v53 }
 0x169   : > { %v1229_v37 = vpop.f32.mrf.mxu1  ;;  %11046 = vmatprep.mubr.msk.bf16.mxu0 %vm12597_vm1, %v17582_v2 }
 0x16a   : > { %v13656_v42 = vadd.f32 %v1229_v37, %v771_v7  ;;  %v10772_v26 = vpop.f32.mrf.mxu0 }
 0x16b   : > { %v10855_v15 = vpop.f32.mrf.mxu1 }
 0x16c   : > { %v779_v36 = vpop.f32.mrf.mxu0 }
 0x16d   : > { %v1234_v3 = vpop.f32.mrf.mxu1  ;;  %11041 = vmatmul.mubr.msk.bf16.gmra.mxu1 %vm538_vm3, %v2006_v18 }
 0x16e   : > { %v13664_v50 = vadd.f32 %v1234_v3, %v776_v27  ;;  %11132 = vmatprep.mubr.msk.bf16.mxu1 %vm12597_vm1, %v17582_v2  ;;  %v10773_v53 = vpop.f32.mrf.mxu0 }
 0x16f   : > { %v10858_v46 = vpop.f32.mrf.mxu1 }
 0x170   : > { %v784_v43 = vpop.f32.mrf.mxu0  ;;  %11047 = vmatmul.mubr.msk.bf16.vlgmr.msra.gmra.mxu0 %vm538_vm3, %v12874_v39 }
 0x171   : > { %v1237_v22 = vpop.f32.mrf.mxu1  ;;  %11217 = vmatpush3.bf16.msra.mxu0 %v3483_v48  ;;  %11050 = vmatprep.mubr.msk.bf16.mxu0 %vm12597_vm1, %v17582_v2 }
 0x172   : > { %v13671_v7 = vadd.f32 %v1237_v22, %v779_v36  ;;  %v10776_v18 = vpop.f32.mrf.mxu0  ;;  %11388 = vmatprep.subr.bf16.mxu0 %v17582_v2 }
 0x173   : > { %v10859_v11 = vpop.f32.mrf.mxu1 }
 0x174   : > { %v787_v1 = vpop.f32.mrf.mxu0 }
 0x175   : > { %v1242_v25 = vpop.f32.mrf.mxu1  ;;  %11133 = vmatmul.mubr.msk.bf16.vlgmr.msra.gmra.mxu1 %vm538_vm3, %v13307_v52 }
 0x176   : > { %v13678_v27 = vadd.f32 %v1242_v25, %v784_v43  ;;  %11136 = vmatprep.mubr.msk.bf16.mxu1 %vm12597_vm1, %v17582_v2  ;;  %v10777_v39 = vpop.f32.mrf.mxu0 }
 0x177   : > { %v10862_v37 = vpop.f32.mrf.mxu1 }
 0x178   : > { %v792_v26 = vpop.f32.mrf.mxu0  ;;  %11051 = vmatmul.mubr.msk.bf16.gmra.mxu0 %vm538_vm3, %v12908_v57 }
 0x179   : > { %v1245_v15 = vpop.f32.mrf.mxu1  ;;  %11054 = vmatprep.mubr.msk.bf16.mxu0 %vm12597_vm1, %v17582_v2 }
 0x17a   : > { %v13684_v49 = vadd.f32 %v1245_v15, %v787_v1  ;;  %v10780_v36 = vpop.f32.mrf.mxu0 }
 0x17b   : > { %v10863_v3 = vpop.f32.mrf.mxu1 }
 0x17c   : > { %v795_v52 = vpop.f32.mrf.mxu0 }
 0x17d   : > { %v1250_v53 = vpop.f32.mrf.mxu1  ;;  %11137 = vmatmul.mubr.msk.bf16.gmra.mxu1 %vm538_vm3, %v13333_v28 }
 0x17e   : > { %v13690_v46 = vadd.f32 %v1250_v53, %v792_v26  ;;  %11140 = vmatprep.mubr.msk.bf16.mxu1 %vm12597_vm1, %v17582_v2  ;;  %v10781_v48 = vpop.f32.mrf.mxu0 }
 0x17f   : > { %v10866_v43 = vpop.f32.mrf.mxu1 }
 0x180   : > { %v800_v57 = vpop.f32.mrf.mxu0  ;;  %11055 = vmatmul.mubr.msk.bf16.gmra.mxu0 %vm538_vm3, %v12943_v17 }
 0x181   : > { %v1253_v22 = vpop.f32.mrf.mxu1  ;;  %11058 = vmatprep.mubr.msk.bf16.mxu0 %vm12597_vm1, %v17582_v2 }
 0x182   : > { %v13696_v18 = vadd.f32 %v1253_v22, %v795_v52  ;;  %v10784_v11 = vpop.f32.mrf.mxu0 }
 0x183   : > { %v10867_v1 = vpop.f32.mrf.mxu1 }
 0x184   : > { %v803_v28 = vpop.f32.mrf.mxu0 }
 0x185   : > { %v1258_v25 = vpop.f32.mrf.mxu1  ;;  %11141 = vmatmul.mubr.msk.bf16.gmra.mxu1 %vm538_vm3, %v13359_v35 }
 0x186   : > { %v13702_v39 = vadd.f32 %v1258_v25, %v800_v57  ;;  %11144 = vmatprep.mubr.msk.bf16.mxu1 %vm12597_vm1, %v17582_v2  ;;  %v10785_v37 = vpop.f32.mrf.mxu0 }
 0x187   : > { %v10870_v26 = vpop.f32.mrf.mxu1 }
 0x188   : > { %v1464_v15 = vpop.f32.mrf.mxu0  ;;  %11059 = vmatmul.mubr.msk.bf16.gmra.mxu0 %vm538_vm3, %v12982_v55 }
 0x189   : > { %v1261_v17 = vpop.f32.mrf.mxu1  ;;  %v1630_v36 = vadd.f32 %v1464_v15, %v13266_v47  ;;  %11062 = vmatprep.mubr.msk.bf16.mxu0 %vm12597_vm1, %v17582_v2 }
 0x18a   : > { %v10876_v52 = vpop.f32.mrf.mxu0  ;;  %v9862_v17 = vld [vmem:[%s17380_s2 + $0xe] sm:$0x3] }
 0x18b   : > { %v10871_v3 = vpop.f32.mrf.mxu1  ;;  %v3838_v15 = vsel %vm602_vm0, %v9862_v17, 0 }
 0x18c   : > { %v1467_v35 = vpop.f32.mrf.mxu0  ;;  %11303 = vmatpush3.bf16.msra.mxu1 %v3838_v15 }
 0x18d   : > { %v2108_v53 = vpop.f32.mrf.mxu1  ;;  %11145 = vmatmul.mubr.msk.bf16.gmra.mxu1 %vm538_vm3, %v13388_v45  ;;  %v1631_v48 = vadd.f32 %v1467_v35, %v13274_v0  ;;  %11474 = vmatprep.subr.bf16.mxu1 %v17582_v2 }
 0x18e   : > { %v13714_v43 = vadd.f32 %v2108_v53, %v1630_v36  ;;  %11148 = vmatprep.mubr.msk.bf16.mxu1 %vm12597_vm1, %v17582_v2  ;;  %v10877_v55 = vpop.f32.mrf.mxu0 }
 0x18f   : > { %v10962_v57 = vpop.f32.mrf.mxu1 }
 0x190   : > { %v1472_v47 = vpop.f32.mrf.mxu0  ;;  %11063 = vmatmul.mubr.msk.bf16.gmra.mxu0 %vm538_vm3, %v13016_v62 }
 0x191   : > { %v2111_v22 = vpop.f32.mrf.mxu1  ;;  %v1632_v11 = vadd.f32 %v1472_v47, %v13282_v58  ;;  %11066 = vmatprep.mubr.msk.bf16.mxu0 %vm12597_vm1, %v17582_v2 }
 0x192   : > { %v13721_v1 = vadd.f32 %v2111_v22, %v1631_v48  ;;  %v10880_v0 = vpop.f32.mrf.mxu0 }
 0x193   : > { %v10963_v45 = vpop.f32.mrf.mxu1 }
 0x194   : > { %v1475_v28 = vpop.f32.mrf.mxu0 }
 0x195   : > { %v2116_v25 = vpop.f32.mrf.mxu1  ;;  %11149 = vmatmul.mubr.msk.bf16.gmra.mxu1 %vm538_vm3, %v13417_v10  ;;  %v1633_v37 = vadd.f32 %v1475_v28, %v13301_v6 }
 0x196   : > { %v13728_v26 = vadd.f32 %v2116_v25, %v1632_v11  ;;  %11152 = vmatprep.mubr.msk.bf16.mxu1 %vm12597_vm1, %v17582_v2  ;;  %v10881_v62 = vpop.f32.mrf.mxu0 }
 0x197   : > { %v10966_v58 = vpop.f32.mrf.mxu1 }
 0x198   : > { %v1480_v36 = vpop.f32.mrf.mxu0  ;;  %11067 = vmatmul.mubr.msk.bf16.gmra.mxu0 %vm538_vm3, %v13044_v24  ;;  %v12491_v58 = vld [vmem:[%s12714_s25 + $0x54] sm:$0xf] }
 0x199   : > { %v2119_v3 = vpop.f32.mrf.mxu1  ;;  %v1634_v6 = vadd.f32 %v1480_v36, %v13310_v32  ;;  %11070 = vmatprep.mubr.msk.bf16.mxu0 %vm12597_vm1, %v17582_v2  ;;  %v12490_v32 = vld [vmem:[%s12714_s25 + $0x4c] sm:$0xf] }
 0x19a   : > { %v13739_v10 = vadd.f32 %v2119_v3, %v1633_v37  ;;  %v10884_v52 = vpop.f32.mrf.mxu0  ;;  %v9762_v57 = vcombine.low %v12490_v32, %v13320_v4 }
 0x19b   : > { %v10967_v35 = vpop.f32.mrf.mxu1 }
 0x19c   : > { %v1483_v53 = vpop.f32.mrf.mxu0  ;;  %v2707_v28 = vshll.u32 %v9762_v57, 16 }
 0x19d   : > { %v2124_v48 = vpop.f32.mrf.mxu1  ;;  %11153 = vmatmul.mubr.msk.bf16.gmra.mxu1 %vm538_vm3, %v13446_v34  ;;  %v1635_v55 = vadd.f32 %v1483_v53, %v13328_v56  ;;  %v2704_v56 = vshrl.u32 %v13082_v54, 16 }
 0x19e   : > { %v13747_v24 = vadd.f32 %v2124_v48, %v1634_v6  ;;  %11156 = vmatprep.mubr.msk.bf16.mxu1 %vm12597_vm1, %v17582_v2  ;;  %v10885_v47 = vpop.f32.mrf.mxu0  ;;  %v2709_v36 = vrot.slane %v2707_v28, 1 }
 0x19f   : > { %v10970_v22 = vpop.f32.mrf.mxu1  ;;  %v2706_v15 = vor.u32 %v2704_v56, %v13474_v33 }
 0x1a0   : > { %v1488_v11 = vpop.f32.mrf.mxu0  ;;  %11071 = vmatmul.mubr.msk.bf16.gmra.mxu0 %vm538_vm3, %v13078_v23  ;;  %v9763_v23 = vcombine.low %v12491_v58, %v13346_v51 }
 0x1a1   : > { %v2127_v0 = vpop.f32.mrf.mxu1  ;;  %v1636_v34 = vadd.f32 %v1488_v11, %v13336_v14  ;;  %11074 = vmatprep.mubr.msk.bf16.mxu0 %vm12597_vm1, %v17582_v2  ;;  %v2710_v48 = vsel %vm2651_vm6, %v2706_v15, %v2709_v36 }
 0x1a2   : > { %v13756_v45 = vadd.f32 %v2127_v0, %v1635_v55  ;;  %v10888_v25 = vpop.f32.mrf.mxu0  ;;  %v2714_v51 = vshll.u32 %v9763_v23, 16 }
 0x1a3   : > { %v10971_v4 = vpop.f32.mrf.mxu1 }
 0x1a4   : > { %v1491_v37 = vpop.f32.mrf.mxu0 }
 0x1a5   : > { %v2132_v62 = vpop.f32.mrf.mxu1  ;;  %11157 = vmatmul.mubr.msk.bf16.gmra.mxu1 %vm538_vm3, %v13478_v38  ;;  %v1637_v14 = vadd.f32 %v1491_v37, %v13354_v30  ;;  %v2711_v38 = vshrl.u32 %v9762_v57, 16 }
 0x1a6   : > { %v13766_v17 = vadd.f32 %v2132_v62, %v1636_v34  ;;  %11160 = vmatprep.mubr.msk.bf16.mxu1 %vm12597_vm1, %v17582_v2  ;;  %v10889_v3 = vpop.f32.mrf.mxu0 }
 0x1a7   : > { %v10974_v6 = vpop.f32.mrf.mxu1  ;;  %v2713_v22 = vor.u32 %v2711_v38, %v2709_v36 }
 0x1a8   : > { %v1496_v52 = vpop.f32.mrf.mxu0  ;;  %11075 = vmatmul.mubr.msk.bf16.gmra.mxu0 %vm538_vm3, %v13082_v54  ;;  %v2716_v54 = vrot.slane %v2714_v51, 1  ;;  %v17615_v6 = vld [vmem:[#allocation7_spill] sm:$0xff] }
 0x1a9   : > { %v2135_v35 = vpop.f32.mrf.mxu1  ;;  %v1638_v30 = vadd.f32 %v1496_v52, %v13362_v20  ;;  %11078 = vmatprep.mubr.msk.bf16.mxu0 %vm12597_vm1, %v17582_v2  ;;  %v12492_v20 = vld [vmem:[%s12714_s25 + $0x5c] sm:$0xf] }
 0x1aa   : > { %v13774_v53 = vadd.f32 %v2135_v35, %v1637_v14  ;;  %v10892_v33 = vpop.f32.mrf.mxu0  ;;  %v9764_v34 = vcombine.low %v12492_v20, %v13372_v60  ;;  %v2717_v37 = vsel %vm2651_vm6, %v2713_v22, %v2716_v54 }
 0x1ab   : > { %v10975_v55 = vpop.f32.mrf.mxu1 }
 0x1ac   : > { %v1499_v32 = vpop.f32.mrf.mxu0  ;;  %v2721_v14 = vshll.u32 %v9764_v34, 16  ;;  %v2725_v55 = vshrl.u32 %v9764_v34, 16 }
 0x1ad   : > { %v2140_v47 = vpop.f32.mrf.mxu1  ;;  %11161 = vmatmul.mubr.msk.bf16.gmra.mxu1 %vm538_vm3, %v2710_v48  ;;  %v1639_v11 = vadd.f32 %v1499_v32, %v13383_v31  ;;  %v2718_v31 = vshrl.u32 %v9763_v23, 16 }
 0x1ae   : > { %v13781_v0 = vadd.f32 %v2140_v47, %v1638_v30  ;;  %11164 = vmatprep.mubr.msk.bf16.mxu1 %vm12597_vm1, %v17582_v2  ;;  %v10893_v56 = vpop.f32.mrf.mxu0  ;;  %v2723_v38 = vrot.slane %v2721_v14, 1  ;;  %v17616_v47 = vld [vmem:[#allocation8_spill] sm:$0xff] }
 0x1af   : > { %v10978_v28 = vpop.f32.mrf.mxu1 }
 0x1b0   : > { %v1504_v25 = vpop.f32.mrf.mxu0  ;;  %11079 = vmatmul.mubr.msk.bf16.gmra.mxu0 %vm538_vm3, %v9762_v57  ;;  %v9765_v57 = vcombine.low %v13375_v8, %v13401_v40  ;;  %v2727_v28 = vor.u32 %v2725_v55, %v2723_v38 }
 0x1b1   : > { %v2143_v4 = vpop.f32.mrf.mxu1  ;;  %v1640_v62 = vadd.f32 %v1504_v25, %v13391_v12  ;;  %11082 = vmatprep.mubr.msk.bf16.mxu0 %vm12597_vm1, %v17582_v2  ;;  %v2720_v12 = vor.u32 %v2718_v31, %v2716_v54  ;;  %v17619_v31 = vld [vmem:[#allocation6_spill] sm:$0xff] }
 0x1b2   : > { %v13790_v58 = vadd.f32 %v2143_v4, %v1639_v11  ;;  %v10896_v15 = vpop.f32.mrf.mxu0  ;;  %v2728_v32 = vshll.u32 %v9765_v57, 16 }
 0x1b3   : > { %v10979_v36 = vpop.f32.mrf.mxu1  ;;  %v2724_v40 = vsel %vm2651_vm6, %v2720_v12, %v2723_v38 }
 0x1b4   : > { %v1507_v60 = vpop.f32.mrf.mxu0  ;;  %v2730_v25 = vrot.slane %v2728_v32, 1 }
 0x1b5   : > { %v2148_v3 = vpop.f32.mrf.mxu1  ;;  %11165 = vmatmul.mubr.msk.bf16.gmra.mxu1 %vm538_vm3, %v2717_v37  ;;  %v1641_v52 = vadd.f32 %v1507_v60, %v17615_v6 }
 0x1b6   : > { %v13798_v35 = vadd.f32 %v2148_v3, %v1640_v62  ;;  %11168 = vmatprep.mubr.msk.bf16.mxu1 %vm12597_vm1, %v17582_v2  ;;  %v10897_v51 = vpop.f32.mrf.mxu0  ;;  %v17618_v62 = vld [vmem:[#allocation9_spill] sm:$0xff]  ;;  %v2731_v6 = vsel %vm2651_vm6, %v2727_v28, %v2730_v25 }
 0x1b7   : > { %v10982_v30 = vpop.f32.mrf.mxu1  ;;  %v9766_v14 = vcombine.low %v17619_v31, %v17618_v62  ;;  %v2732_v51 = vshrl.u32 %v9765_v57, 16  ;;  %v17622_v31 = vld [vmem:[#allocation14_spill] sm:$0xff] }
 0x1b8   : > { %v1512_v48 = vpop.f32.mrf.mxu0  ;;  %11083 = vmatmul.mubr.msk.bf16.gmra.mxu0 %vm538_vm3, %v9763_v23  ;;  %v17617_v23 = vld [vmem:[#allocation11_spill] sm:$0xff] }
 0x1b9   : > { %v2151_v33 = vpop.f32.mrf.mxu1  ;;  %v1642_v22 = vadd.f32 %v1512_v48, %v17616_v47  ;;  %11086 = vmatprep.mubr.msk.bf16.mxu0 %vm12597_vm1, %v17582_v2  ;;  %v2735_v30 = vshll.u32 %v9766_v14, 16  ;;  %v17621_v47 = vld [vmem:[#allocation10_spill] sm:$0xff] }
 0x1ba   : > { %v13804_v8 = vadd.f32 %v2151_v33, %v1641_v52  ;;  %v10900_v11 = vpop.f32.mrf.mxu0  ;;  %v17620_v52 = vld [vmem:[#allocation12_spill] sm:$0xff] }
 0x1bb   : > { %v10983_v54 = vpop.f32.mrf.mxu1  ;;  %v2734_v11 = vor.u32 %v2732_v51, %v2730_v25  ;;  %v17623_v51 = vld [vmem:[#allocation15_spill] sm:$0xff] }
 0x1bc   : > { %v1515_v20 = vpop.f32.mrf.mxu0  ;;  %v2737_v54 = vrot.slane %v2735_v30, 1  ;;  %v17624_v30 = vld [vmem:[#allocation13_spill] sm:$0xff] }
 0x1bd   : > { %v2156_v56 = vpop.f32.mrf.mxu1  ;;  %11169 = vmatmul.mubr.msk.bf16.gmra.mxu1 %vm538_vm3, %v2724_v40  ;;  %v1643_v4 = vadd.f32 %v1515_v20, %v17617_v23 }
 0x1be   : > { %v13811_v37 = vadd.f32 %v2156_v56, %v1642_v22  ;;  %11172 = vmatprep.mubr.msk.bf16.mxu1 %vm12597_vm1, %v17582_v2  ;;  %v10901_v15 = vpop.f32.mrf.mxu0 }
 0x1bf   : > { %v10986_v36 = vpop.f32.mrf.mxu1 }
 0x1c0   : > { %v1520_v60 = vpop.f32.mrf.mxu0  ;;  %11087 = vmatmul.mubr.msk.bf16.gmra.mxu0 %vm538_vm3, %v9764_v34  ;;  %v9767_v34 = vcombine.low %v17621_v47, %v13459_v41 }
 0x1c1   : > { %v2159_v3 = vpop.f32.mrf.mxu1  ;;  %v1644_v12 = vadd.f32 %v1520_v60, %v17620_v52  ;;  %11090 = vmatprep.mubr.msk.bf16.mxu0 %vm12597_vm1, %v17582_v2 }
 0x1c2   : > { %v13820_v38 = vadd.f32 %v2159_v3, %v1643_v4  ;;  %v10904_v48 = vpop.f32.mrf.mxu0  ;;  %v2739_v4 = vshrl.u32 %v9766_v14, 16  ;;  %v2742_v62 = vshll.u32 %v9767_v34, 16 }
 0x1c3   : > { %v10987_v33 = vpop.f32.mrf.mxu1  ;;  %v9768_v48 = vcombine.low %v17624_v30, %v17623_v51 }
 0x1c4   : > { %v1523_v55 = vpop.f32.mrf.mxu0  ;;  %v2744_v52 = vrot.slane %v2742_v62, 1 }
 0x1c5   : > { %v2164_v32 = vpop.f32.mrf.mxu1  ;;  %11173 = vmatmul.mubr.msk.bf16.gmra.mxu1 %vm538_vm3, %v2731_v6  ;;  %v1645_v22 = vadd.f32 %v1523_v55, %v13470_v63  ;;  %v2738_v63 = vsel %vm2651_vm6, %v2734_v11, %v2737_v54  ;;  %v2741_v6 = vor.u32 %v2739_v4, %v2737_v54  ;;  %v17625_v11 = vld [vmem:[#allocation17_spill] sm:$0xff] }
 0x1c6   : > { %v13828_v40 = vadd.f32 %v2164_v32, %v1644_v12  ;;  %11176 = vmatprep.mubr.msk.bf16.mxu1 %vm12597_vm1, %v17582_v2  ;;  %v10905_v20 = vpop.f32.mrf.mxu0 }
 0x1c7   : > { %v10990_v56 = vpop.f32.mrf.mxu1 }
 0x1c8   : > { %v1528_v28 = vpop.f32.mrf.mxu0  ;;  %11091 = vmatmul.mubr.msk.bf16.gmra.mxu0 %vm538_vm3, %v9765_v57  ;;  %v2749_v56 = vshll.u32 %v9768_v48, 16 }
 0x1c9   : > { %v2167_v23 = vpop.f32.mrf.mxu1  ;;  %v1646_v15 = vadd.f32 %v1528_v28, %v17622_v31  ;;  %11094 = vmatprep.mubr.msk.bf16.mxu0 %vm12597_vm1, %v17582_v2  ;;  %v17626_v31 = vld [vmem:[#allocation18_spill] sm:$0xff] }
 0x1ca   : > { %v13834_v41 = vadd.f32 %v2167_v23, %v1645_v22  ;;  %v10908_v36 = vpop.f32.mrf.mxu0  ;;  %v2745_v22 = vsel %vm2651_vm6, %v2741_v6, %v2744_v52 }
 0x1cb   : > { %v10991_v25 = vpop.f32.mrf.mxu1 }
 0x1cc   : > { %v1531_v60 = vpop.f32.mrf.mxu0 }
 0x1cd   : > { %v2172_v3 = vpop.f32.mrf.mxu1  ;;  %11177 = vmatmul.mubr.msk.bf16.gmra.mxu1 %vm538_vm3, %v2738_v63  ;;  %v1647_v57 = vadd.f32 %v1531_v60, %v13497_v13  ;;  %v2746_v13 = vshrl.u32 %v9767_v34, 16  ;;  %v17628_v63 = vld [vmem:[#allocation20_spill] sm:$0xff] }
 0x1ce   : > { %v13841_v12 = vadd.f32 %v2172_v3, %v1646_v15  ;;  %11180 = vmatprep.mubr.msk.bf16.mxu1 %vm12597_vm1, %v17582_v2  ;;  %v10909_v33 = vpop.f32.mrf.mxu0  ;;  %v17627_v15 = vld [vmem:[#allocation16_spill] sm:$0xff]  ;;  %v2751_v3 = vrot.slane %v2749_v56, 1 }
 0x1cf   : > { %v10994_v55 = vpop.f32.mrf.mxu1  ;;  %v2748_v60 = vor.u32 %v2746_v13, %v2744_v52  ;;  %v2753_v33 = vshrl.u32 %v9768_v48, 16 }
 0x1d0   : > { %v1536_v32 = vpop.f32.mrf.mxu0  ;;  %11095 = vmatmul.mubr.msk.bf16.gmra.mxu0 %vm538_vm3, %v9766_v14  ;;  %v9769_v14 = vcombine.low %v17627_v15, %v17626_v31 }
 0x1d1   : > { %v2175_v47 = vpop.f32.mrf.mxu1  ;;  %v1648_v54 = vadd.f32 %v1536_v32, %v17625_v11  ;;  %11098 = vmatprep.mubr.msk.bf16.mxu0 %vm12597_vm1, %v17582_v2  ;;  %v2755_v56 = vor.u32 %v2753_v33, %v2751_v3 }
 0x1d2   : > { %v13850_v20 = vadd.f32 %v2175_v47, %v1647_v57  ;;  %v10912_v28 = vpop.f32.mrf.mxu0  ;;  %v2756_v55 = vshll.u32 %v9769_v14, 16 }
 0x1d3   : > { %v10995_v23 = vpop.f32.mrf.mxu1 }
 0x1d4   : > { %v1539_v4 = vpop.f32.mrf.mxu0  ;;  %v2758_v28 = vrot.slane %v2756_v55, 1 }
 0x1d5   : > { %v2180_v62 = vpop.f32.mrf.mxu1  ;;  %11181 = vmatmul.mubr.msk.bf16.gmra.mxu1 %vm538_vm3, %v2745_v22  ;;  %v1649_v36 = vadd.f32 %v1539_v4, %v17628_v63  ;;  %v2752_v22 = vsel %vm2651_vm6, %v2748_v60, %v2751_v3  ;;  %v17630_v4 = vld [vmem:[#allocation19_spill] sm:$0xff] }
 0x1d6   : > { %v13858_v25 = vadd.f32 %v2180_v62, %v1648_v54  ;;  %11184 = vmatprep.mubr.msk.bf16.mxu1 %vm12597_vm1, %v17582_v2  ;;  %v10913_v6 = vpop.f32.mrf.mxu0  ;;  %v2759_v60 = vsel %vm2651_vm6, %v2755_v56, %v2758_v28  ;;  %v17631_v3 = vld [vmem:[#allocation23_spill] sm:$0xff] }
 0x1d7   : > { %v10998_v57 = vpop.f32.mrf.mxu1 }
 0x1d8   : > { %v1544_v51 = vpop.f32.mrf.mxu0  ;;  %11099 = vmatmul.mubr.msk.bf16.gmra.mxu0 %vm538_vm3, %v9767_v34 }
 0x1d9   : > { %v2183_v30 = vpop.f32.mrf.mxu1  ;;  %v1650_v32 = vadd.f32 %v1544_v51, %v13534_v16  ;;  %11102 = vmatprep.mubr.msk.bf16.mxu0 %vm12597_vm1, %v17582_v2  ;;  %v17629_v16 = vld [vmem:[#allocation21_spill] sm:$0xff] }
 0x1da   : > { %v13864_v47 = vadd.f32 %v2183_v30, %v1649_v36  ;;  %v10916_v11 = vpop.f32.mrf.mxu0  ;;  %v9770_v62 = vcombine.low %v17630_v4, %v17629_v16 }
 0x1db   : > { %v10999_v52 = vpop.f32.mrf.mxu1  ;;  %v17633_v11 = vld [vmem:[#allocation22_spill] sm:$0xff] }
 0x1dc   : > { %v1547_v54 = vpop.f32.mrf.mxu0  ;;  %v2763_v51 = vshll.u32 %v9770_v62, 16  ;;  %v17634_v52 = vld [vmem:[#allocation26_spill] sm:$0xff] }
 0x1dd   : > { %v2188_v13 = vpop.f32.mrf.mxu1  ;;  %11185 = vmatmul.mubr.msk.bf16.gmra.mxu1 %vm538_vm3, %v2752_v22  ;;  %v1651_v34 = vadd.f32 %v1547_v54, %v13547_v29  ;;  %v2760_v29 = vshrl.u32 %v9769_v14, 16  ;;  %v17632_v22 = vld [vmem:[#allocation24_spill] sm:$0xff] }
 0x1de   : > { %v13871_v23 = vadd.f32 %v2188_v13, %v1650_v32  ;;  %11188 = vmatprep.mubr.msk.bf16.mxu1 %vm12597_vm1, %v17582_v2  ;;  %v10917_v31 = vpop.f32.mrf.mxu0 }
 0x1df   : > { %v11002_v15 = vpop.f32.mrf.mxu1  ;;  %v2762_v56 = vor.u32 %v2760_v29, %v2758_v28 }
 0x1e0   : > { %v1552_v63 = vpop.f32.mrf.mxu0  ;;  %11103 = vmatmul.mubr.msk.bf16.gmra.mxu0 %vm538_vm3, %v9768_v48  ;;  %v9771_v48 = vcombine.low %v17633_v11, %v17632_v22 }
 0x1e1   : > { %v2191_v36 = vpop.f32.mrf.mxu1  ;;  %v1652_v6 = vadd.f32 %v1552_v63, %v17631_v3  ;;  %11106 = vmatprep.mubr.msk.bf16.mxu0 %vm12597_vm1, %v17582_v2  ;;  %v2767_v63 = vshrl.u32 %v9770_v62, 16 }
 0x1e2   : > { %v13880_v57 = vadd.f32 %v2191_v36, %v1651_v34  ;;  %v10920_v30 = vpop.f32.mrf.mxu0  ;;  %v2765_v34 = vrot.slane %v2763_v51, 1  ;;  %v2770_v36 = vshll.u32 %v9771_v48, 16 }
 0x1e3   : > { %v11003_v33 = vpop.f32.mrf.mxu1 }
 0x1e4   : > { %v1555_v55 = vpop.f32.mrf.mxu0 }
 0x1e5   : > { %v2196_v32 = vpop.f32.mrf.mxu1  ;;  %11189 = vmatmul.mubr.msk.bf16.gmra.mxu1 %vm538_vm3, %v2759_v60  ;;  %v1653_v54 = vadd.f32 %v1555_v55, %v17634_v52  ;;  %v17635_v60 = vld [vmem:[#allocation27_spill] sm:$0xff]  ;;  %v2769_v55 = vor.u32 %v2767_v63, %v2765_v34  ;;  %v17637_v52 = vld [vmem:[#allocation28_spill] sm:$0xff] }
 0x1e6   : > { %v13888_v13 = vadd.f32 %v2196_v32, %v1652_v6  ;;  %11192 = vmatprep.mubr.msk.bf16.mxu1 %vm12597_vm1, %v17582_v2  ;;  %v10921_v16 = vpop.f32.mrf.mxu0  ;;  %v2766_v6 = vsel %vm2651_vm6, %v2762_v56, %v2765_v34  ;;  %v2772_v32 = vrot.slane %v2770_v36, 1  ;;  %v17639_v34 = vld [vmem:[#allocation31_spill] sm:$0xff] }
 0x1e7   : > { %v11006_v4 = vpop.f32.mrf.mxu1 }
 0x1e8   : > { %v1560_v31 = vpop.f32.mrf.mxu0  ;;  %11107 = vmatmul.mubr.msk.bf16.gmra.mxu0 %vm538_vm3, %v9769_v14  ;;  %v17636_v14 = vld [vmem:[#allocation30_spill] sm:$0xff] }
 0x1e9   : > { %v2199_v15 = vpop.f32.mrf.mxu1  ;;  %v1654_v3 = vadd.f32 %v1560_v31, %v17635_v60  ;;  %11110 = vmatprep.mubr.msk.bf16.mxu0 %vm12597_vm1, %v17582_v2  ;;  %v2773_v60 = vsel %vm2651_vm6, %v2769_v55, %v2772_v32 }
 0x1ea   : > { %v13894_v30 = vadd.f32 %v2199_v15, %v1653_v54  ;;  %v10924_v33 = vpop.f32.mrf.mxu0  ;;  %v17638_v54 = vld [vmem:[#allocation25_spill] sm:$0xff] }
 0x1eb   : > { %v11007_v28 = vpop.f32.mrf.mxu1  ;;  %v9772_v56 = vcombine.low %v17638_v54, %v17637_v52 }
 0x1ec   : > { %v1563_v29 = vpop.f32.mrf.mxu0 }
 0x1ed   : > { %v2204_v51 = vpop.f32.mrf.mxu1  ;;  %11193 = vmatmul.mubr.msk.bf16.gmra.mxu1 %vm538_vm3, %v2766_v6  ;;  %v1655_v22 = vadd.f32 %v1563_v29, %v17636_v14  ;;  %v2777_v6 = vshll.u32 %v9772_v56, 16  ;;  %v17640_v14 = vld [vmem:[#allocation29_spill] sm:$0xff] }
 0x1ee   : > { %v13901_v11 = vadd.f32 %v2204_v51, %v1654_v3  ;;  %11196 = vmatprep.mubr.msk.bf16.mxu1 %vm12597_vm1, %v17582_v2  ;;  %v10925_v16 = vpop.f32.mrf.mxu0  ;;  %v2774_v3 = vshrl.u32 %v9771_v48, 16 }
 0x1ef   : > { %v11010_v4 = vpop.f32.mrf.mxu1  ;;  %v2779_v54 = vrot.slane %v2777_v6, 1 }
 0x1f0   : > { %v1568_v31 = vpop.f32.mrf.mxu0  ;;  %11111 = vmatmul.mubr.msk.bf16.gmra.mxu0 %vm538_vm3, %v9770_v62  ;;  %v9773_v62 = vcombine.low %v17640_v14, %v13613_v44 }
 0x1f1   : > { %v2207_v15 = vpop.f32.mrf.mxu1  ;;  %v1656_v63 = vadd.f32 %v1568_v31, %v17639_v34  ;;  %11114 = vmatprep.mubr.msk.bf16.mxu0 %vm12597_vm1, %v17582_v2  ;;  %v2781_v34 = vshrl.u32 %v9772_v56, 16 }
 0x1f2   : > { %v13910_v36 = vadd.f32 %v2207_v15, %v1655_v22  ;;  %v10928_v33 = vpop.f32.mrf.mxu0  ;;  %v2776_v22 = vor.u32 %v2774_v3, %v2772_v32 }
 0x1f3   : > { %v11011_v28 = vpop.f32.mrf.mxu1 }
 0x1f4   : > { %v1571_v29 = vpop.f32.mrf.mxu0  ;;  %v2783_v28 = vor.u32 %v2781_v34, %v2779_v54  ;;  %v3106_v34 = vld [vmem:[%s12714_s25 + $0x14] sm:$0xf] }
 0x1f5   : > { %v2212_v51 = vpop.f32.mrf.mxu1  ;;  %11197 = vmatmul.mubr.msk.bf16.gmra.mxu1 %vm538_vm3, %v2773_v60  ;;  %v1657_v55 = vadd.f32 %v1571_v29, %v13619_v19  ;;  %v2784_v60 = vshll.u32 %v9773_v62, 16  ;;  %v2780_v19 = vsel %vm2651_vm6, %v2776_v22, %v2779_v54 }
 0x1f6   : > { %v13918_v52 = vadd.f32 %v2212_v51, %v1656_v63  ;;  %11200 = vmatprep.mubr.msk.bf16.mxu1 %vm12597_vm1, %v17582_v2  ;;  %v10929_v16 = vpop.f32.mrf.mxu0  ;;  %v12368_v51 = vld [vmem:[%s12714_s25 + $0xac] ss:$0 sps:$4 sm:$0x77]  }
 0x1f7   : > { %v11014_v4 = vpop.f32.mrf.mxu1 }
 0x1f8   : > { %v1576_v31 = vpop.f32.mrf.mxu0  ;;  %11115 = vmatmul.mubr.msk.bf16.gmra.mxu0 %vm538_vm3, %v9771_v48  ;;  %v2786_v48 = vrot.slane %v2784_v60, 1  ;;  %v3107_v60 = vld [vmem:[%s12714_s25 + $0x18] sm:$0xf] }
 0x1f9   : > { %v2215_v15 = vpop.f32.mrf.mxu1  ;;  %v1658_v44 = vadd.f32 %v1576_v31, %v13628_v59  ;;  %11118 = vmatprep.mubr.msk.bf16.mxu0 %vm12597_vm1, %v17582_v2 }
 0x1fa   : > { %v13924_v33 = vadd.f32 %v2215_v15, %v1657_v55  ;;  %v10932_v32 = vpop.f32.mrf.mxu0  ;;  %v2787_v4 = vsel %vm2651_vm6, %v2783_v28, %v2786_v48  ;;  %v2792_v15 = vshll.u32 %v12368_v51, 16 }
 0x1fb   : > { %v11015_v63 = vpop.f32.mrf.mxu1 }
 0x1fc   : > { %v1579_v3 = vpop.f32.mrf.mxu0  ;;  %v2794_v28 = vrot.slane %v2792_v15, 1 }
 0x1fd   : > { %v2220_v6 = vpop.f32.mrf.mxu1  ;;  %11201 = vmatmul.mubr.msk.bf16.gmra.mxu1 %vm538_vm3, %v2780_v19  ;;  %v1659_v29 = vadd.f32 %v1579_v3, %v13634_v21  ;;  %v2788_v21 = vshrl.u32 %v9773_v62, 16 }
 0x1fe   : > { %v13931_v59 = vadd.f32 %v2220_v6, %v1658_v44  ;;  %11204 = vmatprep.mubr.msk.bf16.mxu1 %vm12597_vm1, %v17582_v2  ;;  %v10933_v14 = vpop.f32.mrf.mxu0 }
 0x1ff   : > { %v11018_v55 = vpop.f32.mrf.mxu1  ;;  %v2790_v6 = vor.u32 %v2788_v21, %v2786_v48  ;;  %v17641_v21 = vld [vmem:[#allocation32_spill] sm:$0xff] }
 0x200   : > { %v1584_v22 = vpop.f32.mrf.mxu0  ;;  %11119 = vmatmul.mubr.msk.bf16.gmra.mxu0 %vm538_vm3, %v9772_v56  ;;  %v9820_v56 = vcombine.low %v3106_v34, %v3107_v60  ;;  %v9774_v15 = vcombine.low %v17641_v21, %v17641_v21 }
 0x201   : > { %v2223_v16 = vpop.f32.mrf.mxu1  ;;  %v1660_v54 = vadd.f32 %v1584_v22, %v13639_v5  ;;  %11122 = vmatprep.mubr.msk.bf16.mxu0 %vm12597_vm1, %v17582_v2 }
 0x202   : > { %v13939_v31 = vadd.f32 %v2223_v16, %v1659_v29  ;;  %v10936_v44 = vpop.f32.mrf.mxu0  ;;  %v13953_v16 = vld [vmem:[%s12714_s25 + $0x1c] sm:$0xff]  }
 0x203   : > { %v11019_v19 = vpop.f32.mrf.mxu1  ;;  %v3255_v44 = vshll.u32 %v9820_v56, 16 }
 0x204   : > { %v1587_v32 = vpop.f32.mrf.mxu0 }
 0x205   : > { %v2228_v63 = vpop.f32.mrf.mxu1  ;;  %11205 = vmatmul.mubr.msk.bf16.gmra.mxu1 %vm538_vm3, %v2787_v4  ;;  %v1661_v3 = vadd.f32 %v1587_v32, %v13645_v61  ;;  %v2795_v61 = vsel %vm2651_vm6, %v2790_v6, %v2794_v28  ;;  %v2796_v32 = vshrl.u32 %v12368_v51, 16 }
 0x206   : > { %v13947_v5 = vadd.f32 %v2228_v63, %v1660_v54  ;;  %11208 = vmatprep.mubr.msk.bf16.mxu1 %vm12597_vm1, %v17582_v2  ;;  %v10937_v29 = vpop.f32.mrf.mxu0  ;;  %v3257_v63 = vrot.slane %v3255_v44, 1  ;;  %v13975_v44 = vld [vmem:[%s12714_s25 + $0x24] sm:$0xff]  }
 0x207   : > { %v11022_v14 = vpop.f32.mrf.mxu1  ;;  %v2798_v51 = vor.u32 %v2796_v32, %v2794_v28  ;;  %v9885_v28 = vld [vmem:[%s17380_s2 + $0x10] sm:$0x3] }
 0x208   : > { %v1592_v55 = vpop.f32.mrf.mxu0  ;;  %11123 = vmatmul.mubr.msk.bf16.gmra.mxu0 %vm538_vm3, %v9773_v62 }
 0x209   : > { %v2231_v22 = vpop.f32.mrf.mxu1  ;;  %v1662_v4 = vadd.f32 %v1592_v55, %v13651_v9  ;;  %11126 = vmatprep.mubr.msk.bf16.mxu0 %vm12597_vm1, %v17582_v2  ;;  %v3253_v9 = vshrl.u32 %v9820_v56, 16 }
 0x20a   : > { %v13956_v34 = vadd.f32 %v2231_v22, %v1661_v3  ;;  %v10940_v48 = vpop.f32.mrf.mxu0  ;;  %v17430_v3 = vshll.u32 %v13953_v16, 16  ;;  %v3726_v22 = vld [vmem:[%s12714_s25 + $0x14] sm:$0xe] }
 0x20b   : > { %v11023_v54 = vpop.f32.mrf.mxu1  ;;  %v13982_v21 = vcombine.low %v3726_v22, %v3107_v60 }
 0x20c   : > { %v1595_v19 = vpop.f32.mrf.mxu0  ;;  %v3262_v56 = vrot.slane %v17430_v3, 1 }
 0x20d   : > { %v2236_v62 = vpop.f32.mrf.mxu1  ;;  %11209 = vmatmul.mubr.msk.bf16.gmra.mxu1 %vm538_vm3, %v2795_v61  ;;  %v1663_v6 = vadd.f32 %v1595_v19, %v13656_v42  ;;  %v3258_v61 = vor.u32 %v3257_v63, %v3253_v9  ;;  %v17429_v63 = vshll.u32 %v13975_v44, 16 }
 0x20e   : > { %v13966_v29 = vadd.f32 %v2236_v62, %v1662_v4  ;;  %11212 = vmatprep.mubr.msk.bf16.mxu1 %vm12597_vm1, %v17582_v2  ;;  %v10941_v14 = vpop.f32.mrf.mxu0 }
 0x20f   : > { %v11026_v55 = vpop.f32.mrf.mxu1  ;;  %v3263_v9 = vsel %vm2651_vm6, %v3258_v61, %v3262_v56  ;;  %v3733_v14 = vrot.slane %v13982_v21, 1 }
 0x210   : > { %v1600_v48 = vpop.f32.mrf.mxu0  ;;  %11127 = vmatmul.mubr.msk.bf16.gmra.mxu0 %vm538_vm3, %v9774_v15  ;;  %v3734_v55 = vrot.slane %v13953_v16, 1 }
 0x211   : > { %v2239_v54 = vpop.f32.mrf.mxu1  ;;  %v1664_v42 = vadd.f32 %v1600_v48, %v13664_v50  ;;  %11218 = vmatprep.mubr.msk.bf16.mxu0 %vm12597_vm1, %v17582_v2  ;;  %v17433_v50 = vshrl.u32 %v13953_v16, 16 }
 0x212   : > { %v13978_v4 = vadd.f32 %v2239_v54, %v1663_v6  ;;  %v10944_v19 = vpop.f32.mrf.mxu0  ;;  %v4245_v54 = vsel %vm602_vm0, %v9885_v28, 0  ;;  %v14011_v28 = vld [vmem:[%s12714_s25 + $0x2c] sm:$0xff]  }
 0x213   : > { %v11027_v62 = vpop.f32.mrf.mxu1 }
 0x214   : > { %v1603_v15 = vpop.f32.mrf.mxu0 }
 0x215   : > { %v2244_v32 = vpop.f32.mrf.mxu1  ;;  %11213 = vmatmul.mubr.msk.bf16.gmra.mxu1 %vm538_vm3, %v2798_v51  ;;  %v1665_v6 = vadd.f32 %v1603_v15, %v13671_v7  ;;  %v3266_v7 = vor.u32 %v17433_v50, %v3262_v56  ;;  %v3735_v15 = vsel %vm3732_vm7, %v3733_v14, %v3734_v55 }
 0x216   : > { %v13992_v60 = vadd.f32 %v2244_v32, %v1664_v42  ;;  %11304 = vmatprep.mubr.msk.bf16.mxu1 %vm12597_vm1, %v17582_v2  ;;  %v10945_v22 = vpop.f32.mrf.mxu0  ;;  %v3270_v42 = vrot.slane %v17429_v63, 1 }
 0x217   : > { %v11030_v48 = vpop.f32.mrf.mxu1 }
 0x218   : > { %v1608_v51 = vpop.f32.mrf.mxu0  ;;  %11219 = vmatmul.mubr.msk.bf16.vlgmr.msra.gmra.mxu0 %vm538_vm3, %v3263_v9 }
 0x219   : > { %v2247_v61 = vpop.f32.mrf.mxu1  ;;  %v1666_v19 = vadd.f32 %v1608_v51, %v13678_v27  ;;  %11389 = vmatpush3.bf16.msra.mxu0 %v4245_v54  ;;  %11222 = vmatprep.mubr.msk.bf16.mxu0 %vm12597_vm1, %v17582_v2  ;;  %v3271_v27 = vsel %vm2651_vm6, %v3266_v7, %v3270_v42  ;;  %v17432_v54 = vshrl.u32 %v13975_v44, 16  ;;  %v17431_v51 = vshll.u32 %v14011_v28, 16 }
 0x21a   : > { %v14005_v62 = vadd.f32 %v2247_v61, %v1665_v6  ;;  %v10948_v32 = vpop.f32.mrf.mxu0  ;;  %11560 = vmatprep.subr.bf16.mxu0 %v17582_v2  ;;  %v3736_v6 = vrot.slane %v13975_v44, 1 }
 0x21b   : > { %v11031_v9 = vpop.f32.mrf.mxu1 }
 0x21c   : > { %v1611_v56 = vpop.f32.mrf.mxu0  ;;  %v3737_v7 = vsel %vm3732_vm7, %v3734_v55, %v3736_v6  ;;  %v17435_v55 = vshrl.u32 %v14011_v28, 16 }
 0x21d   : > { %v2252_v22 = vpop.f32.mrf.mxu1  ;;  %11305 = vmatmul.mubr.msk.bf16.vlgmr.msra.gmra.mxu1 %vm538_vm3, %v3735_v15  ;;  %v1667_v14 = vadd.f32 %v1611_v56, %v13684_v49  ;;  %v14027_v15 = vld [vmem:[%s12714_s25 + $0x34] sm:$0xff]   ;;  %v3274_v56 = vor.u32 %v17432_v54, %v3270_v42 }
 0x21e   : > { %v14018_v48 = vadd.f32 %v2252_v22, %v1666_v19  ;;  %11308 = vmatprep.mubr.msk.bf16.mxu1 %vm12597_vm1, %v17582_v2  ;;  %v10949_v61 = vpop.f32.mrf.mxu0  ;;  %v3278_v22 = vrot.slane %v17431_v51, 1 }
 0x21f   : > { %v11034_v32 = vpop.f32.mrf.mxu1 }
 0x220   : > { %v1616_v9 = vpop.f32.mrf.mxu0  ;;  %11223 = vmatmul.mubr.msk.bf16.gmra.mxu0 %vm538_vm3, %v3271_v27  ;;  %v3279_v42 = vsel %vm2651_vm6, %v3274_v56, %v3278_v22  ;;  %v3282_v54 = vor.u32 %v17435_v55, %v3278_v22 }
 0x221   : > { %v2255_v63 = vpop.f32.mrf.mxu1  ;;  %v1668_v49 = vadd.f32 %v1616_v9, %v13690_v46  ;;  %11226 = vmatprep.mubr.msk.bf16.mxu0 %vm12597_vm1, %v17582_v2  ;;  %v17434_v46 = vshll.u32 %v14027_v15, 16  ;;  %v3738_v9 = vrot.slane %v14011_v28, 1 }
 0x222   : > { %v14030_v19 = vadd.f32 %v2255_v63, %v1667_v14  ;;  %v10952_v61 = vpop.f32.mrf.mxu0 }
 0x223   : > { %v11035_v32 = vpop.f32.mrf.mxu1  ;;  %v3739_v56 = vsel %vm3732_vm7, %v3736_v6, %v3738_v9  ;;  %v17437_v6 = vshrl.u32 %v14027_v15, 16 }
 0x224   : > { %v1619_v27 = vpop.f32.mrf.mxu0 }
 0x225   : > { %v2260_v3 = vpop.f32.mrf.mxu1  ;;  %11309 = vmatmul.mubr.msk.bf16.gmra.mxu1 %vm538_vm3, %v3737_v7  ;;  %v1669_v63 = vadd.f32 %v1619_v27, %v13696_v18  ;;  %v3286_v18 = vrot.slane %v17434_v46, 1  ;;  %v14060_v27 = vld [vmem:[%s12714_s25 + $0x3c] sm:$0xff]  }
 0x226   : > { %v14042_v14 = vadd.f32 %v2260_v3, %v1668_v49  ;;  %11312 = vmatprep.mubr.msk.bf16.mxu1 %vm12597_vm1, %v17582_v2  ;;  %v10953_v61 = vpop.f32.mrf.mxu0 }
 0x227   : > { %v11038_v32 = vpop.f32.mrf.mxu1  ;;  %v3287_v22 = vsel %vm2651_vm6, %v3282_v54, %v3286_v18 }
 0x228   : > { %v1624_v51 = vpop.f32.mrf.mxu0  ;;  %11227 = vmatmul.mubr.msk.bf16.gmra.mxu0 %vm538_vm3, %v3279_v42 }
 0x229   : > { %v2263_v7 = vpop.f32.mrf.mxu1  ;;  %v1670_v3 = vadd.f32 %v1624_v51, %v13702_v39  ;;  %11230 = vmatprep.mubr.msk.bf16.mxu0 %vm12597_vm1, %v17582_v2  ;;  %v3740_v39 = vrot.slane %v14027_v15, 1  ;;  %v17436_v51 = vshll.u32 %v14060_v27, 16 }
 0x22a   : > { %v14054_v49 = vadd.f32 %v2263_v7, %v1669_v63  ;;  %v10956_v61 = vpop.f32.mrf.mxu0 }
 0x22b   : > { %v11039_v32 = vpop.f32.mrf.mxu1 }
 0x22c   : > { %v1627_v42 = vpop.f32.mrf.mxu0 }
 0x22d   : > { %v2268_v50 = vpop.f32.mrf.mxu1  ;;  %11313 = vmatmul.mubr.msk.bf16.gmra.mxu1 %vm538_vm3, %v3739_v56  ;;  %v3294_v56 = vrot.slane %v17436_v51, 1  ;;  %v14081_v42 = vld [vmem:[%s12714_s25 + $0x44] sm:$0xff]  }
 0x22e   : > { %v14064_v46 = vadd.f32 %v2268_v50, %v1670_v3  ;;  %11316 = vmatprep.mubr.msk.bf16.mxu1 %vm12597_vm1, %v17582_v2  ;;  %v10957_v63 = vpop.f32.mrf.mxu0  ;;  %v3741_v50 = vsel %vm3732_vm7, %v3738_v9, %v3740_v39  ;;  %v3290_v3 = vor.u32 %v17437_v6, %v3286_v18  ;;  %v17441_v9 = vshrl.u32 %v14060_v27, 16 }
 0x22f   : > { %v11042_v7 = vpop.f32.mrf.mxu1 }
 0x230   : > { %17642 = vst [vmem:[#allocation7_spill] sm:$0xff] %v14064_v46  ;;  %v2438_v32 = vpop.f32.mrf.mxu0  ;;  %11231 = vmatmul.mubr.msk.bf16.gmra.mxu0 %vm538_vm3, %v3287_v22  ;;  %v3295_v18 = vsel %vm2651_vm6, %v3290_v3, %v3294_v56 }
 0x231   : > { %v2271_v61 = vpop.f32.mrf.mxu1  ;;  %v2604_v54 = vadd.f32 %v2438_v32, %v13714_v43  ;;  %11234 = vmatprep.mubr.msk.bf16.mxu0 %vm12597_vm1, %v17582_v2  ;;  %v3742_v43 = vrot.slane %v14060_v27, 1 }
 0x232   : > { %v11048_v7 = vpop.f32.mrf.mxu0 }
 0x233   : > { %v11043_v63 = vpop.f32.mrf.mxu1 }
 0x234   : > { %v2441_v61 = vpop.f32.mrf.mxu0  ;;  %v17440_v63 = vshll.u32 %v14081_v42, 16 }
 0x235   : > { %v2899_v55 = vpop.f32.mrf.mxu1  ;;  %11317 = vmatmul.mubr.msk.bf16.gmra.mxu1 %vm538_vm3, %v3741_v50  ;;  %v2605_v22 = vadd.f32 %v2441_v61, %v13721_v1  ;;  %v3743_v50 = vsel %vm3732_vm7, %v3740_v39, %v3742_v43  ;;  %v3298_v1 = vor.u32 %v17441_v9, %v3294_v56  ;;  %v304_v39 = vld [vmem:[%s17379_s1] sm:$0xff] }
 0x236   : > { %v14087_v32 = vadd.f32 %v2899_v55, %v2604_v54  ;;  %11320 = vmatprep.mubr.msk.bf16.mxu1 %vm12597_vm1, %v17582_v2  ;;  %v11049_v7 = vpop.f32.mrf.mxu0  ;;  %v14098_v55 = vld [vmem:[%s12714_s25 + $0x4c] sm:$0xff]  }
 0x237   : > { %v11134_v51 = vpop.f32.mrf.mxu1 }
 0x238   : > { %v2446_v6 = vpop.f32.mrf.mxu0  ;;  %11235 = vmatmul.mubr.msk.bf16.gmra.mxu0 %vm538_vm3, %v3295_v18  ;;  %v3302_v51 = vrot.slane %v17440_v63, 1  ;;  %v17438_v18 = vmov 0  }
 0x239   : > { %v2902_v46 = vpop.f32.mrf.mxu1  ;;  %v2606_v54 = vadd.f32 %v2446_v6, %v13728_v26  ;;  %11238 = vmatprep.mubr.msk.bf16.mxu0 %vm12597_vm1, %v17582_v2  ;;  %12302 = vset.pattern.permute.xlu0 %v17438_v18  ;;  %v17442_v6 = vshrl.u32 %v14081_v42, 16 }
 0x23a   : > { %v14101_v3 = vadd.f32 %v2902_v46, %v2605_v22  ;;  %v11052_v61 = vpop.f32.mrf.mxu0  ;;  %12303 = vset.pattern.permute.xlu1 %v17438_v18  ;;  %4579 = vperm.xlu0 %12302, %v304_v39   ;;  %v3744_v39 = vrot.slane %v14081_v42, 1 }
 0x23b   : > { %v11135_v7 = vpop.f32.mrf.mxu1 }
 0x23c   : > { %v2449_v26 = vpop.f32.mrf.mxu0  ;;  %v3303_v7 = vsel %vm2651_vm6, %v3298_v1, %v3302_v51  ;;  %v17644_v1 = vshll.u32 %v14098_v55, 16 }
 0x23d   : > { %v2907_v46 = vpop.f32.mrf.mxu1  ;;  %11321 = vmatmul.mubr.msk.bf16.gmra.mxu1 %vm538_vm3, %v3743_v50  ;;  %v2607_v22 = vadd.f32 %v2449_v26, %v13739_v10  ;;  %v305_v50 = vld [vmem:[%s17379_s1 + $0x8] sm:$0xff]  ;;  %v3306_v10 = vor.u32 %v17442_v6, %v3302_v51  ;;  %v308_v51 = vld [vmem:[%s17379_s1 + $0x20] sm:$0xff] }
 0x23e   : > { %v14116_v61 = vadd.f32 %v2907_v46, %v2606_v54  ;;  %11324 = vmatprep.mubr.msk.bf16.mxu1 %vm12597_vm1, %v17582_v2  ;;  %v11053_v18 = vpop.f32.mrf.mxu0  ;;  %4584 = vperm.xlu0 %12302, %v305_v50   ;;  %v3310_v54 = vrot.slane %v17644_v1, 1 }
 0x23f   : > { %v11138_v63 = vpop.f32.mrf.mxu1  ;;  %v14137_v18 = vld [vmem:[%s12714_s25 + $0x54] sm:$0xff]  }
 0x240   : > { %17643 = vst [vmem:[#allocation8_spill] sm:$0xff] %v14116_v61  ;;  %v2454_v9 = vpop.f32.mrf.mxu0  ;;  %11239 = vmatmul.mubr.msk.bf16.gmra.mxu0 %vm538_vm3, %v3303_v7  ;;  %v3745_v63 = vsel %vm3732_vm7, %v3742_v43, %v3744_v39  ;;  %v3746_v43 = vrot.slane %v14098_v55, 1 }
 0x241   : > { %v2910_v56 = vpop.f32.mrf.mxu1  ;;  %v2608_v26 = vadd.f32 %v2454_v9, %v13747_v24  ;;  %11242 = vmatprep.mubr.msk.bf16.mxu0 %vm12597_vm1, %v17582_v2  ;;  %v3311_v24 = vsel %vm2651_vm6, %v3306_v10, %v3310_v54  ;;  %v306_v10 = vld [vmem:[%s17379_s1 + $0x10] sm:$0xff] }
 0x242   : > { %v14131_v46 = vadd.f32 %v2910_v56, %v2607_v22  ;;  %v11056_v50 = vpop.f32.mrf.mxu0  ;;  %4599 = vperm.xlu0 %12302, %v308_v51   ;;  %v17444_v22 = vshrl.u32 %v14098_v55, 16  ;;  %4589 = vperm.xlu1 %12303, %v306_v10  }
 0x243   : > { %v11139_v61 = vpop.f32.mrf.mxu1 }
 0x244   : > { %v2457_v7 = vpop.f32.mrf.mxu0  ;;  %v17443_v61 = vshll.u32 %v14137_v18, 16  ;;  %v3314_v6 = vor.u32 %v17444_v22, %v3310_v54  ;;  %v17446_v54 = vshrl.u32 %v14137_v18, 16 }
 0x245   : > { %v2915_v1 = vpop.f32.mrf.mxu1  ;;  %11325 = vmatmul.mubr.msk.bf16.gmra.mxu1 %vm538_vm3, %v3745_v63  ;;  %v2609_v9 = vadd.f32 %v2457_v7, %v13756_v45  ;;  %v310_v63 = vld [vmem:[%s17379_s1 + $0x30] sm:$0xff]  ;;  %v3747_v7 = vsel %vm3732_vm7, %v3744_v39, %v3746_v43  ;;  %v307_v39 = vld [vmem:[%s17379_s1 + $0x18] sm:$0xff] }
 0x246   : > { %v14146_v56 = vadd.f32 %v2915_v1, %v2608_v26  ;;  %11328 = vmatprep.mubr.msk.bf16.mxu1 %vm12597_vm1, %v17582_v2  ;;  %v11057_v50 = vpop.f32.mrf.mxu0  ;;  %4609 = vperm.xlu0 %12302, %v310_v63   ;;  %v14161_v1 = vld [vmem:[%s12714_s25 + $0x5c] sm:$0xff]   ;;  %v3318_v10 = vrot.slane %v17443_v61, 1 }
 0x247   : > { %v11142_v51 = vpop.f32.mrf.mxu1  ;;  %4594 = vperm.xlu1 %12303, %v307_v39   ;;  %v3748_v39 = vrot.slane %v14137_v18, 1 }
 0x248   : > { %17645 = vst [vmem:[#allocation11_spill] sm:$0xff] %v14146_v56  ;;  %v2462_v45 = vpop.f32.mrf.mxu0  ;;  %11243 = vmatmul.mubr.msk.bf16.gmra.mxu0 %vm538_vm3, %v3311_v24 }
 0x249   : > { %v2918_v26 = vpop.f32.mrf.mxu1  ;;  %v2610_v50 = vadd.f32 %v2462_v45, %v13766_v17  ;;  %11246 = vmatprep.mubr.msk.bf16.mxu0 %vm12597_vm1, %v17582_v2  ;;  %v312_v17 = vld [vmem:[%s17379_s1 + $0x40] sm:$0xff]  ;;  %v17445_v45 = vshll.u32 %v14161_v1, 16  ;;  %v3749_v22 = vsel %vm3732_vm7, %v3746_v43, %v3748_v39 }
 0x24a   : > { %v14164_v51 = vadd.f32 %v2918_v26, %v2609_v9  ;;  %v11060_v63 = vpop.f32.mrf.mxu0  ;;  %4619 = vperm.xlu0 %12302, %v312_v17  }
 0x24b   : > { %v11143_v56 = vpop.f32.mrf.mxu1  ;;  %v3319_v63 = vsel %vm2651_vm6, %v3314_v6, %v3318_v10 }
 0x24c   : > { %v2465_v24 = vpop.f32.mrf.mxu0 }
 0x24d   : > { %v2923_v9 = vpop.f32.mrf.mxu1  ;;  %11329 = vmatmul.mubr.msk.bf16.gmra.mxu1 %vm538_vm3, %v3747_v7  ;;  %v2611_v56 = vadd.f32 %v2465_v24, %v13774_v53  ;;  %v309_v7 = vld [vmem:[%s17379_s1 + $0x28] sm:$0xff]  ;;  %v314_v53 = vld [vmem:[%s17379_s1 + $0x50] sm:$0xff]  ;;  %v3322_v24 = vor.u32 %v17446_v54, %v3318_v10  ;;  %v311_v10 = vld [vmem:[%s17379_s1 + $0x38] sm:$0xff] }
 0x24e   : > { %v14182_v26 = vadd.f32 %v2923_v9, %v2610_v50  ;;  %11332 = vmatprep.mubr.msk.bf16.mxu1 %vm12597_vm1, %v17582_v2  ;;  %v11061_v17 = vpop.f32.mrf.mxu0  ;;  %4604 = vperm.xlu1 %12303, %v309_v7   ;;  %v14206_v7 = vld [vmem:[%s12714_s25 + $0x64] sm:$0xff]  }
 0x24f   : > { %v11146_v61 = vpop.f32.mrf.mxu1  ;;  %4629 = vperm.xlu0 %12302, %v314_v53  }
 0x250   : > { %17646 = vst [vmem:[#allocation9_spill] sm:$0xff] %v14182_v26  ;;  %v2470_v50 = vpop.f32.mrf.mxu0  ;;  %11247 = vmatmul.mubr.msk.bf16.gmra.mxu0 %vm538_vm3, %v3319_v63  ;;  %v3326_v61 = vrot.slane %v17445_v45, 1  ;;  %v316_v63 = vld [vmem:[%s17379_s1 + $0x60] sm:$0xff] }
 0x251   : > { %v2926_v6 = vpop.f32.mrf.mxu1  ;;  %v2612_v9 = vadd.f32 %v2470_v50, %v13781_v0  ;;  %11250 = vmatprep.mubr.msk.bf16.mxu0 %vm12597_vm1, %v17582_v2  ;;  %v3750_v50 = vrot.slane %v14161_v1, 1 }
 0x252   : > { %v14200_v17 = vadd.f32 %v2926_v6, %v2611_v56  ;;  %v11064_v53 = vpop.f32.mrf.mxu0  ;;  %4614 = vperm.xlu1 %12303, %v311_v10   ;;  %v3327_v43 = vsel %vm2651_vm6, %v3322_v24, %v3326_v61  ;;  %v17447_v10 = vshll.u32 %v14206_v7, 16  ;;  %v318_v24 = vld [vmem:[%s17379_s1 + $0x70] sm:$0xff] }
 0x253   : > { %v11147_v26 = vpop.f32.mrf.mxu1  ;;  %4639 = vperm.xlu0 %12302, %v316_v63   ;;  %v17448_v53 = vshrl.u32 %v14161_v1, 16 }
 0x254   : > { %v2473_v0 = vpop.f32.mrf.mxu0 }
 0x255   : > { %v2931_v56 = vpop.f32.mrf.mxu1  ;;  %11333 = vmatmul.mubr.msk.bf16.gmra.mxu1 %vm538_vm3, %v3749_v22  ;;  %v2613_v26 = vadd.f32 %v2473_v0, %v13790_v58  ;;  %v313_v22 = vld [vmem:[%s17379_s1 + $0x48] sm:$0xff]  ;;  %v3751_v0 = vsel %vm3732_vm7, %v3748_v39, %v3750_v50  ;;  %v3330_v54 = vor.u32 %v17448_v53, %v3326_v61  ;;  %v315_v39 = vld [vmem:[%s17379_s1 + $0x58] sm:$0xff]  ;;  %v17450_v61 = vshrl.u32 %v14206_v7, 16 }
 0x256   : > { %v14218_v6 = vadd.f32 %v2931_v56, %v2612_v9  ;;  %11336 = vmatprep.mubr.msk.bf16.mxu1 %vm12597_vm1, %v17582_v2  ;;  %v11065_v63 = vpop.f32.mrf.mxu0  ;;  %4624 = vperm.xlu1 %12303, %v313_v22   ;;  %v14233_v56 = vld [vmem:[%s12714_s25 + $0x6c] sm:$0xff]   ;;  %v3334_v22 = vrot.slane %v17447_v10, 1 }
 0x257   : > { %v11150_v45 = vpop.f32.mrf.mxu1  ;;  %4649 = vperm.xlu0 %12302, %v318_v24  }
 0x258   : > { %17647 = vst [vmem:[#allocation6_spill] sm:$0xff] %v14218_v6  ;;  %v2478_v58 = vpop.f32.mrf.mxu0  ;;  %11251 = vmatmul.mubr.msk.bf16.gmra.mxu0 %vm538_vm3, %v3327_v43 }
 0x259   : > { %v2934_v9 = vpop.f32.mrf.mxu1  ;;  %v2614_v45 = vadd.f32 %v2478_v58, %v13798_v35  ;;  %11254 = vmatprep.mubr.msk.bf16.mxu0 %vm12597_vm1, %v17582_v2  ;;  %v320_v35 = vld [vmem:[%s17379_s1 + $0x80] sm:$0xff]  ;;  %v17449_v58 = vshll.u32 %v14233_v56, 16 }
 0x25a   : > { %v14236_v63 = vadd.f32 %v2934_v9, %v2613_v26  ;;  %v11068_v24 = vpop.f32.mrf.mxu0  ;;  %4634 = vperm.xlu1 %12303, %v315_v39   ;;  %v3752_v39 = vrot.slane %v14206_v7, 1 }
 0x25b   : > { %v11151_v6 = vpop.f32.mrf.mxu1  ;;  %4659 = vperm.xlu0 %12302, %v320_v35   ;;  %v3335_v24 = vsel %vm2651_vm6, %v3330_v54, %v3334_v22 }
 0x25c   : > { %v2481_v43 = vpop.f32.mrf.mxu0  ;;  %v3753_v53 = vsel %vm3732_vm7, %v3750_v50, %v3752_v39 }
 0x25d   : > { %v2939_v26 = vpop.f32.mrf.mxu1  ;;  %11337 = vmatmul.mubr.msk.bf16.gmra.mxu1 %vm538_vm3, %v3751_v0  ;;  %v2615_v6 = vadd.f32 %v2481_v43, %v13804_v8  ;;  %v317_v0 = vld [vmem:[%s17379_s1 + $0x68] sm:$0xff]  ;;  %v322_v8 = vld [vmem:[%s17379_s1 + $0x90] sm:$0xff]  ;;  %v3338_v43 = vor.u32 %v17450_v61, %v3334_v22  ;;  %v319_v22 = vld [vmem:[%s17379_s1 + $0x78] sm:$0xff] }
 0x25e   : > { %v14254_v9 = vadd.f32 %v2939_v26, %v2614_v45  ;;  %11340 = vmatprep.mubr.msk.bf16.mxu1 %vm12597_vm1, %v17582_v2  ;;  %v11069_v35 = vpop.f32.mrf.mxu0  ;;  %4644 = vperm.xlu1 %12303, %v317_v0   ;;  %v14278_v0 = vld [vmem:[%s12714_s25 + $0x74] sm:$0xff]  }
 0x25f   : > { %v11154_v10 = vpop.f32.mrf.mxu1  ;;  %4669 = vperm.xlu0 %12302, %v322_v8  }
 0x260   : > { %17648 = vst [vmem:[#allocation12_spill] sm:$0xff] %v14254_v9  ;;  %v2486_v45 = vpop.f32.mrf.mxu0  ;;  %11255 = vmatmul.mubr.msk.bf16.gmra.mxu0 %vm538_vm3, %v3335_v24  ;;  %v3342_v10 = vrot.slane %v17449_v58, 1  ;;  %v324_v24 = vld [vmem:[%s17379_s1 + $0xa0] sm:$0xff] }
 0x261   : > { %v2942_v54 = vpop.f32.mrf.mxu1  ;;  %v2616_v26 = vadd.f32 %v2486_v45, %v13811_v37  ;;  %11258 = vmatprep.mubr.msk.bf16.mxu0 %vm12597_vm1, %v17582_v2  ;;  %v3754_v45 = vrot.slane %v14233_v56, 1 }
 0x262   : > { %v14272_v35 = vadd.f32 %v2942_v54, %v2615_v6  ;;  %v11072_v8 = vpop.f32.mrf.mxu0  ;;  %4654 = vperm.xlu1 %12303, %v319_v22   ;;  %v3343_v50 = vsel %vm2651_vm6, %v3338_v43, %v3342_v10  ;;  %v17451_v22 = vshll.u32 %v14278_v0, 16  ;;  %v326_v43 = vld [vmem:[%s17379_s1 + $0xb0] sm:$0xff] }
 0x263   : > { %v11155_v9 = vpop.f32.mrf.mxu1  ;;  %4679 = vperm.xlu0 %12302, %v324_v24   ;;  %v17452_v8 = vshrl.u32 %v14233_v56, 16 }
 0x264   : > { %v2489_v37 = vpop.f32.mrf.mxu0 }
 0x265   : > { %v2947_v6 = vpop.f32.mrf.mxu1  ;;  %11341 = vmatmul.mubr.msk.bf16.gmra.mxu1 %vm538_vm3, %v3753_v53  ;;  %v2617_v9 = vadd.f32 %v2489_v37, %v13820_v38  ;;  %v321_v53 = vld [vmem:[%s17379_s1 + $0x88] sm:$0xff]  ;;  %v3755_v37 = vsel %vm3732_vm7, %v3752_v39, %v3754_v45  ;;  %v3346_v61 = vor.u32 %v17452_v8, %v3342_v10  ;;  %v323_v39 = vld [vmem:[%s17379_s1 + $0x98] sm:$0xff]  ;;  %v17454_v10 = vshrl.u32 %v14278_v0, 16 }
 0x266   : > { %v14290_v54 = vadd.f32 %v2947_v6, %v2616_v26  ;;  %11344 = vmatprep.mubr.msk.bf16.mxu1 %vm12597_vm1, %v17582_v2  ;;  %v11073_v24 = vpop.f32.mrf.mxu0  ;;  %4664 = vperm.xlu1 %12303, %v321_v53   ;;  %v14305_v6 = vld [vmem:[%s12714_s25 + $0x7c] sm:$0xff]   ;;  %v3350_v53 = vrot.slane %v17451_v22, 1 }
 0x267   : > { %v11158_v58 = vpop.f32.mrf.mxu1  ;;  %4689 = vperm.xlu0 %12302, %v326_v43  }
 0x268   : > { %17649 = vst [vmem:[#allocation10_spill] sm:$0xff] %v14290_v54  ;;  %v2494_v38 = vpop.f32.mrf.mxu0  ;;  %11259 = vmatmul.mubr.msk.bf16.gmra.mxu0 %vm538_vm3, %v3343_v50 }
 0x269   : > { %v2950_v26 = vpop.f32.mrf.mxu1  ;;  %v2618_v58 = vadd.f32 %v2494_v38, %v13828_v40  ;;  %11262 = vmatprep.mubr.msk.bf16.mxu0 %vm12597_vm1, %v17582_v2  ;;  %v328_v40 = vld [vmem:[%s17379_s1 + $0xc0] sm:$0xff]  ;;  %v17453_v38 = vshll.u32 %v14305_v6, 16 }
 0x26a   : > { %v14308_v24 = vadd.f32 %v2950_v26, %v2617_v9  ;;  %v11076_v43 = vpop.f32.mrf.mxu0  ;;  %4674 = vperm.xlu1 %12303, %v323_v39   ;;  %v3756_v39 = vrot.slane %v14278_v0, 1 }
 0x26b   : > { %v11159_v54 = vpop.f32.mrf.mxu1  ;;  %4699 = vperm.xlu0 %12302, %v328_v40   ;;  %v3351_v43 = vsel %vm2651_vm6, %v3346_v61, %v3350_v53 }
 0x26c   : > { %v2497_v50 = vpop.f32.mrf.mxu0  ;;  %v3757_v8 = vsel %vm3732_vm7, %v3754_v45, %v3756_v39 }
 0x26d   : > { %v2955_v9 = vpop.f32.mrf.mxu1  ;;  %11345 = vmatmul.mubr.msk.bf16.gmra.mxu1 %vm538_vm3, %v3755_v37  ;;  %v2619_v54 = vadd.f32 %v2497_v50, %v13834_v41  ;;  %v325_v37 = vld [vmem:[%s17379_s1 + $0xa8] sm:$0xff]  ;;  %v330_v41 = vld [vmem:[%s17379_s1 + $0xd0] sm:$0xff]  ;;  %v3354_v50 = vor.u32 %v17454_v10, %v3350_v53 }
 0x26e   : > { %v14326_v26 = vadd.f32 %v2955_v9, %v2618_v58  ;;  %11348 = vmatprep.mubr.msk.bf16.mxu1 %vm12597_vm1, %v17582_v2  ;;  %v11077_v40 = vpop.f32.mrf.mxu0  ;;  %4684 = vperm.xlu1 %12303, %v325_v37   ;;  %v14350_v37 = vld [vmem:[%s12714_s25 + $0x84] sm:$0xff]  }
 0x26f   : > { %v11162_v22 = vpop.f32.mrf.mxu1  ;;  %4709 = vperm.xlu0 %12302, %v330_v41  }
 0x270   : > { %v2502_v58 = vpop.f32.mrf.mxu0  ;;  %11263 = vmatmul.mubr.msk.bf16.gmra.mxu0 %vm538_vm3, %v3351_v43  ;;  %v3358_v22 = vrot.slane %v17453_v38, 1  ;;  %v12392_v43 = vld [vmem:[%s17382_s4 + $0x8] sm:$0xff]   ;;  %v327_v38 = vld [vmem:[%s17379_s1 + $0xb8] sm:$0xff] }
 0x271   : > { %v2958_v61 = vpop.f32.mrf.mxu1  ;;  %v2620_v9 = vadd.f32 %v2502_v58, %v13841_v12  ;;  %11266 = vmatprep.mubr.msk.bf16.mxu0 %vm12597_vm1, %v17582_v2  ;;  %v332_v12 = vld [vmem:[%s17379_s1 + $0xe0] sm:$0xff]  ;;  %11475 = vmatpush3.bf16.msra.mxu1 %v12392_v43  ;;  %v17455_v43 = vshrl.u32 %v14305_v6, 16 }
 0x272   : > { %v14344_v40 = vadd.f32 %v2958_v61, %v2619_v54  ;;  %v11080_v41 = vpop.f32.mrf.mxu0  ;;  %4694 = vperm.xlu1 %12303, %v327_v38   ;;  %v3359_v58 = vsel %vm2651_vm6, %v3354_v50, %v3358_v22  ;;  %v3758_v61 = vrot.slane %v14305_v6, 1  ;;  %11646 = vmatprep.subr.bf16.mxu1 %v17582_v2  ;;  %v329_v50 = vld [vmem:[%s17379_s1 + $0xc8] sm:$0xff] }
 0x273   : > { %v11163_v53 = vpop.f32.mrf.mxu1  ;;  %4719 = vperm.xlu0 %12302, %v332_v12   ;;  %v3362_v38 = vor.u32 %v17455_v43, %v3358_v22  ;;  %v17457_v22 = vshrl.u32 %v14350_v37, 16 }
 0x274   : > { %17650 = vst [vmem:[#allocation14_spill] sm:$0xff] %v14344_v40  ;;  %v2505_v45 = vpop.f32.mrf.mxu0 }
 0x275   : > { %v2963_v54 = vpop.f32.mrf.mxu1  ;;  %11349 = vmatmul.mubr.msk.bf16.gmra.mxu1 %vm538_vm3, %v3757_v8  ;;  %v2621_v41 = vadd.f32 %v2505_v45, %v13850_v20  ;;  %v334_v20 = vld [vmem:[%s17379_s1 + $0xf0] sm:$0xff]  ;;  %v3759_v45 = vsel %vm3732_vm7, %v3756_v39, %v3758_v61  ;;  %v331_v39 = vld [vmem:[%s17379_s1 + $0xd8] sm:$0xff] }
 0x276   : > { %v14365_v53 = vadd.f32 %v2963_v54, %v2620_v9  ;;  %11352 = vmatprep.mubr.msk.bf16.mxu1 %vm12597_vm1, %v17582_v2  ;;  %v11081_v8 = vpop.f32.mrf.mxu0  ;;  %4704 = vperm.xlu1 %12303, %v329_v50   ;;  %v14381_v54 = vld [vmem:[%s12714_s25 + $0x8c] sm:$0xff]   ;;  %v17652_v50 = vshll.u32 %v14350_v37, 16 }
 0x277   : > { %v11166_v10 = vpop.f32.mrf.mxu1  ;;  %4729 = vperm.xlu0 %12302, %v334_v20  }
 0x278   : > { %17651 = vst [vmem:[#allocation15_spill] sm:$0xff] %v14365_v53  ;;  %v2510_v9 = vpop.f32.mrf.mxu0  ;;  %11267 = vmatmul.mubr.msk.bf16.gmra.mxu0 %vm538_vm3, %v3359_v58  ;;  %v3366_v53 = vrot.slane %v17652_v50, 1 }
 0x279   : > { %v2966_v12 = vpop.f32.mrf.mxu1  ;;  %v2622_v10 = vadd.f32 %v2510_v9, %v13858_v25  ;;  %11270 = vmatprep.mubr.msk.bf16.mxu0 %vm12597_vm1, %v17582_v2  ;;  %v336_v25 = vld [vmem:[%s17379_s1 + $0x100] sm:$0xff]  ;;  %v17456_v9 = vshll.u32 %v14381_v54, 16 }
 0x27a   : > { %v14384_v8 = vadd.f32 %v2966_v12, %v2621_v41  ;;  %v11084_v40 = vpop.f32.mrf.mxu0  ;;  %4714 = vperm.xlu1 %12303, %v331_v39   ;;  %v3367_v50 = vsel %vm2651_vm6, %v3362_v38, %v3366_v53  ;;  %v3370_v38 = vor.u32 %v17457_v22, %v3366_v53  ;;  %v335_v53 = vld [vmem:[%s17379_s1 + $0xf8] sm:$0xff] }
 0x27b   : > { %v11167_v58 = vpop.f32.mrf.mxu1  ;;  %4739 = vperm.xlu0 %12302, %v336_v25  }
 0x27c   : > { %v2513_v41 = vpop.f32.mrf.mxu0  ;;  %v3760_v58 = vrot.slane %v14350_v37, 1 }
 0x27d   : > { %v2971_v20 = vpop.f32.mrf.mxu1  ;;  %11353 = vmatmul.mubr.msk.bf16.gmra.mxu1 %vm538_vm3, %v3759_v45  ;;  %v2623_v40 = vadd.f32 %v2513_v41, %v13864_v47  ;;  %v333_v45 = vld [vmem:[%s17379_s1 + $0xe8] sm:$0xff]  ;;  %v338_v47 = vld [vmem:[%s17379_s1 + $0x110] sm:$0xff]  ;;  %v3374_v41 = vrot.slane %v17456_v9, 1 }
 0x27e   : > { %v14402_v12 = vadd.f32 %v2971_v20, %v2622_v10  ;;  %11356 = vmatprep.mubr.msk.bf16.mxu1 %vm12597_vm1, %v17582_v2  ;;  %v11085_v39 = vpop.f32.mrf.mxu0  ;;  %4724 = vperm.xlu1 %12303, %v333_v45   ;;  %v14426_v45 = vld [vmem:[%s12714_s25 + $0x94] sm:$0xff]  }
 0x27f   : > { %v11170_v43 = vpop.f32.mrf.mxu1  ;;  %4749 = vperm.xlu0 %12302, %v338_v47   ;;  %v3761_v39 = vsel %vm3732_vm7, %v3758_v61, %v3760_v58  ;;  %v340_v47 = vld [vmem:[%s17379_s1 + $0x120] sm:$0xff]  ;;  %v3375_v61 = vsel %vm2651_vm6, %v3370_v38, %v3374_v41  ;;  %v337_v38 = vld [vmem:[%s17379_s1 + $0x108] sm:$0xff] }
 0x280   : > { %17653 = vst [vmem:[#allocation13_spill] sm:$0xff] %v14402_v12  ;;  %v2518_v10 = vpop.f32.mrf.mxu0  ;;  %11271 = vmatmul.mubr.msk.bf16.gmra.mxu0 %vm538_vm3, %v3367_v50 }
 0x281   : > { %v2974_v25 = vpop.f32.mrf.mxu1  ;;  %v2624_v43 = vadd.f32 %v2518_v10, %v13871_v23  ;;  %11274 = vmatprep.mubr.msk.bf16.mxu0 %vm12597_vm1, %v17582_v2  ;;  %v3762_v10 = vrot.slane %v14381_v54, 1 }
 0x282   : > { %v14420_v20 = vadd.f32 %v2974_v25, %v2623_v40  ;;  %v11088_v12 = vpop.f32.mrf.mxu0  ;;  %4734 = vperm.xlu1 %12303, %v335_v53   ;;  %v17458_v53 = vshll.u32 %v14426_v45, 16 }
 0x283   : > { %v11171_v50 = vpop.f32.mrf.mxu1  ;;  %4759 = vperm.xlu0 %12302, %v340_v47   ;;  %v3763_v47 = vsel %vm3732_vm7, %v3760_v58, %v3762_v10  ;;  %v339_v58 = vld [vmem:[%s17379_s1 + $0x118] sm:$0xff] }
 0x284   : > { %v2521_v23 = vpop.f32.mrf.mxu0  ;;  %v17459_v50 = vshrl.u32 %v14381_v54, 16 }
 0x285   : > { %v2979_v40 = vpop.f32.mrf.mxu1  ;;  %11357 = vmatmul.mubr.msk.bf16.gmra.mxu1 %vm538_vm3, %v3761_v39  ;;  %v2625_v12 = vadd.f32 %v2521_v23, %v13880_v57  ;;  %v342_v39 = vld [vmem:[%s17379_s1 + $0x130] sm:$0xff]  ;;  %v14453_v23 = vld [vmem:[%s12714_s25 + $0x9c] sm:$0xff]  }
 0x286   : > { %v14438_v25 = vadd.f32 %v2979_v40, %v2624_v43  ;;  %11360 = vmatprep.mubr.msk.bf16.mxu1 %vm12597_vm1, %v17582_v2  ;;  %v11089_v9 = vpop.f32.mrf.mxu0  ;;  %4744 = vperm.xlu1 %12303, %v337_v38   ;;  %v3378_v40 = vor.u32 %v17459_v50, %v3374_v41  ;;  %v3382_v38 = vrot.slane %v17458_v53, 1  ;;  %v17460_v41 = vshrl.u32 %v14426_v45, 16 }
 0x287   : > { %v11174_v22 = vpop.f32.mrf.mxu1  ;;  %4769 = vperm.xlu0 %12302, %v342_v39  }
 0x288   : > { %17654 = vst [vmem:[#allocation17_spill] sm:$0xff] %v14438_v25  ;;  %v2526_v57 = vpop.f32.mrf.mxu0  ;;  %11275 = vmatmul.mubr.msk.bf16.gmra.mxu0 %vm538_vm3, %v3375_v61 }
 0x289   : > { %v2982_v43 = vpop.f32.mrf.mxu1  ;;  %v2626_v22 = vadd.f32 %v2526_v57, %v13888_v13  ;;  %11278 = vmatprep.mubr.msk.bf16.mxu0 %vm12597_vm1, %v17582_v2  ;;  %v344_v13 = vld [vmem:[%s17379_s1 + $0x140] sm:$0xf] }
 0x28a   : > { %v14456_v9 = vadd.f32 %v2982_v43, %v2625_v12  ;;  %v11092_v25 = vpop.f32.mrf.mxu0  ;;  %4754 = vperm.xlu1 %12303, %v339_v58   ;;  %v3764_v58 = vrot.slane %v14426_v45, 1 }
 0x28b   : > { %v11175_v61 = vpop.f32.mrf.mxu1  ;;  %4779 = vperm.xlu0 %12302, %v344_v13  }
 0x28c   : > { %v2529_v12 = vpop.f32.mrf.mxu0  ;;  %v3383_v61 = vsel %vm2651_vm6, %v3378_v40, %v3382_v38 }
 0x28d   : > { %v2987_v39 = vpop.f32.mrf.mxu1  ;;  %11361 = vmatmul.mubr.msk.bf16.gmra.mxu1 %vm538_vm3, %v3763_v47  ;;  %v2627_v25 = vadd.f32 %v2529_v12, %v13894_v30  ;;  %v341_v47 = vld [vmem:[%s17379_s1 + $0x128] sm:$0xff]  ;;  %v3386_v30 = vor.u32 %v17460_v41, %v3382_v38  ;;  %v343_v38 = vld [vmem:[%s17379_s1 + $0x138] sm:$0xff] }
 0x28e   : > { %v14474_v43 = vadd.f32 %v2987_v39, %v2626_v22  ;;  %11364 = vmatprep.mubr.msk.bf16.mxu1 %vm12597_vm1, %v17582_v2  ;;  %v11093_v53 = vpop.f32.mrf.mxu0  ;;  %4764 = vperm.xlu1 %12303, %v341_v47   ;;  %v17656_v22 = vshll.u32 %v14453_v23, 16 }
 0x28f   : > { %v11178_v50 = vpop.f32.mrf.mxu1  ;;  %v14495_v53 = vld [vmem:[%s12714_s25 + $0xa4] sm:$0xff]  }
 0x290   : > { %17655 = vst [vmem:[#allocation18_spill] sm:$0xff] %v14474_v43  ;;  %v2534_v13 = vpop.f32.mrf.mxu0  ;;  %11279 = vmatmul.mubr.msk.bf16.gmra.mxu0 %vm538_vm3, %v3383_v61  ;;  %v3390_v40 = vrot.slane %v17656_v22, 1  ;;  %v3765_v50 = vsel %vm3732_vm7, %v3762_v10, %v3764_v58  ;;  %v3766_v10 = vrot.slane %v14453_v23, 1 }
 0x291   : > { %v2990_v57 = vpop.f32.mrf.mxu1  ;;  %v2628_v12 = vadd.f32 %v2534_v13, %v13901_v11  ;;  %11282 = vmatprep.mubr.msk.bf16.mxu0 %vm12597_vm1, %v17582_v2  ;;  %v17461_v13 = vshll.u32 %v14495_v53, 16 }
 0x292   : > { %v14489_v39 = vadd.f32 %v2990_v57, %v2627_v25  ;;  %v11096_v47 = vpop.f32.mrf.mxu0  ;;  %4774 = vperm.xlu1 %12303, %v343_v38   ;;  %v3391_v11 = vsel %vm2651_vm6, %v3386_v30, %v3390_v40  ;;  %v3767_v30 = vsel %vm3732_vm7, %v3764_v58, %v3766_v10  ;;  %v17464_v58 = vshrl.u32 %v14495_v53, 16 }
 0x293   : > { %v11179_v43 = vpop.f32.mrf.mxu1 }
 0x294   : > { %17657 = vst [vmem:[#allocation16_spill] sm:$0xff] %v14489_v39  ;;  %v2537_v61 = vpop.f32.mrf.mxu0  ;;  %v17462_v43 = vshrl.u32 %v14453_v23, 16 }
 0x295   : > { %v2995_v22 = vpop.f32.mrf.mxu1  ;;  %11365 = vmatmul.mubr.msk.bf16.gmra.mxu1 %vm538_vm3, %v3765_v50  ;;  %v2629_v57 = vadd.f32 %v2537_v61, %v13910_v36  ;;  %v14513_v50 = vld [vmem:[%s12714_s25 + $0xac] sm:$0xff]  }
 0x296   : > { %v14504_v25 = vadd.f32 %v2995_v22, %v2628_v12  ;;  %11368 = vmatprep.mubr.msk.bf16.mxu1 %vm12597_vm1, %v17582_v2  ;;  %v11097_v47 = vpop.f32.mrf.mxu0  ;;  %v3394_v61 = vor.u32 %v17462_v43, %v3390_v40  ;;  %v3398_v22 = vrot.slane %v17461_v13, 1 }
 0x297   : > { %v11182_v38 = vpop.f32.mrf.mxu1 }
 0x298   : > { %17658 = vst [vmem:[#allocation20_spill] sm:$0xff] %v14504_v25  ;;  %v2542_v41 = vpop.f32.mrf.mxu0  ;;  %11283 = vmatmul.mubr.msk.bf16.gmra.mxu0 %vm538_vm3, %v3391_v11  ;;  %v3399_v40 = vsel %vm2651_vm6, %v3394_v61, %v3398_v22  ;;  %v3402_v43 = vor.u32 %v17464_v58, %v3398_v22 }
 0x299   : > { %v2998_v39 = vpop.f32.mrf.mxu1  ;;  %v2630_v36 = vadd.f32 %v2542_v41, %v13918_v52  ;;  %11286 = vmatprep.mubr.msk.bf16.mxu0 %vm12597_vm1, %v17582_v2  ;;  %v17463_v52 = vshll.u32 %v14513_v50, 16 }
 0x29a   : > { %v14516_v12 = vadd.f32 %v2998_v39, %v2629_v57  ;;  %v11100_v47 = vpop.f32.mrf.mxu0  ;;  %v3768_v57 = vrot.slane %v14495_v53, 1 }
 0x29b   : > { %v11183_v38 = vpop.f32.mrf.mxu1 }
 0x29c   : > { %v2545_v11 = vpop.f32.mrf.mxu0  ;;  %v3769_v61 = vsel %vm3732_vm7, %v3766_v10, %v3768_v57  ;;  %v17465_v10 = vshrl.u32 %v14513_v50, 16 }
 0x29d   : > { %v3003_v25 = vpop.f32.mrf.mxu1  ;;  %11369 = vmatmul.mubr.msk.bf16.gmra.mxu1 %vm538_vm3, %v3767_v30  ;;  %v2631_v41 = vadd.f32 %v2545_v11, %v13924_v33  ;;  %v3406_v33 = vrot.slane %v17463_v52, 1  ;;  %v14546_v11 = vld [vmem:[%s12714_s25 + $0xb4] ss:$0 sps:$4 sm:$0x77]   ;;  %v3770_v52 = vrot.slane %v14513_v50, 1 }
 0x29e   : > { %v14528_v39 = vadd.f32 %v3003_v25, %v2630_v36  ;;  %11372 = vmatprep.mubr.msk.bf16.mxu1 %vm12597_vm1, %v17582_v2  ;;  %v11101_v47 = vpop.f32.mrf.mxu0 }
 0x29f   : > { %v11186_v38 = vpop.f32.mrf.mxu1  ;;  %v3407_v22 = vsel %vm2651_vm6, %v3402_v43, %v3406_v33  ;;  %v3771_v43 = vsel %vm3732_vm7, %v3768_v57, %v3770_v52 }
 0x2a0   : > { %17659 = vst [vmem:[#allocation21_spill] sm:$0xff] %v14528_v39  ;;  %v2550_v13 = vpop.f32.mrf.mxu0  ;;  %11287 = vmatmul.mubr.msk.bf16.gmra.mxu0 %vm538_vm3, %v3399_v40 }
 0x2a1   : > { %v3006_v30 = vpop.f32.mrf.mxu1  ;;  %v2632_v25 = vadd.f32 %v2550_v13, %v13931_v59  ;;  %11290 = vmatprep.mubr.msk.bf16.mxu0 %vm12597_vm1, %v17582_v2 }
 0x2a2   : > { %v14540_v36 = vadd.f32 %v3006_v30, %v2631_v41  ;;  %v11104_v47 = vpop.f32.mrf.mxu0  ;;  %v3412_v41 = vshll.u32 %v14546_v11, 16 }
 0x2a3   : > { %v11187_v38 = vpop.f32.mrf.mxu1 }
 0x2a4   : > { %v2553_v40 = vpop.f32.mrf.mxu0 }
 0x2a5   : > { %v3011_v39 = vpop.f32.mrf.mxu1  ;;  %11373 = vmatmul.mubr.msk.bf16.gmra.mxu1 %vm538_vm3, %v3769_v61  ;;  %v2633_v59 = vadd.f32 %v2553_v40, %v13939_v31 }
 0x2a6   : > { %v14552_v13 = vadd.f32 %v3011_v39, %v2632_v25  ;;  %11376 = vmatprep.mubr.msk.bf16.mxu1 %vm12597_vm1, %v17582_v2  ;;  %v11105_v30 = vpop.f32.mrf.mxu0  ;;  %v3410_v39 = vor.u32 %v17465_v10, %v3406_v33  ;;  %v3414_v25 = vrot.slane %v3412_v41, 1 }
 0x2a7   : > { %v11190_v47 = vpop.f32.mrf.mxu1 }
 0x2a8   : > { %17660 = vst [vmem:[#allocation19_spill] sm:$0xff] %v14552_v13  ;;  %v2558_v38 = vpop.f32.mrf.mxu0  ;;  %11291 = vmatmul.mubr.msk.bf16.gmra.mxu0 %vm538_vm3, %v3407_v22 }
 0x2a9   : > { %v3014_v58 = vpop.f32.mrf.mxu1  ;;  %v2634_v61 = vadd.f32 %v2558_v38, %v13947_v5  ;;  %11294 = vmatprep.mubr.msk.bf16.mxu0 %vm12597_vm1, %v17582_v2  ;;  %v3415_v5 = vsel %vm2651_vm6, %v3410_v39, %v3414_v25 }
 0x2aa   : > { %v14561_v31 = vadd.f32 %v3014_v58, %v2633_v59  ;;  %v11108_v40 = vpop.f32.mrf.mxu0  ;;  %v3772_v58 = vrot.slane %v14546_v11, 1 }
 0x2ab   : > { %v11191_v30 = vpop.f32.mrf.mxu1  ;;  %v3416_v40 = vshrl.u32 %v14546_v11, 16 }
 0x2ac   : > { %v2561_v47 = vpop.f32.mrf.mxu0  ;;  %v3773_v39 = vsel %vm3732_vm7, %v3770_v52, %v3772_v58 }
 0x2ad   : > { %v3019_v13 = vpop.f32.mrf.mxu1  ;;  %11377 = vmatmul.mubr.msk.bf16.gmra.mxu1 %vm538_vm3, %v3771_v43  ;;  %v2635_v22 = vadd.f32 %v2561_v47, %v13956_v34  ;;  %v4089_v43 = vshrl.u32 %v13982_v21, 16  ;;  %v4092_v34 = vshll.u32 %v13982_v21, 16  ;;  %v3418_v10 = vor.u32 %v3416_v40, %v3414_v25 }
 0x2ae   : > { %v14569_v57 = vadd.f32 %v3019_v13, %v2634_v61  ;;  %11380 = vmatprep.mubr.msk.bf16.mxu1 %vm12597_vm1, %v17582_v2  ;;  %v11109_v59 = vpop.f32.mrf.mxu0 }
 0x2af   : > { %v11194_v33 = vpop.f32.mrf.mxu1  ;;  %v17662_v59 = vshrl.u32 %v13953_v16, 16  ;;  %v4091_v21 = vrot.slane %v4089_v43, 1 }
 0x2b0   : > { %17661 = vst [vmem:[#allocation23_spill] sm:$0xff] %v14569_v57  ;;  %v2566_v41 = vpop.f32.mrf.mxu0  ;;  %11295 = vmatmul.mubr.msk.bf16.gmra.mxu0 %vm538_vm3, %v3415_v5  ;;  %v4094_v57 = vrot.slane %v4092_v34, 2 }
 0x2b1   : > { %v3022_v38 = vpop.f32.mrf.mxu1  ;;  %v2636_v13 = vadd.f32 %v2566_v41, %v13966_v29  ;;  %11298 = vmatprep.mubr.msk.bf16.mxu0 %vm12597_vm1, %v17582_v2  ;;  %v4096_v5 = vrot.slane %v17662_v59, 1  ;;  %v17663_v29 = vshll.u32 %v13953_v16, 16 }
 0x2b2   : > { %v14580_v61 = vadd.f32 %v3022_v38, %v2635_v22  ;;  %v11112_v30 = vpop.f32.mrf.mxu0 }
 0x2b3   : > { %v11195_v47 = vpop.f32.mrf.mxu1  ;;  %v4097_v22 = vrot.slane %v17663_v29, 2 }
 0x2b4   : > { %v2569_v33 = vpop.f32.mrf.mxu0 }
 0x2b5   : > { %v3027_v11 = vpop.f32.mrf.mxu1  ;;  %11381 = vmatmul.mubr.msk.bf16.gmra.mxu1 %vm538_vm3, %v3773_v39  ;;  %v2637_v52 = vadd.f32 %v2569_v33, %v13978_v4  ;;  %v4095_v39 = vor.u32 %v4094_v57, %v4091_v21  ;;  %v4098_v25 = vor.u32 %v4097_v22, %v4096_v5 }
 0x2b6   : > { %v14591_v41 = vadd.f32 %v3027_v11, %v2636_v13  ;;  %11384 = vmatprep.mubr.msk.bf16.mxu1 %vm12597_vm1, %v17582_v2  ;;  %v11113_v38 = vpop.f32.mrf.mxu0  ;;  %v17665_v11 = vshll.u32 %v13975_v44, 16 }
 0x2b7   : > { %v11198_v30 = vpop.f32.mrf.mxu1  ;;  %v4099_v33 = vsel %vm4087_vm8, %v4095_v39, %v4098_v25 }
 0x2b8   : > { %v2574_v47 = vpop.f32.mrf.mxu0  ;;  %11299 = vmatmul.mubr.msk.bf16.gmra.mxu0 %vm538_vm3, %v3418_v10  ;;  %v4101_v21 = vrot.slane %v17665_v11, 2 }
 0x2b9   : > { %v3030_v59 = vpop.f32.mrf.mxu1  ;;  %v2638_v40 = vadd.f32 %v2574_v47, %v13992_v60  ;;  %11390 = vmatprep.mubr.msk.bf16.mxu0 %vm12597_vm1, %v17582_v2  ;;  %v17664_v60 = vshrl.u32 %v13975_v44, 16 }
 0x2ba   : > { %v14597_v43 = vadd.f32 %v3030_v59, %v2637_v52  ;;  %v11116_v16 = vpop.f32.mrf.mxu0 }
 0x2bb   : > { %v11199_v4 = vpop.f32.mrf.mxu1  ;;  %v4100_v5 = vrot.slane %v17664_v60, 1 }
 0x2bc   : > { %v2577_v34 = vpop.f32.mrf.mxu0  ;;  %v17667_v4 = vshll.u32 %v14011_v28, 16 }
 0x2bd   : > { %v3035_v13 = vpop.f32.mrf.mxu1  ;;  %11385 = vmatmul.mubr.msk.bf16.gmra.mxu1 %vm538_vm3, %v3772_v58  ;;  %v2639_v10 = vadd.f32 %v2577_v34, %v14005_v62  ;;  %v4102_v30 = vor.u32 %v4101_v21, %v4100_v5 }
 0x2be   : > { %v14604_v57 = vadd.f32 %v3035_v13, %v2638_v40  ;;  %11476 = vmatprep.mubr.msk.bf16.mxu1 %vm12597_vm1, %v17582_v2  ;;  %v11117_v29 = vpop.f32.mrf.mxu0  ;;  %v17666_v40 = vshrl.u32 %v14011_v28, 16  ;;  %v4105_v34 = vrot.slane %v17667_v4, 2 }
 0x2bf   : > { %v11202_v22 = vpop.f32.mrf.mxu1 }
 0x2c0   : > { %v2582_v52 = vpop.f32.mrf.mxu0  ;;  %11391 = vmatmul.mubr.msk.bf16.vlgmr.msra.gmra.mxu0 %vm538_vm3, %v4099_v33  ;;  %v4104_v16 = vrot.slane %v17666_v40, 1 }
 0x2c1   : > { %v3038_v38 = vpop.f32.mrf.mxu1  ;;  %v2640_v58 = vadd.f32 %v2582_v52, %v14018_v48  ;;  %11394 = vmatprep.mubr.msk.bf16.mxu0 %vm12597_vm1, %v17582_v2  ;;  %v4103_v48 = vsel %vm4087_vm8, %v4098_v25, %v4102_v30 }
 0x2c2   : > { %v14614_v62 = vadd.f32 %v3038_v38, %v2639_v10  ;;  %v11120_v47 = vpop.f32.mrf.mxu0  ;;  %v4106_v21 = vor.u32 %v4105_v34, %v4104_v16 }
 0x2c3   : > { %v11203_v44 = vpop.f32.mrf.mxu1 }
 0x2c4   : > { %v2585_v59 = vpop.f32.mrf.mxu0  ;;  %v4107_v25 = vsel %vm4087_vm8, %v4102_v30, %v4106_v21  ;;  %v17668_v44 = vshrl.u32 %v14027_v15, 16 }
 0x2c5   : > { %v3043_v39 = vpop.f32.mrf.mxu1  ;;  %v2641_v13 = vadd.f32 %v2585_v59, %v14030_v19 }
 0x2c6   : > { %v14623_v33 = vadd.f32 %v3043_v39, %v2640_v58  ;;  %v11121_v10 = vpop.f32.mrf.mxu0  ;;  %v4108_v59 = vrot.slane %v17668_v44, 1 }
 0x2c7   : > { %v11206_v60 = vpop.f32.mrf.mxu1 }
 0x2c8   : > { %v2590_v11 = vpop.f32.mrf.mxu0  ;;  %11395 = vmatmul.mubr.msk.bf16.gmra.mxu0 %vm538_vm3, %v4103_v48 }
 0x2c9   : > { %v3046_v5 = vpop.f32.mrf.mxu1  ;;  %v2642_v29 = vadd.f32 %v2590_v11, %v14042_v14  ;;  %11398 = vmatprep.mubr.msk.bf16.mxu0 %vm12597_vm1, %v17582_v2  ;;  %v17669_v14 = vshll.u32 %v14027_v15, 16  ;;  %v17671_v15 = vshrl.u32 %v14060_v27, 16 }
 0x2ca   : > { %v14628_v22 = vadd.f32 %v3046_v5, %v2641_v13  ;;  %v11124_v28 = vpop.f32.mrf.mxu0  ;;  %v17670_v13 = vld [vmem:[#allocation7_spill] sm:$0xff] }
 0x2cb   : > { %v11207_v19 = vpop.f32.mrf.mxu1  ;;  %v4109_v39 = vrot.slane %v17669_v14, 2  ;;  %v17672_v28 = vshll.u32 %v14060_v27, 16 }
 0x2cc   : > { %v2593_v52 = vpop.f32.mrf.mxu0 }
 0x2cd   : > { %v3051_v38 = vpop.f32.mrf.mxu1  ;;  %v2643_v58 = vadd.f32 %v2593_v52, %v14054_v49  ;;  %v4110_v49 = vor.u32 %v4109_v39, %v4108_v59  ;;  %v4113_v19 = vrot.slane %v17672_v28, 2  ;;  %v17675_v28 = vld [vmem:[#allocation8_spill] sm:$0xff] }
 0x2ce   : > { %v14634_v47 = vadd.f32 %v3051_v38, %v2642_v29  ;;  %v11125_v40 = vpop.f32.mrf.mxu0  ;;  %v4112_v29 = vrot.slane %v17671_v15, 1 }
 0x2cf   : > { %v11210_v16 = vpop.f32.mrf.mxu1  ;;  %v4111_v38 = vsel %vm4087_vm8, %v4106_v21, %v4110_v49 }
 0x2d0   : > { %v2598_v4 = vpop.f32.mrf.mxu0  ;;  %11399 = vmatmul.mubr.msk.bf16.gmra.mxu0 %vm538_vm3, %v4107_v25  ;;  %v4114_v59 = vor.u32 %v4113_v19, %v4112_v29 }
 0x2d1   : > { %v3054_v34 = vpop.f32.mrf.mxu1  ;;  %v2644_v48 = vadd.f32 %v2598_v4, %v17670_v13  ;;  %11402 = vmatprep.mubr.msk.bf16.mxu0 %vm12597_vm1, %v17582_v2 }
 0x2d2   : > { %v14642_v10 = vadd.f32 %v3054_v34, %v2643_v58  ;;  %v11128_v30 = vpop.f32.mrf.mxu0  ;;  %v4115_v34 = vsel %vm4087_vm8, %v4110_v49, %v4114_v59 }
 0x2d3   : > { %v11211_v60 = vpop.f32.mrf.mxu1 }
 0x2d4   : > { %v2601_v11 = vpop.f32.mrf.mxu0  ;;  %v17674_v60 = vshll.u32 %v14081_v42, 16 }
 0x2d5   : > { %v3059_v5 = vpop.f32.mrf.mxu1 }
 0x2d6   : > { %v14650_v52 = vadd.f32 %v3059_v5, %v2644_v48  ;;  %v11129_v25 = vpop.f32.mrf.mxu0  ;;  %v17673_v48 = vshrl.u32 %v14081_v42, 16  ;;  %v4117_v11 = vrot.slane %v17674_v60, 2  ;;  %v17676_v42 = vshrl.u32 %v14098_v55, 16 }
 0x2d7   : > { %v11214_v58 = vpop.f32.mrf.mxu1 }
 0x2d8   : > { %v3519_v14 = vpop.f32.mrf.mxu0  ;;  %11403 = vmatmul.mubr.msk.bf16.gmra.mxu0 %vm538_vm3, %v4111_v38  ;;  %v4116_v30 = vrot.slane %v17673_v48, 1 }
 0x2d9   : > { %v3062_v44 = vpop.f32.mrf.mxu1  ;;  %v3685_v39 = vadd.f32 %v3519_v14, %v14087_v32  ;;  %11406 = vmatprep.mubr.msk.bf16.mxu0 %vm12597_vm1, %v17582_v2  ;;  %v4120_v14 = vrot.slane %v17676_v42, 1 }
 0x2da   : > { %v11220_v16 = vpop.f32.mrf.mxu0 }
 0x2db   : > { %v11215_v40 = vpop.f32.mrf.mxu1 }
 0x2dc   : > { %v3522_v27 = vpop.f32.mrf.mxu0 }
 0x2dd   : > { %v3874_v4 = vpop.f32.mrf.mxu1  ;;  %v3686_v21 = vadd.f32 %v3522_v27, %v14101_v3  ;;  %v4118_v3 = vor.u32 %v4117_v11, %v4116_v30  ;;  %v17678_v11 = vld [vmem:[#allocation11_spill] sm:$0xff] }
 0x2de   : > { %v14659_v13 = vadd.f32 %v3874_v4, %v3685_v39  ;;  %v11221_v32 = vpop.f32.mrf.mxu0  ;;  %v17677_v39 = vshll.u32 %v14098_v55, 16 }
 0x2df   : > { %v11306_v5 = vpop.f32.mrf.mxu1  ;;  %v4119_v4 = vsel %vm4087_vm8, %v4114_v59, %v4118_v3 }
 0x2e0   : > { %v3527_v15 = vpop.f32.mrf.mxu0  ;;  %11407 = vmatmul.mubr.msk.bf16.gmra.mxu0 %vm538_vm3, %v4115_v34  ;;  %v4121_v40 = vrot.slane %v17677_v39, 2 }
 0x2e1   : > { %v3877_v29 = vpop.f32.mrf.mxu1  ;;  %v3687_v19 = vadd.f32 %v3527_v15, %v17675_v28  ;;  %11410 = vmatprep.mubr.msk.bf16.mxu0 %vm12597_vm1, %v17582_v2 }
 0x2e2   : > { %v14667_v38 = vadd.f32 %v3877_v29, %v3686_v21  ;;  %v11224_v49 = vpop.f32.mrf.mxu0  ;;  %v4122_v60 = vor.u32 %v4121_v40, %v4120_v14 }
 0x2e3   : > { %v11307_v25 = vpop.f32.mrf.mxu1  ;;  %v17679_v49 = vshrl.u32 %v14137_v18, 16 }
 0x2e4   : > { %v3530_v58 = vpop.f32.mrf.mxu0  ;;  %v4123_v59 = vsel %vm4087_vm8, %v4118_v3, %v4122_v60 }
 0x2e5   : > { %v3882_v44 = vpop.f32.mrf.mxu1  ;;  %v3688_v16 = vadd.f32 %v3530_v58, %v14131_v46  ;;  %v4124_v25 = vrot.slane %v17679_v49, 1  ;;  %v17680_v58 = vshll.u32 %v14137_v18, 16  ;;  %v17682_v18 = vshrl.u32 %v14161_v1, 16 }
 0x2e6   : > { %v14676_v27 = vadd.f32 %v3882_v44, %v3687_v19  ;;  %v11225_v34 = vpop.f32.mrf.mxu0 }
 0x2e7   : > { %v11310_v21 = vpop.f32.mrf.mxu1  ;;  %v4125_v44 = vrot.slane %v17680_v58, 2 }
 0x2e8   : > { %v3535_v48 = vpop.f32.mrf.mxu0  ;;  %11411 = vmatmul.mubr.msk.bf16.gmra.mxu0 %vm538_vm3, %v4119_v4 }
 0x2e9   : > { %v3885_v30 = vpop.f32.mrf.mxu1  ;;  %v3689_v32 = vadd.f32 %v3535_v48, %v17678_v11  ;;  %11414 = vmatprep.mubr.msk.bf16.mxu0 %vm12597_vm1, %v17582_v2  ;;  %v4128_v11 = vrot.slane %v17682_v18, 1 }
 0x2ea   : > { %v14681_v5 = vadd.f32 %v3885_v30, %v3688_v16  ;;  %v11228_v55 = vpop.f32.mrf.mxu0  ;;  %v17681_v16 = vld [vmem:[#allocation9_spill] sm:$0xff] }
 0x2eb   : > { %v11311_v46 = vpop.f32.mrf.mxu1 }
 0x2ec   : > { %v3538_v15 = vpop.f32.mrf.mxu0 }
 0x2ed   : > { %v3890_v29 = vpop.f32.mrf.mxu1  ;;  %v3690_v28 = vadd.f32 %v3538_v15, %v14164_v51  ;;  %v4126_v51 = vor.u32 %v4125_v44, %v4124_v25  ;;  %v17684_v44 = vld [vmem:[#allocation6_spill] sm:$0xff] }
 0x2ee   : > { %v14687_v19 = vadd.f32 %v3890_v29, %v3689_v32  ;;  %v11229_v42 = vpop.f32.mrf.mxu0  ;;  %v17683_v32 = vshll.u32 %v14161_v1, 16 }
 0x2ef   : > { %v11314_v14 = vpop.f32.mrf.mxu1  ;;  %v4127_v29 = vsel %vm4087_vm8, %v4122_v60, %v4126_v51 }
 0x2f0   : > { %v3543_v39 = vpop.f32.mrf.mxu0  ;;  %11415 = vmatmul.mubr.msk.bf16.gmra.mxu0 %vm538_vm3, %v4123_v59  ;;  %v4129_v55 = vrot.slane %v17683_v32, 2 }
 0x2f1   : > { %v3893_v40 = vpop.f32.mrf.mxu1  ;;  %v3691_v4 = vadd.f32 %v3543_v39, %v17681_v16  ;;  %11418 = vmatprep.mubr.msk.bf16.mxu0 %vm12597_vm1, %v17582_v2 }
 0x2f2   : > { %v14695_v34 = vadd.f32 %v3893_v40, %v3690_v28  ;;  %v11232_v3 = vpop.f32.mrf.mxu0  ;;  %v4130_v58 = vor.u32 %v4129_v55, %v4128_v11 }
 0x2f3   : > { %v11315_v21 = vpop.f32.mrf.mxu1  ;;  %v17685_v3 = vshrl.u32 %v14206_v7, 16 }
 0x2f4   : > { %v3546_v48 = vpop.f32.mrf.mxu0  ;;  %v4131_v60 = vsel %vm4087_vm8, %v4126_v51, %v4130_v58 }
 0x2f5   : > { %v3898_v30 = vpop.f32.mrf.mxu1  ;;  %v3692_v46 = vadd.f32 %v3546_v48, %v14200_v17  ;;  %v4132_v21 = vrot.slane %v17685_v3, 1  ;;  %v17686_v48 = vshll.u32 %v14206_v7, 16 }
 0x2f6   : > { %v14704_v15 = vadd.f32 %v3898_v30, %v3691_v4  ;;  %v11233_v59 = vpop.f32.mrf.mxu0 }
 0x2f7   : > { %v11318_v28 = vpop.f32.mrf.mxu1  ;;  %v4133_v30 = vrot.slane %v17686_v48, 2 }
 0x2f8   : > { %v3551_v49 = vpop.f32.mrf.mxu0  ;;  %11419 = vmatmul.mubr.msk.bf16.gmra.mxu0 %vm538_vm3, %v4127_v29 }
 0x2f9   : > { %v3901_v25 = vpop.f32.mrf.mxu1  ;;  %v3693_v42 = vadd.f32 %v3551_v49, %v17684_v44  ;;  %11422 = vmatprep.mubr.msk.bf16.mxu0 %vm12597_vm1, %v17582_v2 }
 0x2fa   : > { %v14709_v14 = vadd.f32 %v3901_v25, %v3692_v46  ;;  %v11236_v1 = vpop.f32.mrf.mxu0  ;;  %v17687_v46 = vld [vmem:[#allocation12_spill] sm:$0xff]  ;;  %v17688_v25 = vshrl.u32 %v14233_v56, 16 }
 0x2fb   : > { %v11319_v17 = vpop.f32.mrf.mxu1 }
 0x2fc   : > { %v3554_v39 = vpop.f32.mrf.mxu0  ;;  %v4136_v44 = vrot.slane %v17688_v25, 1 }
 0x2fd   : > { %v3906_v40 = vpop.f32.mrf.mxu1  ;;  %v3694_v16 = vadd.f32 %v3554_v39, %v14236_v63  ;;  %v14727_v63 = vor.u32 %v4133_v30, %v4132_v21  ;;  %v17690_v30 = vmov 0  }
 0x2fe   : > { %v14715_v4 = vadd.f32 %v3906_v40, %v3693_v42  ;;  %v11237_v18 = vpop.f32.mrf.mxu0  ;;  %v17689_v42 = vshll.u32 %v14233_v56, 16  ;;  %4827 = vst.msk [vmem:[#allocation2 + $0xc] sm:$0xf] %vm4823_vm9, %v17690_v30  ;;  %4824 = vst.msk [vmem:[#allocation2] sm:$0xf] %vm4823_vm9, %v17690_v30  ;;  %v17691_v56 = vld [vmem:[#allocation10_spill] sm:$0xff] }
 0x2ff   : > { %v11322_v11 = vpop.f32.mrf.mxu1  ;;  %v4135_v40 = vsel %vm4087_vm8, %v4130_v58, %v14727_v63  ;;  %4825 = vst.msk [vmem:[#allocation2 + $0x4] sm:$0xf] %vm4823_vm9, %v17690_v30  ;;  %4826 = vst.msk [vmem:[#allocation2 + $0x8] sm:$0xf] %vm4823_vm9, %v17690_v30 }
 0x300   : > { %v3559_v32 = vpop.f32.mrf.mxu0  ;;  %11423 = vmatmul.mubr.msk.bf16.gmra.mxu0 %vm538_vm3, %v4131_v60  ;;  %v4137_v1 = vrot.slane %v17689_v42, 2  ;;  %4828 = vst.msk [vmem:[#allocation2 + $0x10] sm:$0xf] %vm4823_vm9, %v17690_v30  ;;  %4829 = vst.msk [vmem:[#allocation2 + $0x14] sm:$0xf] %vm4823_vm9, %v17690_v30 }
 0x301   : > { %v3909_v55 = vpop.f32.mrf.mxu1  ;;  %v3695_v29 = vadd.f32 %v3559_v32, %v17687_v46  ;;  %11426 = vmatprep.mubr.msk.bf16.mxu0 %vm12597_vm1, %v17582_v2  ;;  %4830 = vst.msk [vmem:[#allocation2 + $0x18] sm:$0xf] %vm4823_vm9, %v17690_v30  ;;  %4831 = vst.msk [vmem:[#allocation2 + $0x1c] sm:$0xf] %vm4823_vm9, %v17690_v30 }
 0x302   : > { %v14723_v59 = vadd.f32 %v3909_v55, %v3694_v16  ;;  %v11240_v51 = vpop.f32.mrf.mxu0  ;;  %v14739_v48 = vor.u32 %v4137_v1, %v4136_v44  ;;  %4832 = vst.msk [vmem:[#allocation2 + $0x20] sm:$0xf] %vm4823_vm9, %v17690_v30  ;;  %4833 = vst.msk [vmem:[#allocation2 + $0x24] sm:$0xf] %vm4823_vm9, %v17690_v30 }
 0x303   : > { %v11323_v28 = vpop.f32.mrf.mxu1  ;;  %4834 = vst.msk [vmem:[#allocation2 + $0x28] sm:$0xf] %vm4823_vm9, %v17690_v30  ;;  %4835 = vst.msk [vmem:[#allocation2 + $0x2c] sm:$0xf] %vm4823_vm9, %v17690_v30 }
 0x304   : > { %v3562_v49 = vpop.f32.mrf.mxu0  ;;  %4836 = vst.msk [vmem:[#allocation2 + $0x30] sm:$0xf] %vm4823_vm9, %v17690_v30  ;;  %4837 = vst.msk [vmem:[#allocation2 + $0x34] sm:$0xf] %vm4823_vm9, %v17690_v30  ;;  %v4139_v46 = vsel %vm4087_vm8, %v14727_v63, %v14739_v48  ;;  %v17692_v28 = vshrl.u32 %v14278_v0, 16 }
 0x305   : > { %v3914_v7 = vpop.f32.mrf.mxu1  ;;  %v3696_v17 = vadd.f32 %v3562_v49, %v14272_v35  ;;  %4838 = vst.msk [vmem:[#allocation2 + $0x38] sm:$0xf] %vm4823_vm9, %v17690_v30  ;;  %4839 = vst.msk [vmem:[#allocation2 + $0x3c] sm:$0xf] %vm4823_vm9, %v17690_v30 }
 0x306   : > { %v14734_v39 = vadd.f32 %v3914_v7, %v3695_v29  ;;  %v11241_v60 = vpop.f32.mrf.mxu0  ;;  %4840 = vst.msk [vmem:[#allocation2 + $0x40] sm:$0xf] %vm4823_vm9, %v17690_v30  ;;  %4841 = vst.msk [vmem:[#allocation2 + $0x44] sm:$0xf] %vm4823_vm9, %v17690_v30  ;;  %v4140_v49 = vrot.slane %v17692_v28, 1  ;;  %v17693_v7 = vshll.u32 %v14278_v0, 16 }
 0x307   : > { %v11326_v16 = vpop.f32.mrf.mxu1  ;;  %4842 = vst.msk [vmem:[#allocation2 + $0x48] sm:$0xf] %vm4823_vm9, %v17690_v30  ;;  %4843 = vst.msk [vmem:[#allocation2 + $0x4c] sm:$0xf] %vm4823_vm9, %v17690_v30  ;;  %v17694_v0 = vshrl.u32 %v14305_v6, 16 }
 0x308   : > { %v3567_v3 = vpop.f32.mrf.mxu0  ;;  %11427 = vmatmul.mubr.msk.bf16.gmra.mxu0 %vm538_vm3, %v4135_v40  ;;  %4844 = vst.msk [vmem:[#allocation2 + $0x50] sm:$0xf] %vm4823_vm9, %v17690_v30  ;;  %4845 = vst.msk [vmem:[#allocation2 + $0x54] sm:$0xf] %vm4823_vm9, %v17690_v30  ;;  %v4141_v25 = vrot.slane %v17693_v7, 2 }
 0x309   : > { %v3917_v21 = vpop.f32.mrf.mxu1  ;;  %4846 = vst.msk [vmem:[#allocation2 + $0x58] sm:$0xf] %vm4823_vm9, %v17690_v30  ;;  %4847 = vst.msk [vmem:[#allocation2 + $0x5c] sm:$0xf] %vm4823_vm9, %v17690_v30  ;;  %v3697_v35 = vadd.f32 %v3567_v3, %v17691_v56  ;;  %11430 = vmatprep.mubr.msk.bf16.mxu0 %vm12597_vm1, %v17582_v2  ;;  %v17695_v56 = vshll.u32 %v14305_v6, 16  ;;  %v17697_v6 = vld [vmem:[#allocation15_spill] sm:$0xff] }
 0x30a   : > { %4848 = vst.msk [vmem:[#allocation2 + $0x60] sm:$0xf] %vm4823_vm9, %v17690_v30  ;;  %4849 = vst.msk [vmem:[#allocation2 + $0x64] sm:$0xf] %vm4823_vm9, %v17690_v30  ;;  %v14834_v58 = vadd.f32 %v3917_v21, %v3696_v17  ;;  %v11244_v18 = vpop.f32.mrf.mxu0 }
 0x30b   : > { %4850 = vst.msk [vmem:[#allocation2 + $0x68] sm:$0xf] %vm4823_vm9, %v17690_v30  ;;  %4851 = vst.msk [vmem:[#allocation2 + $0x6c] sm:$0xf] %vm4823_vm9, %v17690_v30  ;;  %v11327_v11 = vpop.f32.mrf.mxu1  ;;  %v17696_v18 = vld [vmem:[#allocation14_spill] sm:$0xff] }
 0x30c   : > { %4852 = vst.msk [vmem:[#allocation2 + $0x70] sm:$0xf] %vm4823_vm9, %v17690_v30  ;;  %4853 = vst.msk [vmem:[#allocation2 + $0x74] sm:$0xf] %vm4823_vm9, %v17690_v30  ;;  %v3570_v32 = vpop.f32.mrf.mxu0 }
 0x30d   : > { %4854 = vst.msk [vmem:[#allocation2 + $0x78] sm:$0xf] %vm4823_vm9, %v17690_v30  ;;  %4855 = vst.msk [vmem:[#allocation2 + $0x7c] sm:$0xf] %vm4823_vm9, %v17690_v30  ;;  %v3922_v55 = vpop.f32.mrf.mxu1  ;;  %v3698_v29 = vadd.f32 %v3570_v32, %v14308_v24  ;;  %v4142_v24 = vor.u32 %v4141_v25, %v4140_v49 }
 0x30e   : > { %4856 = vst.msk [vmem:[#allocation2 + $0x80] sm:$0xf] %vm4823_vm9, %v17690_v30  ;;  %4857 = vst.msk [vmem:[#allocation2 + $0x84] sm:$0xf] %vm4823_vm9, %v17690_v30  ;;  %v14842_v51 = vadd.f32 %v3922_v55, %v3697_v35  ;;  %v11245_v44 = vpop.f32.mrf.mxu0  ;;  %v4145_v35 = vrot.slane %v17695_v56, 2 }
 0x30f   : > { %4858 = vst.msk [vmem:[#allocation2 + $0x88] sm:$0xf] %vm4823_vm9, %v17690_v30  ;;  %4859 = vst.msk [vmem:[#allocation2 + $0x8c] sm:$0xf] %vm4823_vm9, %v17690_v30  ;;  %v11330_v42 = vpop.f32.mrf.mxu1 }
 0x310   : > { %4860 = vst.msk [vmem:[#allocation2 + $0x90] sm:$0xf] %vm4823_vm9, %v17690_v30  ;;  %4861 = vst.msk [vmem:[#allocation2 + $0x94] sm:$0xf] %vm4823_vm9, %v17690_v30  ;;  %v3575_v1 = vpop.f32.mrf.mxu0  ;;  %11431 = vmatmul.mubr.msk.bf16.gmra.mxu0 %vm538_vm3, %v4139_v46 }
 0x311   : > { %4862 = vst.msk [vmem:[#allocation2 + $0x98] sm:$0xf] %vm4823_vm9, %v17690_v30  ;;  %4863 = vst.msk [vmem:[#allocation2 + $0x9c] sm:$0xf] %vm4823_vm9, %v17690_v30  ;;  %v3925_v17 = vpop.f32.mrf.mxu1  ;;  %v3699_v40 = vadd.f32 %v3575_v1, %v14326_v26  ;;  %11434 = vmatprep.mubr.msk.bf16.mxu0 %vm12597_vm1, %v17582_v2  ;;  %v4143_v26 = vsel %vm4087_vm8, %v14739_v48, %v4142_v24 }
 0x312   : > { %4864 = vst.msk [vmem:[#allocation2 + $0xa0] sm:$0xf] %vm4823_vm9, %v17690_v30  ;;  %4865 = vst.msk [vmem:[#allocation2 + $0xa4] sm:$0xf] %vm4823_vm9, %v17690_v30  ;;  %v14850_v60 = vadd.f32 %v3925_v17, %v3698_v29  ;;  %v11248_v63 = vpop.f32.mrf.mxu0  ;;  %v12394_v29 = vld [vmem:[%s17382_s4] sm:$0xff]  }
 0x313   : > { %4866 = vst.msk [vmem:[#allocation2 + $0xa8] sm:$0xf] %vm4823_vm9, %v17690_v30  ;;  %4867 = vst.msk [vmem:[#allocation2 + $0xac] sm:$0xf] %vm4823_vm9, %v17690_v30  ;;  %v11331_v16 = vpop.f32.mrf.mxu1  ;;  %11561 = vmatpush3.bf16.msra.mxu0 %v12394_v29 }
 0x314   : > { %4868 = vst.msk [vmem:[#allocation2 + $0xb0] sm:$0xf] %vm4823_vm9, %v17690_v30  ;;  %4869 = vst.msk [vmem:[#allocation2 + $0xb4] sm:$0xf] %vm4823_vm9, %v17690_v30  ;;  %v3578_v3 = vpop.f32.mrf.mxu0  ;;  %v4144_v30 = vrot.slane %v17694_v0, 1  ;;  %11732 = vmatprep.subr.bf16.mxu0 %v17582_v2  ;;  %v17699_v0 = vshll.u32 %v14350_v37, 16 }
 0x315   : > { %v3930_v21 = vpop.f32.mrf.mxu1  ;;  %v3700_v11 = vadd.f32 %v3578_v3, %v17696_v18  ;;  %v17698_v3 = vshrl.u32 %v14350_v37, 16  ;;  %v17701_v37 = vshrl.u32 %v14381_v54, 16 }
 0x316   : > { %v14859_v32 = vadd.f32 %v3930_v21, %v3699_v40  ;;  %v11249_v55 = vpop.f32.mrf.mxu0  ;;  %v4146_v7 = vor.u32 %v4145_v35, %v4144_v30  ;;  %v4149_v30 = vrot.slane %v17699_v0, 2 }
 0x317   : > { %v11334_v46 = vpop.f32.mrf.mxu1  ;;  %v4148_v21 = vrot.slane %v17698_v3, 1 }
 0x318   : > { %v3583_v28 = vpop.f32.mrf.mxu0  ;;  %11435 = vmatmul.mubr.msk.bf16.gmra.mxu0 %vm538_vm3, %v4143_v26  ;;  %v4147_v40 = vsel %vm4087_vm8, %v4142_v24, %v4146_v7  ;;  %v17700_v26 = vld [vmem:[#allocation13_spill] sm:$0xff] }
 0x319   : > { %v3933_v49 = vpop.f32.mrf.mxu1  ;;  %v3701_v25 = vadd.f32 %v3583_v28, %v17697_v6  ;;  %11438 = vmatprep.mubr.msk.bf16.mxu0 %vm12597_vm1, %v17582_v2  ;;  %v4152_v6 = vrot.slane %v17701_v37, 1 }
 0x31a   : > { %v14868_v44 = vadd.f32 %v3933_v49, %v3700_v11  ;;  %v11252_v48 = vpop.f32.mrf.mxu0 }
 0x31b   : > { %v11335_v42 = vpop.f32.mrf.mxu1 }
 0x31c   : > { %v3586_v1 = vpop.f32.mrf.mxu0 }
 0x31d   : > { %v3938_v17 = vpop.f32.mrf.mxu1  ;;  %v3702_v63 = vadd.f32 %v3586_v1, %v14384_v8  ;;  %v4150_v8 = vor.u32 %v4149_v30, %v4148_v21  ;;  %v17703_v30 = vld [vmem:[#allocation17_spill] sm:$0xff] }
 0x31e   : > { %v14875_v16 = vadd.f32 %v3938_v17, %v3701_v25  ;;  %v11253_v56 = vpop.f32.mrf.mxu0  ;;  %v17702_v25 = vshll.u32 %v14381_v54, 16 }
 0x31f   : > { %v11338_v35 = vpop.f32.mrf.mxu1  ;;  %v4151_v17 = vsel %vm4087_vm8, %v4146_v7, %v4150_v8 }
 0x320   : > { %v3591_v18 = vpop.f32.mrf.mxu0  ;;  %11439 = vmatmul.mubr.msk.bf16.gmra.mxu0 %vm538_vm3, %v4147_v40  ;;  %v4153_v48 = vrot.slane %v17702_v25, 2 }
 0x321   : > { %v3941_v11 = vpop.f32.mrf.mxu1  ;;  %v3703_v55 = vadd.f32 %v3591_v18, %v17700_v26  ;;  %11442 = vmatprep.mubr.msk.bf16.mxu0 %vm12597_vm1, %v17582_v2 }
 0x322   : > { %v14883_v46 = vadd.f32 %v3941_v11, %v3702_v63  ;;  %v11256_v24 = vpop.f32.mrf.mxu0  ;;  %v4154_v0 = vor.u32 %v4153_v48, %v4152_v6 }
 0x323   : > { %v11339_v29 = vpop.f32.mrf.mxu1  ;;  %v17704_v24 = vshrl.u32 %v14426_v45, 16 }
 0x324   : > { %v3594_v28 = vpop.f32.mrf.mxu0  ;;  %v4155_v7 = vsel %vm4087_vm8, %v4150_v8, %v4154_v0 }
 0x325   : > { %v3946_v49 = vpop.f32.mrf.mxu1  ;;  %v3704_v42 = vadd.f32 %v3594_v28, %v14420_v20  ;;  %v4156_v29 = vrot.slane %v17704_v24, 1  ;;  %v17705_v28 = vshll.u32 %v14426_v45, 16  ;;  %v17707_v45 = vshrl.u32 %v14453_v23, 16 }
 0x326   : > { %v14892_v1 = vadd.f32 %v3946_v49, %v3703_v55  ;;  %v11257_v40 = vpop.f32.mrf.mxu0 }
 0x327   : > { %v11342_v63 = vpop.f32.mrf.mxu1  ;;  %v4157_v49 = vrot.slane %v17705_v28, 2 }
 0x328   : > { %v3599_v3 = vpop.f32.mrf.mxu0  ;;  %11443 = vmatmul.mubr.msk.bf16.gmra.mxu0 %vm538_vm3, %v4151_v17 }
 0x329   : > { %v3949_v21 = vpop.f32.mrf.mxu1  ;;  %v3705_v56 = vadd.f32 %v3599_v3, %v17703_v30  ;;  %11446 = vmatprep.mubr.msk.bf16.mxu0 %vm12597_vm1, %v17582_v2  ;;  %v4160_v30 = vrot.slane %v17707_v45, 1  ;;  %v17712_v45 = vshll.u32 %v14495_v53, 16 }
 0x32a   : > { %v14897_v35 = vadd.f32 %v3949_v21, %v3704_v42  ;;  %v11260_v54 = vpop.f32.mrf.mxu0  ;;  %v17706_v42 = vld [vmem:[#allocation18_spill] sm:$0xff] }
 0x32b   : > { %v11343_v20 = vpop.f32.mrf.mxu1 }
 0x32c   : > { %v3602_v18 = vpop.f32.mrf.mxu0  ;;  %v17709_v20 = vld [vmem:[#allocation16_spill] sm:$0xff] }
 0x32d   : > { %v3954_v11 = vpop.f32.mrf.mxu1  ;;  %v3706_v26 = vadd.f32 %v3602_v18, %v14456_v9  ;;  %v4158_v9 = vor.u32 %v4157_v49, %v4156_v29 }
 0x32e   : > { %v14903_v55 = vadd.f32 %v3954_v11, %v3705_v56  ;;  %v11261_v37 = vpop.f32.mrf.mxu0  ;;  %v17708_v56 = vshll.u32 %v14453_v23, 16 }
 0x32f   : > { %v11346_v6 = vpop.f32.mrf.mxu1  ;;  %v17710_v37 = vld [vmem:[#allocation20_spill] sm:$0xff] }
 0x330   : > { %v3607_v25 = vpop.f32.mrf.mxu0  ;;  %11447 = vmatmul.mubr.msk.bf16.gmra.mxu0 %vm538_vm3, %v4155_v7  ;;  %v4161_v54 = vrot.slane %v17708_v56, 2  ;;  %v4159_v7 = vsel %vm4087_vm8, %v4154_v0, %v4158_v9 }
 0x331   : > { %v3957_v48 = vpop.f32.mrf.mxu1  ;;  %v3707_v17 = vadd.f32 %v3607_v25, %v17706_v42  ;;  %11450 = vmatprep.mubr.msk.bf16.mxu0 %vm12597_vm1, %v17582_v2 }
 0x332   : > { %v14911_v40 = vadd.f32 %v3957_v48, %v3706_v26  ;;  %v11264_v8 = vpop.f32.mrf.mxu0  ;;  %v4162_v49 = vor.u32 %v4161_v54, %v4160_v30  ;;  %v4165_v30 = vrot.slane %v17712_v45, 2 }
 0x333   : > { %v11347_v63 = vpop.f32.mrf.mxu1 }
 0x334   : > { %v3610_v3 = vpop.f32.mrf.mxu0  ;;  %v4163_v0 = vsel %vm4087_vm8, %v4158_v9, %v4162_v49 }
 0x335   : > { %v3962_v21 = vpop.f32.mrf.mxu1  ;;  %v3708_v18 = vadd.f32 %v3610_v3, %v17709_v20  ;;  %v17711_v3 = vshrl.u32 %v14495_v53, 16 }
 0x336   : > { %v14920_v11 = vadd.f32 %v3962_v21, %v3707_v17  ;;  %v11265_v26 = vpop.f32.mrf.mxu0 }
 0x337   : > { %v11350_v24 = vpop.f32.mrf.mxu1  ;;  %v4164_v21 = vrot.slane %v17711_v3, 1 }
 0x338   : > { %v3615_v28 = vpop.f32.mrf.mxu0  ;;  %11451 = vmatmul.mubr.msk.bf16.gmra.mxu0 %vm538_vm3, %v4159_v7  ;;  %v17713_v7 = vld [vmem:[#allocation21_spill] sm:$0xff] }
 0x339   : > { %v3965_v29 = vpop.f32.mrf.mxu1  ;;  %v3709_v6 = vadd.f32 %v3615_v28, %v17710_v37  ;;  %11454 = vmatprep.mubr.msk.bf16.mxu0 %vm12597_vm1, %v17582_v2  ;;  %v17714_v37 = vshrl.u32 %v14513_v50, 16 }
 0x33a   : > { %v14925_v25 = vadd.f32 %v3965_v29, %v3708_v18  ;;  %v11268_v23 = vpop.f32.mrf.mxu0 }
 0x33b   : > { %v11351_v48 = vpop.f32.mrf.mxu1  ;;  %v17715_v23 = vshll.u32 %v14513_v50, 16 }
 0x33c   : > { %v3618_v42 = vpop.f32.mrf.mxu0 }
 0x33d   : > { %v3970_v17 = vpop.f32.mrf.mxu1  ;;  %v3710_v8 = vadd.f32 %v3618_v42, %v14516_v12  ;;  %v4166_v12 = vor.u32 %v4165_v30, %v4164_v21  ;;  %v4169_v48 = vrot.slane %v17715_v23, 2 }
 0x33e   : > { %v14931_v63 = vadd.f32 %v3970_v17, %v3709_v6  ;;  %v11269_v56 = vpop.f32.mrf.mxu0  ;;  %v4168_v6 = vrot.slane %v17714_v37, 1 }
 0x33f   : > { %v11354_v54 = vpop.f32.mrf.mxu1 }
 0x340   : > { %v3623_v20 = vpop.f32.mrf.mxu0  ;;  %11455 = vmatmul.mubr.msk.bf16.gmra.mxu0 %vm538_vm3, %v4163_v0  ;;  %v4167_v0 = vsel %vm4087_vm8, %v4162_v49, %v4166_v12  ;;  %v4170_v56 = vor.u32 %v4169_v48, %v4168_v6  ;;  %v17716_v54 = vld [vmem:[#allocation19_spill] sm:$0xff] }
 0x341   : > { %v3973_v18 = vpop.f32.mrf.mxu1  ;;  %v3711_v26 = vadd.f32 %v3623_v20, %v17713_v7  ;;  %11458 = vmatprep.mubr.msk.bf16.mxu0 %vm12597_vm1, %v17582_v2 }
 0x342   : > { %v14939_v9 = vadd.f32 %v3973_v18, %v3710_v8  ;;  %v11272_v24 = vpop.f32.mrf.mxu0  ;;  %v12393_v8 = vld [vmem:[%s12714_s25 + $0xb4] ss:$0 sps:$4 sm:$0xff]   ;;  %s12599_s25 = smov [#allocation3]  }
 0x343   : > { %v11355_v28 = vpop.f32.mrf.mxu1  ;;  %v4173_v50 = vshrl.u32 %v12393_v8, 16  ;;  %s12538_s9 = sshll.u32 %s12599_s25, 4  ;;  %s12539_s9 = int_to_ptr.vmem [resolvable:$false] %s12538_s9 }
 0x344   : > { %v3626_v29 = vpop.f32.mrf.mxu0  ;;  %v4171_v28 = vsel %vm4087_vm8, %v4166_v12, %v4170_v56  ;;  %s12540_s17 = scalar_lea.vmem %s12539_s9, 32  ;;  %p12541_p0 = scmp.lt.s32.totalorder %s9563_s23, %s12539_s9 }
 0x345   : > { %v3978_v53 = vpop.f32.mrf.mxu1  ;;  %v3712_v42 = vadd.f32 %v3626_v29, %v14540_v36  ;;  %v4176_v36 = vshll.u32 %v12393_v8, 16  ;;  %v4175_v37 = vrot.slane %v4173_v50, 1  ;;  %p12542_p1 = scmp.lt.s32.totalorder %s12540_s17, %s12534_s13 }
 0x346   : > { %v14948_v17 = vadd.f32 %v3978_v53, %v3711_v26  ;;  %v11273_v3 = vpop.f32.mrf.mxu0 }
 0x347   : > { %v11358_v45 = vpop.f32.mrf.mxu1  ;;  %v4178_v6 = vrot.slane %v4176_v36, 2  ;;  %v17717_v3 = vld [vmem:[#allocation23_spill] sm:$0xff]  ;;  %p12543_p2 = por %p12542_p1, %p12541_p0 }
 0x348   : > { %v3631_v21 = vpop.f32.mrf.mxu0  ;;  %11459 = vmatmul.mubr.msk.bf16.gmra.mxu0 %vm538_vm3, %v4167_v0 }
 0x349   : > { %v3981_v30 = vpop.f32.mrf.mxu1  ;;  %v3713_v20 = vadd.f32 %v3631_v21, %v17716_v54  ;;  %11462 = vmatprep.mubr.msk.bf16.mxu0 %vm12597_vm1, %v17582_v2  ;;  %v4179_v12 = vor.u32 %v4178_v6, %v4175_v37  ;;  %p12544_p3 = pnand %p12543_p2, %p12537_p13 }
 0x34a   : > { %v14954_v18 = vadd.f32 %v3981_v30, %v3712_v42  ;;  %v11276_v7 = vpop.f32.mrf.mxu0 }
 0x34b   : > { %v11359_v26 = vpop.f32.mrf.mxu1  ;;  %v4180_v36 = vsel %vm4087_vm8, %v4170_v56, %v4179_v12 }
 0x34c   : > { %v3634_v49 = vpop.f32.mrf.mxu0 }
 0x34d   : > { %v3986_v24 = vpop.f32.mrf.mxu1  ;;  %v3714_v29 = vadd.f32 %v3634_v49, %v14561_v31 }
 0x34e   : > { %v14960_v53 = vadd.f32 %v3986_v24, %v3713_v20  ;;  %v11277_v23 = vpop.f32.mrf.mxu0 }
 0x34f   : > { %v11362_v48 = vpop.f32.mrf.mxu1 }
 0x350   : > { %v3639_v42 = vpop.f32.mrf.mxu0  ;;  %11463 = vmatmul.mubr.msk.bf16.gmra.mxu0 %vm538_vm3, %v4171_v28 }
 0x351   : > { %v3989_v0 = vpop.f32.mrf.mxu1  ;;  %v3715_v8 = vadd.f32 %v3639_v42, %v17717_v3  ;;  %11466 = vmatprep.mubr.msk.bf16.mxu0 %vm12597_vm1, %v17582_v2 }
 0x352   : > { %v14964_v45 = vadd.f32 %v3989_v0, %v3714_v29  ;;  %v11280_v21 = vpop.f32.mrf.mxu0 }
 0x353   : > { %v11363_v31 = vpop.f32.mrf.mxu1 }
 0x354   : > { %v3642_v30 = vpop.f32.mrf.mxu0 }
 0x355   : > { %v3994_v54 = vpop.f32.mrf.mxu1  ;;  %v3716_v20 = vadd.f32 %v3642_v30, %v14580_v61 }
 0x356   : > { %v14969_v50 = vadd.f32 %v3994_v54, %v3715_v8  ;;  %v11281_v7 = vpop.f32.mrf.mxu0 }
 0x357   : > { %v11366_v26 = vpop.f32.mrf.mxu1 }
 0x358   : > { %v3647_v49 = vpop.f32.mrf.mxu0  ;;  %11467 = vmatmul.mubr.msk.bf16.gmra.mxu0 %vm538_vm3, %v4180_v36 }
 0x359   : > { %v3997_v24 = vpop.f32.mrf.mxu1  ;;  %v3717_v28 = vadd.f32 %v3647_v49, %v14591_v41  ;;  %11470 = vmatprep.mubr.msk.bf16.mxu0 %vm12597_vm1, %v17582_v2 }
 0x35a   : > { %v14974_v29 = vadd.f32 %v3997_v24, %v3716_v20  ;;  %v11284_v37 = vpop.f32.mrf.mxu0 }
 0x35b   : > { %v11367_v6 = vpop.f32.mrf.mxu1 }
 0x35c   : > { %v3650_v61 = vpop.f32.mrf.mxu0 }
 0x35d   : > { %v4002_v23 = vpop.f32.mrf.mxu1  ;;  %v3718_v48 = vadd.f32 %v3650_v61, %v14597_v43 }
 0x35e   : > { %v14979_v56 = vadd.f32 %v4002_v23, %v3717_v28  ;;  %v11285_v42 = vpop.f32.mrf.mxu0 }
 0x35f   : > { %v11370_v0 = vpop.f32.mrf.mxu1 }
 0x360   : > { %v3655_v3 = vpop.f32.mrf.mxu0  ;;  %11471 = vmatmul.mubr.msk.bf16.gmra.mxu0 %vm538_vm3, %v4179_v12 }
 0x361   : > { %v4005_v8 = vpop.f32.mrf.mxu1  ;;  %v3719_v41 = vadd.f32 %v3655_v3, %v14604_v57  ;;  %11562 = vmatprep.mubr.msk.bf16.mxu0 %vm12597_vm1, %v17582_v2 }
 0x362   : > { %v14983_v21 = vadd.f32 %v4005_v8, %v3718_v48  ;;  %v11288_v31 = vpop.f32.mrf.mxu0 }
 0x363   : > { %v11371_v30 = vpop.f32.mrf.mxu1 }
 0x364   : > { %v3658_v54 = vpop.f32.mrf.mxu0 }
 0x365   : > { %v4010_v20 = vpop.f32.mrf.mxu1  ;;  %v3720_v43 = vadd.f32 %v3658_v54, %v14614_v62 }
 0x366   : > { %v14988_v36 = vadd.f32 %v4010_v20, %v3719_v41  ;;  %v11289_v7 = vpop.f32.mrf.mxu0 }
 0x367   : > { %v11374_v26 = vpop.f32.mrf.mxu1 }
 0x368   : > { %v3663_v49 = vpop.f32.mrf.mxu0 }
 0x369   : > { %v4013_v24 = vpop.f32.mrf.mxu1  ;;  %v3721_v12 = vadd.f32 %v3663_v49, %v14623_v33 }
 0x36a   : > { %v14991_v57 = vadd.f32 %v4013_v24, %v3720_v43  ;;  %v11292_v28 = vpop.f32.mrf.mxu0 }
 0x36b   : > { %v11375_v37 = vpop.f32.mrf.mxu1 }
 0x36c   : > { %v3666_v6 = vpop.f32.mrf.mxu0 }
 0x36d   : > { %v4018_v61 = vpop.f32.mrf.mxu1  ;;  %v3722_v23 = vadd.f32 %v3666_v6, %v14628_v22 }
 0x36e   : > { %v14994_v48 = vadd.f32 %v4018_v61, %v3721_v12  ;;  %v11293_v42 = vpop.f32.mrf.mxu0 }
 0x36f   : > { %v11378_v62 = vpop.f32.mrf.mxu1 }
 0x370   : > { %v3671_v0 = vpop.f32.mrf.mxu0 }
 0x371   : > { %v4021_v3 = vpop.f32.mrf.mxu1  ;;  %v3723_v8 = vadd.f32 %v3671_v0, %v14634_v47 }
 0x372   : > { %v14997_v41 = vadd.f32 %v4021_v3, %v3722_v23  ;;  %v11296_v31 = vpop.f32.mrf.mxu0 }
 0x373   : > { %v11379_v33 = vpop.f32.mrf.mxu1 }
 0x374   : > { %v3674_v30 = vpop.f32.mrf.mxu0  ;;  %v15014_v33 = vpop.permute.xlu0 %4579 }
 0x375   : > { %v4026_v54 = vpop.f32.mrf.mxu1  ;;  %v3724_v20 = vadd.f32 %v3674_v30, %v14642_v10  ;;  %v15010_v10 = vld [vmem:[%s17381_s3] ss:$0 sm:$0xff]  ;;  %17718 = vst [vmem:[#allocation24_spill] sm:$0xff] %v15014_v33 }
 0x376   : > { %v15000_v43 = vadd.f32 %v4026_v54, %v3723_v8  ;;  %v11297_v7 = vpop.f32.mrf.mxu0 }
 0x377   : > { %v11382_v22 = vpop.f32.mrf.mxu1  ;;  %v5079_v7 = vld [vmem:[#allocation2 + $0x4] sm:$0xf] }
 0x378   : > { %v3679_v26 = vpop.f32.mrf.mxu0  ;;  %v5078_v22 = vld [vmem:[#allocation2] sm:$0xc] }
 0x379   : > { %v4029_v49 = vpop.f32.mrf.mxu1  ;;  %v3725_v24 = vadd.f32 %v3679_v26, %v14650_v52 }
 0x37a   : > { %v15003_v12 = vadd.f32 %v4029_v49, %v3724_v20  ;;  %v11300_v28 = vpop.f32.mrf.mxu0 }
 0x37b   : > { %v11383_v47 = vpop.f32.mrf.mxu1 }
 0x37c   : > { %v3682_v37 = vpop.f32.mrf.mxu0  ;;  %v5122_v47 = vld [vmem:[#allocation2] sm:$0x8] }
 0x37d   : > { %v4034_v6 = vpop.f32.mrf.mxu1 }
 0x37e   : > { %v15005_v61 = vadd.f32 %v4034_v6, %v3725_v24  ;;  %v11301_v23 = vpop.f32.mrf.mxu0 }
 0x37f   : > { %v11386_v42 = vpop.f32.mrf.mxu1 }
 0x380   : > { %v4281_v62 = vpop.f32.mrf.mxu0  ;;  %v15020_v42 = vpop.permute.xlu0 %4584 }
 0x381   : > { %v4037_v0 = vpop.f32.mrf.mxu1  ;;  %v4447_v3 = vadd.f32 %v4281_v62, %v14659_v13  ;;  %v9995_v13 = vcombine.low %v5078_v22, %v5079_v7  ;;  %17719 = vst [vmem:[#allocation22_spill] sm:$0xff] %v15020_v42 }
 0x382   : > { %v11392_v52 = vpop.f32.mrf.mxu0 }
 0x383   : > { %v11387_v8 = vpop.f32.mrf.mxu1  ;;  %v4495_v31 = vadd.f32 %v15010_v10, %v4447_v3  ;;  %v9952_v3 = vcombine.low %v5122_v47, %v5079_v7  ;;  %v15025_v52 = vpop.permute.xlu1 %4589  ;;  %v5549_v22 = vshll.u32 %v9995_v13, 16 }
 0x384   : > { %v4284_v30 = vpop.f32.mrf.mxu0  ;;  %17720 = vst [vmem:[#allocation26_spill] sm:$0xff] %v15025_v52 }
 0x385   : > { %v4536_v54 = vmax.f32 %v4495_v31, 0.0  ;;  %v4448_v20 = vadd.f32 %v4284_v30, %v14667_v38  ;;  %v5546_v31 = vshrl.u32 %v9995_v13, 16 }
 0x386   : > { %v11393_v26 = vpop.f32.mrf.mxu0 }
 0x387   : > { %v4782_v49 = vmul.f32 %v15014_v33, %v4536_v54  ;;  %v4496_v24 = vadd.f32 %v15010_v10, %v4448_v20  ;;  %v5548_v7 = vrot.slane %v5546_v31, 2 }
 0x388   : > { %v4289_v28 = vpop.f32.mrf.mxu0 }
 0x389   : > { %v10258_v37 = vpack.c.bf16 %v4782_v49, %v4782_v49  ;;  %v4537_v6 = vmax.f32 %v4496_v24, 0.0  ;;  %v4449_v23 = vadd.f32 %v4289_v28, %v14676_v27  ;;  %v6010_v24 = vshrl.u32 %v9952_v3, 16 }
 0x38a   : > { %v11396_v62 = vpop.f32.mrf.mxu0  ;;  %v6013_v28 = vshll.u32 %v9952_v3, 16 }
 0x38b   : > { %5037 = vst.msk [vmem:[#allocation2 + $0xc] sm:$0xf] %vm4823_vm9, %v10258_v37  ;;  %v4783_v38 = vmul.f32 %v15020_v42, %v4537_v6  ;;  %v4497_v0 = vadd.f32 %v15010_v10, %v4449_v23  ;;  %v5551_v62 = vrot.slane %v5549_v22, 3 }
 0x38c   : > { %v4292_v8 = vpop.f32.mrf.mxu0 }
 0x38d   : > { %v10259_v30 = vpack.c.bf16 %v4783_v38, %v4783_v38  ;;  %v4538_v54 = vmax.f32 %v4497_v0, 0.0  ;;  %v4450_v20 = vadd.f32 %v4292_v8, %v14681_v5  ;;  %v15032_v38 = vpop.permute.xlu1 %4594  ;;  %v5231_v0 = vrot.slane %v9952_v3, 3 }
 0x38e   : > { %v11397_v27 = vpop.f32.mrf.mxu0  ;;  %17721 = vst [vmem:[#allocation27_spill] sm:$0xff] %v15032_v38 }
 0x38f   : > { %5038 = vst.msk [vmem:[#allocation2 + $0x10] sm:$0xf] %vm4823_vm9, %v10259_v30  ;;  %v4784_v26 = vmul.f32 %v15025_v52, %v4538_v54  ;;  %v4498_v49 = vadd.f32 %v15010_v10, %v4450_v20  ;;  %v6012_v54 = vrot.slane %v6010_v24, 3  ;;  %v6015_v20 = vrot.slane %v6013_v28, 4 }
 0x390   : > { %v4297_v37 = vpop.f32.mrf.mxu0 }
 0x391   : > { %v10260_v47 = vpack.c.bf16 %v4784_v26, %v4784_v26  ;;  %v4539_v6 = vmax.f32 %v4498_v49, 0.0  ;;  %v4451_v23 = vadd.f32 %v4297_v37, %v14687_v19  ;;  %v12397_v19 = vld [vmem:[%s17382_s4 + $0x10] sm:$0xff]  }
 0x392   : > { %v11400_v5 = vpop.f32.mrf.mxu0  ;;  %v12396_v13 = vld [vmem:[#allocation2 + $0x8] sm:$0xff]  }
 0x393   : > { %5039 = vst.msk [vmem:[#allocation2 + $0x14] sm:$0xf] %vm4823_vm9, %v10260_v47  ;;  %v4785_v8 = vmul.f32 %v15032_v38, %v4539_v6  ;;  %v4499_v30 = vadd.f32 %v15010_v10, %v4451_v23  ;;  %v5232_v31 = vrot.slane %v12396_v13, 3  ;;  %v5554_v22 = vshrl.u32 %v12396_v13, 16  ;;  %v15041_v5 = vpop.permute.xlu0 %4599 }
 0x394   : > { %v4300_v27 = vpop.f32.mrf.mxu0  ;;  %v5557_v26 = vshll.u32 %v12396_v13, 16  ;;  %v5552_v47 = vor.u32 %v5551_v62, %v5548_v7  ;;  %17722 = vst [vmem:[#allocation30_spill] sm:$0xff] %v15041_v5  ;;  %v6016_v13 = vor.u32 %v6015_v20, %v6012_v54 }
 0x395   : > { %v10261_v49 = vpack.c.bf16 %v4785_v8, %v4785_v8  ;;  %v4540_v37 = vmax.f32 %v4499_v30, 0.0  ;;  %v4452_v3 = vadd.f32 %v4300_v27, %v14695_v34  ;;  %v5233_v24 = vsel %vm496_vm2, %v5231_v0, %v5232_v31  ;;  %v6413_v34 = vld [vmem:[#allocation2 + $0xc] sm:$0xf] }
 0x396   : > { %v11401_v6 = vpop.f32.mrf.mxu0  ;;  %v5556_v28 = vrot.slane %v5554_v22, 2  ;;  %v5559_v23 = vrot.slane %v5557_v26, 3  ;;  %v6017_v38 = vrot.slane %v5554_v22, 3  ;;  %11477 = vmatmul.mubr.msk.bf16.vlgmr.msra.gmra.mxu1 %vm5278_vm10, %v5233_v24  ;;  %v6018_v8 = vrot.slane %v5557_v26, 4  ;;  %v6414_v7 = vld [vmem:[#allocation2 + $0x10] sm:$0xf] }
 0x397   : > { %5040 = vst.msk [vmem:[#allocation2 + $0x18] sm:$0xf] %vm4823_vm9, %v10261_v49  ;;  %v4786_v52 = vmul.f32 %v15041_v5, %v4540_v37  ;;  %v4500_v42 = vadd.f32 %v15010_v10, %v4452_v3  ;;  %11647 = vmatpush3.bf16.msra.mxu1 %v12397_v19  ;;  %11480 = vmatprep.mubr.msk.bf16.mxu1 %vm12597_vm1, %v17582_v2  ;;  %v15054_v3 = vpop.permute.xlu1 %4604 }
 0x398   : > { %v4305_v62 = vpop.f32.mrf.mxu0  ;;  %v5560_v30 = vor.u32 %v5559_v23, %v5556_v28  ;;  %v15050_v0 = vcombine.low %v6413_v34, %v6414_v7  ;;  %11818 = vmatprep.subr.bf16.mxu1 %v17582_v2  ;;  %v6019_v37 = vor.u32 %v6018_v8, %v6017_v38  ;;  %17724 = vst [vmem:[#allocation25_spill] sm:$0xff] %v15054_v3  ;;  %v15067_v8 = vpop.permute.xlu0 %4609 }
 0x399   : > { %v10262_v27 = vpack.c.bf16 %v4786_v52, %v4786_v52  ;;  %v4541_v22 = vmax.f32 %v4500_v42, 0.0  ;;  %v4453_v49 = vadd.f32 %v4305_v62, %v14704_v15  ;;  %17725 = vst [vmem:[#allocation31_spill] sm:$0xff] %v15067_v8 }
 0x39a   : > { %17723 = vst [vmem:[#allocation28_spill] sm:$0xff] %v15050_v0  ;;  %v11404_v54 = vpop.f32.mrf.mxu0  ;;  %v5561_v20 = vsel %vm809_vm4, %v5552_v47, %v5560_v30  ;;  %v12398_v26 = vld [vmem:[#allocation2 + $0x10] sm:$0xff]   ;;  %v15062_v42 = vsel %vm1270_vm5, %v6016_v13, %v6019_v37 }
 0x39b   : > { %5041 = vst.msk [vmem:[#allocation2 + $0x1c] sm:$0xf] %vm4823_vm9, %v10262_v27  ;;  %v4787_v19 = vmul.f32 %v15054_v3, %v4541_v22  ;;  %v4501_v6 = vadd.f32 %v15010_v10, %v4453_v49  ;;  %11563 = vmatmul.mubr.msk.bf16.vlgmr.msra.gmra.mxu0 %vm5278_vm10, %v5561_v20  ;;  %v5234_v52 = vrot.slane %v12398_v26, 3  ;;  %v5563_v38 = vshrl.u32 %v12398_v26, 16  ;;  %v6415_v49 = vld [vmem:[#allocation2 + $0x14] sm:$0xf] }
 0x39c   : > { %v4308_v15 = vpop.f32.mrf.mxu0  ;;  %11566 = vmatprep.mubr.msk.bf16.mxu0 %vm12597_vm1, %v17582_v2  ;;  %v5566_v24 = vshll.u32 %v12398_v26, 16 }
 0x39d   : > { %v10263_v47 = vpack.c.bf16 %v4787_v19, %v4787_v19  ;;  %v4542_v28 = vmax.f32 %v4501_v6, 0.0  ;;  %v4454_v23 = vadd.f32 %v4308_v15, %v14709_v14  ;;  %v5235_v7 = vsel %vm496_vm2, %v5232_v31, %v5234_v52 }
 0x39e   : > { %v11405_v34 = vpop.f32.mrf.mxu0  ;;  %v5565_v62 = vrot.slane %v5563_v38, 2  ;;  %v5568_v27 = vrot.slane %v5566_v24, 3  ;;  %11481 = vmatmul.mubr.msk.bf16.gmra.mxu1 %vm5278_vm10, %v5235_v7  ;;  %v6021_v54 = vrot.slane %v5563_v38, 3  ;;  %v6416_v20 = vld [vmem:[#allocation2 + $0x18] sm:$0xf]  ;;  %v6022_v19 = vrot.slane %v5566_v24, 4 }
 0x39f   : > { %5042 = vst.msk [vmem:[#allocation2 + $0x20] sm:$0xf] %vm4823_vm9, %v10263_v47  ;;  %v4788_v13 = vmul.f32 %v15067_v8, %v4542_v28  ;;  %v4502_v22 = vadd.f32 %v15010_v10, %v4454_v23  ;;  %11484 = vmatprep.mubr.msk.bf16.mxu1 %vm12597_vm1, %v17582_v2  ;;  %v15076_v31 = vcombine.low %v6415_v49, %v6416_v20  ;;  %v15079_v28 = vpop.permute.xlu1 %4614 }
 0x3a0   : > { %v4313_v26 = vpop.f32.mrf.mxu0  ;;  %v5569_v14 = vor.u32 %v5568_v27, %v5565_v62  ;;  %17727 = vst [vmem:[#allocation32_spill] sm:$0xff] %v15079_v28  ;;  %v6023_v38 = vor.u32 %v6022_v19, %v6021_v54 }
 0x3a1   : > { %17726 = vst [vmem:[#allocation29_spill] sm:$0xff] %v15076_v31  ;;  %v10264_v6 = vpack.c.bf16 %v4788_v13, %v4788_v13  ;;  %v4543_v15 = vmax.f32 %v4502_v22, 0.0  ;;  %v4455_v47 = vadd.f32 %v4313_v26, %v14715_v4  ;;  %v15092_v26 = vpop.permute.xlu0 %4619 }
 0x3a2   : > { %v11408_v23 = vpop.f32.mrf.mxu0  ;;  %v5570_v34 = vsel %vm809_vm4, %v5560_v30, %v5569_v14  ;;  %v12399_v7 = vld [vmem:[#allocation2 + $0x18] sm:$0xff]   ;;  %v15090_v54 = vsel %vm1270_vm5, %v6019_v37, %v6023_v38  ;;  %17728 = vst [vmem:[#allocation7_spill] sm:$0xff] %v15092_v26 }
 0x3a3   : > { %5043 = vst.msk [vmem:[#allocation2 + $0x24] sm:$0xf] %vm4823_vm9, %v10264_v6  ;;  %v4789_v62 = vmul.f32 %v15079_v28, %v4543_v15  ;;  %v4503_v27 = vadd.f32 %v15010_v10, %v4455_v47  ;;  %11567 = vmatmul.mubr.msk.bf16.gmra.mxu0 %vm5278_vm10, %v5570_v34  ;;  %v5236_v13 = vrot.slane %v12399_v7, 3  ;;  %v5572_v4 = vshrl.u32 %v12399_v7, 16  ;;  %v15102_v28 = vpop.permute.xlu1 %4624 }
 0x3a4   : > { %v4316_v24 = vpop.f32.mrf.mxu0  ;;  %11570 = vmatprep.mubr.msk.bf16.mxu0 %vm12597_vm1, %v17582_v2  ;;  %v5575_v22 = vshll.u32 %v12399_v7, 16  ;;  %17729 = vst [vmem:[#allocation8_spill] sm:$0xff] %v15102_v28 }
 0x3a5   : > { %v10265_v49 = vpack.c.bf16 %v4789_v62, %v4789_v62  ;;  %v4544_v20 = vmax.f32 %v4503_v27, 0.0  ;;  %v4456_v30 = vadd.f32 %v4316_v24, %v14723_v59  ;;  %v5237_v6 = vsel %vm496_vm2, %v5234_v52, %v5236_v13 }
 0x3a6   : > { %v11409_v19 = vpop.f32.mrf.mxu0  ;;  %v5574_v15 = vrot.slane %v5572_v4, 2  ;;  %v5577_v47 = vrot.slane %v5575_v22, 3  ;;  %11485 = vmatmul.mubr.msk.bf16.gmra.mxu1 %vm5278_vm10, %v5237_v6  ;;  %v6418_v59 = vld [vmem:[#allocation2 + $0x20] sm:$0xf]  ;;  %v6025_v62 = vrot.slane %v5572_v4, 3  ;;  %v6026_v27 = vrot.slane %v5575_v22, 4 }
 0x3a7   : > { %5044 = vst.msk [vmem:[#allocation2 + $0x28] sm:$0xf] %vm4823_vm9, %v10265_v49  ;;  %v4790_v23 = vmul.f32 %v15092_v26, %v4544_v20  ;;  %v4504_v34 = vadd.f32 %v15010_v10, %v4456_v30  ;;  %11488 = vmatprep.mubr.msk.bf16.mxu1 %vm12597_vm1, %v17582_v2  ;;  %v6417_v49 = vld [vmem:[#allocation2 + $0x1c] sm:$0xf] }
 0x3a8   : > { %v4321_v7 = vpop.f32.mrf.mxu0  ;;  %v5578_v37 = vor.u32 %v5577_v47, %v5574_v15  ;;  %v6027_v26 = vor.u32 %v6026_v27, %v6025_v62  ;;  %v15107_v8 = vcombine.low %v6417_v49, %v6418_v59  ;;  %v15122_v62 = vpop.permute.xlu0 %4629  ;;  %v7403_v49 = vshll.u32 %v15050_v0, 16 }
 0x3a9   : > { %v10266_v52 = vpack.c.bf16 %v4790_v23, %v4790_v23  ;;  %v4545_v24 = vmax.f32 %v4504_v34, 0.0  ;;  %v4457_v19 = vadd.f32 %v4321_v7, %v14734_v39  ;;  %17731 = vst [vmem:[#allocation9_spill] sm:$0xff] %v15122_v62 }
 0x3aa   : > { %v11412_v20 = vpop.f32.mrf.mxu0  ;;  %v5579_v30 = vsel %vm809_vm4, %v5569_v14, %v5578_v37  ;;  %v15105_v6 = vld [vmem:[#allocation2 + $0x20] sm:$0xff]   ;;  %17730 = vst [vmem:[#allocation11_spill] sm:$0xff] %v15107_v8  ;;  %v15119_v23 = vsel %vm1270_vm5, %v6023_v38, %v6027_v26  ;;  %v7405_v3 = vrot.slane %v7403_v49, 1 }
 0x3ab   : > { %5045 = vst.msk [vmem:[#allocation2 + $0x2c] sm:$0xf] %vm4823_vm9, %v10266_v52  ;;  %v4791_v4 = vmul.f32 %v15102_v28, %v4545_v24  ;;  %v4505_v22 = vadd.f32 %v15010_v10, %v4457_v19  ;;  %11571 = vmatmul.mubr.msk.bf16.gmra.mxu0 %vm5278_vm10, %v5579_v30  ;;  %v5238_v15 = vrot.slane %v15105_v6, 3  ;;  %v5581_v14 = vshrl.u32 %v15105_v6, 16  ;;  %v6419_v28 = vld [vmem:[#allocation2 + $0x24] sm:$0xf] }
 0x3ac   : > { %v4324_v39 = vpop.f32.mrf.mxu0  ;;  %11574 = vmatprep.mubr.msk.bf16.mxu0 %vm12597_vm1, %v17582_v2  ;;  %v5584_v47 = vshll.u32 %v15105_v6, 16 }
 0x3ad   : > { %v10267_v34 = vpack.c.bf16 %v4791_v4, %v4791_v4  ;;  %v4546_v59 = vmax.f32 %v4505_v22, 0.0  ;;  %v4458_v7 = vadd.f32 %v4324_v39, %v14834_v58  ;;  %v5239_v52 = vsel %vm496_vm2, %v5236_v13, %v5238_v15 }
 0x3ae   : > { %v11413_v27 = vpop.f32.mrf.mxu0  ;;  %v5583_v24 = vrot.slane %v5581_v14, 2  ;;  %v5586_v19 = vrot.slane %v5584_v47, 3  ;;  %11489 = vmatmul.mubr.msk.bf16.gmra.mxu1 %vm5278_vm10, %v5239_v52  ;;  %v6029_v30 = vrot.slane %v5581_v14, 3  ;;  %v6420_v6 = vld [vmem:[#allocation2 + $0x28] sm:$0xf]  ;;  %v7407_v58 = vshll.u32 %v15076_v31, 16 }
 0x3af   : > { %5046 = vst.msk [vmem:[#allocation2 + $0x30] sm:$0xf] %vm4823_vm9, %v10267_v34  ;;  %v4792_v20 = vmul.f32 %v15122_v62, %v4546_v59  ;;  %v4506_v38 = vadd.f32 %v15010_v10, %v4458_v7  ;;  %11492 = vmatprep.mubr.msk.bf16.mxu1 %vm12597_vm1, %v17582_v2  ;;  %v6030_v13 = vrot.slane %v5584_v47, 4  ;;  %v15134_v59 = vpop.permute.xlu1 %4634  ;;  %v15139_v5 = vcombine.low %v6419_v28, %v6420_v6 }
 0x3b0   : > { %v4329_v4 = vpop.f32.mrf.mxu0  ;;  %v5587_v22 = vor.u32 %v5586_v19, %v5583_v24  ;;  %17732 = vst [vmem:[#allocation6_spill] sm:$0xff] %v15134_v59  ;;  %v15146_v19 = vrot.slane %v7407_v58, 1 }
 0x3b1   : > { %v10268_v39 = vpack.c.bf16 %v4792_v20, %v4792_v20  ;;  %v4547_v27 = vmax.f32 %v4506_v38, 0.0  ;;  %v4459_v34 = vadd.f32 %v4329_v4, %v14842_v51  ;;  %v6031_v62 = vor.u32 %v6030_v13, %v6029_v30  ;;  %17733 = vst [vmem:[#allocation12_spill] sm:$0xff] %v15139_v5  ;;  %v15157_v13 = vpop.permute.xlu0 %4639 }
 0x3b2   : > { %v11416_v7 = vpop.f32.mrf.mxu0  ;;  %v5588_v52 = vsel %vm809_vm4, %v5578_v37, %v5587_v22  ;;  %v15137_v14 = vld [vmem:[#allocation2 + $0x28] sm:$0xff]   ;;  %v7401_v51 = vshrl.u32 %v15050_v0, 16  ;;  %17734 = vst [vmem:[#allocation10_spill] sm:$0xff] %v15157_v13 }
 0x3b3   : > { %5047 = vst.msk [vmem:[#allocation2 + $0x34] sm:$0xf] %vm4823_vm9, %v10268_v39  ;;  %v4793_v47 = vmul.f32 %v15134_v59, %v4547_v27  ;;  %v4507_v24 = vadd.f32 %v15010_v10, %v4459_v34  ;;  %11575 = vmatmul.mubr.msk.bf16.gmra.mxu0 %vm5278_vm10, %v5588_v52  ;;  %v5240_v37 = vrot.slane %v15137_v14, 3  ;;  %v5590_v28 = vshrl.u32 %v15137_v14, 16 }
 0x3b4   : > { %v4332_v20 = vpop.f32.mrf.mxu0  ;;  %11578 = vmatprep.mubr.msk.bf16.mxu0 %vm12597_vm1, %v17582_v2  ;;  %v5593_v49 = vshll.u32 %v15137_v14, 16  ;;  %v15154_v38 = vsel %vm1270_vm5, %v6027_v26, %v6031_v62  ;;  %v7406_v7 = vor.u32 %v7405_v3, %v7401_v51 }
 0x3b5   : > { %v10269_v30 = vpack.c.bf16 %v4793_v47, %v4793_v47  ;;  %v4548_v6 = vmax.f32 %v4507_v24, 0.0  ;;  %v4460_v4 = vadd.f32 %v4332_v20, %v14850_v60  ;;  %v5241_v39 = vsel %vm496_vm2, %v5238_v15, %v5240_v37 }
 0x3b6   : > { %v11417_v58 = vpop.f32.mrf.mxu0  ;;  %v5592_v27 = vrot.slane %v5590_v28, 2  ;;  %v5595_v34 = vrot.slane %v5593_v49, 3  ;;  %11493 = vmatmul.mubr.msk.bf16.gmra.mxu1 %vm5278_vm10, %v5241_v39  ;;  %v6033_v26 = vrot.slane %v5590_v28, 3  ;;  %v6422_v47 = vld [vmem:[#allocation2 + $0x30] sm:$0xf]  ;;  %v6034_v20 = vrot.slane %v5593_v49, 4 }
 0x3b7   : > { %5048 = vst.msk [vmem:[#allocation2 + $0x38] sm:$0xf] %vm4823_vm9, %v10269_v30  ;;  %v4794_v52 = vmul.f32 %v15157_v13, %v4548_v6  ;;  %v4508_v14 = vadd.f32 %v15010_v10, %v4460_v4  ;;  %11496 = vmatprep.mubr.msk.bf16.mxu1 %vm12597_vm1, %v17582_v2  ;;  %v15168_v15 = vsel %vm2651_vm6, %v7406_v7, %v15146_v19  ;;  %v6421_v6 = vld [vmem:[#allocation2 + $0x2c] sm:$0xf]  ;;  %v15171_v4 = vpop.permute.xlu1 %4644 }
 0x3b8   : > { %v4337_v24 = vpop.f32.mrf.mxu0  ;;  %v5596_v60 = vor.u32 %v5595_v34, %v5592_v27  ;;  %17735 = vst [vmem:[#allocation14_spill] sm:$0xff] %v15168_v15  ;;  %17736 = vst [vmem:[#allocation15_spill] sm:$0xff] %v15171_v4  ;;  %v6035_v27 = vor.u32 %v6034_v20, %v6033_v26  ;;  %v15174_v34 = vcombine.low %v6421_v6, %v6422_v47 }
 0x3b9   : > { %v10270_v3 = vpack.c.bf16 %v4794_v52, %v4794_v52  ;;  %v4549_v51 = vmax.f32 %v4508_v14, 0.0  ;;  %v4461_v30 = vadd.f32 %v4337_v24, %v14859_v32 }
 0x3ba   : > { %v11420_v58 = vpop.f32.mrf.mxu0  ;;  %v5597_v28 = vsel %vm809_vm4, %v5587_v22, %v5596_v60  ;;  %v12402_v39 = vld [vmem:[#allocation2 + $0x30] sm:$0xff]   ;;  %17737 = vst [vmem:[#allocation13_spill] sm:$0xff] %v15174_v34  ;;  %v12417_v22 = vld [vmem:[%s17382_s4 + $0x18] sm:$0xff]   ;;  %v15186_v26 = vsel %vm1270_vm5, %v6031_v62, %v6035_v27 }
 0x3bb   : > { %5049 = vst.msk [vmem:[#allocation2 + $0x3c] sm:$0xf] %vm4823_vm9, %v10270_v3  ;;  %v4795_v49 = vmul.f32 %v15171_v4, %v4549_v51  ;;  %v4509_v7 = vadd.f32 %v15010_v10, %v4461_v30  ;;  %11579 = vmatmul.mubr.msk.bf16.gmra.mxu0 %vm5278_vm10, %v5597_v28  ;;  %v5242_v32 = vrot.slane %v12402_v39, 3  ;;  %v5599_v14 = vshrl.u32 %v12402_v39, 16  ;;  %v15189_v51 = vpop.permute.xlu0 %4649 }
 0x3bc   : > { %v4340_v52 = vpop.f32.mrf.mxu0  ;;  %11582 = vmatprep.mubr.msk.bf16.mxu0 %vm12597_vm1, %v17582_v2  ;;  %v5602_v24 = vshll.u32 %v12402_v39, 16  ;;  %17738 = vst [vmem:[#allocation17_spill] sm:$0xff] %v15189_v51  ;;  %11733 = vmatpush3.bf16.msra.mxu0 %v12417_v22 }
 0x3bd   : > { %v10271_v47 = vpack.c.bf16 %v4795_v49, %v4795_v49  ;;  %v4550_v20 = vmax.f32 %v4509_v7, 0.0  ;;  %v4462_v3 = vadd.f32 %v4340_v52, %v14868_v44  ;;  %v5243_v6 = vsel %vm496_vm2, %v5240_v37, %v5242_v32  ;;  %11904 = vmatprep.subr.bf16.mxu0 %v17582_v2 }
 0x3be   : > { %v11421_v30 = vpop.f32.mrf.mxu0  ;;  %v5601_v58 = vrot.slane %v5599_v14, 2  ;;  %v5604_v28 = vrot.slane %v5602_v24, 3  ;;  %11497 = vmatmul.mubr.msk.bf16.gmra.mxu1 %vm5278_vm10, %v5243_v6  ;;  %v6037_v62 = vrot.slane %v5599_v14, 3  ;;  %v6424_v49 = vld [vmem:[#allocation2 + $0x38] sm:$0xf]  ;;  %v6038_v37 = vrot.slane %v5602_v24, 4 }
 0x3bf   : > { %5050 = vst.msk [vmem:[#allocation2 + $0x40] sm:$0xf] %vm4823_vm9, %v10271_v47  ;;  %v4796_v39 = vmul.f32 %v15189_v51, %v4550_v20  ;;  %v4510_v4 = vadd.f32 %v15010_v10, %v4462_v3  ;;  %11500 = vmatprep.mubr.msk.bf16.mxu1 %vm12597_vm1, %v17582_v2  ;;  %v6423_v30 = vld [vmem:[#allocation2 + $0x34] sm:$0xf]  ;;  %v15200_v20 = vpop.permute.xlu1 %4654 }
 0x3c0   : > { %v4345_v44 = vpop.f32.mrf.mxu0  ;;  %v5605_v7 = vor.u32 %v5604_v28, %v5601_v58  ;;  %17739 = vst [vmem:[#allocation18_spill] sm:$0xff] %v15200_v20  ;;  %v6039_v51 = vor.u32 %v6038_v37, %v6037_v62  ;;  %v15203_v13 = vcombine.low %v6423_v30, %v6424_v49 }
 0x3c1   : > { %v10272_v52 = vpack.c.bf16 %v4796_v39, %v4796_v39  ;;  %v4551_v22 = vmax.f32 %v4510_v4, 0.0  ;;  %v4463_v47 = vadd.f32 %v4345_v44, %v14875_v16  ;;  %v7414_v16 = vshll.u32 %v15107_v8, 16 }
 0x3c2   : > { %v11424_v3 = vpop.f32.mrf.mxu0  ;;  %v5606_v6 = vsel %vm809_vm4, %v5596_v60, %v5605_v7  ;;  %v12403_v14 = vld [vmem:[#allocation2 + $0x38] sm:$0xff]   ;;  %17740 = vst [vmem:[#allocation16_spill] sm:$0xff] %v15203_v13  ;;  %v15213_v62 = vsel %vm1270_vm5, %v6035_v27, %v6039_v51 }
 0x3c3   : > { %5051 = vst.msk [vmem:[#allocation2 + $0x44] sm:$0xf] %vm4823_vm9, %v10272_v52  ;;  %v4797_v58 = vmul.f32 %v15200_v20, %v4551_v22  ;;  %v4511_v24 = vadd.f32 %v15010_v10, %v4463_v47  ;;  %11583 = vmatmul.mubr.msk.bf16.gmra.mxu0 %vm5278_vm10, %v5606_v6  ;;  %v5244_v28 = vrot.slane %v12403_v14, 3  ;;  %v5608_v60 = vshrl.u32 %v12403_v14, 16  ;;  %v15216_v52 = vpop.permute.xlu0 %4659 }
 0x3c4   : > { %v4348_v4 = vpop.f32.mrf.mxu0  ;;  %11586 = vmatprep.mubr.msk.bf16.mxu0 %vm12597_vm1, %v17582_v2  ;;  %v5611_v39 = vshll.u32 %v12403_v14, 16  ;;  %17741 = vst [vmem:[#allocation20_spill] sm:$0xff] %v15216_v52  ;;  %v7411_v6 = vshrl.u32 %v15076_v31, 16 }
 0x3c5   : > { %v10273_v49 = vpack.c.bf16 %v4797_v58, %v4797_v58  ;;  %v4552_v44 = vmax.f32 %v4511_v24, 0.0  ;;  %v4464_v37 = vadd.f32 %v4348_v4, %v14883_v46  ;;  %v5245_v47 = vsel %vm496_vm2, %v5242_v32, %v5244_v28 }
 0x3c6   : > { %v11425_v22 = vpop.f32.mrf.mxu0  ;;  %v5610_v30 = vrot.slane %v5608_v60, 2  ;;  %v5613_v3 = vrot.slane %v5611_v39, 3  ;;  %11501 = vmatmul.mubr.msk.bf16.gmra.mxu1 %vm5278_vm10, %v5245_v47  ;;  %v6041_v58 = vrot.slane %v5608_v60, 3  ;;  %v6042_v4 = vrot.slane %v5611_v39, 4 }
 0x3c7   : > { %5052 = vst.msk [vmem:[#allocation2 + $0x48] sm:$0xf] %vm4823_vm9, %v10273_v49  ;;  %v4798_v14 = vmul.f32 %v15216_v52, %v4552_v44  ;;  %v4512_v27 = vadd.f32 %v15010_v10, %v4464_v37  ;;  %11504 = vmatprep.mubr.msk.bf16.mxu1 %vm12597_vm1, %v17582_v2  ;;  %v7413_v32 = vor.u32 %v7411_v6, %v15146_v19  ;;  %v15227_v22 = vrot.slane %v7414_v16, 1  ;;  %v15230_v44 = vpop.permute.xlu1 %4664 }
 0x3c8   : > { %v4353_v24 = vpop.f32.mrf.mxu0  ;;  %v5614_v46 = vor.u32 %v5613_v3, %v5610_v30  ;;  %17742 = vst [vmem:[#allocation21_spill] sm:$0xff] %v15230_v44  ;;  %v6043_v52 = vor.u32 %v6042_v4, %v6041_v58  ;;  %v15247_v58 = vpop.permute.xlu0 %4669 }
 0x3c9   : > { %v10274_v20 = vpack.c.bf16 %v4798_v14, %v4798_v14  ;;  %v4553_v59 = vmax.f32 %v4512_v27, 0.0  ;;  %v4465_v49 = vadd.f32 %v4353_v24, %v14892_v1  ;;  %v15235_v30 = vsel %vm2651_vm6, %v7413_v32, %v15227_v22  ;;  %17744 = vst [vmem:[#allocation23_spill] sm:$0xff] %v15247_v58 }
 0x3ca   : > { %v11428_v37 = vpop.f32.mrf.mxu0  ;;  %v5615_v47 = vsel %vm809_vm4, %v5605_v7, %v5614_v46  ;;  %v12404_v60 = vld [vmem:[#allocation2 + $0x40] sm:$0xff]   ;;  %17743 = vst [vmem:[#allocation19_spill] sm:$0xff] %v15235_v30  ;;  %v15244_v6 = vsel %vm1270_vm5, %v6039_v51, %v6043_v52 }
 0x3cb   : > { %5053 = vst.msk [vmem:[#allocation2 + $0x4c] sm:$0xf] %vm4823_vm9, %v10274_v20  ;;  %v4799_v19 = vmul.f32 %v15230_v44, %v4553_v59  ;;  %v4513_v16 = vadd.f32 %v15010_v10, %v4465_v49  ;;  %11587 = vmatmul.mubr.msk.bf16.gmra.mxu0 %vm5278_vm10, %v5615_v47  ;;  %v5246_v39 = vrot.slane %v12404_v60, 3  ;;  %v5617_v7 = vshrl.u32 %v12404_v60, 16  ;;  %v6426_v51 = vld [vmem:[#allocation2 + $0x40] sm:$0xf] }
 0x3cc   : > { %v4356_v1 = vpop.f32.mrf.mxu0  ;;  %11590 = vmatprep.mubr.msk.bf16.mxu0 %vm12597_vm1, %v17582_v2  ;;  %v5620_v3 = vshll.u32 %v12404_v60, 16 }
 0x3cd   : > { %v10275_v14 = vpack.c.bf16 %v4799_v19, %v4799_v19  ;;  %v4554_v27 = vmax.f32 %v4513_v16, 0.0  ;;  %v4466_v20 = vadd.f32 %v4356_v1, %v14897_v35  ;;  %v5247_v24 = vsel %vm496_vm2, %v5244_v28, %v5246_v39 }
 0x3ce   : > { %v11429_v59 = vpop.f32.mrf.mxu0  ;;  %v5619_v4 = vrot.slane %v5617_v7, 2  ;;  %v5622_v32 = vrot.slane %v5620_v3, 3  ;;  %11505 = vmatmul.mubr.msk.bf16.gmra.mxu1 %vm5278_vm10, %v5247_v24  ;;  %v6045_v47 = vrot.slane %v5617_v7, 3  ;;  %v6046_v35 = vrot.slane %v5620_v3, 4 }
 0x3cf   : > { %5054 = vst.msk [vmem:[#allocation2 + $0x50] sm:$0xf] %vm4823_vm9, %v10275_v14  ;;  %v4800_v49 = vmul.f32 %v15247_v58, %v4554_v27  ;;  %v4514_v37 = vadd.f32 %v15010_v10, %v4466_v20  ;;  %11508 = vmatprep.mubr.msk.bf16.mxu1 %vm12597_vm1, %v17582_v2  ;;  %v6425_v59 = vld [vmem:[#allocation2 + $0x3c] sm:$0xf]  ;;  %v15257_v14 = vpop.permute.xlu1 %4674 }
 0x3d0   : > { %v4361_v60 = vpop.f32.mrf.mxu0  ;;  %v5623_v19 = vor.u32 %v5622_v32, %v5619_v4  ;;  %17745 = vst [vmem:[#allocation33_spill] sm:$0xff] %v15257_v14  ;;  %v6047_v24 = vor.u32 %v6046_v35, %v6045_v47  ;;  %v15260_v44 = vcombine.low %v6425_v59, %v6426_v51  ;;  %v15273_v35 = vpop.permute.xlu0 %4679 }
 0x3d1   : > { %v10276_v16 = vpack.c.bf16 %v4800_v49, %v4800_v49  ;;  %v4555_v28 = vmax.f32 %v4514_v37, 0.0  ;;  %v4467_v1 = vadd.f32 %v4361_v60, %v14903_v55  ;;  %v7421_v55 = vshll.u32 %v15139_v5, 16  ;;  %17747 = vst [vmem:[#allocation35_spill] sm:$0xff] %v15273_v35 }
 0x3d2   : > { %v11432_v27 = vpop.f32.mrf.mxu0  ;;  %v5624_v20 = vsel %vm809_vm4, %v5614_v46, %v5623_v19  ;;  %v12405_v58 = vld [vmem:[#allocation2 + $0x48] sm:$0xff]   ;;  %17746 = vst [vmem:[#allocation34_spill] sm:$0xff] %v15260_v44  ;;  %v15270_v37 = vsel %vm1270_vm5, %v6043_v52, %v6047_v24 }
 0x3d3   : > { %5055 = vst.msk [vmem:[#allocation2 + $0x54] sm:$0xf] %vm4823_vm9, %v10276_v16  ;;  %v4801_v7 = vmul.f32 %v15257_v14, %v4555_v28  ;;  %v4515_v3 = vadd.f32 %v15010_v10, %v4467_v1  ;;  %11591 = vmatmul.mubr.msk.bf16.gmra.mxu0 %vm5278_vm10, %v5624_v20  ;;  %v5248_v32 = vrot.slane %v12405_v58, 3  ;;  %v5626_v46 = vshrl.u32 %v12405_v58, 16 }
 0x3d4   : > { %v4364_v4 = vpop.f32.mrf.mxu0  ;;  %11594 = vmatprep.mubr.msk.bf16.mxu0 %vm12597_vm1, %v17582_v2  ;;  %v5629_v49 = vshll.u32 %v12405_v58, 16  ;;  %v7418_v27 = vshrl.u32 %v15107_v8, 16 }
 0x3d5   : > { %v10277_v51 = vpack.c.bf16 %v4801_v7, %v4801_v7  ;;  %v4556_v47 = vmax.f32 %v4515_v3, 0.0  ;;  %v4468_v60 = vadd.f32 %v4364_v4, %v14911_v40  ;;  %v5249_v28 = vsel %vm496_vm2, %v5246_v39, %v5248_v32 }
 0x3d6   : > { %v11433_v16 = vpop.f32.mrf.mxu0  ;;  %v5628_v1 = vrot.slane %v5626_v46, 2  ;;  %v5631_v59 = vrot.slane %v5629_v49, 3  ;;  %11509 = vmatmul.mubr.msk.bf16.gmra.mxu1 %vm5278_vm10, %v5249_v28  ;;  %v6049_v20 = vrot.slane %v5626_v46, 3  ;;  %v6050_v3 = vrot.slane %v5629_v49, 4 }
 0x3d7   : > { %5056 = vst.msk [vmem:[#allocation2 + $0x58] sm:$0xf] %vm4823_vm9, %v10277_v51  ;;  %v4802_v58 = vmul.f32 %v15273_v35, %v4556_v47  ;;  %v4516_v52 = vadd.f32 %v15010_v10, %v4468_v60  ;;  %11512 = vmatprep.mubr.msk.bf16.mxu1 %vm12597_vm1, %v17582_v2  ;;  %v7420_v39 = vor.u32 %v7418_v27, %v15227_v22  ;;  %v15284_v4 = vrot.slane %v7421_v55, 1  ;;  %v15287_v47 = vpop.permute.xlu1 %4684 }
 0x3d8   : > { %v4369_v7 = vpop.f32.mrf.mxu0  ;;  %v5632_v40 = vor.u32 %v5631_v59, %v5628_v1  ;;  %17748 = vst [vmem:[#allocation36_spill] sm:$0xff] %v15287_v47  ;;  %v6051_v35 = vor.u32 %v6050_v3, %v6049_v20 }
 0x3d9   : > { %v10278_v16 = vpack.c.bf16 %v4802_v58, %v4802_v58  ;;  %v4557_v14 = vmax.f32 %v4516_v52, 0.0  ;;  %v4469_v51 = vadd.f32 %v4369_v7, %v14920_v11  ;;  %v15292_v1 = vsel %vm2651_vm6, %v7420_v39, %v15284_v4  ;;  %v15304_v7 = vpop.permute.xlu0 %4689 }
 0x3da   : > { %v11436_v60 = vpop.f32.mrf.mxu0  ;;  %v5633_v28 = vsel %vm809_vm4, %v5623_v19, %v5632_v40  ;;  %v12406_v46 = vld [vmem:[#allocation2 + $0x50] sm:$0xff]   ;;  %17749 = vst [vmem:[#allocation37_spill] sm:$0xff] %v15292_v1  ;;  %v15301_v27 = vsel %vm1270_vm5, %v6047_v24, %v6051_v35  ;;  %17750 = vst [vmem:[#allocation38_spill] sm:$0xff] %v15304_v7  ;;  %v6428_v24 = vld [vmem:[#allocation2 + $0x48] sm:$0xf] }
 0x3db   : > { %5057 = vst.msk [vmem:[#allocation2 + $0x5c] sm:$0xf] %vm4823_vm9, %v10278_v16  ;;  %v4803_v22 = vmul.f32 %v15287_v47, %v4557_v14  ;;  %v4517_v55 = vadd.f32 %v15010_v10, %v4469_v51  ;;  %11595 = vmatmul.mubr.msk.bf16.gmra.mxu0 %vm5278_vm10, %v5633_v28  ;;  %v5250_v49 = vrot.slane %v12406_v46, 3  ;;  %v5635_v19 = vshrl.u32 %v12406_v46, 16 }
 0x3dc   : > { %v4372_v11 = vpop.f32.mrf.mxu0  ;;  %11598 = vmatprep.mubr.msk.bf16.mxu0 %vm12597_vm1, %v17582_v2  ;;  %v5638_v59 = vshll.u32 %v12406_v46, 16 }
 0x3dd   : > { %v10279_v58 = vpack.c.bf16 %v4803_v22, %v4803_v22  ;;  %v4558_v52 = vmax.f32 %v4517_v55, 0.0  ;;  %v4470_v20 = vadd.f32 %v4372_v11, %v14925_v25  ;;  %v5251_v3 = vsel %vm496_vm2, %v5248_v32, %v5250_v49 }
 0x3de   : > { %v11437_v14 = vpop.f32.mrf.mxu0  ;;  %v5637_v39 = vrot.slane %v5635_v19, 2  ;;  %v5640_v16 = vrot.slane %v5638_v59, 3  ;;  %11513 = vmatmul.mubr.msk.bf16.gmra.mxu1 %vm5278_vm10, %v5251_v3  ;;  %v6053_v28 = vrot.slane %v5635_v19, 3  ;;  %v6054_v25 = vrot.slane %v5638_v59, 4 }
 0x3df   : > { %5058 = vst.msk [vmem:[#allocation2 + $0x60] sm:$0xf] %vm4823_vm9, %v10279_v58  ;;  %v4804_v51 = vmul.f32 %v15304_v7, %v4558_v52  ;;  %v4518_v60 = vadd.f32 %v15010_v10, %v4470_v20  ;;  %11516 = vmatprep.mubr.msk.bf16.mxu1 %vm12597_vm1, %v17582_v2  ;;  %v6427_v14 = vld [vmem:[#allocation2 + $0x44] sm:$0xf]  ;;  %v15314_v58 = vpop.permute.xlu1 %4694 }
 0x3e0   : > { %v4377_v46 = vpop.f32.mrf.mxu0  ;;  %v5641_v22 = vor.u32 %v5640_v16, %v5637_v39  ;;  %17751 = vst [vmem:[#allocation39_spill] sm:$0xff] %v15314_v58  ;;  %v6055_v3 = vor.u32 %v6054_v25, %v6053_v28  ;;  %v15317_v47 = vcombine.low %v6427_v14, %v6428_v24  ;;  %v15330_v25 = vpop.permute.xlu0 %4699  ;;  %v7425_v14 = vshrl.u32 %v15139_v5, 16 }
 0x3e1   : > { %v10280_v55 = vpack.c.bf16 %v4804_v51, %v4804_v51  ;;  %v4559_v32 = vmax.f32 %v4518_v60, 0.0  ;;  %v4471_v11 = vadd.f32 %v4377_v46, %v14931_v63  ;;  %v7428_v63 = vshll.u32 %v15174_v34, 16  ;;  %17753 = vst [vmem:[#allocation41_spill] sm:$0xff] %v15330_v25 }
 0x3e2   : > { %v11440_v52 = vpop.f32.mrf.mxu0  ;;  %v5642_v20 = vsel %vm809_vm4, %v5632_v40, %v5641_v22  ;;  %v12407_v7 = vld [vmem:[#allocation2 + $0x58] sm:$0xff]   ;;  %17752 = vst [vmem:[#allocation40_spill] sm:$0xff] %v15317_v47  ;;  %v15327_v60 = vsel %vm1270_vm5, %v6051_v35, %v6055_v3  ;;  %v15339_v35 = vld [vmem:[%s17381_s3] ss:$0 sm:$0xff] }
 0x3e3   : > { %5059 = vst.msk [vmem:[#allocation2 + $0x64] sm:$0xf] %vm4823_vm9, %v10280_v55  ;;  %v4805_v19 = vmul.f32 %v15314_v58, %v4559_v32  ;;  %v4519_v59 = vadd.f32 %v15010_v10, %v4471_v11  ;;  %11599 = vmatmul.mubr.msk.bf16.gmra.mxu0 %vm5278_vm10, %v5642_v20  ;;  %v5252_v16 = vrot.slane %v12407_v7, 3  ;;  %v5644_v40 = vshrl.u32 %v12407_v7, 16 }
 0x3e4   : > { %v4380_v39 = vpop.f32.mrf.mxu0  ;;  %11602 = vmatprep.mubr.msk.bf16.mxu0 %vm12597_vm1, %v17582_v2  ;;  %v5647_v51 = vshll.u32 %v12407_v7, 16 }
 0x3e5   : > { %v10281_v24 = vpack.c.bf16 %v4805_v19, %v4805_v19  ;;  %v4560_v28 = vmax.f32 %v4519_v59, 0.0  ;;  %v4472_v46 = vadd.f32 %v4380_v39, %v14939_v9  ;;  %v5253_v55 = vsel %vm496_vm2, %v5250_v49, %v5252_v16 }
 0x3e6   : > { %v11441_v10 = vpop.f32.mrf.mxu0  ;;  %v5646_v32 = vrot.slane %v5644_v40, 2  ;;  %v5649_v11 = vrot.slane %v5647_v51, 3  ;;  %11517 = vmatmul.mubr.msk.bf16.gmra.mxu1 %vm5278_vm10, %v5253_v55  ;;  %v6057_v52 = vrot.slane %v5644_v40, 3  ;;  %v6058_v19 = vrot.slane %v5647_v51, 4 }
 0x3e7   : > { %5060 = vst.msk [vmem:[#allocation2 + $0x68] sm:$0xf] %vm4823_vm9, %v10281_v24  ;;  %v4806_v7 = vmul.f32 %v15330_v25, %v4560_v28  ;;  %v4520_v9 = vadd.f32 %v15339_v35, %v4472_v46  ;;  %11520 = vmatprep.mubr.msk.bf16.mxu1 %vm12597_vm1, %v17582_v2  ;;  %v7427_v59 = vor.u32 %v7425_v14, %v15284_v4  ;;  %v15346_v39 = vrot.slane %v7428_v63, 1  ;;  %v15349_v25 = vpop.permute.xlu1 %4704 }
 0x3e8   : > { %v4385_v20 = vpop.f32.mrf.mxu0  ;;  %v5650_v49 = vor.u32 %v5649_v11, %v5646_v32  ;;  %17754 = vst [vmem:[#allocation42_spill] sm:$0xff] %v15349_v25  ;;  %v6059_v58 = vor.u32 %v6058_v19, %v6057_v52 }
 0x3e9   : > { %v10282_v24 = vpack.c.bf16 %v4806_v7, %v4806_v7  ;;  %v4561_v28 = vmax.f32 %v4520_v9, 0.0  ;;  %v4473_v10 = vadd.f32 %v4385_v20, %v14948_v17  ;;  %v15354_v32 = vsel %vm2651_vm6, %v7427_v59, %v15346_v39  ;;  %v15366_v20 = vpop.permute.xlu0 %4709 }
 0x3ea   : > { %v11444_v46 = vpop.f32.mrf.mxu0  ;;  %v5651_v55 = vsel %vm809_vm4, %v5641_v22, %v5650_v49  ;;  %v12408_v40 = vld [vmem:[#allocation2 + $0x60] sm:$0xff]   ;;  %17755 = vst [vmem:[#allocation43_spill] sm:$0xff] %v15354_v32  ;;  %v15363_v14 = vsel %vm1270_vm5, %v6055_v3, %v6059_v58  ;;  %17756 = vst [vmem:[#allocation44_spill] sm:$0xff] %v15366_v20  ;;  %v15373_v3 = vld [vmem:[#allocation2 + $0x50] sm:$0xf] }
 0x3eb   : > { %5061 = vst.msk [vmem:[#allocation2 + $0x6c] sm:$0xf] %vm4823_vm9, %v10282_v24  ;;  %v4807_v4 = vmul.f32 %v15349_v25, %v4561_v28  ;;  %v4521_v63 = vadd.f32 %v15339_v35, %v4473_v10  ;;  %11603 = vmatmul.mubr.msk.bf16.gmra.mxu0 %vm5278_vm10, %v5651_v55  ;;  %v5254_v51 = vrot.slane %v12408_v40, 3  ;;  %v5653_v22 = vshrl.u32 %v12408_v40, 16 }
 0x3ec   : > { %v4388_v17 = vpop.f32.mrf.mxu0  ;;  %11606 = vmatprep.mubr.msk.bf16.mxu0 %vm12597_vm1, %v17582_v2  ;;  %v5656_v11 = vshll.u32 %v12408_v40, 16  ;;  %v7432_v25 = vshrl.u32 %v15174_v34, 16 }
 0x3ed   : > { %v10283_v7 = vpack.c.bf16 %v4807_v4, %v4807_v4  ;;  %v4562_v9 = vmax.f32 %v4521_v63, 0.0  ;;  %v4474_v52 = vadd.f32 %v4388_v17, %v14954_v18  ;;  %v5255_v59 = vsel %vm496_vm2, %v5252_v16, %v5254_v51 }
 0x3ee   : > { %v11445_v19 = vpop.f32.mrf.mxu0  ;;  %v5655_v24 = vrot.slane %v5653_v22, 2  ;;  %v5658_v28 = vrot.slane %v5656_v11, 3  ;;  %11521 = vmatmul.mubr.msk.bf16.gmra.mxu1 %vm5278_vm10, %v5255_v59  ;;  %v6061_v55 = vrot.slane %v5653_v22, 3  ;;  %v6062_v4 = vrot.slane %v5656_v11, 4 }
 0x3ef   : > { %5062 = vst.msk [vmem:[#allocation2 + $0x70] sm:$0xf] %vm4823_vm9, %v10283_v7  ;;  %v4808_v10 = vmul.f32 %v15366_v20, %v4562_v9  ;;  %v4522_v46 = vadd.f32 %v15339_v35, %v4474_v52  ;;  %11524 = vmatprep.mubr.msk.bf16.mxu1 %vm12597_vm1, %v17582_v2  ;;  %v15378_v7 = vld [vmem:[#allocation2 + $0x4c] sm:$0xf]  ;;  %v15380_v9 = vpop.permute.xlu1 %4714 }
 0x3f0   : > { %v4393_v40 = vpop.f32.mrf.mxu0  ;;  %v5659_v18 = vor.u32 %v5658_v28, %v5655_v24  ;;  %17757 = vst [vmem:[#allocation45_spill] sm:$0xff] %v15380_v9  ;;  %v6063_v20 = vor.u32 %v6062_v4, %v6061_v55  ;;  %v15385_v22 = vcombine.low %v15378_v7, %v15373_v3 }
 0x3f1   : > { %v10284_v16 = vpack.c.bf16 %v4808_v10, %v4808_v10  ;;  %v4563_v63 = vmax.f32 %v4522_v46, 0.0  ;;  %v4475_v17 = vadd.f32 %v4393_v40, %v14960_v53  ;;  %v7435_v53 = vshll.u32 %v15203_v13, 16 }
 0x3f2   : > { %v11448_v52 = vpop.f32.mrf.mxu0  ;;  %v5660_v19 = vsel %vm809_vm4, %v5650_v49, %v5659_v18  ;;  %v12409_v59 = vld [vmem:[#allocation2 + $0x68] sm:$0xff]   ;;  %17758 = vst [vmem:[#allocation46_spill] sm:$0xff] %v15385_v22  ;;  %v15395_v55 = vsel %vm1270_vm5, %v6059_v58, %v6063_v20 }
 0x3f3   : > { %5063 = vst.msk [vmem:[#allocation2 + $0x74] sm:$0xf] %vm4823_vm9, %v10284_v16  ;;  %v4809_v11 = vmul.f32 %v15380_v9, %v4563_v63  ;;  %v4523_v24 = vadd.f32 %v15339_v35, %v4475_v17  ;;  %11607 = vmatmul.mubr.msk.bf16.gmra.mxu0 %vm5278_vm10, %v5660_v19  ;;  %v5256_v10 = vrot.slane %v12409_v59, 3  ;;  %v5662_v49 = vshrl.u32 %v12409_v59, 16  ;;  %v15398_v63 = vpop.permute.xlu0 %4719 }
 0x3f4   : > { %v4396_v28 = vpop.f32.mrf.mxu0  ;;  %11610 = vmatprep.mubr.msk.bf16.mxu0 %vm12597_vm1, %v17582_v2  ;;  %v5665_v46 = vshll.u32 %v12409_v59, 16  ;;  %17759 = vst [vmem:[#allocation47_spill] sm:$0xff] %v15398_v63 }
 0x3f5   : > { %v10285_v40 = vpack.c.bf16 %v4809_v11, %v4809_v11  ;;  %v4564_v4 = vmax.f32 %v4523_v24, 0.0  ;;  %v4476_v16 = vadd.f32 %v4396_v28, %v14964_v45  ;;  %v5257_v52 = vsel %vm496_vm2, %v5254_v51, %v5256_v10 }
 0x3f6   : > { %v11449_v17 = vpop.f32.mrf.mxu0  ;;  %v5664_v19 = vrot.slane %v5662_v49, 2  ;;  %v5667_v9 = vrot.slane %v5665_v46, 3  ;;  %11525 = vmatmul.mubr.msk.bf16.gmra.mxu1 %vm5278_vm10, %v5257_v52  ;;  %v6065_v11 = vrot.slane %v5662_v49, 3  ;;  %v6066_v28 = vrot.slane %v5665_v46, 4 }
 0x3f7   : > { %5064 = vst.msk [vmem:[#allocation2 + $0x78] sm:$0xf] %vm4823_vm9, %v10285_v40  ;;  %v4810_v59 = vmul.f32 %v15398_v63, %v4564_v4  ;;  %v4524_v58 = vadd.f32 %v15339_v35, %v4476_v16  ;;  %11528 = vmatprep.mubr.msk.bf16.mxu1 %vm12597_vm1, %v17582_v2  ;;  %v7434_v51 = vor.u32 %v7432_v25, %v15346_v39  ;;  %v15409_v17 = vrot.slane %v7435_v53, 1  ;;  %v15412_v4 = vpop.permute.xlu1 %4724 }
 0x3f8   : > { %v4401_v24 = vpop.f32.mrf.mxu0  ;;  %v5668_v45 = vor.u32 %v5667_v9, %v5664_v19  ;;  %17760 = vst [vmem:[#allocation48_spill] sm:$0xff] %v15412_v4  ;;  %v6067_v63 = vor.u32 %v6066_v28, %v6065_v11  ;;  %v15429_v11 = vpop.permute.xlu0 %4729 }
 0x3f9   : > { %v10286_v33 = vpack.c.bf16 %v4810_v59, %v4810_v59  ;;  %v4565_v34 = vmax.f32 %v4524_v58, 0.0  ;;  %v4477_v40 = vadd.f32 %v4401_v24, %v14969_v50  ;;  %v15417_v9 = vsel %vm2651_vm6, %v7434_v51, %v15409_v17  ;;  %17762 = vst [vmem:[#allocation50_spill] sm:$0xff] %v15429_v11 }
 0x3fa   : > { %v11452_v16 = vpop.f32.mrf.mxu0  ;;  %v5669_v52 = vsel %vm809_vm4, %v5659_v18, %v5668_v45  ;;  %v12410_v49 = vld [vmem:[#allocation2 + $0x70] sm:$0xff]   ;;  %17761 = vst [vmem:[#allocation49_spill] sm:$0xff] %v15417_v9  ;;  %v15426_v19 = vsel %vm1270_vm5, %v6063_v20, %v6067_v63  ;;  %v6432_v20 = vld [vmem:[#allocation2 + $0x58] sm:$0xf] }
 0x3fb   : > { %5065 = vst.msk [vmem:[#allocation2 + $0x7c] sm:$0xf] %vm4823_vm9, %v10286_v33  ;;  %v4811_v25 = vmul.f32 %v15412_v4, %v4565_v34  ;;  %v4525_v39 = vadd.f32 %v15339_v35, %v4477_v40  ;;  %11611 = vmatmul.mubr.msk.bf16.gmra.mxu0 %vm5278_vm10, %v5669_v52  ;;  %v5258_v53 = vrot.slane %v12410_v49, 3  ;;  %v5671_v18 = vshrl.u32 %v12410_v49, 16 }
 0x3fc   : > { %v4404_v50 = vpop.f32.mrf.mxu0  ;;  %11614 = vmatprep.mubr.msk.bf16.mxu0 %vm12597_vm1, %v17582_v2  ;;  %v5674_v46 = vshll.u32 %v12410_v49, 16 }
 0x3fd   : > { %v10287_v59 = vpack.c.bf16 %v4811_v25, %v4811_v25  ;;  %v4566_v58 = vmax.f32 %v4525_v39, 0.0  ;;  %v4478_v33 = vadd.f32 %v4404_v50, %v14974_v29  ;;  %v5259_v24 = vsel %vm496_vm2, %v5256_v10, %v5258_v53 }
 0x3fe   : > { %v11453_v34 = vpop.f32.mrf.mxu0  ;;  %v5673_v28 = vrot.slane %v5671_v18, 2  ;;  %v5676_v51 = vrot.slane %v5674_v46, 3  ;;  %11529 = vmatmul.mubr.msk.bf16.gmra.mxu1 %vm5278_vm10, %v5259_v24  ;;  %v6069_v52 = vrot.slane %v5671_v18, 3  ;;  %v6070_v29 = vrot.slane %v5674_v46, 4 }
 0x3ff   : > { %5066 = vst.msk [vmem:[#allocation2 + $0x80] sm:$0xf] %vm4823_vm9, %v10287_v59  ;;  %v4812_v40 = vmul.f32 %v15429_v11, %v4566_v58  ;;  %v4526_v16 = vadd.f32 %v15339_v35, %v4478_v33  ;;  %11532 = vmatprep.mubr.msk.bf16.mxu1 %vm12597_vm1, %v17582_v2  ;;  %v15439_v34 = vld [vmem:[#allocation2 + $0x54] sm:$0xf]  ;;  %v15441_v59 = vpop.permute.xlu1 %4734 }
 0x400   : > { %v4409_v49 = vpop.f32.mrf.mxu0  ;;  %v5677_v25 = vor.u32 %v5676_v51, %v5673_v28  ;;  %17763 = vst [vmem:[#allocation51_spill] sm:$0xff] %v15441_v59  ;;  %v6071_v11 = vor.u32 %v6070_v29, %v6069_v52  ;;  %v15445_v18 = vcombine.low %v15439_v34, %v6432_v20 }
 0x401   : > { %v10288_v39 = vpack.c.bf16 %v4812_v40, %v4812_v40  ;;  %v4567_v10 = vmax.f32 %v4526_v16, 0.0  ;;  %v4479_v50 = vadd.f32 %v4409_v49, %v14979_v56  ;;  %v7442_v56 = vshll.u32 %v15260_v44, 16 }
 0x402   : > { %v11456_v58 = vpop.f32.mrf.mxu0  ;;  %v5678_v33 = vsel %vm809_vm4, %v5668_v45, %v5677_v25  ;;  %v12411_v24 = vld [vmem:[#allocation2 + $0x78] sm:$0xff]   ;;  %17764 = vst [vmem:[#allocation52_spill] sm:$0xff] %v15445_v18  ;;  %v15455_v20 = vsel %vm1270_vm5, %v6067_v63, %v6071_v11 }
 0x403   : > { %5067 = vst.msk [vmem:[#allocation2 + $0x84] sm:$0xf] %vm4823_vm9, %v10288_v39  ;;  %v4813_v46 = vmul.f32 %v15441_v59, %v4567_v10  ;;  %v4527_v28 = vadd.f32 %v15339_v35, %v4479_v50  ;;  %11615 = vmatmul.mubr.msk.bf16.gmra.mxu0 %vm5278_vm10, %v5678_v33  ;;  %v5260_v40 = vrot.slane %v12411_v24, 3  ;;  %v5680_v45 = vshrl.u32 %v12411_v24, 16  ;;  %v15458_v39 = vpop.permute.xlu0 %4739 }
 0x404   : > { %v4412_v51 = vpop.f32.mrf.mxu0  ;;  %11618 = vmatprep.mubr.msk.bf16.mxu0 %vm12597_vm1, %v17582_v2  ;;  %v5683_v16 = vshll.u32 %v12411_v24, 16  ;;  %17765 = vst [vmem:[#allocation53_spill] sm:$0xff] %v15458_v39  ;;  %v7439_v59 = vshrl.u32 %v15203_v13, 16 }
 0x405   : > { %v10289_v52 = vpack.c.bf16 %v4813_v46, %v4813_v46  ;;  %v4568_v49 = vmax.f32 %v4527_v28, 0.0  ;;  %v4480_v29 = vadd.f32 %v4412_v51, %v14983_v21  ;;  %v5261_v50 = vsel %vm496_vm2, %v5258_v53, %v5260_v40 }
 0x406   : > { %v11457_v10 = vpop.f32.mrf.mxu0  ;;  %v5682_v58 = vrot.slane %v5680_v45, 2  ;;  %v5685_v33 = vrot.slane %v5683_v16, 3  ;;  %11533 = vmatmul.mubr.msk.bf16.gmra.mxu1 %vm5278_vm10, %v5261_v50  ;;  %v6073_v46 = vrot.slane %v5680_v45, 3  ;;  %v6074_v51 = vrot.slane %v5683_v16, 4 }
 0x407   : > { %5068 = vst.msk [vmem:[#allocation2 + $0x88] sm:$0xf] %vm4823_vm9, %v10289_v52  ;;  %v4814_v24 = vmul.f32 %v15458_v39, %v4568_v49  ;;  %v4528_v63 = vadd.f32 %v15339_v35, %v4480_v29  ;;  %11536 = vmatprep.mubr.msk.bf16.mxu1 %vm12597_vm1, %v17582_v2  ;;  %v7441_v53 = vor.u32 %v7439_v59, %v15409_v17  ;;  %v15469_v10 = vrot.slane %v7442_v56, 1  ;;  %v15472_v49 = vpop.permute.xlu1 %4744 }
 0x408   : > { %v4417_v28 = vpop.f32.mrf.mxu0  ;;  %v5686_v21 = vor.u32 %v5685_v33, %v5682_v58  ;;  %17766 = vst [vmem:[#allocation54_spill] sm:$0xff] %v15472_v49  ;;  %v6075_v39 = vor.u32 %v6074_v51, %v6073_v46  ;;  %v15489_v46 = vpop.permute.xlu0 %4749 }
 0x409   : > { %v10290_v4 = vpack.c.bf16 %v4814_v24, %v4814_v24  ;;  %v4569_v13 = vmax.f32 %v4528_v63, 0.0  ;;  %v4481_v52 = vadd.f32 %v4417_v28, %v14988_v36  ;;  %v15477_v58 = vsel %vm2651_vm6, %v7441_v53, %v15469_v10  ;;  %17769 = vst [vmem:[#allocation57_spill] sm:$0xff] %v15489_v46 }
 0x40a   : > { %v11460_v29 = vpop.f32.mrf.mxu0  ;;  %v5687_v50 = vsel %vm809_vm4, %v5677_v25, %v5686_v21  ;;  %v12412_v45 = vld [vmem:[#allocation2 + $0x80] sm:$0xff]   ;;  %17767 = vst [vmem:[#allocation55_spill] sm:$0xff] %v15477_v58  ;;  %v15486_v33 = vsel %vm1270_vm5, %v6071_v11, %v6075_v39 }
 0x40b   : > { %5069 = vst.msk [vmem:[#allocation2 + $0x8c] sm:$0xf] %vm4823_vm9, %v10290_v4  ;;  %v4815_v17 = vmul.f32 %v15472_v49, %v4569_v13  ;;  %v4529_v59 = vadd.f32 %v15339_v35, %v4481_v52  ;;  %11619 = vmatmul.mubr.msk.bf16.gmra.mxu0 %vm5278_vm10, %v5687_v50  ;;  %v5262_v56 = vrot.slane %v12412_v45, 3  ;;  %v5689_v25 = vshrl.u32 %v12412_v45, 16  ;;  %17768 = vst [vmem:[#allocation56_spill] sm:$0xff] %v15486_v33 }
 0x40c   : > { %v4420_v36 = vpop.f32.mrf.mxu0  ;;  %11622 = vmatprep.mubr.msk.bf16.mxu0 %vm12597_vm1, %v17582_v2  ;;  %v5692_v16 = vshll.u32 %v12412_v45, 16  ;;  %v6434_v11 = vld [vmem:[#allocation2 + $0x60] sm:$0xf]  ;;  %v15675_v5 = vld [vmem:[#allocation2 + $0x84] sm:$0xf] }
 0x40d   : > { %v10291_v24 = vpack.c.bf16 %v4815_v17, %v4815_v17  ;;  %v4570_v63 = vmax.f32 %v4529_v59, 0.0  ;;  %v4482_v4 = vadd.f32 %v4420_v36, %v14991_v57  ;;  %v5263_v28 = vsel %vm496_vm2, %v5260_v40, %v5262_v56 }
 0x40e   : > { %v11461_v13 = vpop.f32.mrf.mxu0  ;;  %v5691_v51 = vrot.slane %v5689_v25, 2  ;;  %v5694_v53 = vrot.slane %v5692_v16, 3  ;;  %11537 = vmatmul.mubr.msk.bf16.gmra.mxu1 %vm5278_vm10, %v5263_v28  ;;  %v6077_v50 = vrot.slane %v5689_v25, 3  ;;  %v6078_v57 = vrot.slane %v5692_v16, 4 }
 0x40f   : > { %5070 = vst.msk [vmem:[#allocation2 + $0x90] sm:$0xf] %vm4823_vm9, %v10291_v24  ;;  %v4816_v52 = vmul.f32 %v15489_v46, %v4570_v63  ;;  %v4530_v29 = vadd.f32 %v15339_v35, %v4482_v4  ;;  %11540 = vmatprep.mubr.msk.bf16.mxu1 %vm12597_vm1, %v17582_v2  ;;  %v6433_v13 = vld [vmem:[#allocation2 + $0x5c] sm:$0xf]  ;;  %v15499_v24 = vpop.permute.xlu1 %4754 }
 0x410   : > { %v4425_v45 = vpop.f32.mrf.mxu0  ;;  %v5695_v17 = vor.u32 %v5694_v53, %v5691_v51  ;;  %17770 = vst [vmem:[#allocation58_spill] sm:$0xff] %v15499_v24  ;;  %v6079_v28 = vor.u32 %v6078_v57, %v6077_v50  ;;  %v15502_v49 = vcombine.low %v6433_v13, %v6434_v11  ;;  %v15515_v57 = vpop.permute.xlu0 %4759 }
 0x411   : > { %v10292_v59 = vpack.c.bf16 %v4816_v52, %v4816_v52  ;;  %v4571_v40 = vmax.f32 %v4530_v29, 0.0  ;;  %v4483_v36 = vadd.f32 %v4425_v45, %v14994_v48  ;;  %v7449_v48 = vshll.u32 %v15317_v47, 16  ;;  %17773 = vst [vmem:[#allocation61_spill] sm:$0xff] %v15515_v57 }
 0x412   : > { %v11464_v63 = vpop.f32.mrf.mxu0  ;;  %v5696_v4 = vsel %vm809_vm4, %v5686_v21, %v5695_v17  ;;  %v12413_v46 = vld [vmem:[#allocation2 + $0x88] sm:$0xff]   ;;  %17771 = vst [vmem:[#allocation59_spill] sm:$0xff] %v15502_v49  ;;  %v15512_v29 = vsel %vm1270_vm5, %v6075_v39, %v6079_v28 }
 0x413   : > { %5071 = vst.msk [vmem:[#allocation2 + $0x94] sm:$0xf] %vm4823_vm9, %v10292_v59  ;;  %v4817_v25 = vmul.f32 %v15499_v24, %v4571_v40  ;;  %v4531_v16 = vadd.f32 %v15339_v35, %v4483_v36  ;;  %11623 = vmatmul.mubr.msk.bf16.gmra.mxu0 %vm5278_vm10, %v5696_v4  ;;  %v5264_v53 = vrot.slane %v12413_v46, 3  ;;  %v5698_v21 = vshrl.u32 %v12413_v46, 16  ;;  %17772 = vst [vmem:[#allocation60_spill] sm:$0xff] %v15512_v29 }
 0x414   : > { %v4428_v51 = vpop.f32.mrf.mxu0  ;;  %11626 = vmatprep.mubr.msk.bf16.mxu0 %vm12597_vm1, %v17582_v2  ;;  %v5701_v52 = vshll.u32 %v12413_v46, 16  ;;  %v7446_v63 = vshrl.u32 %v15260_v44, 16 }
 0x415   : > { %v10293_v11 = vpack.c.bf16 %v4817_v25, %v4817_v25  ;;  %v4572_v50 = vmax.f32 %v4531_v16, 0.0  ;;  %v4484_v45 = vadd.f32 %v4428_v51, %v14997_v41  ;;  %v5265_v40 = vsel %vm496_vm2, %v5262_v56, %v5264_v53 }
 0x416   : > { %v11465_v59 = vpop.f32.mrf.mxu0  ;;  %v5700_v36 = vrot.slane %v5698_v21, 2  ;;  %v5703_v13 = vrot.slane %v5701_v52, 3  ;;  %11541 = vmatmul.mubr.msk.bf16.gmra.mxu1 %vm5278_vm10, %v5265_v40  ;;  %v6081_v4 = vrot.slane %v5698_v21, 3  ;;  %v6082_v16 = vrot.slane %v5701_v52, 4 }
 0x417   : > { %5072 = vst.msk [vmem:[#allocation2 + $0x98] sm:$0xf] %vm4823_vm9, %v10293_v11  ;;  %v4818_v46 = vmul.f32 %v15515_v57, %v4572_v50  ;;  %v4532_v39 = vadd.f32 %v15339_v35, %v4484_v45  ;;  %11544 = vmatprep.mubr.msk.bf16.mxu1 %vm12597_vm1, %v17582_v2  ;;  %v7448_v56 = vor.u32 %v7446_v63, %v15469_v10  ;;  %v15526_v51 = vrot.slane %v7449_v48, 1  ;;  %v15529_v50 = vpop.permute.xlu1 %4764 }
 0x418   : > { %v4433_v25 = vpop.f32.mrf.mxu0  ;;  %v5704_v41 = vor.u32 %v5703_v13, %v5700_v36  ;;  %17774 = vst [vmem:[#allocation62_spill] sm:$0xff] %v15529_v50  ;;  %v6083_v57 = vor.u32 %v6082_v16, %v6081_v4 }
 0x419   : > { %v10294_v59 = vpack.c.bf16 %v4818_v46, %v4818_v46  ;;  %v4573_v24 = vmax.f32 %v4532_v39, 0.0  ;;  %v4485_v11 = vadd.f32 %v4433_v25, %v15000_v43  ;;  %v15534_v36 = vsel %vm2651_vm6, %v7448_v56, %v15526_v51  ;;  %v15546_v25 = vpop.permute.xlu0 %4769 }
 0x41a   : > { %v11468_v45 = vpop.f32.mrf.mxu0  ;;  %v5705_v40 = vsel %vm809_vm4, %v5695_v17, %v5704_v41  ;;  %v12414_v21 = vld [vmem:[#allocation2 + $0x90] sm:$0xff]   ;;  %17775 = vst [vmem:[#allocation63_spill] sm:$0xff] %v15534_v36  ;;  %v15543_v63 = vsel %vm1270_vm5, %v6079_v28, %v6083_v57  ;;  %17777 = vst [vmem:[#allocation65_spill] sm:$0xff] %v15546_v25  ;;  %v15553_v28 = vld [vmem:[#allocation2 + $0x68] sm:$0xf] }
 0x41b   : > { %5073 = vst.msk [vmem:[#allocation2 + $0x9c] sm:$0xf] %vm4823_vm9, %v10294_v59  ;;  %v4819_v10 = vmul.f32 %v15529_v50, %v4573_v24  ;;  %v4533_v48 = vadd.f32 %v15339_v35, %v4485_v11  ;;  %11627 = vmatmul.mubr.msk.bf16.gmra.mxu0 %vm5278_vm10, %v5705_v40  ;;  %v5266_v52 = vrot.slane %v12414_v21, 3  ;;  %v5707_v17 = vshrl.u32 %v12414_v21, 16  ;;  %17776 = vst [vmem:[#allocation64_spill] sm:$0xff] %v15543_v63 }
 0x41c   : > { %v4436_v43 = vpop.f32.mrf.mxu0  ;;  %11630 = vmatprep.mubr.msk.bf16.mxu0 %vm12597_vm1, %v17582_v2  ;;  %v5710_v13 = vshll.u32 %v12414_v21, 16  ;;  %v12496_v36 = vld [vmem:[#allocation2 + $0x14] sm:$0xf] }
 0x41d   : > { %v10295_v46 = vpack.c.bf16 %v4819_v10, %v4819_v10  ;;  %v4574_v39 = vmax.f32 %v4533_v48, 0.0  ;;  %v4486_v4 = vadd.f32 %v4436_v43, %v15003_v12  ;;  %v5267_v16 = vsel %vm496_vm2, %v5264_v53, %v5266_v52 }
 0x41e   : > { %v11469_v24 = vpop.f32.mrf.mxu0  ;;  %v5709_v56 = vrot.slane %v5707_v17, 2  ;;  %v5712_v59 = vrot.slane %v5710_v13, 3  ;;  %11545 = vmatmul.mubr.msk.bf16.gmra.mxu1 %vm5278_vm10, %v5267_v16  ;;  %v6085_v40 = vrot.slane %v5707_v17, 3  ;;  %v6086_v10 = vrot.slane %v5710_v13, 4 }
 0x41f   : > { %5074 = vst.msk [vmem:[#allocation2 + $0xa0] sm:$0xf] %vm4823_vm9, %v10295_v46  ;;  %v4820_v11 = vmul.f32 %v15546_v25, %v4574_v39  ;;  %v4534_v45 = vadd.f32 %v15339_v35, %v4486_v4  ;;  %11548 = vmatprep.mubr.msk.bf16.mxu1 %vm12597_vm1, %v17582_v2  ;;  %v15558_v46 = vld [vmem:[#allocation2 + $0x64] sm:$0xf]  ;;  %v15560_v39 = vpop.permute.xlu1 %4774  ;;  %v7453_v25 = vshrl.u32 %v15317_v47, 16 }
 0x420   : > { %v4441_v21 = vpop.f32.mrf.mxu0  ;;  %v5713_v12 = vor.u32 %v5712_v59, %v5709_v56  ;;  %17778 = vst [vmem:[#allocation66_spill] sm:$0xff] %v15560_v39  ;;  %v6087_v17 = vor.u32 %v6086_v10, %v6085_v40  ;;  %v15567_v56 = vcombine.low %v15558_v46, %v15553_v28  ;;  %v7456_v59 = vshll.u32 %v15385_v22, 16  ;;  %v6412_v40 = vld [vmem:[#allocation2 + $0x8] sm:$0x8] }
 0x421   : > { %v10296_v53 = vpack.c.bf16 %v4820_v11, %v4820_v11  ;;  %v4575_v48 = vmax.f32 %v4534_v45, 0.0  ;;  %v4487_v43 = vadd.f32 %v4441_v21, %v15005_v61  ;;  %v7455_v47 = vor.u32 %v7453_v25, %v15526_v51 }
 0x422   : > { %v5714_v4 = vsel %vm809_vm4, %v5704_v41, %v5713_v12  ;;  %v15563_v24 = vld [vmem:[#allocation2 + $0x98] sm:$0xff]   ;;  %v11472_v16 = vpop.f32.mrf.mxu0  ;;  %17779 = vst [vmem:[#allocation67_spill] sm:$0xff] %v15567_v56  ;;  %v15580_v10 = vsel %vm1270_vm5, %v6083_v57, %v6087_v17  ;;  %v7458_v44 = vrot.slane %v7456_v59, 1 }
 0x423   : > { %5075 = vst.msk [vmem:[#allocation2 + $0xa4] sm:$0xf] %vm4823_vm9, %v10296_v53  ;;  %v4821_v13 = vmul.f32 %v15560_v39, %v4575_v48  ;;  %v4535_v61 = vadd.f32 %v15339_v35, %v4487_v43  ;;  %11631 = vmatmul.mubr.msk.bf16.gmra.mxu0 %vm5278_vm10, %v5714_v4  ;;  %v5268_v41 = vrot.slane %v15563_v24, 3  ;;  %v5716_v11 = vshrl.u32 %v15563_v24, 16  ;;  %17780 = vst [vmem:[#allocation68_spill] sm:$0xff] %v15580_v10  ;;  %v15582_v48 = vpop.permute.xlu0 %4779 }
 0x424   : > { %11634 = vmatprep.mubr.msk.bf16.mxu0 %vm12597_vm1, %v17582_v2  ;;  %v5719_v45 = vshll.u32 %v15563_v24, 16  ;;  %v4444_v21 = vpop.f32.mrf.mxu0  ;;  %17781 = vst [vmem:[#allocation69_spill] sm:$0xff] %v15582_v48 }
 0x425   : > { %v10297_v53 = vpack.c.bf16 %v4821_v13, %v4821_v13  ;;  %v4576_v35 = vmax.f32 %v4535_v61, 0.0  ;;  %v5269_v43 = vsel %vm496_vm2, %v5266_v52, %v5268_v41  ;;  %v5718_v4 = vrot.slane %v5716_v11, 2  ;;  %v12494_v21 = vld [vmem:[#allocation2 + $0xc] sm:$0xf]  ;;  %v12495_v52 = vld [vmem:[#allocation2 + $0x10] sm:$0xf] }
 0x426   : > { %v5721_v16 = vrot.slane %v5719_v45, 3  ;;  %v11473_v39 = vpop.f32.mrf.mxu0  ;;  %11549 = vmatmul.mubr.msk.bf16.gmra.mxu1 %vm5278_vm10, %v5269_v43  ;;  %v15589_v57 = vcombine.low %v6412_v40, %v12494_v21  ;;  %v6089_v13 = vrot.slane %v5716_v11, 3  ;;  %v6090_v61 = vrot.slane %v5719_v45, 4  ;;  %v5118_v58 = vld [vmem:[#allocation2 + $0xa0] sm:$0xf] }
 0x427   : > { %5076 = vst.msk [vmem:[#allocation2 + $0xa8] sm:$0xf] %vm4823_vm9, %v10297_v53  ;;  %v4822_v24 = vmul.f32 %v15582_v48, %v4576_v35  ;;  %11552 = vmatprep.mubr.msk.bf16.mxu1 %vm12597_vm1, %v17582_v2  ;;  %v10046_v39 = vcombine.low %v12495_v52, %v12496_v36  ;;  %v7463_v43 = vshll.u32 %v15445_v18, 16  ;;  %v15597_v45 = vsel %vm2651_vm6, %v7455_v47, %v7458_v44  ;;  %v15625_v48 = vld [vmem:[#allocation2 + $0x6c] sm:$0xf] }
 0x428   : > { %v5722_v50 = vor.u32 %v5721_v16, %v5718_v4  ;;  %v6091_v35 = vor.u32 %v6090_v61, %v6089_v13  ;;  %17782 = vst [vmem:[#allocation70_spill] sm:$0xff] %v15597_v45  ;;  %v7460_v4 = vshrl.u32 %v15385_v22, 16  ;;  %v6563_v36 = vshrl.u32 %v15589_v57, 16 }
 0x429   : > { %v10298_v53 = vpack.c.bf16 %v4822_v24, %v4822_v24  ;;  %v6574_v47 = vshll.u32 %v10046_v39, 16  ;;  %v7465_v24 = vrot.slane %v7463_v43, 1 }
 0x42a   : > { %v5723_v40 = vsel %vm809_vm4, %v5713_v12, %v5722_v50  ;;  %v5119_v21 = vld [vmem:[#allocation2 + $0xa4] sm:$0x1]  ;;  %v15606_v25 = vsel %vm1270_vm5, %v6087_v17, %v6091_v35  ;;  %v6571_v12 = vshrl.u32 %v10046_v39, 16  ;;  %v7462_v16 = vor.u32 %v7460_v4, %v7458_v44  ;;  %v15621_v4 = vld [vmem:[#allocation2 + $0x78] sm:$0xf] }
 0x42b   : > { %v6002_v11 = vld [vmem:[#allocation2 + $0xa4] sm:$0x3]  ;;  %5077 = vst.msk [vmem:[#allocation2 + $0xac] sm:$0x3] %vm4870_vm11, %v10298_v53  ;;  %11635 = vmatmul.mubr.msk.bf16.gmra.mxu0 %vm5278_vm10, %v5723_v40  ;;  %v15602_v51 = vcombine.low %v5118_v58, %v5119_v21  ;;  %17783 = vst [vmem:[#allocation71_spill] sm:$0xff] %v15606_v25  ;;  %v7470_v53 = vshll.u32 %v15502_v49, 16 }
 0x42c   : > { %v10020_v59 = vcombine.low %v5118_v58, %v6002_v11  ;;  %11638 = vmatprep.mubr.msk.bf16.mxu0 %vm12597_vm1, %v17582_v2  ;;  %v15614_v40 = vld [vmem:[#allocation2 + $0x70] sm:$0xf]  ;;  %v15617_v58 = vsel %vm2651_vm6, %v7462_v16, %v7465_v24  ;;  %v7467_v11 = vshrl.u32 %v15445_v18, 16  ;;  %v15629_v16 = vld [vmem:[#allocation2 + $0x74] sm:$0xf] }
 0x42d   : > { %v5270_v13 = vrot.slane %v15602_v51, 3  ;;  %v5725_v61 = vshrl.u32 %v15602_v51, 16  ;;  %v5728_v52 = vshll.u32 %v15602_v51, 16  ;;  %17784 = vst [vmem:[#allocation72_spill] sm:$0xff] %v15617_v58  ;;  %v6566_v51 = vshll.u32 %v15589_v57, 16 }
 0x42e   : > { %v6094_v17 = vshrl.u32 %v10020_v59, 16  ;;  %v6097_v21 = vshll.u32 %v10020_v59, 16  ;;  %v7469_v59 = vor.u32 %v7467_v11, %v7465_v24  ;;  %v15641_v24 = vcombine.low %v15629_v16, %v15621_v4  ;;  %v12497_v18 = vld [vmem:[#allocation2 + $0x18] sm:$0xf]  ;;  %v12498_v58 = vld [vmem:[#allocation2 + $0x1c] sm:$0xf] }
 0x42f   : > { %v5271_v44 = vsel %vm496_vm2, %v5268_v41, %v5270_v13  ;;  %v5727_v39 = vrot.slane %v5725_v61, 2  ;;  %v5730_v43 = vrot.slane %v5728_v52, 3  ;;  %v7472_v41 = vrot.slane %v7470_v53, 1  ;;  %v15887_v63 = vld [vmem:[#allocation2 + $0xa4] sm:$0xff]  }
 0x430   : > { %11553 = vmatmul.mubr.msk.bf16.gmra.mxu1 %vm5278_vm10, %v5271_v44  ;;  %v6096_v22 = vrot.slane %v6094_v17, 3  ;;  %v6099_v45 = vrot.slane %v6097_v21, 4  ;;  %v7477_v61 = vshll.u32 %v15567_v56, 16  ;;  %v15634_v52 = vcombine.low %v15625_v48, %v15614_v40  ;;  %17787 = vst [vmem:[#allocation75_spill] sm:$0xff] %v15641_v24  ;;  %17825 = vst [vmem:[#allocation113_spill] sm:$0xff] %v15887_v63 }
 0x431   : > { %v5731_v9 = vor.u32 %v5730_v43, %v5727_v39  ;;  %11556 = vmatprep.mubr.msk.bf16.mxu1 %vm12597_vm1, %v17582_v2  ;;  %v6573_v44 = vrot.slane %v6571_v12, 3  ;;  %v7474_v17 = vshrl.u32 %v15502_v49, 16  ;;  %v6576_v11 = vrot.slane %v6574_v47, 4  ;;  %v15644_v39 = vld [vmem:[#allocation2 + $0x80] sm:$0xf] }
 0x432   : > { %17785 = vst [vmem:[#allocation73_spill] sm:$0xff] %v15634_v52  ;;  %v15636_v57 = vor.u32 %v6099_v45, %v6096_v22  ;;  %v15647_v53 = vsel %vm2651_vm6, %v7469_v59, %v7472_v41  ;;  %v7481_v43 = vshrl.u32 %v15567_v56, 16  ;;  %v7479_v12 = vrot.slane %v7477_v61, 1  ;;  %v15660_v47 = vld [vmem:[#allocation2 + $0x88] sm:$0xf] }
 0x433   : > { %v5732_v21 = vsel %vm809_vm4, %v5722_v50, %v5731_v9  ;;  %17788 = vst [vmem:[#allocation76_spill] sm:$0xff] %v15647_v53  ;;  %v7476_v45 = vor.u32 %v7474_v17, %v7472_v41  ;;  %v7484_v49 = vshll.u32 %v15634_v52, 16  ;;  %v15658_v50 = vld [vmem:[#allocation2 + $0x7c] sm:$0xf]  ;;  %17790 = vst [vmem:[#allocation78_spill] sm:$0xff] %v15660_v47  ;;  %v7488_v59 = vshrl.u32 %v15634_v52, 16 }
 0x434   : > { %17786 = vst [vmem:[#allocation74_spill] sm:$0xff] %v15636_v57  ;;  %11639 = vmatmul.mubr.msk.bf16.gmra.mxu0 %vm5278_vm10, %v5732_v21  ;;  %v15653_v22 = vsel %vm1270_vm5, %v6091_v35, %v15636_v57  ;;  %v7491_v56 = vshll.u32 %v15641_v24, 16  ;;  %v15664_v21 = vld [vmem:[#allocation2 + $0x90] sm:$0xf]  ;;  %v7483_v41 = vor.u32 %v7481_v43, %v7479_v12  ;;  %v15671_v17 = vcombine.low %v15658_v50, %v15644_v39  ;;  %v15681_v43 = vld [vmem:[#allocation2 + $0x98] sm:$0xf] }
 0x435   : > { %17789 = vst [vmem:[#allocation77_spill] sm:$0xff] %v15653_v22  ;;  %11642 = vmatprep.mubr.msk.bf16.mxu0 %vm12597_vm1, %v17582_v2  ;;  %17791 = vst [vmem:[#allocation79_spill] sm:$0xff] %v15664_v21  ;;  %v15667_v35 = vsel %vm2651_vm6, %v7476_v45, %v7479_v12  ;;  %v7486_v61 = vrot.slane %v7484_v49, 1  ;;  %v15673_v53 = vrot.slane %v6563_v36, 3  ;;  %v10047_v32 = vcombine.low %v12497_v18, %v12498_v58  ;;  %v15679_v45 = vld [vmem:[#allocation2 + $0x8c] sm:$0xf] }
 0x436   : > { %17792 = vst [vmem:[#allocation80_spill] sm:$0xff] %v15667_v35  ;;  %17793 = vst [vmem:[#allocation81_spill] sm:$0xff] %v15671_v17  ;;  %v7493_v52 = vrot.slane %v7491_v56, 1  ;;  %v7495_v1 = vshrl.u32 %v15641_v24, 16  ;;  %v7498_v36 = vshll.u32 %v15671_v17, 16  ;;  %v15689_v18 = vcombine.low %v15675_v5, %v15660_v47 }
 0x437   : > { %17794 = vst [vmem:[#allocation82_spill] sm:$0xff] %v15681_v43  ;;  %v15684_v49 = vsel %vm2651_vm6, %v7483_v41, %v7486_v61  ;;  %v7490_v12 = vor.u32 %v7488_v59, %v7486_v61  ;;  %v6568_v56 = vrot.slane %v6566_v51, 4  ;;  %v15693_v58 = vor.u32 %v6576_v11, %v6573_v44  ;;  %v15697_v24 = vld [vmem:[#allocation2 + $0xa0] sm:$0xf]  ;;  %v6452_v41 = vld [vmem:[#allocation2 + $0xa8] sm:$0xf] }
 0x438   : > { %11557 = vmatmul.mubr.msk.bf16.gmra.mxu1 %vm5278_vm10, %v5270_v13  ;;  %17795 = vst [vmem:[#allocation83_spill] sm:$0xff] %v15684_v49  ;;  %17796 = vst [vmem:[#allocation84_spill] sm:$0xff] %v15689_v18  ;;  %v15695_v13 = vld [vmem:[#allocation2 + $0x94] sm:$0xf]  ;;  %v7497_v35 = vor.u32 %v7495_v1, %v7493_v52  ;;  %v15701_v59 = vcombine.low %v15679_v45, %v15664_v21  ;;  %v7500_v49 = vrot.slane %v7498_v36, 1  ;;  %v7502_v8 = vshrl.u32 %v15671_v17, 16 }
 0x439   : > { %11648 = vmatprep.mubr.msk.bf16.mxu1 %vm12597_vm1, %v17582_v2  ;;  %17797 = vst [vmem:[#allocation85_spill] sm:$0xff] %v15695_v13  ;;  %17798 = vst [vmem:[#allocation86_spill] sm:$0xff] %v15697_v24  ;;  %v15704_v61 = vsel %vm2651_vm6, %v7490_v12, %v7493_v52  ;;  %v7505_v51 = vshll.u32 %v15689_v18, 16  ;;  %v6580_v44 = vshrl.u32 %v10047_v32, 16  ;;  %v15708_v11 = vld [vmem:[#allocation2 + $0x9c] sm:$0xf]  ;;  %v15714_v31 = vcombine.low %v15695_v13, %v15681_v43 }
 0x43a   : > { %17799 = vst [vmem:[#allocation87_spill] sm:$0xff] %v15701_v59  ;;  %17800 = vst [vmem:[#allocation88_spill] sm:$0xff] %v15704_v61  ;;  %v7509_v30 = vshrl.u32 %v15689_v18, 16  ;;  %v7512_v1 = vshll.u32 %v15701_v59, 16  ;;  %v15717_v52 = vld [vmem:[#allocation2 + $0xa4] sm:$0xf]  ;;  %v15720_v12 = vsel %vm2651_vm6, %v7497_v35, %v7500_v49  ;;  %v7504_v36 = vor.u32 %v7502_v8, %v7500_v49 }
 0x43b   : > { %17801 = vst [vmem:[#allocation89_spill] sm:$0xff] %v15708_v11  ;;  %17802 = vst [vmem:[#allocation90_spill] sm:$0xff] %v15714_v31  ;;  %v7507_v17 = vrot.slane %v7505_v51, 1  ;;  %v15724_v61 = vcombine.low %v15708_v11, %v15697_v24  ;;  %v12418_v18 = vld [vmem:[%s17382_s4 + $0x20] sm:$0xff]   ;;  %v7519_v0 = vshll.u32 %v15714_v31, 16  ;;  %v15734_v35 = vcombine.low %v15717_v52, %v6452_v41  ;;  %v15877_v24 = vld [vmem:[#allocation2 + $0x94] sm:$0xff]  }
 0x43c   : > { %11643 = vmatmul.mubr.msk.bf16.gmra.mxu0 %vm5278_vm10, %v5731_v9  ;;  %17803 = vst [vmem:[#allocation91_spill] sm:$0xff] %v15717_v52  ;;  %17804 = vst [vmem:[#allocation92_spill] sm:$0xff] %v15720_v12  ;;  %v7514_v15 = vrot.slane %v7512_v1, 1  ;;  %v7516_v9 = vshrl.u32 %v15701_v59, 16  ;;  %v6583_v8 = vshll.u32 %v10047_v32, 16  ;;  %v7523_v25 = vshrl.u32 %v15714_v31, 16 }
 0x43d   : > { %17805 = vst [vmem:[#allocation93_spill] sm:$0xff] %v15724_v61  ;;  %11734 = vmatprep.mubr.msk.bf16.mxu0 %vm12597_vm1, %v17582_v2  ;;  %17806 = vst [vmem:[#allocation94_spill] sm:$0xff] %v15734_v35  ;;  %v15737_v49 = vsel %vm2651_vm6, %v7504_v36, %v7507_v17  ;;  %v7511_v51 = vor.u32 %v7509_v30, %v7507_v17  ;;  %v7526_v12 = vshll.u32 %v15724_v61, 16  ;;  %v7521_v22 = vrot.slane %v7519_v0, 1  ;;  %v15844_v31 = vld [vmem:[#allocation2 + $0x64] sm:$0xff]  }
 0x43e   : > { %17807 = vst [vmem:[#allocation95_spill] sm:$0xff] %v15737_v49  ;;  %v7518_v57 = vor.u32 %v7516_v9, %v7514_v15  ;;  %v7533_v1 = vshll.u32 %v15734_v35, 16  ;;  %v6569_v59 = vor.u32 %v6568_v56, %v15673_v53  ;;  %v7530_v36 = vshrl.u32 %v15724_v61, 16  ;;  %v12500_v9 = vld [vmem:[#allocation2 + $0x24] sm:$0xf]  ;;  %17822 = vst [vmem:[#allocation110_spill] sm:$0xff] %v15877_v24 }
 0x43f   : > { %v15746_v41 = vsel %vm2651_vm6, %v7511_v51, %v7514_v15  ;;  %v7528_v32 = vrot.slane %v7526_v12, 1  ;;  %v7525_v30 = vor.u32 %v7523_v25, %v7521_v22  ;;  %v6582_v53 = vrot.slane %v6580_v44, 3  ;;  %v12499_v12 = vld [vmem:[#allocation2 + $0x20] sm:$0xf] }
 0x440   : > { %11649 = vmatmul.mubr.msk.bf16.vlgmr.msra.gmra.mxu1 %vm5278_vm10, %v15062_v42  ;;  %17808 = vst [vmem:[#allocation96_spill] sm:$0xff] %v15746_v41  ;;  %v15752_v0 = vsel %vm2651_vm6, %v7518_v57, %v7521_v22  ;;  %v15754_v17 = vrot.slane %v7533_v1, 1  ;;  %v6578_v42 = vsel %vm1270_vm5, %v6569_v59, %v15693_v58  ;;  %v6585_v56 = vrot.slane %v6583_v8, 4 }
 0x441   : > { %11819 = vmatpush3.bf16.msra.mxu1 %v12418_v18  ;;  %11652 = vmatprep.mubr.msk.bf16.mxu1 %vm12597_vm1, %v17582_v2  ;;  %17809 = vst [vmem:[#allocation97_spill] sm:$0xff] %v15752_v0  ;;  %v7532_v15 = vor.u32 %v7530_v36, %v7528_v32  ;;  %v10048_v18 = vcombine.low %v12499_v12, %v12500_v9  ;;  %v12502_v36 = vld [vmem:[#allocation2 + $0x2c] sm:$0xf]  ;;  %v12507_v9 = vld [vmem:[#allocation2 + $0x40] sm:$0xf] }
 0x442   : > { %17810 = vst [vmem:[#allocation98_spill] sm:$0xff] %v15754_v17  ;;  %11990 = vmatprep.subr.bf16.mxu1 %v17582_v2  ;;  %v15760_v51 = vsel %vm2651_vm6, %v7525_v30, %v7528_v32  ;;  %v6586_v57 = vor.u32 %v6585_v56, %v6582_v53  ;;  %v12501_v32 = vld [vmem:[#allocation2 + $0x28] sm:$0xf]  ;;  %v12506_v56 = vld [vmem:[#allocation2 + $0x3c] sm:$0xf]  ;;  %v15853_v0 = vld [vmem:[#allocation2 + $0x6c] sm:$0xff]  }
 0x443   : > { %17811 = vst [vmem:[#allocation99_spill] sm:$0xff] %v15760_v51  ;;  %v15765_v25 = vsel %vm2651_vm6, %v7532_v15, %v15754_v17  ;;  %v6589_v22 = vshrl.u32 %v10048_v18, 16  ;;  %v6592_v59 = vshll.u32 %v10048_v18, 16  ;;  %v10049_v30 = vcombine.low %v12501_v32, %v12502_v36  ;;  %v12504_v15 = vld [vmem:[#allocation2 + $0x34] sm:$0xf] }
 0x444   : > { %11735 = vmatmul.mubr.msk.bf16.vlgmr.msra.gmra.mxu0 %vm5278_vm10, %v6578_v42  ;;  %17812 = vst [vmem:[#allocation100_spill] sm:$0xff] %v15765_v25  ;;  %v6587_v44 = vsel %vm1270_vm5, %v15693_v58, %v6586_v57  ;;  %v12503_v42 = vld [vmem:[#allocation2 + $0x30] sm:$0xf]  ;;  %v12508_v18 = vld [vmem:[#allocation2 + $0x44] sm:$0xf] }
 0x445   : > { %11738 = vmatprep.mubr.msk.bf16.mxu0 %vm12597_vm1, %v17582_v2  ;;  %v6591_v8 = vrot.slane %v6589_v22, 3  ;;  %v6594_v1 = vrot.slane %v6592_v59, 4  ;;  %v10050_v53 = vcombine.low %v12503_v42, %v12504_v15  ;;  %v10052_v17 = vcombine.low %v12507_v9, %v12508_v18  ;;  %v12509_v58 = vld [vmem:[#allocation2 + $0x48] sm:$0xf] }
 0x446   : > { %v10053_v22 = vcombine.low %v12509_v58, %v15378_v7  ;;  %v6598_v35 = vshrl.u32 %v10049_v30, 16  ;;  %v6601_v32 = vshll.u32 %v10049_v30, 16 }
 0x447   : > { %v6595_v59 = vor.u32 %v6594_v1, %v6591_v8  ;;  %v6610_v36 = vshll.u32 %v10050_v53, 16 }
 0x448   : > { %11653 = vmatmul.mubr.msk.bf16.gmra.mxu1 %vm5278_vm10, %v15090_v54  ;;  %v12505_v54 = vld [vmem:[#allocation2 + $0x38] sm:$0xf]  ;;  %v6634_v25 = vshrl.u32 %v10053_v22, 16  ;;  %v6637_v9 = vshll.u32 %v10053_v22, 16  ;;  %v6600_v7 = vrot.slane %v6598_v35, 3  ;;  %v6603_v8 = vrot.slane %v6601_v32, 4 }
 0x449   : > { %11656 = vmatprep.mubr.msk.bf16.mxu1 %vm12597_vm1, %v17582_v2  ;;  %v10051_v12 = vcombine.low %v12505_v54, %v12506_v56  ;;  %v6625_v54 = vshrl.u32 %v10052_v17, 16  ;;  %v6628_v56 = vshll.u32 %v10052_v17, 16  ;;  %v6596_v18 = vsel %vm1270_vm5, %v6586_v57, %v6595_v59  ;;  %v15789_v35 = vld [vmem:[#allocation2 + $0x1c] sm:$0xff]  }
 0x44a   : > { %v6612_v30 = vrot.slane %v6610_v36, 4  ;;  %v6639_v51 = vrot.slane %v6637_v9, 4  ;;  %v10054_v17 = vcombine.low %v15373_v3, %v15439_v34  ;;  %v6604_v57 = vor.u32 %v6603_v8, %v6600_v7  ;;  %17813 = vst [vmem:[#allocation101_spill] sm:$0xff] %v15789_v35  ;;  %v15798_v9 = vld [vmem:[#allocation2 + $0x24] sm:$0xff]   ;;  %v7859_v7 = vld [vmem:[#allocation2 + $0x18] sm:$0xf] }
 0x44b   : > { %v6616_v42 = vshrl.u32 %v10051_v12, 16  ;;  %v6619_v15 = vshll.u32 %v10051_v12, 16  ;;  %v6627_v58 = vrot.slane %v6625_v54, 3  ;;  %v6630_v61 = vrot.slane %v6628_v56, 4  ;;  %17814 = vst [vmem:[#allocation102_spill] sm:$0xff] %v15798_v9  ;;  %v15804_v8 = vld [vmem:[#allocation2 + $0x2c] sm:$0xff]  }
 0x44c   : > { %11739 = vmatmul.mubr.msk.bf16.gmra.mxu0 %vm5278_vm10, %v6587_v44  ;;  %v6607_v44 = vshrl.u32 %v10050_v53, 16  ;;  %v6636_v12 = vrot.slane %v6634_v25, 3  ;;  %v6643_v25 = vshrl.u32 %v10054_v17, 16  ;;  %v6646_v54 = vshll.u32 %v10054_v17, 16  ;;  %17816 = vst [vmem:[#allocation104_spill] sm:$0xff] %v15804_v8 }
 0x44d   : > { %11742 = vmatprep.mubr.msk.bf16.mxu0 %vm12597_vm1, %v17582_v2  ;;  %v6621_v53 = vrot.slane %v6619_v15, 4  ;;  %v6605_v34 = vsel %vm1270_vm5, %v6595_v59, %v6604_v57  ;;  %v17829_v49 = vshrl.u32 %v15798_v9, 16 }
 0x44e   : > { %v6609_v1 = vrot.slane %v6607_v44, 3  ;;  %v15795_v15 = vor.u32 %v6639_v51, %v6636_v12  ;;  %v15819_v12 = vld [vmem:[#allocation2 + $0x44] sm:$0xff]  }
 0x450   : > { %11657 = vmatmul.mubr.msk.bf16.gmra.mxu1 %vm5278_vm10, %v15119_v23  ;;  %v6618_v23 = vrot.slane %v6616_v42, 3  ;;  %v6613_v44 = vor.u32 %v6612_v30, %v6609_v1  ;;  %v6631_v42 = vor.u32 %v6630_v61, %v6627_v58  ;;  %v15806_v61 = vld [vmem:[#allocation2 + $0x34] sm:$0xff]   ;;  %v15817_v58 = vld [vmem:[#allocation2 + $0x3c] sm:$0xff]  }
 0x451   : > { %11660 = vmatprep.mubr.msk.bf16.mxu1 %vm12597_vm1, %v17582_v2  ;;  %17817 = vst [vmem:[#allocation105_spill] sm:$0xff] %v15806_v61 }
 0x452   : > { %v6622_v36 = vor.u32 %v6621_v53, %v6618_v23  ;;  %v6614_v59 = vsel %vm1270_vm5, %v6604_v57, %v6613_v44  ;;  %v8482_v53 = vld [vmem:[#allocation2 + $0x14] sm:$0xe]  ;;  %v15823_v17 = vsel %vm1270_vm5, %v6631_v42, %v15795_v15 }
 0x454   : > { %11743 = vmatmul.mubr.msk.bf16.gmra.mxu0 %vm5278_vm10, %v6596_v18  ;;  %v17530_v18 = vshrl.u32 %v15789_v35, 16  ;;  %v15812_v30 = vsel %vm1270_vm5, %v6613_v44, %v6622_v36  ;;  %v15815_v23 = vsel %vm1270_vm5, %v6622_v36, %v6631_v42  ;;  %v15830_v44 = vld [vmem:[#allocation2 + $0x4c] sm:$0xff]  }
 0x455   : > { %11746 = vmatprep.mubr.msk.bf16.mxu0 %vm12597_vm1, %v17582_v2 }
 0x456   : > { %v5376_v22 = vpop.f32.mrf.mxu1  ;;  %v15839_v42 = vrot.slane %v17530_v18, 1 }
 0x458   : > { %11661 = vmatmul.mubr.msk.bf16.gmra.mxu1 %vm5278_vm10, %v15154_v38  ;;  %v11478_v32 = vpop.f32.mrf.mxu1 }
 0x459   : > { %11664 = vmatprep.mubr.msk.bf16.mxu1 %vm12597_vm1, %v17582_v2  ;;  %v15827_v32 = vrot.slane %v6646_v54, 4  ;;  %v15842_v54 = vld [vmem:[#allocation2 + $0x5c] sm:$0xff]  }
 0x45a   : > { %v5379_v56 = vpop.f32.mrf.mxu1 }
 0x45b   : > { %v5836_v3 = vpop.f32.mrf.mxu0 }
 0x45c   : > { %v15801_v38 = vadd.f32 %v5836_v3, %v5376_v22  ;;  %11747 = vmatmul.mubr.msk.bf16.gmra.mxu0 %vm5278_vm10, %v6605_v34  ;;  %v11479_v51 = vpop.f32.mrf.mxu1  ;;  %v15825_v22 = vrot.slane %v6643_v25, 3  ;;  %v15832_v3 = vld [vmem:[#allocation2 + $0x54] sm:$0xff]   ;;  %v15871_v25 = vld [vmem:[#allocation2 + $0x8c] sm:$0xff]  }
 0x45d   : > { %v11564_v1 = vpop.f32.mrf.mxu0  ;;  %11750 = vmatprep.mubr.msk.bf16.mxu0 %vm12597_vm1, %v17582_v2  ;;  %v15834_v51 = vcombine.low %v8482_v53, %v7859_v7  ;;  %v15861_v7 = vld [vmem:[#allocation2 + $0x74] sm:$0xff]   ;;  %v15863_v53 = vld [vmem:[#allocation2 + $0x7c] sm:$0xff]   ;;  %17821 = vst [vmem:[#allocation109_spill] sm:$0xff] %v15871_v25 }
 0x45e   : > { %17815 = vst [vmem:[#allocation103_spill] sm:$0xff] %v15801_v38  ;;  %v5384_v36 = vpop.f32.mrf.mxu1 }
 0x45f   : > { %v5839_v34 = vpop.f32.mrf.mxu0  ;;  %17818 = vst [vmem:[#allocation106_spill] sm:$0xff] %v15834_v51  ;;  %v8848_v52 = vshrl.u32 %v15834_v51, 16 }
 0x460   : > { %v15846_v57 = vadd.f32 %v5839_v34, %v5379_v56  ;;  %11665 = vmatmul.mubr.msk.bf16.gmra.mxu1 %vm5278_vm10, %v15186_v26  ;;  %v11482_v18 = vpop.f32.mrf.mxu1  ;;  %v15898_v26 = vld [vmem:[#allocation2 + $0xac] sm:$0xff]  }
 0x461   : > { %v11565_v41 = vpop.f32.mrf.mxu0  ;;  %11668 = vmatprep.mubr.msk.bf16.mxu1 %vm12597_vm1, %v17582_v2  ;;  %v15879_v18 = vld [vmem:[#allocation2 + $0x9c] sm:$0xff]   ;;  %17826 = vst [vmem:[#allocation114_spill] sm:$0xff] %v15898_v26 }
 0x462   : > { %17819 = vst [vmem:[#allocation107_spill] sm:$0xff] %v15846_v57  ;;  %v15869_v57 = vld [vmem:[#allocation2 + $0x84] sm:$0xff]   ;;  %v5387_v56 = vpop.f32.mrf.mxu1  ;;  %17823 = vst [vmem:[#allocation111_spill] sm:$0xff] %v15879_v18 }
 0x463   : > { %17820 = vst [vmem:[#allocation108_spill] sm:$0xff] %v15869_v57  ;;  %v5844_v34 = vpop.f32.mrf.mxu0 }
 0x464   : > { %v15881_v41 = vadd.f32 %v5844_v34, %v5384_v36  ;;  %11751 = vmatmul.mubr.msk.bf16.gmra.mxu0 %vm5278_vm10, %v6614_v59  ;;  %v11483_v38 = vpop.f32.mrf.mxu1  ;;  %v12443_v36 = vld [vmem:[%s17382_s4 + $0x28] sm:$0xff]  }
 0x465   : > { %v11568_v10 = vpop.f32.mrf.mxu0  ;;  %11754 = vmatprep.mubr.msk.bf16.mxu0 %vm12597_vm1, %v17582_v2  ;;  %11905 = vmatpush3.bf16.msra.mxu0 %v12443_v36  ;;  %v17830_v36 = vshll.u32 %v15798_v9, 16  ;;  %v17835_v9 = vshrl.u32 %v15817_v58, 16 }
 0x466   : > { %17824 = vst [vmem:[#allocation112_spill] sm:$0xff] %v15881_v41  ;;  %v5392_v43 = vpop.f32.mrf.mxu1  ;;  %12076 = vmatprep.subr.bf16.mxu0 %v17582_v2  ;;  %v8859_v41 = vrot.slane %v17829_v49, 1 }
 0x467   : > { %v5847_v11 = vpop.f32.mrf.mxu0 }
 0x468   : > { %v15908_v29 = vadd.f32 %v5847_v11, %v5387_v56  ;;  %11669 = vmatmul.mubr.msk.bf16.gmra.mxu1 %vm5278_vm10, %v15213_v62  ;;  %v11486_v34 = vpop.f32.mrf.mxu1  ;;  %v8850_v11 = vrot.slane %v8848_v52, 1  ;;  %v8851_v56 = vshll.u32 %v15834_v51, 16  ;;  %v17828_v62 = vshll.u32 %v15789_v35, 16 }
 0x469   : > { %v11569_v38 = vpop.f32.mrf.mxu0  ;;  %11672 = vmatprep.mubr.msk.bf16.mxu1 %vm12597_vm1, %v17582_v2  ;;  %v8860_v34 = vrot.slane %v17830_v36, 2  ;;  %v17832_v51 = vshll.u32 %v15804_v8, 16  ;;  %v17834_v36 = vshll.u32 %v15806_v61, 16 }
 0x46a   : > { %17827 = vst [vmem:[#allocation115_spill] sm:$0xff] %v15908_v29  ;;  %v8856_v59 = vrot.slane %v17828_v62, 2  ;;  %v17831_v38 = vshrl.u32 %v15804_v8, 16  ;;  %v5395_v21 = vpop.f32.mrf.mxu1  ;;  %v8853_v1 = vrot.slane %v8851_v56, 2  ;;  %v17833_v62 = vshrl.u32 %v15806_v61, 16 }
 0x46b   : > { %v5852_v13 = vpop.f32.mrf.mxu0  ;;  %v8864_v35 = vrot.slane %v17832_v51, 2  ;;  %v8861_v49 = vor.u32 %v8860_v34, %v8859_v41  ;;  %v8871_v56 = vrot.slane %v17835_v9, 1 }
 0x46c   : > { %v8863_v29 = vrot.slane %v17831_v38, 1  ;;  %v8857_v52 = vor.u32 %v8856_v59, %v15839_v42  ;;  %v8867_v10 = vrot.slane %v17833_v62, 1  ;;  %v15934_v33 = vadd.f32 %v5852_v13, %v5392_v43  ;;  %11755 = vmatmul.mubr.msk.bf16.gmra.mxu0 %vm5278_vm10, %v15812_v30  ;;  %v11487_v47 = vpop.f32.mrf.mxu1 }
 0x46d   : > { %v8868_v38 = vrot.slane %v17834_v36, 2  ;;  %v11572_v42 = vpop.f32.mrf.mxu0  ;;  %11758 = vmatprep.mubr.msk.bf16.mxu0 %vm12597_vm1, %v17582_v2  ;;  %v8854_v51 = vor.u32 %v8853_v1, %v8850_v11  ;;  %v17836_v43 = vshll.u32 %v15817_v58, 16  ;;  %v17837_v62 = vshrl.u32 %v15819_v12, 16 }
 0x46e   : > { %v8865_v59 = vor.u32 %v8864_v35, %v8863_v29  ;;  %v15949_v41 = vsel %vm4087_vm8, %v8857_v52, %v8861_v49  ;;  %v17839_v36 = vshll.u32 %v15819_v12, 16  ;;  %v17840_v47 = vshrl.u32 %v15830_v44, 16  ;;  %v5400_v61 = vpop.f32.mrf.mxu1 }
 0x46f   : > { %v8872_v13 = vrot.slane %v17836_v43, 2  ;;  %v8875_v30 = vrot.slane %v17837_v62, 1  ;;  %17838 = vst [vmem:[#allocation116_spill] sm:$0xff] %v15949_v41  ;;  %v8869_v34 = vor.u32 %v8868_v38, %v8867_v10  ;;  %v5855_v8 = vpop.f32.mrf.mxu0  ;;  %v15956_v29 = vsel %vm4087_vm8, %v8854_v51, %v8857_v52 }
 0x470   : > { %v8876_v9 = vrot.slane %v17839_v36, 2  ;;  %v8879_v42 = vrot.slane %v17840_v47, 1  ;;  %17841 = vst [vmem:[#allocation117_spill] sm:$0xff] %v15956_v29  ;;  %v15959_v35 = vsel %vm4087_vm8, %v8861_v49, %v8865_v59  ;;  %v17843_v11 = vshll.u32 %v15830_v44, 16  ;;  %11673 = vmatmul.mubr.msk.bf16.gmra.mxu1 %vm5278_vm10, %v15244_v6  ;;  %v11490_v51 = vpop.f32.mrf.mxu1 }
 0x471   : > { %17842 = vst [vmem:[#allocation118_spill] sm:$0xff] %v15959_v35  ;;  %v8873_v1 = vor.u32 %v8872_v13, %v8871_v56  ;;  %v15963_v62 = vadd.f32 %v5855_v8, %v5395_v21  ;;  %v15968_v10 = vsel %vm4087_vm8, %v8865_v59, %v8869_v34  ;;  %v17845_v36 = vshrl.u32 %v15832_v3, 16  ;;  %v11573_v47 = vpop.f32.mrf.mxu0  ;;  %11676 = vmatprep.mubr.msk.bf16.mxu1 %vm12597_vm1, %v17582_v2 }
 0x472   : > { %v8880_v43 = vrot.slane %v17843_v11, 2  ;;  %17844 = vst [vmem:[#allocation119_spill] sm:$0xff] %v15968_v10  ;;  %v8877_v38 = vor.u32 %v8876_v9, %v8875_v30  ;;  %v17847_v8 = vshll.u32 %v15832_v3, 16  ;;  %v17848_v6 = vshrl.u32 %v15842_v54, 16  ;;  %v5403_v47 = vpop.f32.mrf.mxu1 }
 0x473   : > { %v8883_v52 = vrot.slane %v17845_v36, 1  ;;  %v15975_v49 = vsel %vm4087_vm8, %v8869_v34, %v8873_v1  ;;  %v17850_v30 = vshll.u32 %v15842_v54, 16  ;;  %v17851_v11 = vshrl.u32 %v15844_v31, 16 }
 0x474   : > { %17846 = vst [vmem:[#allocation120_spill] sm:$0xff] %v15975_v49  ;;  %v8881_v21 = vor.u32 %v8880_v43, %v8879_v42  ;;  %v8884_v56 = vrot.slane %v17847_v8, 2  ;;  %v8887_v59 = vrot.slane %v17848_v6, 1  ;;  %v15982_v13 = vsel %vm4087_vm8, %v8873_v1, %v8877_v38  ;;  %v5860_v42 = vpop.f32.mrf.mxu0  ;;  %11759 = vmatmul.mubr.msk.bf16.gmra.mxu0 %vm5278_vm10, %v15815_v23  ;;  %v11491_v41 = vpop.f32.mrf.mxu1 }
 0x475   : > { %17849 = vst [vmem:[#allocation121_spill] sm:$0xff] %v15982_v13  ;;  %v8888_v9 = vrot.slane %v17850_v30, 2  ;;  %v8891_v36 = vrot.slane %v17851_v11, 1  ;;  %v17852_v51 = vshll.u32 %v15844_v31, 16  ;;  %v17854_v6 = vshrl.u32 %v15853_v0, 16  ;;  %11762 = vmatprep.mubr.msk.bf16.mxu0 %vm12597_vm1, %v17582_v2 }
 0x476   : > { %v15991_v43 = vsel %vm4087_vm8, %v8877_v38, %v8881_v21  ;;  %v8885_v8 = vor.u32 %v8884_v56, %v8883_v52  ;;  %v17855_v1 = vshll.u32 %v15853_v0, 16  ;;  %v15997_v10 = vadd.f32 %v5860_v42, %v5400_v61  ;;  %v11576_v38 = vpop.f32.mrf.mxu0 }
 0x477   : > { %v8892_v34 = vrot.slane %v17852_v51, 2  ;;  %17853 = vst [vmem:[#allocation122_spill] sm:$0xff] %v15991_v43  ;;  %v8895_v49 = vrot.slane %v17854_v6, 1  ;;  %v8889_v30 = vor.u32 %v8888_v9, %v8887_v59  ;;  %v17856_v51 = vshrl.u32 %v15861_v7, 16 }
 0x478   : > { %v8896_v13 = vrot.slane %v17855_v1, 2  ;;  %v16006_v52 = vsel %vm4087_vm8, %v8881_v21, %v8885_v8  ;;  %v17858_v61 = vshll.u32 %v15861_v7, 16  ;;  %v17859_v6 = vshrl.u32 %v15863_v53, 16  ;;  %v5408_v1 = vpop.f32.mrf.mxu1  ;;  %11677 = vmatmul.mubr.msk.bf16.gmra.mxu1 %vm5278_vm10, %v15270_v37 }
 0x479   : > { %v8893_v11 = vor.u32 %v8892_v34, %v8891_v36  ;;  %v8899_v35 = vrot.slane %v17856_v51, 1  ;;  %17857 = vst [vmem:[#allocation123_spill] sm:$0xff] %v16006_v52  ;;  %v16013_v59 = vsel %vm4087_vm8, %v8885_v8, %v8889_v30  ;;  %v17862_v41 = vshll.u32 %v15863_v53, 16  ;;  %11680 = vmatprep.mubr.msk.bf16.mxu1 %vm12597_vm1, %v17582_v2 }
 0x47a   : > { %v8897_v56 = vor.u32 %v8896_v13, %v8895_v49  ;;  %v8900_v42 = vrot.slane %v17858_v61, 2  ;;  %v8903_v23 = vrot.slane %v17859_v6, 1  ;;  %17860 = vst [vmem:[#allocation124_spill] sm:$0xff] %v16013_v59  ;;  %v17863_v34 = vshrl.u32 %v15869_v57, 16  ;;  %v5863_v49 = vpop.f32.mrf.mxu0 }
 0x47b   : > { %v16016_v9 = vsel %vm4087_vm8, %v8889_v30, %v8893_v11  ;;  %v8904_v36 = vrot.slane %v17862_v41, 2  ;;  %v17865_v38 = vshll.u32 %v15869_v57, 16  ;;  %v17866_v8 = vshrl.u32 %v15871_v25, 16 }
 0x47c   : > { %17861 = vst [vmem:[#allocation125_spill] sm:$0xff] %v16016_v9  ;;  %v8907_v21 = vrot.slane %v17863_v34, 1  ;;  %v16023_v13 = vsel %vm4087_vm8, %v8893_v11, %v8897_v56  ;;  %v8901_v51 = vor.u32 %v8900_v42, %v8899_v35  ;;  %v16029_v30 = vadd.f32 %v5863_v49, %v5403_v47  ;;  %v11577_v35 = vpop.f32.mrf.mxu0  ;;  %11763 = vmatmul.mubr.msk.bf16.gmra.mxu0 %vm5278_vm10, %v15823_v17 }
 0x47d   : > { %17864 = vst [vmem:[#allocation126_spill] sm:$0xff] %v16023_v13  ;;  %v8908_v61 = vrot.slane %v17865_v38, 2  ;;  %v8911_v6 = vrot.slane %v17866_v8, 1  ;;  %v8905_v41 = vor.u32 %v8904_v36, %v8903_v23  ;;  %v17867_v34 = vshll.u32 %v15871_v25, 16  ;;  %v11494_v13 = vpop.f32.mrf.mxu1  ;;  %11766 = vmatprep.mubr.msk.bf16.mxu0 %vm12597_vm1, %v17582_v2 }
 0x47e   : > { %v17868_v59 = vshrl.u32 %v15877_v24, 16  ;;  %v16040_v42 = vsel %vm4087_vm8, %v8897_v56, %v8901_v51  ;;  %v17870_v49 = vshll.u32 %v15877_v24, 16  ;;  %v17871_v37 = vshrl.u32 %v15879_v18, 16  ;;  %v5868_v56 = vpop.f32.mrf.mxu0  ;;  %v17909_v24 = vld [vmem:[#allocation13_spill] sm:$0xff] }
 0x47f   : > { %v8912_v9 = vrot.slane %v17867_v34, 2  ;;  %17869 = vst [vmem:[#allocation127_spill] sm:$0xff] %v16040_v42  ;;  %v8909_v47 = vor.u32 %v8908_v61, %v8907_v21  ;;  %v16047_v36 = vsel %vm4087_vm8, %v8901_v51, %v8905_v41  ;;  %v17874_v34 = vshrl.u32 %v15887_v63, 16  ;;  %v5411_v52 = vpop.f32.mrf.mxu1  ;;  %v12510_v42 = vld [vmem:[#allocation2 + $0x58] sm:$0xf] }
 0x480   : > { %v8915_v11 = vrot.slane %v17868_v59, 1  ;;  %v8916_v38 = vrot.slane %v17870_v49, 2  ;;  %v8919_v23 = vrot.slane %v17871_v37, 1  ;;  %17872 = vst [vmem:[#allocation128_spill] sm:$0xff] %v16047_v36  ;;  %v17873_v59 = vshll.u32 %v15879_v18, 16  ;;  %11681 = vmatmul.mubr.msk.bf16.gmra.mxu1 %vm5278_vm10, %v15301_v27  ;;  %v17908_v18 = vld [vmem:[#allocation107_spill] sm:$0xff] }
 0x481   : > { %v8913_v8 = vor.u32 %v8912_v9, %v8911_v6  ;;  %v8923_v35 = vrot.slane %v17874_v34, 1  ;;  %v12511_v21 = vld [vmem:[#allocation2 + $0x5c] sm:$0xf]  ;;  %v16054_v49 = vsel %vm4087_vm8, %v8905_v41, %v8909_v47  ;;  %v17876_v37 = vshll.u32 %v15887_v63, 16  ;;  %v11580_v34 = vpop.f32.mrf.mxu0  ;;  %11684 = vmatprep.mubr.msk.bf16.mxu1 %vm12597_vm1, %v17582_v2  ;;  %v17906_v63 = vld [vmem:[#allocation103_spill] sm:$0xff] }
 0x482   : > { %v8920_v13 = vrot.slane %v17873_v59, 2  ;;  %v10055_v61 = vcombine.low %v12510_v42, %v12511_v21  ;;  %17875 = vst [vmem:[#allocation129_spill] sm:$0xff] %v16054_v49  ;;  %v8917_v43 = vor.u32 %v8916_v38, %v8915_v11  ;;  %v16058_v36 = vadd.f32 %v5868_v56, %v5408_v1  ;;  %v11495_v59 = vpop.f32.mrf.mxu1 }
 0x483   : > { %v8924_v51 = vrot.slane %v17876_v37, 2  ;;  %v16063_v9 = vsel %vm4087_vm8, %v8909_v47, %v8913_v8  ;;  %v17880_v1 = vshrl.u32 %v15898_v26, 16  ;;  %v17881_v17 = vshll.u32 %v15898_v26, 16 }
 0x484   : > { %17877 = vst [vmem:[#allocation130_spill] sm:$0xff] %v16063_v9  ;;  %v8921_v6 = vor.u32 %v8920_v13, %v8919_v23  ;;  %v16068_v41 = vsel %vm4087_vm8, %v8913_v8, %v8917_v43  ;;  %v5416_v56 = vpop.f32.mrf.mxu1  ;;  %v5871_v23 = vpop.f32.mrf.mxu0  ;;  %v6649_v13 = vor.u32 %v15827_v32, %v15825_v22  ;;  %v6652_v21 = vshrl.u32 %v10055_v61, 16 }
 0x485   : > { %17878 = vst [vmem:[#allocation131_spill] sm:$0xff] %v16068_v41  ;;  %v8925_v11 = vor.u32 %v8924_v51, %v8923_v35  ;;  %v8927_v38 = vrot.slane %v17880_v1, 1  ;;  %v8928_v47 = vrot.slane %v17881_v17, 2  ;;  %v6655_v37 = vshll.u32 %v10055_v61, 16  ;;  %v12512_v1 = vld [vmem:[#allocation2 + $0x60] sm:$0xf] }
 0x486   : > { %v16071_v42 = vsel %vm4087_vm8, %v8917_v43, %v8921_v6  ;;  %v16082_v35 = vadd.f32 %v5871_v23, %v5411_v52  ;;  %v11498_v51 = vpop.f32.mrf.mxu1  ;;  %v11581_v59 = vpop.f32.mrf.mxu0  ;;  %v6650_v52 = vsel %vm1270_vm5, %v15795_v15, %v6649_v13  ;;  %v10056_v27 = vcombine.low %v12512_v1, %v15558_v46 }
 0x487   : > { %17879 = vst [vmem:[#allocation132_spill] sm:$0xff] %v16071_v42  ;;  %v16080_v8 = vsel %vm4087_vm8, %v8921_v6, %v8925_v11  ;;  %v16086_v43 = vor.u32 %v8928_v47, %v8927_v38  ;;  %v6654_v6 = vrot.slane %v6652_v21, 3  ;;  %v6657_v34 = vrot.slane %v6655_v37, 4  ;;  %11767 = vmatmul.mubr.msk.bf16.gmra.mxu0 %vm5278_vm10, %v6650_v52 }
 0x488   : > { %17882 = vst [vmem:[#allocation133_spill] sm:$0xff] %v16080_v8  ;;  %v5419_v32 = vpop.f32.mrf.mxu1  ;;  %v5876_v61 = vpop.f32.mrf.mxu0  ;;  %11770 = vmatprep.mubr.msk.bf16.mxu0 %vm12597_vm1, %v17582_v2  ;;  %v6661_v59 = vshrl.u32 %v10056_v27, 16  ;;  %11685 = vmatmul.mubr.msk.bf16.gmra.mxu1 %vm5278_vm10, %v15327_v60 }
 0x489   : > { %17883 = vst [vmem:[#allocation134_spill] sm:$0xff] %v16086_v43  ;;  %v16092_v22 = vsel %vm4087_vm8, %v8925_v11, %v16086_v43  ;;  %v16097_v38 = vadd.f32 %v5876_v61, %v5416_v56  ;;  %v6658_v51 = vor.u32 %v6657_v34, %v6654_v6  ;;  %v6664_v43 = vshll.u32 %v10056_v27, 16  ;;  %11688 = vmatprep.mubr.msk.bf16.mxu1 %vm12597_vm1, %v17582_v2 }
 0x48a   : > { %17884 = vst [vmem:[#allocation135_spill] sm:$0xff] %v16092_v22  ;;  %v11499_v17 = vpop.f32.mrf.mxu1  ;;  %v11584_v47 = vpop.f32.mrf.mxu0  ;;  %v6663_v52 = vrot.slane %v6661_v59, 3  ;;  %v10057_v6 = vcombine.low %v15553_v28, %v15625_v48 }
 0x48b   : > { %v6659_v61 = vsel %vm1270_vm5, %v6649_v13, %v6658_v51  ;;  %v6666_v1 = vrot.slane %v6664_v43, 4 }
 0x48c   : > { %v5424_v11 = vpop.f32.mrf.mxu1  ;;  %v5879_v23 = vpop.f32.mrf.mxu0 }
 0x48d   : > { %v16102_v15 = vadd.f32 %v5879_v23, %v5419_v32  ;;  %v6667_v47 = vor.u32 %v6666_v1, %v6663_v52  ;;  %v6670_v23 = vshrl.u32 %v10057_v6, 16 }
 0x48e   : > { %v11502_v46 = vpop.f32.mrf.mxu1  ;;  %v11585_v56 = vpop.f32.mrf.mxu0 }
 0x48f   : > { %11771 = vmatmul.mubr.msk.bf16.gmra.mxu0 %vm5278_vm10, %v6659_v61  ;;  %v6673_v46 = vshll.u32 %v10057_v6, 16  ;;  %v6668_v59 = vsel %vm1270_vm5, %v6658_v51, %v6667_v47  ;;  %v6672_v56 = vrot.slane %v6670_v23, 3  ;;  %v10058_v61 = vcombine.low %v15614_v40, %v15629_v16 }
 0x490   : > { %v5427_v21 = vpop.f32.mrf.mxu1  ;;  %v5884_v37 = vpop.f32.mrf.mxu0  ;;  %11774 = vmatprep.mubr.msk.bf16.mxu0 %vm12597_vm1, %v17582_v2  ;;  %11689 = vmatmul.mubr.msk.bf16.gmra.mxu1 %vm5278_vm10, %v15363_v14 }
 0x491   : > { %v16111_v34 = vadd.f32 %v5884_v37, %v5424_v11  ;;  %11692 = vmatprep.mubr.msk.bf16.mxu1 %vm12597_vm1, %v17582_v2  ;;  %v6675_v37 = vrot.slane %v6673_v46, 4 }
 0x492   : > { %v11503_v32 = vpop.f32.mrf.mxu1  ;;  %v11588_v60 = vpop.f32.mrf.mxu0 }
 0x493   : > { %v6676_v32 = vor.u32 %v6675_v37, %v6672_v56  ;;  %v6679_v60 = vshrl.u32 %v10058_v61, 16 }
 0x494   : > { %v5432_v27 = vpop.f32.mrf.mxu1  ;;  %v5887_v17 = vpop.f32.mrf.mxu0 }
 0x495   : > { %v16116_v13 = vadd.f32 %v5887_v17, %v5427_v21  ;;  %v6682_v17 = vshll.u32 %v10058_v61, 16  ;;  %v6677_v46 = vsel %vm1270_vm5, %v6667_v47, %v6676_v32 }
 0x496   : > { %v11506_v28 = vpop.f32.mrf.mxu1  ;;  %v11589_v48 = vpop.f32.mrf.mxu0 }
 0x497   : > { %11775 = vmatmul.mubr.msk.bf16.gmra.mxu0 %vm5278_vm10, %v6668_v59  ;;  %v6681_v28 = vrot.slane %v6679_v60, 3  ;;  %v6684_v48 = vrot.slane %v6682_v17, 4 }
 0x498   : > { %v5435_v43 = vpop.f32.mrf.mxu1  ;;  %v5892_v11 = vpop.f32.mrf.mxu0  ;;  %11778 = vmatprep.mubr.msk.bf16.mxu0 %vm12597_vm1, %v17582_v2  ;;  %11693 = vmatmul.mubr.msk.bf16.gmra.mxu1 %vm5278_vm10, %v15395_v55 }
 0x499   : > { %v16125_v52 = vadd.f32 %v5892_v11, %v5432_v27  ;;  %11696 = vmatprep.mubr.msk.bf16.mxu1 %vm12597_vm1, %v17582_v2  ;;  %v10059_v11 = vcombine.low %v15621_v4, %v15658_v50  ;;  %v6685_v61 = vor.u32 %v6684_v48, %v6681_v28 }
 0x49a   : > { %v11507_v21 = vpop.f32.mrf.mxu1  ;;  %v11592_v14 = vpop.f32.mrf.mxu0 }
 0x49b   : > { %v6688_v21 = vshrl.u32 %v10059_v11, 16  ;;  %v6691_v14 = vshll.u32 %v10059_v11, 16  ;;  %v6686_v60 = vsel %vm1270_vm5, %v6676_v32, %v6685_v61 }
 0x49c   : > { %v5440_v1 = vpop.f32.mrf.mxu1  ;;  %v5895_v6 = vpop.f32.mrf.mxu0 }
 0x49d   : > { %v16130_v51 = vadd.f32 %v5895_v6, %v5435_v43  ;;  %v6690_v17 = vrot.slane %v6688_v21, 3 }
 0x49e   : > { %v11510_v40 = vpop.f32.mrf.mxu1  ;;  %v11593_v16 = vpop.f32.mrf.mxu0 }
 0x49f   : > { %11779 = vmatmul.mubr.msk.bf16.gmra.mxu0 %vm5278_vm10, %v6677_v46  ;;  %v6693_v40 = vrot.slane %v6691_v14, 4  ;;  %v10060_v16 = vcombine.low %v15644_v39, %v15675_v5 }
 0x4a0   : > { %v5443_v27 = vpop.f32.mrf.mxu1  ;;  %v5900_v23 = vpop.f32.mrf.mxu0  ;;  %11782 = vmatprep.mubr.msk.bf16.mxu0 %vm12597_vm1, %v17582_v2  ;;  %11697 = vmatmul.mubr.msk.bf16.gmra.mxu1 %vm5278_vm10, %v15426_v19 }
 0x4a1   : > { %v16139_v59 = vadd.f32 %v5900_v23, %v5440_v1  ;;  %11700 = vmatprep.mubr.msk.bf16.mxu1 %vm12597_vm1, %v17582_v2  ;;  %v6694_v48 = vor.u32 %v6693_v40, %v6690_v17  ;;  %v6697_v11 = vshrl.u32 %v10060_v16, 16 }
 0x4a2   : > { %v11511_v43 = vpop.f32.mrf.mxu1  ;;  %v11596_v55 = vpop.f32.mrf.mxu0 }
 0x4a3   : > { %v6700_v43 = vshll.u32 %v10060_v16, 16  ;;  %v6699_v21 = vrot.slane %v6697_v11, 3 }
 0x4a4   : > { %v5448_v56 = vpop.f32.mrf.mxu1  ;;  %v5903_v37 = vpop.f32.mrf.mxu0 }
 0x4a5   : > { %v16144_v47 = vadd.f32 %v5903_v37, %v5443_v27  ;;  %v6695_v37 = vsel %vm1270_vm5, %v6685_v61, %v6694_v48  ;;  %v6702_v14 = vrot.slane %v6700_v43, 4 }
 0x4a6   : > { %v11514_v4 = vpop.f32.mrf.mxu1  ;;  %v11597_v50 = vpop.f32.mrf.mxu0 }
 0x4a7   : > { %11783 = vmatmul.mubr.msk.bf16.gmra.mxu0 %vm5278_vm10, %v6686_v60  ;;  %v17885_v4 = vld [vmem:[#allocation78_spill] sm:$0xff]  ;;  %v6703_v40 = vor.u32 %v6702_v14, %v6699_v21 }
 0x4a8   : > { %v5451_v1 = vpop.f32.mrf.mxu1  ;;  %v5908_v6 = vpop.f32.mrf.mxu0  ;;  %11786 = vmatprep.mubr.msk.bf16.mxu0 %vm12597_vm1, %v17582_v2  ;;  %11701 = vmatmul.mubr.msk.bf16.gmra.mxu1 %vm5278_vm10, %v15455_v20  ;;  %v10061_v50 = vcombine.low %v17885_v4, %v15679_v45 }
 0x4a9   : > { %v16153_v23 = vadd.f32 %v5908_v6, %v5448_v56  ;;  %11704 = vmatprep.mubr.msk.bf16.mxu1 %vm12597_vm1, %v17582_v2  ;;  %v6704_v43 = vsel %vm1270_vm5, %v6694_v48, %v6703_v40 }
 0x4aa   : > { %v11515_v27 = vpop.f32.mrf.mxu1  ;;  %v11600_v19 = vpop.f32.mrf.mxu0  ;;  %v6706_v16 = vshrl.u32 %v10061_v50, 16 }
 0x4ab   : > { %v6709_v27 = vshll.u32 %v10061_v50, 16  ;;  %v17886_v19 = vld [vmem:[#allocation56_spill] sm:$0xff] }
 0x4ac   : > { %v5456_v46 = vpop.f32.mrf.mxu1  ;;  %v5911_v28 = vpop.f32.mrf.mxu0 }
 0x4ad   : > { %v16158_v32 = vadd.f32 %v5911_v28, %v5451_v1 }
 0x4ae   : > { %v11518_v5 = vpop.f32.mrf.mxu1  ;;  %v11601_v39 = vpop.f32.mrf.mxu0 }
 0x4af   : > { %11787 = vmatmul.mubr.msk.bf16.gmra.mxu0 %vm5278_vm10, %v6695_v37  ;;  %v6708_v5 = vrot.slane %v6706_v16, 3  ;;  %v6711_v39 = vrot.slane %v6709_v27, 4  ;;  %v17888_v37 = vld [vmem:[#allocation79_spill] sm:$0xff]  ;;  %v17889_v16 = vld [vmem:[#allocation60_spill] sm:$0xff] }
 0x4b0   : > { %v5459_v55 = vpop.f32.mrf.mxu1  ;;  %v5916_v56 = vpop.f32.mrf.mxu0  ;;  %11790 = vmatprep.mubr.msk.bf16.mxu0 %vm12597_vm1, %v17582_v2  ;;  %11705 = vmatmul.mubr.msk.bf16.gmra.mxu1 %vm5278_vm10, %v17886_v19 }
 0x4b1   : > { %v16167_v6 = vadd.f32 %v5916_v56, %v5456_v46  ;;  %11708 = vmatprep.mubr.msk.bf16.mxu1 %vm12597_vm1, %v17582_v2  ;;  %v17887_v56 = vld [vmem:[#allocation85_spill] sm:$0xff] }
 0x4b2   : > { %v11519_v1 = vpop.f32.mrf.mxu1  ;;  %v11604_v20 = vpop.f32.mrf.mxu0  ;;  %v10062_v21 = vcombine.low %v17888_v37, %v17887_v56  ;;  %v17890_v37 = vld [vmem:[#allocation89_spill] sm:$0xff] }
 0x4b3   : > { %v6712_v20 = vor.u32 %v6711_v39, %v6708_v5  ;;  %v17891_v5 = vld [vmem:[#allocation82_spill] sm:$0xff] }
 0x4b4   : > { %v5464_v60 = vpop.f32.mrf.mxu1  ;;  %v5919_v17 = vpop.f32.mrf.mxu0  ;;  %v6718_v19 = vshll.u32 %v10062_v21, 16  ;;  %v10063_v39 = vcombine.low %v17891_v5, %v17890_v37 }
 0x4b5   : > { %v16172_v61 = vadd.f32 %v5919_v17, %v5459_v55  ;;  %v6715_v17 = vshrl.u32 %v10062_v21, 16 }
 0x4b6   : > { %v11522_v45 = vpop.f32.mrf.mxu1  ;;  %v11605_v46 = vpop.f32.mrf.mxu0  ;;  %v6720_v56 = vrot.slane %v6718_v19, 4 }
 0x4b7   : > { %11791 = vmatmul.mubr.msk.bf16.gmra.mxu0 %vm5278_vm10, %v6704_v43  ;;  %v6717_v43 = vrot.slane %v6715_v17, 3  ;;  %v17892_v17 = vld [vmem:[#allocation64_spill] sm:$0xff] }
 0x4b8   : > { %v5467_v28 = vpop.f32.mrf.mxu1  ;;  %v5924_v11 = vpop.f32.mrf.mxu0  ;;  %11794 = vmatprep.mubr.msk.bf16.mxu0 %vm12597_vm1, %v17582_v2  ;;  %11709 = vmatmul.mubr.msk.bf16.gmra.mxu1 %vm5278_vm10, %v17889_v16 }
 0x4b9   : > { %v16181_v14 = vadd.f32 %v5924_v11, %v5464_v60  ;;  %11712 = vmatprep.mubr.msk.bf16.mxu1 %vm12597_vm1, %v17582_v2  ;;  %v6713_v11 = vsel %vm1270_vm5, %v6703_v40, %v6712_v20  ;;  %v6721_v16 = vor.u32 %v6720_v56, %v6717_v43  ;;  %v17894_v43 = vld [vmem:[#allocation86_spill] sm:$0xff] }
 0x4ba   : > { %v11523_v55 = vpop.f32.mrf.mxu1  ;;  %v11608_v4 = vpop.f32.mrf.mxu0 }
 0x4bb   : > { %v6722_v37 = vsel %vm1270_vm5, %v6712_v20, %v6721_v16 }
 0x4bc   : > { %v5472_v50 = vpop.f32.mrf.mxu1  ;;  %v5927_v1 = vpop.f32.mrf.mxu0 }
 0x4bd   : > { %v16186_v48 = vadd.f32 %v5927_v1, %v5467_v28 }
 0x4be   : > { %v11526_v27 = vpop.f32.mrf.mxu1  ;;  %v11609_v60 = vpop.f32.mrf.mxu0 }
 0x4bf   : > { %11795 = vmatmul.mubr.msk.bf16.gmra.mxu0 %vm5278_vm10, %v6713_v11  ;;  %v6724_v27 = vshrl.u32 %v10063_v39, 16  ;;  %v6727_v60 = vshll.u32 %v10063_v39, 16 }
 0x4c0   : > { %v5475_v45 = vpop.f32.mrf.mxu1  ;;  %v5932_v46 = vpop.f32.mrf.mxu0  ;;  %11798 = vmatprep.mubr.msk.bf16.mxu0 %vm12597_vm1, %v17582_v2  ;;  %11713 = vmatmul.mubr.msk.bf16.gmra.mxu1 %vm5278_vm10, %v17892_v17 }
 0x4c1   : > { %v16195_v21 = vadd.f32 %v5932_v46, %v5472_v50  ;;  %11716 = vmatprep.mubr.msk.bf16.mxu1 %vm12597_vm1, %v17582_v2  ;;  %v6726_v5 = vrot.slane %v6724_v27, 3  ;;  %v17895_v27 = vld [vmem:[#allocation68_spill] sm:$0xff] }
 0x4c2   : > { %v11527_v28 = vpop.f32.mrf.mxu1  ;;  %v11612_v55 = vpop.f32.mrf.mxu0 }
 0x4c3   : > { %v6729_v28 = vrot.slane %v6727_v60, 4  ;;  %v17893_v55 = vld [vmem:[#allocation91_spill] sm:$0xff] }
 0x4c4   : > { %v5480_v4 = vpop.f32.mrf.mxu1  ;;  %v5935_v1 = vpop.f32.mrf.mxu0  ;;  %v10064_v56 = vcombine.low %v17894_v43, %v17893_v55  ;;  %v16218_v60 = vld [vmem:[#allocation2 + $0xac] sm:$0x3] }
 0x4c5   : > { %v16200_v40 = vadd.f32 %v5935_v1, %v5475_v45 }
 0x4c6   : > { %v11530_v19 = vpop.f32.mrf.mxu1  ;;  %v11613_v50 = vpop.f32.mrf.mxu0  ;;  %v6733_v22 = vshrl.u32 %v10064_v56, 16  ;;  %v6736_v8 = vshll.u32 %v10064_v56, 16 }
 0x4c7   : > { %11799 = vmatmul.mubr.msk.bf16.gmra.mxu0 %vm5278_vm10, %v6722_v37  ;;  %v6730_v50 = vor.u32 %v6729_v28, %v6726_v5  ;;  %v12513_v28 = vld [vmem:[#allocation2 + $0xa8] sm:$0xf] }
 0x4c8   : > { %v5483_v46 = vpop.f32.mrf.mxu1  ;;  %v5940_v11 = vpop.f32.mrf.mxu0  ;;  %11802 = vmatprep.mubr.msk.bf16.mxu0 %vm12597_vm1, %v17582_v2  ;;  %11717 = vmatmul.mubr.msk.bf16.gmra.mxu1 %vm5278_vm10, %v17895_v27  ;;  %v6738_v5 = vrot.slane %v6736_v8, 4  ;;  %v17896_v8 = vld [vmem:[#allocation71_spill] sm:$0xff] }
 0x4c9   : > { %v16209_v39 = vadd.f32 %v5940_v11, %v5480_v4  ;;  %11720 = vmatprep.mubr.msk.bf16.mxu1 %vm12597_vm1, %v17582_v2  ;;  %v6731_v43 = vsel %vm1270_vm5, %v6721_v16, %v6730_v50 }
 0x4ca   : > { %v11531_v45 = vpop.f32.mrf.mxu1  ;;  %v11616_v1 = vpop.f32.mrf.mxu0 }
 0x4cb   : > { %v6735_v45 = vrot.slane %v6733_v22, 3 }
 0x4cc   : > { %v5488_v17 = vpop.f32.mrf.mxu1  ;;  %v5943_v19 = vpop.f32.mrf.mxu0 }
 0x4cd   : > { %v16214_v20 = vadd.f32 %v5943_v19, %v5483_v46  ;;  %v10065_v46 = vcombine.low %v12513_v28, %v16218_v60 }
 0x4ce   : > { %v11534_v4 = vpop.f32.mrf.mxu1  ;;  %v11617_v11 = vpop.f32.mrf.mxu0 }
 0x4cf   : > { %11803 = vmatmul.mubr.msk.bf16.gmra.mxu0 %vm5278_vm10, %v6731_v43  ;;  %v6739_v11 = vor.u32 %v6738_v5, %v6735_v45  ;;  %v6742_v42 = vshrl.u32 %v10065_v46, 16  ;;  %v6745_v41 = vshll.u32 %v10065_v46, 16 }
 0x4d0   : > { %v5491_v37 = vpop.f32.mrf.mxu1  ;;  %v5948_v55 = vpop.f32.mrf.mxu0  ;;  %11806 = vmatprep.mubr.msk.bf16.mxu0 %vm12597_vm1, %v17582_v2  ;;  %11721 = vmatmul.mubr.msk.bf16.gmra.mxu1 %vm5278_vm10, %v17896_v8 }
 0x4d1   : > { %v16224_v56 = vadd.f32 %v5948_v55, %v5488_v17  ;;  %11724 = vmatprep.mubr.msk.bf16.mxu1 %vm12597_vm1, %v17582_v2  ;;  %v6740_v28 = vsel %vm1270_vm5, %v6730_v50, %v6739_v11 }
 0x4d2   : > { %v11535_v1 = vpop.f32.mrf.mxu1  ;;  %v11620_v19 = vpop.f32.mrf.mxu0 }
 0x4d3   : > { %v6744_v1 = vrot.slane %v6742_v42, 3  ;;  %v6747_v19 = vrot.slane %v6745_v41, 4 }
 0x4d4   : > { %v5496_v27 = vpop.f32.mrf.mxu1  ;;  %v5951_v4 = vpop.f32.mrf.mxu0 }
 0x4d5   : > { %v16229_v16 = vadd.f32 %v5951_v4, %v5491_v37  ;;  %v6748_v4 = vor.u32 %v6747_v19, %v6744_v1 }
 0x4d6   : > { %v11538_v22 = vpop.f32.mrf.mxu1  ;;  %v11621_v17 = vpop.f32.mrf.mxu0 }
 0x4d7   : > { %11807 = vmatmul.mubr.msk.bf16.gmra.mxu0 %vm5278_vm10, %v6740_v28  ;;  %v17897_v22 = vld [vmem:[#allocation77_spill] sm:$0xff]  ;;  %v6749_v17 = vsel %vm1270_vm5, %v6739_v11, %v6748_v4 }
 0x4d8   : > { %v5499_v55 = vpop.f32.mrf.mxu1  ;;  %v5956_v43 = vpop.f32.mrf.mxu0  ;;  %11810 = vmatprep.mubr.msk.bf16.mxu0 %vm12597_vm1, %v17582_v2  ;;  %11725 = vmatmul.mubr.msk.bf16.gmra.mxu1 %vm5278_vm10, %v17897_v22 }
 0x4d9   : > { %v16236_v9 = vadd.f32 %v5956_v43, %v5496_v27  ;;  %11728 = vmatprep.mubr.msk.bf16.mxu1 %vm12597_vm1, %v17582_v2 }
 0x4da   : > { %v11539_v37 = vpop.f32.mrf.mxu1  ;;  %v11624_v45 = vpop.f32.mrf.mxu0 }
 0x4db   : > { %v17898_v45 = vld [vmem:[#allocation74_spill] sm:$0xff] }
 0x4dc   : > { %v5504_v5 = vpop.f32.mrf.mxu1  ;;  %v5959_v46 = vpop.f32.mrf.mxu0 }
 0x4dd   : > { %v16241_v8 = vadd.f32 %v5959_v46, %v5499_v55 }
 0x4de   : > { %v11542_v50 = vpop.f32.mrf.mxu1  ;;  %v11625_v42 = vpop.f32.mrf.mxu0 }
 0x4df   : > { %11811 = vmatmul.mubr.msk.bf16.gmra.mxu0 %vm5278_vm10, %v6749_v17 }
 0x4e0   : > { %v5507_v41 = vpop.f32.mrf.mxu1  ;;  %v5964_v27 = vpop.f32.mrf.mxu0  ;;  %11814 = vmatprep.mubr.msk.bf16.mxu0 %vm12597_vm1, %v17582_v2  ;;  %11729 = vmatmul.mubr.msk.bf16.gmra.mxu1 %vm5278_vm10, %v17898_v45 }
 0x4e1   : > { %v16248_v43 = vadd.f32 %v5964_v27, %v5504_v5  ;;  %11820 = vmatprep.mubr.msk.bf16.mxu1 %vm12597_vm1, %v17582_v2 }
 0x4e2   : > { %v11543_v28 = vpop.f32.mrf.mxu1  ;;  %v11628_v1 = vpop.f32.mrf.mxu0 }
 0x4e4   : > { %v5512_v55 = vpop.f32.mrf.mxu1  ;;  %v5967_v19 = vpop.f32.mrf.mxu0 }
 0x4e5   : > { %v16253_v37 = vadd.f32 %v5967_v19, %v5507_v41  ;;  %v12444_v41 = vld [vmem:[%s17382_s4 + $0x30] sm:$0xff]  }
 0x4e6   : > { %v11546_v46 = vpop.f32.mrf.mxu1  ;;  %v11629_v22 = vpop.f32.mrf.mxu0  ;;  %v17899_v19 = vld [vmem:[#allocation28_spill] sm:$0xff] }
 0x4e7   : > { %11815 = vmatmul.mubr.msk.bf16.gmra.mxu0 %vm5278_vm10, %v6748_v4 }
 0x4e8   : > { %v5515_v11 = vpop.f32.mrf.mxu1  ;;  %v5972_v5 = vpop.f32.mrf.mxu0  ;;  %11906 = vmatprep.mubr.msk.bf16.mxu0 %vm12597_vm1, %v17582_v2  ;;  %11821 = vmatmul.mubr.msk.bf16.vlgmr.msra.gmra.mxu1 %vm5278_vm10, %v17899_v19  ;;  %v17901_v19 = vld [vmem:[#allocation29_spill] sm:$0xff] }
 0x4e9   : > { %v16259_v50 = vadd.f32 %v5972_v5, %v5512_v55  ;;  %11991 = vmatpush3.bf16.msra.mxu1 %v12444_v41  ;;  %11824 = vmatprep.mubr.msk.bf16.mxu1 %vm12597_vm1, %v17582_v2  ;;  %v17900_v5 = vld [vmem:[#allocation14_spill] sm:$0xff] }
 0x4ea   : > { %v11547_v42 = vpop.f32.mrf.mxu1  ;;  %v11632_v27 = vpop.f32.mrf.mxu0  ;;  %12162 = vmatprep.subr.bf16.mxu1 %v17582_v2 }
 0x4ec   : > { %v5520_v17 = vpop.f32.mrf.mxu1  ;;  %v5975_v28 = vpop.f32.mrf.mxu0 }
 0x4ed   : > { %v16267_v1 = vadd.f32 %v5975_v28, %v5515_v11 }
 0x4ee   : > { %v11550_v55 = vpop.f32.mrf.mxu1  ;;  %v11633_v45 = vpop.f32.mrf.mxu0 }
 0x4ef   : > { %11907 = vmatmul.mubr.msk.bf16.vlgmr.msra.gmra.mxu0 %vm5278_vm10, %v17900_v5  ;;  %v17902_v5 = vld [vmem:[#allocation19_spill] sm:$0xff] }
 0x4f0   : > { %v5523_v4 = vpop.f32.mrf.mxu1  ;;  %v5980_v46 = vpop.f32.mrf.mxu0  ;;  %11910 = vmatprep.mubr.msk.bf16.mxu0 %vm12597_vm1, %v17582_v2  ;;  %11825 = vmatmul.mubr.msk.bf16.gmra.mxu1 %vm5278_vm10, %v17901_v19  ;;  %v17903_v19 = vld [vmem:[#allocation11_spill] sm:$0xff] }
 0x4f1   : > { %v16274_v22 = vadd.f32 %v5980_v46, %v5520_v17  ;;  %11828 = vmatprep.mubr.msk.bf16.mxu1 %vm12597_vm1, %v17582_v2 }
 0x4f2   : > { %v11551_v11 = vpop.f32.mrf.mxu1  ;;  %v11636_v42 = vpop.f32.mrf.mxu0 }
 0x4f4   : > { %v5983_v27 = vpop.f32.mrf.mxu0  ;;  %v5528_v41 = vpop.f32.mrf.mxu1 }
 0x4f5   : > { %v16280_v28 = vadd.f32 %v5983_v27, %v5523_v4 }
 0x4f6   : > { %v11637_v55 = vpop.f32.mrf.mxu0  ;;  %v11554_v17 = vpop.f32.mrf.mxu1 }
 0x4f7   : > { %11911 = vmatmul.mubr.msk.bf16.gmra.mxu0 %vm5278_vm10, %v17902_v5 }
 0x4f8   : > { %v5531_v45 = vpop.f32.mrf.mxu1  ;;  %v5988_v46 = vpop.f32.mrf.mxu0  ;;  %11914 = vmatprep.mubr.msk.bf16.mxu0 %vm12597_vm1, %v17582_v2  ;;  %11829 = vmatmul.mubr.msk.bf16.gmra.mxu1 %vm5278_vm10, %v17903_v19 }
 0x4f9   : > { %v16288_v11 = vadd.f32 %v5988_v46, %v5528_v41  ;;  %11832 = vmatprep.mubr.msk.bf16.mxu1 %vm12597_vm1, %v17582_v2  ;;  %v17904_v46 = vld [vmem:[#allocation37_spill] sm:$0xff] }
 0x4fa   : > { %v11555_v4 = vpop.f32.mrf.mxu1  ;;  %v11640_v42 = vpop.f32.mrf.mxu0 }
 0x4fc   : > { %v5536_v27 = vpop.f32.mrf.mxu1  ;;  %v5991_v49 = vpop.f32.mrf.mxu0 }
 0x4fd   : > { %v16294_v55 = vadd.f32 %v5991_v49, %v5531_v45  ;;  %v17905_v45 = vld [vmem:[#allocation12_spill] sm:$0xff] }
 0x4fe   : > { %v11558_v17 = vpop.f32.mrf.mxu1  ;;  %v11641_v29 = vpop.f32.mrf.mxu0 }
 0x4ff   : > { %11915 = vmatmul.mubr.msk.bf16.gmra.mxu0 %vm5278_vm10, %v17904_v46 }
 0x500   : > { %v5539_v5 = vpop.f32.mrf.mxu1  ;;  %v5996_v41 = vpop.f32.mrf.mxu0  ;;  %11918 = vmatprep.mubr.msk.bf16.mxu0 %vm12597_vm1, %v17582_v2  ;;  %11833 = vmatmul.mubr.msk.bf16.gmra.mxu1 %vm5278_vm10, %v17905_v45 }
 0x501   : > { %v16300_v26 = vadd.f32 %v5996_v41, %v5536_v27  ;;  %11836 = vmatprep.mubr.msk.bf16.mxu1 %vm12597_vm1, %v17582_v2  ;;  %v17907_v41 = vld [vmem:[#allocation43_spill] sm:$0xff] }
 0x502   : > { %v11559_v4 = vpop.f32.mrf.mxu1  ;;  %v11644_v42 = vpop.f32.mrf.mxu0 }
 0x504   : > { %v5999_v19 = vpop.f32.mrf.mxu0  ;;  %v6205_v49 = vpop.f32.mrf.mxu1 }
 0x505   : > { %v6371_v17 = vadd.f32 %v6205_v49, %v17906_v63 }
 0x506   : > { %v11645_v29 = vpop.f32.mrf.mxu0  ;;  %v11650_v5 = vpop.f32.mrf.mxu1 }
 0x507   : > { %11919 = vmatmul.mubr.msk.bf16.gmra.mxu0 %vm5278_vm10, %v17907_v41  ;;  %v17910_v29 = vld [vmem:[#allocation112_spill] sm:$0xff]  ;;  %v17911_v41 = vld [vmem:[#allocation49_spill] sm:$0xff] }
 0x508   : > { %v6208_v46 = vpop.f32.mrf.mxu1  ;;  %v6853_v27 = vpop.f32.mrf.mxu0  ;;  %11922 = vmatprep.mubr.msk.bf16.mxu0 %vm12597_vm1, %v17582_v2  ;;  %11837 = vmatmul.mubr.msk.bf16.gmra.mxu1 %vm5278_vm10, %v17909_v24 }
 0x509   : > { %v6372_v4 = vadd.f32 %v6208_v46, %v17908_v18  ;;  %v16312_v42 = vadd.f32 %v6853_v27, %v6371_v17  ;;  %11840 = vmatprep.mubr.msk.bf16.mxu1 %vm12597_vm1, %v17582_v2 }
 0x50a   : > { %v11651_v19 = vpop.f32.mrf.mxu1  ;;  %v11736_v45 = vpop.f32.mrf.mxu0 }
 0x50b   : > { %v17912_v19 = vld [vmem:[#allocation115_spill] sm:$0xff] }
 0x50c   : > { %v6213_v63 = vpop.f32.mrf.mxu1  ;;  %v6856_v49 = vpop.f32.mrf.mxu0 }
 0x50d   : > { %v6373_v5 = vadd.f32 %v6213_v63, %v17910_v29  ;;  %v16319_v25 = vadd.f32 %v6856_v49, %v6372_v4  ;;  %v12465_v63 = vld [vmem:[%s17382_s4 + $0x38] sm:$0xff]  }
 0x50e   : > { %v11654_v18 = vpop.f32.mrf.mxu1  ;;  %v11737_v17 = vpop.f32.mrf.mxu0  ;;  %12077 = vmatpush3.bf16.msra.mxu0 %v12465_v63 }
 0x50f   : > { %11923 = vmatmul.mubr.msk.bf16.gmra.mxu0 %vm5278_vm10, %v17911_v41  ;;  %v17913_v18 = vld [vmem:[#allocation16_spill] sm:$0xff]  ;;  %12248 = vmatprep.subr.mxu0 %v17582_v2 }
 0x510   : > { %v6216_v46 = vpop.f32.mrf.mxu1  ;;  %v6861_v27 = vpop.f32.mrf.mxu0  ;;  %11926 = vmatprep.mubr.msk.bf16.mxu0 %vm12597_vm1, %v17582_v2  ;;  %11841 = vmatmul.mubr.msk.bf16.gmra.mxu1 %vm5278_vm10, %v17913_v18 }
 0x511   : > { %v6374_v45 = vadd.f32 %v6216_v46, %v17912_v19  ;;  %v16326_v57 = vadd.f32 %v6861_v27, %v6373_v5  ;;  %11844 = vmatprep.mubr.msk.bf16.mxu1 %vm12597_vm1, %v17582_v2 }
 0x512   : > { %v11655_v24 = vpop.f32.mrf.mxu1  ;;  %v11740_v4 = vpop.f32.mrf.mxu0 }
 0x513   : > { %v17914_v24 = vld [vmem:[#allocation55_spill] sm:$0xff] }
 0x514   : > { %v6221_v49 = vpop.f32.mrf.mxu1  ;;  %v6864_v29 = vpop.f32.mrf.mxu0 }
 0x515   : > { %v6375_v17 = vadd.f32 %v6221_v49, %v15934_v33  ;;  %v16336_v46 = vadd.f32 %v6864_v29, %v6374_v45  ;;  %v17915_v29 = vld [vmem:[#allocation34_spill] sm:$0xff] }
 0x516   : > { %v11658_v5 = vpop.f32.mrf.mxu1  ;;  %v11741_v27 = vpop.f32.mrf.mxu0 }
 0x517   : > { %11927 = vmatmul.mubr.msk.bf16.gmra.mxu0 %vm5278_vm10, %v17914_v24  ;;  %v17916_v24 = vld [vmem:[#allocation63_spill] sm:$0xff] }
 0x518   : > { %v6224_v41 = vpop.f32.mrf.mxu1  ;;  %v6869_v19 = vpop.f32.mrf.mxu0  ;;  %11930 = vmatprep.mubr.msk.bf16.mxu0 %vm12597_vm1, %v17582_v2  ;;  %11845 = vmatmul.mubr.msk.bf16.gmra.mxu1 %vm5278_vm10, %v17915_v29  ;;  %v17917_v29 = vld [vmem:[#allocation40_spill] sm:$0xff] }
 0x519   : > { %v6376_v4 = vadd.f32 %v6224_v41, %v15963_v62  ;;  %v16344_v18 = vadd.f32 %v6869_v19, %v6375_v17  ;;  %11848 = vmatprep.mubr.msk.bf16.mxu1 %vm12597_vm1, %v17582_v2 }
 0x51a   : > { %v11659_v33 = vpop.f32.mrf.mxu1  ;;  %v11744_v45 = vpop.f32.mrf.mxu0 }
 0x51c   : > { %v6229_v63 = vpop.f32.mrf.mxu1  ;;  %v6872_v49 = vpop.f32.mrf.mxu0 }
 0x51d   : > { %v6377_v5 = vadd.f32 %v6229_v63, %v15997_v10  ;;  %v16351_v27 = vadd.f32 %v6872_v49, %v6376_v4 }
 0x51e   : > { %v11662_v62 = vpop.f32.mrf.mxu1  ;;  %v11745_v17 = vpop.f32.mrf.mxu0 }
 0x51f   : > { %11931 = vmatmul.mubr.msk.bf16.gmra.mxu0 %vm5278_vm10, %v17916_v24  ;;  %v17918_v24 = vld [vmem:[#allocation70_spill] sm:$0xff] }
 0x520   : > { %v6232_v41 = vpop.f32.mrf.mxu1  ;;  %v6877_v19 = vpop.f32.mrf.mxu0  ;;  %11934 = vmatprep.mubr.msk.bf16.mxu0 %vm12597_vm1, %v17582_v2  ;;  %11849 = vmatmul.mubr.msk.bf16.gmra.mxu1 %vm5278_vm10, %v17917_v29  ;;  %v17919_v29 = vld [vmem:[#allocation46_spill] sm:$0xff] }
 0x521   : > { %v6378_v33 = vadd.f32 %v6232_v41, %v16029_v30  ;;  %v16358_v45 = vadd.f32 %v6877_v19, %v6377_v5  ;;  %11852 = vmatprep.mubr.msk.bf16.mxu1 %vm12597_vm1, %v17582_v2 }
 0x522   : > { %v11663_v10 = vpop.f32.mrf.mxu1  ;;  %v11748_v4 = vpop.f32.mrf.mxu0 }
 0x524   : > { %v6237_v63 = vpop.f32.mrf.mxu1  ;;  %v6880_v49 = vpop.f32.mrf.mxu0 }
 0x525   : > { %v6379_v62 = vadd.f32 %v6237_v63, %v16058_v36  ;;  %v16365_v17 = vadd.f32 %v6880_v49, %v6378_v33 }
 0x526   : > { %v11666_v30 = vpop.f32.mrf.mxu1  ;;  %v11749_v5 = vpop.f32.mrf.mxu0 }
 0x527   : > { %11935 = vmatmul.mubr.msk.bf16.gmra.mxu0 %vm5278_vm10, %v17918_v24  ;;  %v17920_v24 = vld [vmem:[#allocation72_spill] sm:$0xff] }
 0x528   : > { %v6240_v41 = vpop.f32.mrf.mxu1  ;;  %v6885_v19 = vpop.f32.mrf.mxu0  ;;  %11938 = vmatprep.mubr.msk.bf16.mxu0 %vm12597_vm1, %v17582_v2  ;;  %11853 = vmatmul.mubr.msk.bf16.gmra.mxu1 %vm5278_vm10, %v17919_v29  ;;  %v17921_v29 = vld [vmem:[#allocation52_spill] sm:$0xff] }
 0x529   : > { %v6380_v10 = vadd.f32 %v6240_v41, %v16082_v35  ;;  %v16372_v4 = vadd.f32 %v6885_v19, %v6379_v62  ;;  %11856 = vmatprep.mubr.msk.bf16.mxu1 %vm12597_vm1, %v17582_v2 }
 0x52a   : > { %v11667_v36 = vpop.f32.mrf.mxu1  ;;  %v11752_v33 = vpop.f32.mrf.mxu0 }
 0x52c   : > { %v6245_v63 = vpop.f32.mrf.mxu1  ;;  %v6888_v49 = vpop.f32.mrf.mxu0 }
 0x52d   : > { %v6381_v30 = vadd.f32 %v6245_v63, %v16097_v38  ;;  %v16379_v5 = vadd.f32 %v6888_v49, %v6380_v10 }
 0x52e   : > { %v11670_v35 = vpop.f32.mrf.mxu1  ;;  %v11753_v62 = vpop.f32.mrf.mxu0 }
 0x52f   : > { %11939 = vmatmul.mubr.msk.bf16.gmra.mxu0 %vm5278_vm10, %v17920_v24  ;;  %v17922_v24 = vld [vmem:[#allocation76_spill] sm:$0xff] }
 0x530   : > { %v6248_v41 = vpop.f32.mrf.mxu1  ;;  %v6893_v19 = vpop.f32.mrf.mxu0  ;;  %11942 = vmatprep.mubr.msk.bf16.mxu0 %vm12597_vm1, %v17582_v2  ;;  %11857 = vmatmul.mubr.msk.bf16.gmra.mxu1 %vm5278_vm10, %v17921_v29  ;;  %v17923_v29 = vld [vmem:[#allocation59_spill] sm:$0xff] }
 0x531   : > { %v6382_v36 = vadd.f32 %v6248_v41, %v16102_v15  ;;  %v16386_v33 = vadd.f32 %v6893_v19, %v6381_v30  ;;  %11860 = vmatprep.mubr.msk.bf16.mxu1 %vm12597_vm1, %v17582_v2 }
 0x532   : > { %v11671_v38 = vpop.f32.mrf.mxu1  ;;  %v11756_v10 = vpop.f32.mrf.mxu0 }
 0x534   : > { %v6253_v63 = vpop.f32.mrf.mxu1  ;;  %v6896_v49 = vpop.f32.mrf.mxu0 }
 0x535   : > { %v6383_v35 = vadd.f32 %v6253_v63, %v16111_v34  ;;  %v16393_v62 = vadd.f32 %v6896_v49, %v6382_v36 }
 0x536   : > { %v11674_v15 = vpop.f32.mrf.mxu1  ;;  %v11757_v30 = vpop.f32.mrf.mxu0 }
 0x537   : > { %11943 = vmatmul.mubr.msk.bf16.gmra.mxu0 %vm5278_vm10, %v17922_v24  ;;  %v17924_v24 = vld [vmem:[#allocation80_spill] sm:$0xff] }
 0x538   : > { %v6256_v41 = vpop.f32.mrf.mxu1  ;;  %v6901_v19 = vpop.f32.mrf.mxu0  ;;  %11946 = vmatprep.mubr.msk.bf16.mxu0 %vm12597_vm1, %v17582_v2  ;;  %11861 = vmatmul.mubr.msk.bf16.gmra.mxu1 %vm5278_vm10, %v17923_v29  ;;  %v17925_v29 = vld [vmem:[#allocation67_spill] sm:$0xff] }
 0x539   : > { %v6384_v38 = vadd.f32 %v6256_v41, %v16116_v13  ;;  %v16400_v10 = vadd.f32 %v6901_v19, %v6383_v35  ;;  %11864 = vmatprep.mubr.msk.bf16.mxu1 %vm12597_vm1, %v17582_v2 }
 0x53a   : > { %v11675_v34 = vpop.f32.mrf.mxu1  ;;  %v11760_v36 = vpop.f32.mrf.mxu0 }
 0x53c   : > { %v6261_v63 = vpop.f32.mrf.mxu1  ;;  %v6904_v49 = vpop.f32.mrf.mxu0 }
 0x53d   : > { %v6385_v15 = vadd.f32 %v6261_v63, %v16125_v52  ;;  %v16407_v30 = vadd.f32 %v6904_v49, %v6384_v38 }
 0x53e   : > { %v11678_v13 = vpop.f32.mrf.mxu1  ;;  %v11761_v35 = vpop.f32.mrf.mxu0 }
 0x53f   : > { %11947 = vmatmul.mubr.msk.bf16.gmra.mxu0 %vm5278_vm10, %v17924_v24  ;;  %v17926_v24 = vld [vmem:[#allocation83_spill] sm:$0xff] }
 0x540   : > { %v6264_v41 = vpop.f32.mrf.mxu1  ;;  %v6909_v19 = vpop.f32.mrf.mxu0  ;;  %11950 = vmatprep.mubr.msk.bf16.mxu0 %vm12597_vm1, %v17582_v2  ;;  %11865 = vmatmul.mubr.msk.bf16.gmra.mxu1 %vm5278_vm10, %v17925_v29  ;;  %v17927_v29 = vld [vmem:[#allocation73_spill] sm:$0xff] }
 0x541   : > { %v6386_v34 = vadd.f32 %v6264_v41, %v16130_v51  ;;  %v16414_v36 = vadd.f32 %v6909_v19, %v6385_v15  ;;  %11868 = vmatprep.mubr.msk.bf16.mxu1 %vm12597_vm1, %v17582_v2 }
 0x542   : > { %v11679_v52 = vpop.f32.mrf.mxu1  ;;  %v11764_v38 = vpop.f32.mrf.mxu0 }
 0x544   : > { %v6269_v63 = vpop.f32.mrf.mxu1  ;;  %v6912_v49 = vpop.f32.mrf.mxu0 }
 0x545   : > { %v6387_v13 = vadd.f32 %v6269_v63, %v16139_v59  ;;  %v16421_v35 = vadd.f32 %v6912_v49, %v6386_v34 }
 0x546   : > { %v11682_v51 = vpop.f32.mrf.mxu1  ;;  %v11765_v15 = vpop.f32.mrf.mxu0 }
 0x547   : > { %11951 = vmatmul.mubr.msk.bf16.gmra.mxu0 %vm5278_vm10, %v17926_v24  ;;  %v17928_v24 = vld [vmem:[#allocation88_spill] sm:$0xff] }
 0x548   : > { %v6272_v41 = vpop.f32.mrf.mxu1  ;;  %v6917_v19 = vpop.f32.mrf.mxu0  ;;  %11954 = vmatprep.mubr.msk.bf16.mxu0 %vm12597_vm1, %v17582_v2  ;;  %11869 = vmatmul.mubr.msk.bf16.gmra.mxu1 %vm5278_vm10, %v17927_v29  ;;  %v17929_v29 = vld [vmem:[#allocation75_spill] sm:$0xff] }
 0x549   : > { %v6388_v52 = vadd.f32 %v6272_v41, %v16144_v47  ;;  %v16428_v38 = vadd.f32 %v6917_v19, %v6387_v13  ;;  %11872 = vmatprep.mubr.msk.bf16.mxu1 %vm12597_vm1, %v17582_v2 }
 0x54a   : > { %v11683_v59 = vpop.f32.mrf.mxu1  ;;  %v11768_v34 = vpop.f32.mrf.mxu0 }
 0x54c   : > { %v6277_v63 = vpop.f32.mrf.mxu1  ;;  %v6920_v49 = vpop.f32.mrf.mxu0 }
 0x54d   : > { %v6389_v51 = vadd.f32 %v6277_v63, %v16153_v23  ;;  %v16435_v15 = vadd.f32 %v6920_v49, %v6388_v52 }
 0x54e   : > { %v11686_v47 = vpop.f32.mrf.mxu1  ;;  %v11769_v13 = vpop.f32.mrf.mxu0 }
 0x54f   : > { %11955 = vmatmul.mubr.msk.bf16.gmra.mxu0 %vm5278_vm10, %v17928_v24  ;;  %v17930_v24 = vld [vmem:[#allocation92_spill] sm:$0xff] }
 0x550   : > { %v6280_v41 = vpop.f32.mrf.mxu1  ;;  %v6925_v19 = vpop.f32.mrf.mxu0  ;;  %11958 = vmatprep.mubr.msk.bf16.mxu0 %vm12597_vm1, %v17582_v2  ;;  %11873 = vmatmul.mubr.msk.bf16.gmra.mxu1 %vm5278_vm10, %v17929_v29  ;;  %v17931_v29 = vld [vmem:[#allocation81_spill] sm:$0xff] }
 0x551   : > { %v6390_v59 = vadd.f32 %v6280_v41, %v16158_v32  ;;  %v16442_v34 = vadd.f32 %v6925_v19, %v6389_v51  ;;  %11876 = vmatprep.mubr.msk.bf16.mxu1 %vm12597_vm1, %v17582_v2 }
 0x552   : > { %v11687_v23 = vpop.f32.mrf.mxu1  ;;  %v11772_v52 = vpop.f32.mrf.mxu0 }
 0x554   : > { %v6285_v63 = vpop.f32.mrf.mxu1  ;;  %v6928_v49 = vpop.f32.mrf.mxu0 }
 0x555   : > { %v6391_v47 = vadd.f32 %v6285_v63, %v16167_v6  ;;  %v16449_v13 = vadd.f32 %v6928_v49, %v6390_v59 }
 0x556   : > { %v11690_v32 = vpop.f32.mrf.mxu1  ;;  %v11773_v51 = vpop.f32.mrf.mxu0 }
 0x557   : > { %11959 = vmatmul.mubr.msk.bf16.gmra.mxu0 %vm5278_vm10, %v17930_v24  ;;  %v17932_v24 = vld [vmem:[#allocation95_spill] sm:$0xff] }
 0x558   : > { %v6288_v41 = vpop.f32.mrf.mxu1  ;;  %v6933_v19 = vpop.f32.mrf.mxu0  ;;  %11962 = vmatprep.mubr.msk.bf16.mxu0 %vm12597_vm1, %v17582_v2  ;;  %11877 = vmatmul.mubr.msk.bf16.gmra.mxu1 %vm5278_vm10, %v17931_v29  ;;  %v17933_v29 = vld [vmem:[#allocation84_spill] sm:$0xff] }
 0x559   : > { %v6392_v23 = vadd.f32 %v6288_v41, %v16172_v61  ;;  %v16456_v52 = vadd.f32 %v6933_v19, %v6391_v47  ;;  %11880 = vmatprep.mubr.msk.bf16.mxu1 %vm12597_vm1, %v17582_v2 }
 0x55a   : > { %v11691_v6 = vpop.f32.mrf.mxu1  ;;  %v11776_v59 = vpop.f32.mrf.mxu0 }
 0x55c   : > { %v6293_v63 = vpop.f32.mrf.mxu1  ;;  %v6936_v49 = vpop.f32.mrf.mxu0 }
 0x55d   : > { %v6393_v32 = vadd.f32 %v6293_v63, %v16181_v14  ;;  %v16463_v51 = vadd.f32 %v6936_v49, %v6392_v23 }
 0x55e   : > { %v11694_v61 = vpop.f32.mrf.mxu1  ;;  %v11777_v47 = vpop.f32.mrf.mxu0 }
 0x55f   : > { %11963 = vmatmul.mubr.msk.bf16.gmra.mxu0 %vm5278_vm10, %v17932_v24  ;;  %v17934_v24 = vld [vmem:[#allocation96_spill] sm:$0xff] }
 0x560   : > { %v6296_v41 = vpop.f32.mrf.mxu1  ;;  %v6941_v19 = vpop.f32.mrf.mxu0  ;;  %11966 = vmatprep.mubr.msk.bf16.mxu0 %vm12597_vm1, %v17582_v2  ;;  %11881 = vmatmul.mubr.msk.bf16.gmra.mxu1 %vm5278_vm10, %v17933_v29  ;;  %v17935_v29 = vld [vmem:[#allocation87_spill] sm:$0xff] }
 0x561   : > { %v6394_v6 = vadd.f32 %v6296_v41, %v16186_v48  ;;  %v16470_v59 = vadd.f32 %v6941_v19, %v6393_v32  ;;  %11884 = vmatprep.mubr.msk.bf16.mxu1 %vm12597_vm1, %v17582_v2 }
 0x562   : > { %v11695_v14 = vpop.f32.mrf.mxu1  ;;  %v11780_v23 = vpop.f32.mrf.mxu0 }
 0x564   : > { %v6301_v63 = vpop.f32.mrf.mxu1  ;;  %v6944_v49 = vpop.f32.mrf.mxu0 }
 0x565   : > { %v6395_v61 = vadd.f32 %v6301_v63, %v16195_v21  ;;  %v16477_v47 = vadd.f32 %v6944_v49, %v6394_v6 }
 0x566   : > { %v11698_v48 = vpop.f32.mrf.mxu1  ;;  %v11781_v32 = vpop.f32.mrf.mxu0 }
 0x567   : > { %11967 = vmatmul.mubr.msk.bf16.gmra.mxu0 %vm5278_vm10, %v17934_v24  ;;  %v17936_v24 = vld [vmem:[#allocation97_spill] sm:$0xff] }
 0x568   : > { %v6304_v41 = vpop.f32.mrf.mxu1  ;;  %v6949_v19 = vpop.f32.mrf.mxu0  ;;  %11970 = vmatprep.mubr.msk.bf16.mxu0 %vm12597_vm1, %v17582_v2  ;;  %11885 = vmatmul.mubr.msk.bf16.gmra.mxu1 %vm5278_vm10, %v17935_v29  ;;  %v17938_v29 = vld [vmem:[#allocation90_spill] sm:$0xff] }
 0x569   : > { %v6396_v14 = vadd.f32 %v6304_v41, %v16200_v40  ;;  %v16484_v23 = vadd.f32 %v6949_v19, %v6395_v61  ;;  %11888 = vmatprep.mubr.msk.bf16.mxu1 %vm12597_vm1, %v17582_v2 }
 0x56a   : > { %v11699_v21 = vpop.f32.mrf.mxu1  ;;  %v11784_v6 = vpop.f32.mrf.mxu0 }
 0x56c   : > { %v6309_v63 = vpop.f32.mrf.mxu1  ;;  %v6952_v49 = vpop.f32.mrf.mxu0 }
 0x56d   : > { %v6397_v48 = vadd.f32 %v6309_v63, %v16209_v39  ;;  %v16491_v32 = vadd.f32 %v6952_v49, %v6396_v14 }
 0x56e   : > { %v11702_v40 = vpop.f32.mrf.mxu1  ;;  %v11785_v61 = vpop.f32.mrf.mxu0 }
 0x56f   : > { %11971 = vmatmul.mubr.msk.bf16.gmra.mxu0 %vm5278_vm10, %v17936_v24  ;;  %v17940_v24 = vld [vmem:[#allocation99_spill] sm:$0xff] }
 0x570   : > { %v6312_v41 = vpop.f32.mrf.mxu1  ;;  %v6957_v19 = vpop.f32.mrf.mxu0  ;;  %11974 = vmatprep.mubr.msk.bf16.mxu0 %vm12597_vm1, %v17582_v2  ;;  %11889 = vmatmul.mubr.msk.bf16.gmra.mxu1 %vm5278_vm10, %v17938_v29 }
 0x571   : > { %v6398_v21 = vadd.f32 %v6312_v41, %v16214_v20  ;;  %v16498_v6 = vadd.f32 %v6957_v19, %v6397_v48  ;;  %11892 = vmatprep.mubr.msk.bf16.mxu1 %vm12597_vm1, %v17582_v2 }
 0x572   : > { %v11703_v39 = vpop.f32.mrf.mxu1  ;;  %v11788_v14 = vpop.f32.mrf.mxu0 }
 0x573   : > { %17937 = vst [vmem:[#allocation78_spill] sm:$0xff] %v16498_v6 }
 0x574   : > { %v6317_v63 = vpop.f32.mrf.mxu1  ;;  %v6960_v49 = vpop.f32.mrf.mxu0 }
 0x575   : > { %v6399_v40 = vadd.f32 %v6317_v63, %v16224_v56  ;;  %v16505_v61 = vadd.f32 %v6960_v49, %v6398_v21  ;;  %v12463_v63 = vld [vmem:[#allocation2 + $0xac] ss:$0 sps:$4 sm:$0x77]  }
 0x576   : > { %v11706_v20 = vpop.f32.mrf.mxu1  ;;  %v11789_v48 = vpop.f32.mrf.mxu0 }
 0x577   : > { %17939 = vst [vmem:[#allocation56_spill] sm:$0xff] %v16505_v61  ;;  %11975 = vmatmul.mubr.msk.bf16.gmra.mxu0 %vm5278_vm10, %v17940_v24  ;;  %v17942_v61 = vld [vmem:[#allocation93_spill] sm:$0xff] }
 0x578   : > { %v6320_v41 = vpop.f32.mrf.mxu1  ;;  %v6965_v19 = vpop.f32.mrf.mxu0  ;;  %11978 = vmatprep.mubr.msk.bf16.mxu0 %vm12597_vm1, %v17582_v2  ;;  %11893 = vmatmul.mubr.msk.bf16.gmra.mxu1 %vm5278_vm10, %v17942_v61 }
 0x579   : > { %v6400_v39 = vadd.f32 %v6320_v41, %v16229_v16  ;;  %v16512_v14 = vadd.f32 %v6965_v19, %v6399_v40  ;;  %11896 = vmatprep.mubr.msk.bf16.mxu1 %vm12597_vm1, %v17582_v2  ;;  %v7541_v41 = vshll.u32 %v12463_v63, 16 }
 0x57a   : > { %v11707_v56 = vpop.f32.mrf.mxu1  ;;  %v11792_v21 = vpop.f32.mrf.mxu0 }
 0x57b   : > { %17941 = vst [vmem:[#allocation85_spill] sm:$0xff] %v16512_v14  ;;  %v17944_v56 = vld [vmem:[#allocation100_spill] sm:$0xff] }
 0x57c   : > { %v6325_v49 = vpop.f32.mrf.mxu1  ;;  %v6968_v29 = vpop.f32.mrf.mxu0 }
 0x57d   : > { %v6401_v20 = vadd.f32 %v6325_v49, %v16236_v9  ;;  %v16519_v48 = vadd.f32 %v6968_v29, %v6400_v39  ;;  %v17946_v9 = vld [vmem:[#allocation94_spill] sm:$0xff] }
 0x57e   : > { %v11710_v16 = vpop.f32.mrf.mxu1  ;;  %v11793_v40 = vpop.f32.mrf.mxu0  ;;  %v7537_v61 = vshrl.u32 %v17946_v9, 16  ;;  %v17947_v29 = vld [vmem:[#allocation98_spill] sm:$0xff] }
 0x57f   : > { %17943 = vst [vmem:[#allocation79_spill] sm:$0xff] %v16519_v48  ;;  %11979 = vmatmul.mubr.msk.bf16.gmra.mxu0 %vm5278_vm10, %v17944_v56  ;;  %v7543_v40 = vrot.slane %v7541_v41, 1  ;;  %v7858_v56 = vld [vmem:[#allocation2 + $0x14] sm:$0xf] }
 0x580   : > { %v6328_v19 = vpop.f32.mrf.mxu1  ;;  %v6973_v24 = vpop.f32.mrf.mxu0  ;;  %11982 = vmatprep.mubr.msk.bf16.mxu0 %vm12597_vm1, %v17582_v2  ;;  %v7539_v16 = vor.u32 %v7537_v61, %v17947_v29  ;;  %11897 = vmatmul.mubr.msk.bf16.gmra.mxu1 %vm5278_vm10, %v17946_v9 }
 0x581   : > { %v6402_v21 = vadd.f32 %v6328_v19, %v16241_v8  ;;  %v16526_v14 = vadd.f32 %v6973_v24, %v6401_v20  ;;  %11900 = vmatprep.mubr.msk.bf16.mxu1 %vm12597_vm1, %v17582_v2  ;;  %v12514_v19 = vld [vmem:[#allocation2 + $0x18] sm:$0xf] }
 0x582   : > { %v11711_v39 = vpop.f32.mrf.mxu1  ;;  %v11796_v49 = vpop.f32.mrf.mxu0  ;;  %v10160_v24 = vcombine.low %v7858_v56, %v12514_v19  ;;  %v7544_v61 = vsel %vm2651_vm6, %v7539_v16, %v7543_v40  ;;  %v7545_v16 = vshrl.u32 %v12463_v63, 16 }
 0x583   : > { %17945 = vst [vmem:[#allocation60_spill] sm:$0xff] %v16526_v14 }
 0x584   : > { %v6333_v48 = vpop.f32.mrf.mxu1  ;;  %v6976_v6 = vpop.f32.mrf.mxu0 }
 0x585   : > { %v6403_v8 = vadd.f32 %v6333_v48, %v16248_v43  ;;  %v16535_v20 = vadd.f32 %v6976_v6, %v6402_v21  ;;  %v8008_v43 = vshll.u32 %v10160_v24, 16  ;;  %v10110_v21 = vcombine.low %v16218_v60, %v16218_v60 }
 0x586   : > { %v11714_v39 = vpop.f32.mrf.mxu1  ;;  %v11797_v49 = vpop.f32.mrf.mxu0 }
 0x587   : > { %17948 = vst [vmem:[#allocation89_spill] sm:$0xff] %v16535_v20  ;;  %11983 = vmatmul.mubr.msk.bf16.gmra.mxu0 %vm5278_vm10, %v7544_v61 }
 0x588   : > { %v6336_v41 = vpop.f32.mrf.mxu1  ;;  %v6981_v29 = vpop.f32.mrf.mxu0  ;;  %11986 = vmatprep.mubr.msk.bf16.mxu0 %vm12597_vm1, %v17582_v2  ;;  %11901 = vmatmul.mubr.msk.bf16.gmra.mxu1 %vm5278_vm10, %v10110_v21 }
 0x589   : > { %v6404_v9 = vadd.f32 %v6336_v41, %v16253_v37  ;;  %v16542_v14 = vadd.f32 %v6981_v29, %v6403_v8  ;;  %11992 = vmatprep.mubr.msk.bf16.mxu1 %vm12597_vm1, %v17582_v2  ;;  %v8010_v37 = vrot.slane %v8008_v43, 1  ;;  %v7547_v41 = vor.u32 %v7545_v16, %v7543_v40  ;;  %v12468_v43 = vld [vmem:[%s17382_s4 + $0x40] sm:$0xff]  }
 0x58a   : > { %v11715_v6 = vpop.f32.mrf.mxu1  ;;  %v11800_v48 = vpop.f32.mrf.mxu0  ;;  %v8006_v29 = vshrl.u32 %v10160_v24, 16 }
 0x58b   : > { %17949 = vst [vmem:[#allocation82_spill] sm:$0xff] %v16542_v14  ;;  %v17950_v6 = vld [vmem:[#allocation101_spill] sm:$0xff] }
 0x58c   : > { %v6341_v56 = vpop.f32.mrf.mxu1  ;;  %v6984_v19 = vpop.f32.mrf.mxu0  ;;  %v17951_v48 = vshll.u32 %v17950_v6, 16 }
 0x58d   : > { %v6405_v39 = vadd.f32 %v6341_v56, %v16259_v50  ;;  %v16550_v49 = vadd.f32 %v6984_v19, %v6404_v9  ;;  %v8011_v9 = vor.u32 %v8010_v37, %v8006_v29  ;;  %v12515_v56 = vld [vmem:[#allocation2 + $0x1c] sm:$0xff]  }
 0x58e   : > { %v11718_v8 = vpop.f32.mrf.mxu1  ;;  %v11801_v61 = vpop.f32.mrf.mxu0  ;;  %v8015_v60 = vrot.slane %v17951_v48, 1  ;;  %v8490_v19 = vrot.slane %v12515_v56, 1  ;;  %v17953_v29 = vld [vmem:[#allocation102_spill] sm:$0xff] }
 0x58f   : > { %11987 = vmatmul.mubr.msk.bf16.gmra.mxu0 %vm5278_vm10, %v7547_v41  ;;  %v17954_v48 = vshll.u32 %v17953_v29, 16 }
 0x590   : > { %v6344_v14 = vpop.f32.mrf.mxu1  ;;  %v6989_v20 = vpop.f32.mrf.mxu0  ;;  %12078 = vmatprep.mubr.msk.bf16.mxu0 %vm12597_vm1, %v17582_v2  ;;  %v8016_v21 = vsel %vm2651_vm6, %v8011_v9, %v8015_v60 }
 0x591   : > { %v6406_v63 = vadd.f32 %v6344_v14, %v16267_v1  ;;  %v16558_v50 = vadd.f32 %v6989_v20, %v6405_v39  ;;  %11993 = vmatmul.mubr.msk.bf16.vlgmr.msra.gmra.mxu1 %vm5278_vm10, %v8016_v21  ;;  %v17952_v20 = vld [vmem:[#allocation106_spill] sm:$0xff]  ;;  %v8023_v9 = vrot.slane %v17954_v48, 1  ;;  %v17956_v48 = vld [vmem:[#allocation104_spill] sm:$0xff] }
 0x592   : > { %v11719_v40 = vpop.f32.mrf.mxu1  ;;  %v11804_v24 = vpop.f32.mrf.mxu0  ;;  %12163 = vmatpush3.bf16.msra.mxu1 %v12468_v43  ;;  %v8489_v39 = vrot.slane %v17952_v20, 1  ;;  %11996 = vmatprep.mubr.msk.bf16.mxu1 %vm12597_vm1, %v17582_v2  ;;  %v17955_v43 = vshrl.u32 %v17950_v6, 16  ;;  %v12516_v20 = vld [vmem:[#allocation2 + $0x24] sm:$0xff]  }
 0x594   : > { %v6349_v16 = vpop.f32.mrf.mxu1  ;;  %v6992_v8 = vpop.f32.mrf.mxu0  ;;  %v8491_v41 = vsel %vm3732_vm7, %v8489_v39, %v8490_v19  ;;  %v8019_v21 = vor.u32 %v17955_v43, %v8015_v60  ;;  %v8492_v39 = vrot.slane %v12516_v20, 1 }
 0x595   : > { %v6407_v1 = vadd.f32 %v6349_v16, %v16274_v22  ;;  %v16568_v14 = vadd.f32 %v6992_v8, %v6406_v63 }
 0x596   : > { %v11722_v37 = vpop.f32.mrf.mxu1  ;;  %v11805_v61 = vpop.f32.mrf.mxu0  ;;  %v8024_v8 = vsel %vm2651_vm6, %v8019_v21, %v8023_v9 }
 0x597   : > { %12079 = vmatmul.mubr.msk.bf16.vlgmr.msra.gmra.mxu0 %vm5278_vm10, %v8491_v41  ;;  %v8493_v41 = vsel %vm3732_vm7, %v8490_v19, %v8492_v39 }
 0x598   : > { %v6352_v40 = vpop.f32.mrf.mxu1  ;;  %v6997_v24 = vpop.f32.mrf.mxu0  ;;  %12082 = vmatprep.mubr.msk.bf16.mxu0 %vm12597_vm1, %v17582_v2 }
 0x599   : > { %v6408_v22 = vadd.f32 %v6352_v40, %v16280_v28  ;;  %v16578_v63 = vadd.f32 %v6997_v24, %v6407_v1  ;;  %11997 = vmatmul.mubr.msk.bf16.gmra.mxu1 %vm5278_vm10, %v8024_v8  ;;  %v17957_v40 = vshll.u32 %v17956_v48, 16 }
 0x59a   : > { %v11723_v56 = vpop.f32.mrf.mxu1  ;;  %v11808_v16 = vpop.f32.mrf.mxu0  ;;  %12000 = vmatprep.mubr.msk.bf16.mxu1 %vm12597_vm1, %v17582_v2 }
 0x59b   : > { %v8031_v24 = vrot.slane %v17957_v40, 1  ;;  %v17959_v40 = vld [vmem:[#allocation105_spill] sm:$0xff] }
 0x59c   : > { %v6357_v37 = vpop.f32.mrf.mxu1  ;;  %v7000_v61 = vpop.f32.mrf.mxu0 }
 0x59d   : > { %v6409_v28 = vadd.f32 %v6357_v37, %v16288_v11  ;;  %v16587_v1 = vadd.f32 %v7000_v61, %v6408_v22  ;;  %v17958_v11 = vshrl.u32 %v17953_v29, 16  ;;  %v12517_v37 = vld [vmem:[#allocation2 + $0x2c] sm:$0xff]  }
 0x59e   : > { %v11726_v6 = vpop.f32.mrf.mxu1  ;;  %v11809_v60 = vpop.f32.mrf.mxu0  ;;  %v8494_v61 = vrot.slane %v12517_v37, 1 }
 0x59f   : > { %12083 = vmatmul.mubr.msk.bf16.gmra.mxu0 %vm5278_vm10, %v8493_v41  ;;  %v8027_v22 = vor.u32 %v17958_v11, %v8023_v9 }
 0x5a0   : > { %v6360_v43 = vpop.f32.mrf.mxu1  ;;  %v7005_v21 = vpop.f32.mrf.mxu0  ;;  %12086 = vmatprep.mubr.msk.bf16.mxu0 %vm12597_vm1, %v17582_v2  ;;  %v8495_v41 = vsel %vm3732_vm7, %v8492_v39, %v8494_v61  ;;  %v12518_v39 = vld [vmem:[#allocation2 + $0x34] sm:$0xff]  }
 0x5a1   : > { %v6410_v56 = vadd.f32 %v6360_v43, %v16294_v55  ;;  %v16596_v16 = vadd.f32 %v7005_v21, %v6409_v28  ;;  %v8032_v19 = vsel %vm2651_vm6, %v8027_v22, %v8031_v24  ;;  %v17960_v43 = vshll.u32 %v17959_v40, 16 }
 0x5a2   : > { %v11727_v8 = vpop.f32.mrf.mxu1  ;;  %v11812_v20 = vpop.f32.mrf.mxu0  ;;  %12001 = vmatmul.mubr.msk.bf16.gmra.mxu1 %vm5278_vm10, %v8032_v19 }
 0x5a3   : > { %12004 = vmatprep.mubr.msk.bf16.mxu1 %vm12597_vm1, %v17582_v2  ;;  %v8039_v21 = vrot.slane %v17960_v43, 1 }
 0x5a4   : > { %v6365_v6 = vpop.f32.mrf.mxu1  ;;  %v7008_v60 = vpop.f32.mrf.mxu0 }
 0x5a5   : > { %v6411_v55 = vadd.f32 %v6365_v6, %v16300_v26  ;;  %v16605_v28 = vadd.f32 %v7008_v60, %v6410_v56  ;;  %v17961_v26 = vshrl.u32 %v17956_v48, 16  ;;  %v8496_v6 = vrot.slane %v12518_v39, 1  ;;  %v12519_v39 = vld [vmem:[#allocation2 + $0x3c] sm:$0xff]  }
 0x5a6   : > { %v11730_v29 = vpop.f32.mrf.mxu1  ;;  %v11813_v9 = vpop.f32.mrf.mxu0 }
 0x5a7   : > { %12087 = vmatmul.mubr.msk.bf16.gmra.mxu0 %vm5278_vm10, %v8495_v41  ;;  %v8035_v56 = vor.u32 %v17961_v26, %v8031_v24  ;;  %v17962_v41 = vshll.u32 %v15817_v58, 16 }
 0x5a8   : > { %v6368_v11 = vpop.f32.mrf.mxu1  ;;  %v7013_v22 = vpop.f32.mrf.mxu0  ;;  %12090 = vmatprep.mubr.msk.bf16.mxu0 %vm12597_vm1, %v17582_v2 }
 0x5a9   : > { %v16613_v8 = vadd.f32 %v7013_v22, %v6411_v55  ;;  %v8040_v37 = vsel %vm2651_vm6, %v8035_v56, %v8039_v21  ;;  %v8497_v55 = vsel %vm3732_vm7, %v8494_v61, %v8496_v6  ;;  %v8047_v43 = vrot.slane %v17962_v41, 1 }
 0x5aa   : > { %v11731_v20 = vpop.f32.mrf.mxu1  ;;  %v11816_v19 = vpop.f32.mrf.mxu0  ;;  %12005 = vmatmul.mubr.msk.bf16.gmra.mxu1 %vm5278_vm10, %v8040_v37 }
 0x5ab   : > { %12008 = vmatprep.mubr.msk.bf16.mxu1 %vm12597_vm1, %v17582_v2 }
 0x5ac   : > { %v7016_v60 = vpop.f32.mrf.mxu0  ;;  %v7187_v29 = vpop.f32.mrf.mxu1 }
 0x5ad   : > { %v7353_v9 = vadd.f32 %v7187_v29, %v16312_v42  ;;  %v17963_v42 = vshrl.u32 %v17959_v40, 16  ;;  %v8498_v60 = vrot.slane %v12519_v39, 1 }
 0x5ae   : > { %v11817_v48 = vpop.f32.mrf.mxu0  ;;  %v11822_v24 = vpop.f32.mrf.mxu1 }
 0x5af   : > { %12091 = vmatmul.mubr.msk.bf16.gmra.mxu0 %vm5278_vm10, %v8497_v55  ;;  %v8043_v20 = vor.u32 %v17963_v42, %v8039_v21  ;;  %v8499_v24 = vsel %vm3732_vm7, %v8496_v6, %v8498_v60  ;;  %v17964_v55 = vshll.u32 %v15819_v12, 16 }
 0x5b0   : > { %v7190_v11 = vpop.f32.mrf.mxu1  ;;  %v7651_v22 = vpop.f32.mrf.mxu0  ;;  %12094 = vmatprep.mubr.msk.bf16.mxu0 %vm12597_vm1, %v17582_v2 }
 0x5b1   : > { %v7354_v26 = vadd.f32 %v7190_v11, %v16319_v25  ;;  %v16629_v56 = vadd.f32 %v7651_v22, %v7353_v9  ;;  %v8048_v61 = vsel %vm2651_vm6, %v8043_v20, %v8047_v43  ;;  %v8055_v41 = vrot.slane %v17964_v55, 1 }
 0x5b2   : > { %v11823_v19 = vpop.f32.mrf.mxu1  ;;  %v11908_v37 = vpop.f32.mrf.mxu0  ;;  %12009 = vmatmul.mubr.msk.bf16.gmra.mxu1 %vm5278_vm10, %v8048_v61  ;;  %v12520_v61 = vld [vmem:[#allocation2 + $0x44] sm:$0xff]  }
 0x5b3   : > { %12012 = vmatprep.mubr.msk.bf16.mxu1 %vm12597_vm1, %v17582_v2  ;;  %v8500_v39 = vrot.slane %v12520_v61, 1 }
 0x5b4   : > { %v7195_v29 = vpop.f32.mrf.mxu1  ;;  %v7654_v48 = vpop.f32.mrf.mxu0 }
 0x5b5   : > { %v7355_v25 = vadd.f32 %v7195_v29, %v16326_v57  ;;  %v16638_v9 = vadd.f32 %v7654_v48, %v7354_v26  ;;  %v17965_v57 = vshrl.u32 %v15817_v58, 16 }
 0x5b6   : > { %v11826_v40 = vpop.f32.mrf.mxu1  ;;  %v11909_v21 = vpop.f32.mrf.mxu0 }
 0x5b7   : > { %12095 = vmatmul.mubr.msk.bf16.gmra.mxu0 %vm5278_vm10, %v8499_v24  ;;  %v8051_v26 = vor.u32 %v17965_v57, %v8047_v43  ;;  %v8501_v40 = vsel %vm3732_vm7, %v8498_v60, %v8500_v39  ;;  %v17966_v21 = vshll.u32 %v15830_v44, 16 }
 0x5b8   : > { %v7198_v11 = vpop.f32.mrf.mxu1  ;;  %v7659_v22 = vpop.f32.mrf.mxu0  ;;  %12098 = vmatprep.mubr.msk.bf16.mxu0 %vm12597_vm1, %v17582_v2 }
 0x5b9   : > { %v7356_v42 = vadd.f32 %v7198_v11, %v16336_v46  ;;  %v16647_v20 = vadd.f32 %v7659_v22, %v7355_v25  ;;  %v8056_v6 = vsel %vm2651_vm6, %v8051_v26, %v8055_v41  ;;  %v8063_v24 = vrot.slane %v17966_v21, 1 }
 0x5ba   : > { %v11827_v19 = vpop.f32.mrf.mxu1  ;;  %v11912_v37 = vpop.f32.mrf.mxu0  ;;  %12013 = vmatmul.mubr.msk.bf16.gmra.mxu1 %vm5278_vm10, %v8056_v6 }
 0x5bb   : > { %12016 = vmatprep.mubr.msk.bf16.mxu1 %vm12597_vm1, %v17582_v2  ;;  %v12521_v37 = vld [vmem:[#allocation2 + $0x4c] sm:$0xff]  }
 0x5bc   : > { %v7203_v29 = vpop.f32.mrf.mxu1  ;;  %v7662_v48 = vpop.f32.mrf.mxu0  ;;  %v8502_v6 = vrot.slane %v12521_v37, 1 }
 0x5bd   : > { %v7357_v46 = vadd.f32 %v7203_v29, %v16344_v18  ;;  %v16656_v25 = vadd.f32 %v7662_v48, %v7356_v42  ;;  %v17967_v18 = vshrl.u32 %v15819_v12, 16 }
 0x5be   : > { %v11830_v58 = vpop.f32.mrf.mxu1  ;;  %v11913_v43 = vpop.f32.mrf.mxu0 }
 0x5bf   : > { %12099 = vmatmul.mubr.msk.bf16.gmra.mxu0 %vm5278_vm10, %v8501_v40  ;;  %v8059_v42 = vor.u32 %v17967_v18, %v8055_v41  ;;  %v17968_v58 = vshll.u32 %v15832_v3, 16 }
 0x5c0   : > { %v7206_v55 = vpop.f32.mrf.mxu1  ;;  %v7667_v11 = vpop.f32.mrf.mxu0  ;;  %12102 = vmatprep.mubr.msk.bf16.mxu0 %vm12597_vm1, %v17582_v2 }
 0x5c1   : > { %v7358_v22 = vadd.f32 %v7206_v55, %v16351_v27  ;;  %v16665_v57 = vadd.f32 %v7667_v11, %v7357_v46  ;;  %v8064_v60 = vsel %vm2651_vm6, %v8059_v42, %v8063_v24  ;;  %v8503_v46 = vsel %vm3732_vm7, %v8500_v39, %v8502_v6 }
 0x5c2   : > { %v11831_v26 = vpop.f32.mrf.mxu1  ;;  %v11916_v19 = vpop.f32.mrf.mxu0  ;;  %12017 = vmatmul.mubr.msk.bf16.gmra.mxu1 %vm5278_vm10, %v8064_v60  ;;  %v8071_v43 = vrot.slane %v17968_v58, 1 }
 0x5c3   : > { %12020 = vmatprep.mubr.msk.bf16.mxu1 %vm12597_vm1, %v17582_v2  ;;  %v12522_v26 = vld [vmem:[#allocation2 + $0x54] sm:$0xff]  }
 0x5c4   : > { %v7211_v61 = vpop.f32.mrf.mxu1  ;;  %v7670_v29 = vpop.f32.mrf.mxu0  ;;  %v8504_v19 = vrot.slane %v12522_v26, 1 }
 0x5c5   : > { %v7359_v27 = vadd.f32 %v7211_v61, %v16358_v45  ;;  %v16674_v48 = vadd.f32 %v7670_v29, %v7358_v22  ;;  %v17969_v45 = vshrl.u32 %v15830_v44, 16 }
 0x5c6   : > { %v11834_v12 = vpop.f32.mrf.mxu1  ;;  %v11917_v41 = vpop.f32.mrf.mxu0  ;;  %v8505_v29 = vsel %vm3732_vm7, %v8502_v6, %v8504_v19 }
 0x5c7   : > { %12103 = vmatmul.mubr.msk.bf16.gmra.mxu0 %vm5278_vm10, %v8503_v46  ;;  %v8067_v22 = vor.u32 %v17969_v45, %v8063_v24 }
 0x5c8   : > { %v7214_v40 = vpop.f32.mrf.mxu1  ;;  %v7675_v21 = vpop.f32.mrf.mxu0  ;;  %12106 = vmatprep.mubr.msk.bf16.mxu0 %vm12597_vm1, %v17582_v2 }
 0x5c9   : > { %v7360_v55 = vadd.f32 %v7214_v40, %v16365_v17  ;;  %v16683_v11 = vadd.f32 %v7675_v21, %v7359_v27  ;;  %v8072_v39 = vsel %vm2651_vm6, %v8067_v22, %v8071_v43  ;;  %v17970_v27 = vshll.u32 %v15842_v54, 16  ;;  %v12523_v22 = vld [vmem:[#allocation2 + $0x5c] sm:$0xff]  }
 0x5ca   : > { %v11835_v18 = vpop.f32.mrf.mxu1  ;;  %v11920_v42 = vpop.f32.mrf.mxu0  ;;  %12021 = vmatmul.mubr.msk.bf16.gmra.mxu1 %vm5278_vm10, %v8072_v39 }
 0x5cb   : > { %12024 = vmatprep.mubr.msk.bf16.mxu1 %vm12597_vm1, %v17582_v2  ;;  %v8079_v12 = vrot.slane %v17970_v27, 1  ;;  %v8506_v18 = vrot.slane %v12523_v22, 1 }
 0x5cc   : > { %v7219_v60 = vpop.f32.mrf.mxu1  ;;  %v7678_v37 = vpop.f32.mrf.mxu0 }
 0x5cd   : > { %v7361_v17 = vadd.f32 %v7219_v60, %v16372_v4  ;;  %v16692_v61 = vadd.f32 %v7678_v37, %v7360_v55  ;;  %v17971_v4 = vshrl.u32 %v15832_v3, 16  ;;  %v8507_v60 = vsel %vm3732_vm7, %v8504_v19, %v8506_v18 }
 0x5ce   : > { %v11838_v44 = vpop.f32.mrf.mxu1  ;;  %v11921_v24 = vpop.f32.mrf.mxu0  ;;  %v17972_v37 = vshll.u32 %v15844_v31, 16 }
 0x5cf   : > { %12107 = vmatmul.mubr.msk.bf16.gmra.mxu0 %vm5278_vm10, %v8505_v29  ;;  %v8075_v21 = vor.u32 %v17971_v4, %v8071_v43  ;;  %v12524_v4 = vld [vmem:[#allocation2 + $0x64] sm:$0xff]  }
 0x5d0   : > { %v7222_v41 = vpop.f32.mrf.mxu1  ;;  %v7683_v46 = vpop.f32.mrf.mxu0  ;;  %12110 = vmatprep.mubr.msk.bf16.mxu0 %vm12597_vm1, %v17582_v2 }
 0x5d1   : > { %v7362_v58 = vadd.f32 %v7222_v41, %v16379_v5  ;;  %v16701_v40 = vadd.f32 %v7683_v46, %v7361_v17  ;;  %v8080_v6 = vsel %vm2651_vm6, %v8075_v21, %v8079_v12  ;;  %v8087_v17 = vrot.slane %v17972_v37, 1 }
 0x5d2   : > { %v11839_v55 = vpop.f32.mrf.mxu1  ;;  %v11924_v45 = vpop.f32.mrf.mxu0  ;;  %12025 = vmatmul.mubr.msk.bf16.gmra.mxu1 %vm5278_vm10, %v8080_v6  ;;  %v8508_v21 = vrot.slane %v12524_v4, 1  ;;  %v17976_v4 = vshll.u32 %v15861_v7, 16 }
 0x5d3   : > { %12028 = vmatprep.mubr.msk.bf16.mxu1 %vm12597_vm1, %v17582_v2 }
 0x5d4   : > { %v7227_v42 = vpop.f32.mrf.mxu1  ;;  %v7686_v39 = vpop.f32.mrf.mxu0  ;;  %v8509_v22 = vsel %vm3732_vm7, %v8506_v18, %v8508_v21 }
 0x5d5   : > { %v7363_v5 = vadd.f32 %v7227_v42, %v16386_v33  ;;  %v16710_v26 = vadd.f32 %v7686_v39, %v7362_v58  ;;  %v17973_v33 = vshrl.u32 %v15842_v54, 16  ;;  %v17974_v42 = vshll.u32 %v15853_v0, 16 }
 0x5d6   : > { %v11842_v3 = vpop.f32.mrf.mxu1  ;;  %v11925_v43 = vpop.f32.mrf.mxu0 }
 0x5d7   : > { %12111 = vmatmul.mubr.msk.bf16.gmra.mxu0 %vm5278_vm10, %v8507_v60  ;;  %v8083_v41 = vor.u32 %v17973_v33, %v8079_v12  ;;  %v8095_v39 = vrot.slane %v17974_v42, 1 }
 0x5d8   : > { %v7230_v44 = vpop.f32.mrf.mxu1  ;;  %v7691_v24 = vpop.f32.mrf.mxu0  ;;  %12114 = vmatprep.mubr.msk.bf16.mxu0 %vm12597_vm1, %v17582_v2 }
 0x5d9   : > { %v7364_v29 = vadd.f32 %v7230_v44, %v16393_v62  ;;  %v16719_v27 = vadd.f32 %v7691_v24, %v7363_v5  ;;  %v8088_v19 = vsel %vm2651_vm6, %v8083_v41, %v8087_v17 }
 0x5da   : > { %v11843_v46 = vpop.f32.mrf.mxu1  ;;  %v11928_v58 = vpop.f32.mrf.mxu0  ;;  %12029 = vmatmul.mubr.msk.bf16.gmra.mxu1 %vm5278_vm10, %v8088_v19 }
 0x5db   : > { %12032 = vmatprep.mubr.msk.bf16.mxu1 %vm12597_vm1, %v17582_v2 }
 0x5dc   : > { %v7235_v55 = vpop.f32.mrf.mxu1  ;;  %v7694_v45 = vpop.f32.mrf.mxu0 }
 0x5dd   : > { %v7365_v62 = vadd.f32 %v7235_v55, %v16400_v10  ;;  %v16728_v6 = vadd.f32 %v7694_v45, %v7364_v29  ;;  %v17975_v10 = vshrl.u32 %v15844_v31, 16  ;;  %v12525_v29 = vld [vmem:[#allocation2 + $0x6c] sm:$0xff]   ;;  %v8103_v55 = vrot.slane %v17976_v4, 1 }
 0x5de   : > { %v11846_v54 = vpop.f32.mrf.mxu1  ;;  %v11929_v12 = vpop.f32.mrf.mxu0  ;;  %v8510_v33 = vrot.slane %v12525_v29, 1 }
 0x5df   : > { %12115 = vmatmul.mubr.msk.bf16.gmra.mxu0 %vm5278_vm10, %v8509_v22  ;;  %v8091_v37 = vor.u32 %v17975_v10, %v8087_v17 }
 0x5e0   : > { %v7238_v5 = vpop.f32.mrf.mxu1  ;;  %v7699_v3 = vpop.f32.mrf.mxu0  ;;  %12118 = vmatprep.mubr.msk.bf16.mxu0 %vm12597_vm1, %v17582_v2  ;;  %v8511_v19 = vsel %vm3732_vm7, %v8508_v21, %v8510_v33 }
 0x5e1   : > { %v7366_v43 = vadd.f32 %v7238_v5, %v16407_v30  ;;  %v16737_v60 = vadd.f32 %v7699_v3, %v7365_v62  ;;  %v8096_v18 = vsel %vm2651_vm6, %v8091_v37, %v8095_v39  ;;  %v12526_v3 = vld [vmem:[#allocation2 + $0x74] sm:$0xff]  }
 0x5e2   : > { %v11847_v44 = vpop.f32.mrf.mxu1  ;;  %v11932_v24 = vpop.f32.mrf.mxu0  ;;  %12033 = vmatmul.mubr.msk.bf16.gmra.mxu1 %vm5278_vm10, %v8096_v18  ;;  %v17978_v18 = vshll.u32 %v15863_v53, 16 }
 0x5e3   : > { %12036 = vmatprep.mubr.msk.bf16.mxu1 %vm12597_vm1, %v17582_v2 }
 0x5e4   : > { %v7243_v41 = vpop.f32.mrf.mxu1  ;;  %v7702_v46 = vpop.f32.mrf.mxu0  ;;  %v8111_v29 = vrot.slane %v17978_v18, 1 }
 0x5e5   : > { %v7367_v30 = vadd.f32 %v7243_v41, %v16414_v36  ;;  %v16746_v58 = vadd.f32 %v7702_v46, %v7366_v43  ;;  %v17977_v36 = vshrl.u32 %v15853_v0, 16  ;;  %v8512_v43 = vrot.slane %v12526_v3, 1 }
 0x5e6   : > { %v11850_v31 = vpop.f32.mrf.mxu1  ;;  %v11933_v17 = vpop.f32.mrf.mxu0 }
 0x5e7   : > { %12119 = vmatmul.mubr.msk.bf16.gmra.mxu0 %vm5278_vm10, %v8511_v19  ;;  %v8099_v22 = vor.u32 %v17977_v36, %v8095_v39  ;;  %v8513_v24 = vsel %vm3732_vm7, %v8510_v33, %v8512_v43 }
 0x5e8   : > { %v7246_v45 = vpop.f32.mrf.mxu1  ;;  %v7707_v62 = vpop.f32.mrf.mxu0  ;;  %12122 = vmatprep.mubr.msk.bf16.mxu0 %vm12597_vm1, %v17582_v2 }
 0x5e9   : > { %v7368_v54 = vadd.f32 %v7246_v45, %v16421_v35  ;;  %v16755_v12 = vadd.f32 %v7707_v62, %v7367_v30  ;;  %v8104_v21 = vsel %vm2651_vm6, %v8099_v22, %v8103_v55  ;;  %v12527_v45 = vld [vmem:[#allocation2 + $0x7c] sm:$0xff]  }
 0x5ea   : > { %v11851_v42 = vpop.f32.mrf.mxu1  ;;  %v11936_v5 = vpop.f32.mrf.mxu0  ;;  %12037 = vmatmul.mubr.msk.bf16.gmra.mxu1 %vm5278_vm10, %v8104_v21  ;;  %v8514_v62 = vrot.slane %v12527_v45, 1 }
 0x5eb   : > { %12040 = vmatprep.mubr.msk.bf16.mxu1 %vm12597_vm1, %v17582_v2  ;;  %v17980_v5 = vld [vmem:[#allocation108_spill] sm:$0xff] }
 0x5ec   : > { %v7251_v10 = vpop.f32.mrf.mxu1  ;;  %v7710_v37 = vpop.f32.mrf.mxu0  ;;  %v8515_v42 = vsel %vm3732_vm7, %v8512_v43, %v8514_v62  ;;  %v17981_v21 = vshll.u32 %v17980_v5, 16 }
 0x5ed   : > { %v7369_v35 = vadd.f32 %v7251_v10, %v16428_v38  ;;  %v16764_v44 = vadd.f32 %v7710_v37, %v7368_v54  ;;  %v17979_v38 = vshrl.u32 %v15861_v7, 16 }
 0x5ee   : > { %v11854_v0 = vpop.f32.mrf.mxu1  ;;  %v11937_v39 = vpop.f32.mrf.mxu0  ;;  %v8119_v3 = vrot.slane %v17981_v21, 1 }
 0x5ef   : > { %12123 = vmatmul.mubr.msk.bf16.gmra.mxu0 %vm5278_vm10, %v8513_v24  ;;  %v8107_v17 = vor.u32 %v17979_v38, %v8103_v55 }
 0x5f0   : > { %v7254_v41 = vpop.f32.mrf.mxu1  ;;  %v7715_v46 = vpop.f32.mrf.mxu0  ;;  %12126 = vmatprep.mubr.msk.bf16.mxu0 %vm12597_vm1, %v17582_v2 }
 0x5f1   : > { %v7370_v30 = vadd.f32 %v7254_v41, %v16435_v15  ;;  %v16773_v31 = vadd.f32 %v7715_v46, %v7369_v35  ;;  %v8112_v33 = vsel %vm2651_vm6, %v8107_v17, %v8111_v29  ;;  %v12528_v41 = vld [vmem:[#allocation2 + $0x84] sm:$0xff]  }
 0x5f2   : > { %v11855_v19 = vpop.f32.mrf.mxu1  ;;  %v11940_v4 = vpop.f32.mrf.mxu0  ;;  %12041 = vmatmul.mubr.msk.bf16.gmra.mxu1 %vm5278_vm10, %v8112_v33  ;;  %v8516_v46 = vrot.slane %v12528_v41, 1 }
 0x5f3   : > { %12044 = vmatprep.mubr.msk.bf16.mxu1 %vm12597_vm1, %v17582_v2  ;;  %v17983_v4 = vld [vmem:[#allocation109_spill] sm:$0xff] }
 0x5f4   : > { %v7259_v54 = vpop.f32.mrf.mxu1  ;;  %v7718_v36 = vpop.f32.mrf.mxu0  ;;  %v8517_v19 = vsel %vm3732_vm7, %v8514_v62, %v8516_v46  ;;  %v17984_v33 = vshll.u32 %v17983_v4, 16 }
 0x5f5   : > { %v7371_v15 = vadd.f32 %v7259_v54, %v16442_v34  ;;  %v16782_v22 = vadd.f32 %v7718_v36, %v7370_v30  ;;  %v17982_v34 = vshrl.u32 %v15863_v53, 16 }
 0x5f6   : > { %v11858_v7 = vpop.f32.mrf.mxu1  ;;  %v11941_v55 = vpop.f32.mrf.mxu0  ;;  %v8127_v45 = vrot.slane %v17984_v33, 1 }
 0x5f7   : > { %12127 = vmatmul.mubr.msk.bf16.gmra.mxu0 %vm5278_vm10, %v8515_v42  ;;  %v8115_v39 = vor.u32 %v17982_v34, %v8111_v29 }
 0x5f8   : > { %v7262_v10 = vpop.f32.mrf.mxu1  ;;  %v7723_v37 = vpop.f32.mrf.mxu0  ;;  %12130 = vmatprep.mubr.msk.bf16.mxu0 %vm12597_vm1, %v17582_v2 }
 0x5f9   : > { %v7372_v35 = vadd.f32 %v7262_v10, %v16449_v13  ;;  %v16791_v0 = vadd.f32 %v7723_v37, %v7371_v15  ;;  %v8120_v43 = vsel %vm2651_vm6, %v8115_v39, %v8119_v3  ;;  %v12529_v10 = vld [vmem:[#allocation2 + $0x8c] sm:$0xff]  }
 0x5fa   : > { %v11859_v24 = vpop.f32.mrf.mxu1  ;;  %v11944_v18 = vpop.f32.mrf.mxu0  ;;  %12045 = vmatmul.mubr.msk.bf16.gmra.mxu1 %vm5278_vm10, %v8120_v43  ;;  %v8518_v37 = vrot.slane %v12529_v10, 1 }
 0x5fb   : > { %12048 = vmatprep.mubr.msk.bf16.mxu1 %vm12597_vm1, %v17582_v2  ;;  %v17986_v18 = vld [vmem:[#allocation110_spill] sm:$0xff] }
 0x5fc   : > { %v7267_v30 = vpop.f32.mrf.mxu1  ;;  %v7726_v38 = vpop.f32.mrf.mxu0  ;;  %v8519_v24 = vsel %vm3732_vm7, %v8516_v46, %v8518_v37  ;;  %v17987_v43 = vshll.u32 %v17986_v18, 16 }
 0x5fd   : > { %v7373_v13 = vadd.f32 %v7267_v30, %v16456_v52  ;;  %v16800_v17 = vadd.f32 %v7726_v38, %v7372_v35  ;;  %v17985_v52 = vshrl.u32 %v17980_v5, 16 }
 0x5fe   : > { %v11862_v53 = vpop.f32.mrf.mxu1  ;;  %v11945_v29 = vpop.f32.mrf.mxu0  ;;  %v8135_v41 = vrot.slane %v17987_v43, 1 }
 0x5ff   : > { %12131 = vmatmul.mubr.msk.bf16.gmra.mxu0 %vm5278_vm10, %v8517_v19  ;;  %v8123_v55 = vor.u32 %v17985_v52, %v8119_v3 }
 0x600   : > { %v7270_v54 = vpop.f32.mrf.mxu1  ;;  %v7731_v36 = vpop.f32.mrf.mxu0  ;;  %12134 = vmatprep.mubr.msk.bf16.mxu0 %vm12597_vm1, %v17582_v2 }
 0x601   : > { %v7374_v15 = vadd.f32 %v7270_v54, %v16463_v51  ;;  %v16809_v7 = vadd.f32 %v7731_v36, %v7373_v13  ;;  %v8128_v62 = vsel %vm2651_vm6, %v8123_v55, %v8127_v45  ;;  %v12530_v54 = vld [vmem:[#allocation2 + $0x94] sm:$0xff]  }
 0x602   : > { %v11863_v42 = vpop.f32.mrf.mxu1  ;;  %v11948_v21 = vpop.f32.mrf.mxu0  ;;  %12049 = vmatmul.mubr.msk.bf16.gmra.mxu1 %vm5278_vm10, %v8128_v62  ;;  %v8520_v36 = vrot.slane %v12530_v54, 1 }
 0x603   : > { %12052 = vmatprep.mubr.msk.bf16.mxu1 %vm12597_vm1, %v17582_v2  ;;  %v17989_v21 = vld [vmem:[#allocation111_spill] sm:$0xff] }
 0x604   : > { %v7275_v35 = vpop.f32.mrf.mxu1  ;;  %v7734_v34 = vpop.f32.mrf.mxu0  ;;  %v8521_v42 = vsel %vm3732_vm7, %v8518_v37, %v8520_v36  ;;  %v17990_v62 = vshll.u32 %v17989_v21, 16 }
 0x605   : > { %v7375_v51 = vadd.f32 %v7275_v35, %v16470_v59  ;;  %v16818_v39 = vadd.f32 %v7734_v34, %v7374_v15  ;;  %v17988_v59 = vshrl.u32 %v17983_v4, 16 }
 0x606   : > { %v11866_v5 = vpop.f32.mrf.mxu1  ;;  %v11949_v3 = vpop.f32.mrf.mxu0  ;;  %v8143_v10 = vrot.slane %v17990_v62, 1  ;;  %v17996_v62 = vshrl.u32 %v17989_v21, 16 }
 0x607   : > { %12135 = vmatmul.mubr.msk.bf16.gmra.mxu0 %vm5278_vm10, %v8519_v24  ;;  %v8131_v29 = vor.u32 %v17988_v59, %v8127_v45 }
 0x608   : > { %v7278_v30 = vpop.f32.mrf.mxu1  ;;  %v7739_v38 = vpop.f32.mrf.mxu0  ;;  %12138 = vmatprep.mubr.msk.bf16.mxu0 %vm12597_vm1, %v17582_v2 }
 0x609   : > { %v7376_v13 = vadd.f32 %v7278_v30, %v16477_v47  ;;  %v16827_v53 = vadd.f32 %v7739_v38, %v7375_v51  ;;  %v8136_v46 = vsel %vm2651_vm6, %v8131_v29, %v8135_v41  ;;  %v12531_v30 = vld [vmem:[#allocation2 + $0x9c] sm:$0xff]  }
 0x60a   : > { %v11867_v19 = vpop.f32.mrf.mxu1  ;;  %v11952_v33 = vpop.f32.mrf.mxu0  ;;  %12053 = vmatmul.mubr.msk.bf16.gmra.mxu1 %vm5278_vm10, %v8136_v46  ;;  %v8522_v38 = vrot.slane %v12531_v30, 1  ;;  %v17992_v29 = vld [vmem:[#allocation78_spill] sm:$0xff]  ;;  %v17993_v46 = vld [vmem:[#allocation113_spill] sm:$0xff] }
 0x60b   : > { %12056 = vmatprep.mubr.msk.bf16.mxu1 %vm12597_vm1, %v17582_v2  ;;  %v17994_v54 = vshll.u32 %v17993_v46, 16 }
 0x60c   : > { %v7283_v15 = vpop.f32.mrf.mxu1  ;;  %v7742_v52 = vpop.f32.mrf.mxu0  ;;  %v8523_v33 = vsel %vm3732_vm7, %v8520_v36, %v8522_v38 }
 0x60d   : > { %v7377_v47 = vadd.f32 %v7283_v15, %v16484_v23  ;;  %v16836_v55 = vadd.f32 %v7742_v52, %v7376_v13  ;;  %v17991_v23 = vshrl.u32 %v17986_v18, 16  ;;  %v8151_v15 = vrot.slane %v17994_v54, 1  ;;  %v18000_v54 = vld [vmem:[#allocation79_spill] sm:$0xff] }
 0x60e   : > { %v11870_v4 = vpop.f32.mrf.mxu1  ;;  %v11953_v45 = vpop.f32.mrf.mxu0 }
 0x60f   : > { %12139 = vmatmul.mubr.msk.bf16.gmra.mxu0 %vm5278_vm10, %v8521_v42  ;;  %v8139_v3 = vor.u32 %v17991_v23, %v8135_v41  ;;  %v17995_v4 = vld [vmem:[#allocation56_spill] sm:$0xff]  ;;  %v12532_v23 = vld [vmem:[#allocation2 + $0xa4] sm:$0xff]  }
 0x610   : > { %v7286_v35 = vpop.f32.mrf.mxu1  ;;  %v7747_v34 = vpop.f32.mrf.mxu0  ;;  %12142 = vmatprep.mubr.msk.bf16.mxu0 %vm12597_vm1, %v17582_v2 }
 0x611   : > { %v7378_v51 = vadd.f32 %v7286_v35, %v16491_v32  ;;  %v16845_v5 = vadd.f32 %v7747_v34, %v7377_v47  ;;  %v8144_v37 = vsel %vm2651_vm6, %v8139_v3, %v8143_v10  ;;  %v8147_v35 = vor.u32 %v17996_v62, %v8143_v10  ;;  %v12488_v62 = vld [vmem:[#allocation2 + $0xb4] ss:$0 sps:$4 sm:$0x77]  }
 0x612   : > { %v11871_v24 = vpop.f32.mrf.mxu1  ;;  %v11956_v43 = vpop.f32.mrf.mxu0  ;;  %12057 = vmatmul.mubr.msk.bf16.gmra.mxu1 %vm5278_vm10, %v8144_v37  ;;  %v8524_v3 = vrot.slane %v12532_v23, 1  ;;  %v17997_v37 = vld [vmem:[#allocation85_spill] sm:$0xff]  ;;  %v8165_v23 = vshll.u32 %v12488_v62, 16 }
 0x613   : > { %12060 = vmatprep.mubr.msk.bf16.mxu1 %vm12597_vm1, %v17582_v2  ;;  %v8152_v36 = vsel %vm2651_vm6, %v8147_v35, %v8151_v15 }
 0x614   : > { %v7291_v13 = vpop.f32.mrf.mxu1  ;;  %v7750_v59 = vpop.f32.mrf.mxu0 }
 0x615   : > { %v7379_v32 = vadd.f32 %v7291_v13, %v17992_v29  ;;  %v16854_v19 = vadd.f32 %v7750_v59, %v7378_v51  ;;  %v8525_v59 = vsel %vm3732_vm7, %v8522_v38, %v8524_v3  ;;  %v17998_v29 = vld [vmem:[#allocation114_spill] sm:$0xff] }
 0x616   : > { %v11874_v18 = vpop.f32.mrf.mxu1  ;;  %v11957_v41 = vpop.f32.mrf.mxu0 }
 0x617   : > { %12143 = vmatmul.mubr.msk.bf16.gmra.mxu0 %vm5278_vm10, %v8523_v33 }
 0x618   : > { %v7294_v52 = vpop.f32.mrf.mxu1  ;;  %v7755_v47 = vpop.f32.mrf.mxu0  ;;  %12146 = vmatprep.mubr.msk.bf16.mxu0 %vm12597_vm1, %v17582_v2 }
 0x619   : > { %v7380_v45 = vadd.f32 %v7294_v52, %v17995_v4  ;;  %v16863_v42 = vadd.f32 %v7755_v47, %v7379_v32  ;;  %v17999_v32 = vshll.u32 %v17998_v29, 16  ;;  %v18001_v4 = vshrl.u32 %v17993_v46, 16 }
 0x61a   : > { %v11875_v34 = vpop.f32.mrf.mxu1  ;;  %v11960_v51 = vpop.f32.mrf.mxu0  ;;  %12061 = vmatmul.mubr.msk.bf16.gmra.mxu1 %vm5278_vm10, %v8152_v36 }
 0x61b   : > { %12064 = vmatprep.mubr.msk.bf16.mxu1 %vm12597_vm1, %v17582_v2  ;;  %v8159_v18 = vrot.slane %v17999_v32, 1  ;;  %v12533_v51 = vld [vmem:[#allocation2 + $0xac] sm:$0xff]  }
 0x61c   : > { %v7299_v24 = vpop.f32.mrf.mxu1  ;;  %v7758_v43 = vpop.f32.mrf.mxu0  ;;  %v8526_v36 = vrot.slane %v12533_v51, 1 }
 0x61d   : > { %v7381_v30 = vadd.f32 %v7299_v24, %v17997_v37  ;;  %v16872_v13 = vadd.f32 %v7758_v43, %v7380_v45  ;;  %v8155_v45 = vor.u32 %v18001_v4, %v8151_v15  ;;  %v18002_v37 = vld [vmem:[#allocation60_spill] sm:$0xff]  ;;  %v18004_v4 = vld [vmem:[#allocation89_spill] sm:$0xff] }
 0x61e   : > { %v11878_v21 = vpop.f32.mrf.mxu1  ;;  %v11961_v10 = vpop.f32.mrf.mxu0 }
 0x61f   : > { %12147 = vmatmul.mubr.msk.bf16.gmra.mxu0 %vm5278_vm10, %v8525_v59  ;;  %v8160_v34 = vsel %vm2651_vm6, %v8155_v45, %v8159_v18  ;;  %v8527_v10 = vsel %vm3732_vm7, %v8524_v3, %v8526_v36  ;;  %v18003_v59 = vshrl.u32 %v17998_v29, 16  ;;  %v8528_v3 = vrot.slane %v12488_v62, 1 }
 0x620   : > { %v7302_v41 = vpop.f32.mrf.mxu1  ;;  %v7763_v33 = vpop.f32.mrf.mxu0  ;;  %12150 = vmatprep.mubr.msk.bf16.mxu0 %vm12597_vm1, %v17582_v2 }
 0x621   : > { %v7382_v52 = vadd.f32 %v7302_v41, %v18000_v54  ;;  %v16881_v47 = vadd.f32 %v7763_v33, %v7381_v30  ;;  %v8163_v32 = vor.u32 %v18003_v59, %v8159_v18  ;;  %v8167_v41 = vrot.slane %v8165_v23, 1  ;;  %v18005_v23 = vld [vmem:[#allocation82_spill] sm:$0xff] }
 0x622   : > { %v11879_v35 = vpop.f32.mrf.mxu1  ;;  %v11964_v38 = vpop.f32.mrf.mxu0  ;;  %12065 = vmatmul.mubr.msk.bf16.gmra.mxu1 %vm5278_vm10, %v8160_v34  ;;  %v8169_v18 = vshrl.u32 %v12488_v62, 16 }
 0x623   : > { %12068 = vmatprep.mubr.msk.bf16.mxu1 %vm12597_vm1, %v17582_v2  ;;  %v8168_v34 = vsel %vm2651_vm6, %v8163_v32, %v8167_v41 }
 0x624   : > { %v7307_v24 = vpop.f32.mrf.mxu1  ;;  %v7766_v43 = vpop.f32.mrf.mxu0  ;;  %v8171_v59 = vor.u32 %v8169_v18, %v8167_v41 }
 0x625   : > { %v7383_v30 = vadd.f32 %v7307_v24, %v18002_v37  ;;  %v16890_v21 = vadd.f32 %v7766_v43, %v7382_v52 }
 0x626   : > { %v11882_v46 = vpop.f32.mrf.mxu1  ;;  %v11965_v15 = vpop.f32.mrf.mxu0 }
 0x627   : > { %12151 = vmatmul.mubr.msk.bf16.gmra.mxu0 %vm5278_vm10, %v8527_v10  ;;  %v8529_v46 = vsel %vm3732_vm7, %v8526_v36, %v8528_v3 }
 0x628   : > { %v7310_v33 = vpop.f32.mrf.mxu1  ;;  %v7771_v54 = vpop.f32.mrf.mxu0  ;;  %12154 = vmatprep.mubr.msk.bf16.mxu0 %vm12597_vm1, %v17582_v2 }
 0x629   : > { %v7384_v45 = vadd.f32 %v7310_v33, %v18004_v4  ;;  %v16899_v35 = vadd.f32 %v7771_v54, %v7383_v30 }
 0x62a   : > { %v11883_v52 = vpop.f32.mrf.mxu1  ;;  %v11968_v38 = vpop.f32.mrf.mxu0  ;;  %12069 = vmatmul.mubr.msk.bf16.gmra.mxu1 %vm5278_vm10, %v8168_v34 }
 0x62b   : > { %12072 = vmatprep.mubr.msk.bf16.mxu1 %vm12597_vm1, %v17582_v2 }
 0x62c   : > { %v7315_v51 = vpop.f32.mrf.mxu1  ;;  %v7774_v29 = vpop.f32.mrf.mxu0 }
 0x62d   : > { %v7385_v24 = vadd.f32 %v7315_v51, %v18005_v23  ;;  %v16906_v43 = vadd.f32 %v7774_v29, %v7384_v45 }
 0x62e   : > { %v11886_v37 = vpop.f32.mrf.mxu1  ;;  %v11969_v30 = vpop.f32.mrf.mxu0 }
 0x62f   : > { %12155 = vmatmul.mubr.msk.bf16.gmra.mxu0 %vm5278_vm10, %v8529_v46  ;;  %v18006_v37 = vld [vmem:[#allocation117_spill] sm:$0xff] }
 0x630   : > { %v7318_v15 = vpop.f32.mrf.mxu1  ;;  %v7779_v10 = vpop.f32.mrf.mxu0  ;;  %12158 = vmatprep.mubr.msk.bf16.mxu0 %vm12597_vm1, %v17582_v2 }
 0x631   : > { %v7386_v32 = vadd.f32 %v7318_v15, %v16550_v49  ;;  %v16913_v33 = vadd.f32 %v7779_v10, %v7385_v24 }
 0x632   : > { %v11887_v62 = vpop.f32.mrf.mxu1  ;;  %v11972_v54 = vpop.f32.mrf.mxu0  ;;  %12073 = vmatmul.mubr.msk.bf16.gmra.mxu1 %vm5278_vm10, %v8171_v59 }
 0x633   : > { %12164 = vmatprep.mubr.msk.bf16.mxu1 %vm12597_vm1, %v17582_v2 }
 0x634   : > { %v7323_v4 = vpop.f32.mrf.mxu1  ;;  %v7782_v45 = vpop.f32.mrf.mxu0 }
 0x635   : > { %v7387_v36 = vadd.f32 %v7323_v4, %v16558_v50  ;;  %v16919_v52 = vadd.f32 %v7782_v45, %v7386_v32 }
 0x636   : > { %v11890_v41 = vpop.f32.mrf.mxu1  ;;  %v11973_v49 = vpop.f32.mrf.mxu0 }
 0x637   : > { %12159 = vmatmul.mubr.msk.bf16.gmra.mxu0 %vm5278_vm10, %v8528_v3 }
 0x638   : > { %v7326_v38 = vpop.f32.mrf.mxu1  ;;  %v7787_v34 = vpop.f32.mrf.mxu0  ;;  %12256 = vmatprep.mubr.msk.f32.mxu0 %vm12597_vm1, %v17582_v2 }
 0x639   : > { %v7388_v51 = vadd.f32 %v7326_v38, %v16568_v14  ;;  %v16925_v29 = vadd.f32 %v7787_v34, %v7387_v36  ;;  %v18007_v36 = vld [vmem:[#allocation116_spill] sm:$0xff] }
 0x63a   : > { %v11891_v18 = vpop.f32.mrf.mxu1  ;;  %v11976_v50 = vpop.f32.mrf.mxu0  ;;  %12165 = vmatmul.mubr.msk.bf16.vlgmr.msra.gmra.mxu1 %vm5278_vm10, %v18006_v37 }
 0x63b   : > { %12168 = vmatprep.mubr.msk.bf16.mxu1 %vm12597_vm1, %v17582_v2 }
 0x63c   : > { %v7331_v23 = vpop.f32.mrf.mxu1  ;;  %v7790_v24 = vpop.f32.mrf.mxu0 }
 0x63d   : > { %v7389_v30 = vadd.f32 %v7331_v23, %v16578_v63  ;;  %v16932_v46 = vadd.f32 %v7790_v24, %v7388_v51 }
 0x63e   : > { %v11894_v14 = vpop.f32.mrf.mxu1  ;;  %v11977_v3 = vpop.f32.mrf.mxu0 }
 0x640   : > { %v7334_v15 = vpop.f32.mrf.mxu1  ;;  %v7795_v10 = vpop.f32.mrf.mxu0 }
 0x641   : > { %v7390_v59 = vadd.f32 %v7334_v15, %v16587_v1  ;;  %v16937_v32 = vadd.f32 %v7795_v10, %v7389_v30  ;;  %v18008_v30 = vld [vmem:[#allocation118_spill] sm:$0xff] }
 0x642   : > { %v11895_v62 = vpop.f32.mrf.mxu1  ;;  %v11980_v54 = vpop.f32.mrf.mxu0  ;;  %12169 = vmatmul.mubr.msk.bf16.gmra.mxu1 %vm5278_vm10, %v18007_v36  ;;  %v18009_v36 = vld [vmem:[#allocation119_spill] sm:$0xff] }
 0x643   : > { %12172 = vmatprep.mubr.msk.bf16.mxu1 %vm12597_vm1, %v17582_v2 }
 0x644   : > { %v7339_v4 = vpop.f32.mrf.mxu1  ;;  %v7798_v45 = vpop.f32.mrf.mxu0 }
 0x645   : > { %v7391_v63 = vadd.f32 %v7339_v4, %v16596_v16  ;;  %v16942_v41 = vadd.f32 %v7798_v45, %v7390_v59 }
 0x646   : > { %v11898_v49 = vpop.f32.mrf.mxu1  ;;  %v11981_v38 = vpop.f32.mrf.mxu0 }
 0x648   : > { %v7342_v34 = vpop.f32.mrf.mxu1  ;;  %v7803_v1 = vpop.f32.mrf.mxu0 }
 0x649   : > { %v7392_v51 = vadd.f32 %v7342_v34, %v16605_v28  ;;  %v16947_v18 = vadd.f32 %v7803_v1, %v7391_v63 }
 0x64a   : > { %v11899_v50 = vpop.f32.mrf.mxu1  ;;  %v11984_v23 = vpop.f32.mrf.mxu0  ;;  %12173 = vmatmul.mubr.msk.bf16.gmra.mxu1 %vm5278_vm10, %v18008_v30  ;;  %v18010_v30 = vld [vmem:[#allocation120_spill] sm:$0xff] }
 0x64b   : > { %12176 = vmatprep.mubr.msk.bf16.mxu1 %vm12597_vm1, %v17582_v2 }
 0x64c   : > { %v7347_v24 = vpop.f32.mrf.mxu1  ;;  %v7806_v37 = vpop.f32.mrf.mxu0 }
 0x64d   : > { %v7393_v16 = vadd.f32 %v7347_v24, %v16613_v8  ;;  %v16952_v14 = vadd.f32 %v7806_v37, %v7392_v51 }
 0x64e   : > { %v11902_v3 = vpop.f32.mrf.mxu1  ;;  %v11985_v15 = vpop.f32.mrf.mxu0 }
 0x650   : > { %v7350_v10 = vpop.f32.mrf.mxu1  ;;  %v7811_v28 = vpop.f32.mrf.mxu0 }
 0x651   : > { %v16956_v59 = vadd.f32 %v7811_v28, %v7393_v16 }
 0x652   : > { %v11903_v62 = vpop.f32.mrf.mxu1  ;;  %v11988_v54 = vpop.f32.mrf.mxu0  ;;  %12177 = vmatmul.mubr.msk.bf16.gmra.mxu1 %vm5278_vm10, %v18009_v36 }
 0x653   : > { %12180 = vmatprep.mubr.msk.bf16.mxu1 %vm12597_vm1, %v17582_v2 }
 0x654   : > { %v7814_v4 = vpop.f32.mrf.mxu0  ;;  %v8275_v45 = vpop.f32.mrf.mxu1 }
 0x655   : > { %v8441_v8 = vadd.f32 %v8275_v45, %v16629_v56 }
 0x656   : > { %v11989_v63 = vpop.f32.mrf.mxu0  ;;  %v11994_v49 = vpop.f32.mrf.mxu1 }
 0x658   : > { %v8278_v38 = vpop.f32.mrf.mxu1  ;;  %v8633_v34 = vpop.f32.mrf.mxu0 }
 0x659   : > { %v8442_v1 = vadd.f32 %v8278_v38, %v16638_v9  ;;  %v16964_v51 = vadd.f32 %v8633_v34, %v8441_v8  ;;  %v18011_v8 = vld [vmem:[#allocation121_spill] sm:$0xff] }
 0x65a   : > { %v11995_v50 = vpop.f32.mrf.mxu1  ;;  %v12080_v23 = vpop.f32.mrf.mxu0  ;;  %12181 = vmatmul.mubr.msk.bf16.gmra.mxu1 %vm5278_vm10, %v18010_v30 }
 0x65b   : > { %12184 = vmatprep.mubr.msk.bf16.mxu1 %vm12597_vm1, %v17582_v2 }
 0x65c   : > { %v8283_v24 = vpop.f32.mrf.mxu1  ;;  %v8636_v37 = vpop.f32.mrf.mxu0 }
 0x65d   : > { %v8443_v56 = vadd.f32 %v8283_v24, %v16647_v20  ;;  %v16969_v16 = vadd.f32 %v8636_v37, %v8442_v1 }
 0x65e   : > { %v11998_v3 = vpop.f32.mrf.mxu1  ;;  %v12081_v15 = vpop.f32.mrf.mxu0 }
 0x660   : > { %v8286_v10 = vpop.f32.mrf.mxu1  ;;  %v8641_v9 = vpop.f32.mrf.mxu0 }
 0x661   : > { %v8444_v28 = vadd.f32 %v8286_v10, %v16656_v25  ;;  %v16974_v62 = vadd.f32 %v8641_v9, %v8443_v56  ;;  %v18012_v56 = vld [vmem:[#allocation122_spill] sm:$0xff] }
 0x662   : > { %v11999_v54 = vpop.f32.mrf.mxu1  ;;  %v12084_v4 = vpop.f32.mrf.mxu0  ;;  %12185 = vmatmul.mubr.msk.bf16.gmra.mxu1 %vm5278_vm10, %v18011_v8 }
 0x663   : > { %12188 = vmatprep.mubr.msk.bf16.mxu1 %vm12597_vm1, %v17582_v2 }
 0x664   : > { %v8291_v45 = vpop.f32.mrf.mxu1  ;;  %v8644_v36 = vpop.f32.mrf.mxu0 }
 0x665   : > { %v8445_v20 = vadd.f32 %v8291_v45, %v16665_v57  ;;  %v16979_v63 = vadd.f32 %v8644_v36, %v8444_v28 }
 0x666   : > { %v12002_v49 = vpop.f32.mrf.mxu1  ;;  %v12085_v38 = vpop.f32.mrf.mxu0 }
 0x668   : > { %v8294_v34 = vpop.f32.mrf.mxu1  ;;  %v8649_v25 = vpop.f32.mrf.mxu0 }
 0x669   : > { %v8446_v1 = vadd.f32 %v8294_v34, %v16674_v48  ;;  %v16984_v50 = vadd.f32 %v8649_v25, %v8445_v20  ;;  %v18013_v20 = vld [vmem:[#allocation123_spill] sm:$0xff] }
 0x66a   : > { %v12003_v23 = vpop.f32.mrf.mxu1  ;;  %v12088_v24 = vpop.f32.mrf.mxu0  ;;  %12189 = vmatmul.mubr.msk.bf16.gmra.mxu1 %vm5278_vm10, %v18012_v56 }
 0x66b   : > { %12192 = vmatprep.mubr.msk.bf16.mxu1 %vm12597_vm1, %v17582_v2 }
 0x66c   : > { %v8299_v37 = vpop.f32.mrf.mxu1  ;;  %v8652_v30 = vpop.f32.mrf.mxu0 }
 0x66d   : > { %v8447_v57 = vadd.f32 %v8299_v37, %v16683_v11  ;;  %v16989_v3 = vadd.f32 %v8652_v30, %v8446_v1 }
 0x66e   : > { %v12006_v15 = vpop.f32.mrf.mxu1  ;;  %v12089_v10 = vpop.f32.mrf.mxu0 }
 0x670   : > { %v8302_v9 = vpop.f32.mrf.mxu1  ;;  %v8657_v48 = vpop.f32.mrf.mxu0 }
 0x671   : > { %v8448_v28 = vadd.f32 %v8302_v9, %v16692_v61  ;;  %v16994_v54 = vadd.f32 %v8657_v48, %v8447_v57  ;;  %v18014_v57 = vld [vmem:[#allocation124_spill] sm:$0xff] }
 0x672   : > { %v12007_v4 = vpop.f32.mrf.mxu1  ;;  %v12092_v45 = vpop.f32.mrf.mxu0  ;;  %12193 = vmatmul.mubr.msk.bf16.gmra.mxu1 %vm5278_vm10, %v18013_v20 }
 0x673   : > { %12196 = vmatprep.mubr.msk.bf16.mxu1 %vm12597_vm1, %v17582_v2 }
 0x674   : > { %v8307_v36 = vpop.f32.mrf.mxu1  ;;  %v8660_v8 = vpop.f32.mrf.mxu0 }
 0x675   : > { %v8449_v11 = vadd.f32 %v8307_v36, %v16701_v40  ;;  %v16999_v49 = vadd.f32 %v8660_v8, %v8448_v28 }
 0x676   : > { %v12010_v38 = vpop.f32.mrf.mxu1  ;;  %v12093_v34 = vpop.f32.mrf.mxu0 }
 0x678   : > { %v8310_v25 = vpop.f32.mrf.mxu1  ;;  %v8665_v61 = vpop.f32.mrf.mxu0 }
 0x679   : > { %v8450_v1 = vadd.f32 %v8310_v25, %v16710_v26  ;;  %v17004_v23 = vadd.f32 %v8665_v61, %v8449_v11  ;;  %v18015_v11 = vld [vmem:[#allocation125_spill] sm:$0xff] }
 0x67a   : > { %v12011_v24 = vpop.f32.mrf.mxu1  ;;  %v12096_v37 = vpop.f32.mrf.mxu0  ;;  %12197 = vmatmul.mubr.msk.bf16.gmra.mxu1 %vm5278_vm10, %v18014_v57 }
 0x67b   : > { %12200 = vmatprep.mubr.msk.bf16.mxu1 %vm12597_vm1, %v17582_v2 }
 0x67c   : > { %v8315_v30 = vpop.f32.mrf.mxu1  ;;  %v8668_v56 = vpop.f32.mrf.mxu0 }
 0x67d   : > { %v8451_v40 = vadd.f32 %v8315_v30, %v16719_v27  ;;  %v17009_v15 = vadd.f32 %v8668_v56, %v8450_v1 }
 0x67e   : > { %v12014_v10 = vpop.f32.mrf.mxu1  ;;  %v12097_v9 = vpop.f32.mrf.mxu0 }
 0x680   : > { %v8318_v48 = vpop.f32.mrf.mxu1  ;;  %v8673_v26 = vpop.f32.mrf.mxu0 }
 0x681   : > { %v8452_v28 = vadd.f32 %v8318_v48, %v16728_v6  ;;  %v17014_v4 = vadd.f32 %v8673_v26, %v8451_v40  ;;  %v18016_v40 = vld [vmem:[#allocation126_spill] sm:$0xff] }
 0x682   : > { %v12015_v45 = vpop.f32.mrf.mxu1  ;;  %v12100_v36 = vpop.f32.mrf.mxu0  ;;  %12201 = vmatmul.mubr.msk.bf16.gmra.mxu1 %vm5278_vm10, %v18015_v11 }
 0x683   : > { %12204 = vmatprep.mubr.msk.bf16.mxu1 %vm12597_vm1, %v17582_v2 }
 0x684   : > { %v8323_v8 = vpop.f32.mrf.mxu1  ;;  %v8676_v20 = vpop.f32.mrf.mxu0 }
 0x685   : > { %v8453_v27 = vadd.f32 %v8323_v8, %v16737_v60  ;;  %v17019_v38 = vadd.f32 %v8676_v20, %v8452_v28 }
 0x686   : > { %v12018_v34 = vpop.f32.mrf.mxu1  ;;  %v12101_v25 = vpop.f32.mrf.mxu0 }
 0x688   : > { %v8326_v61 = vpop.f32.mrf.mxu1  ;;  %v8681_v6 = vpop.f32.mrf.mxu0 }
 0x689   : > { %v8454_v1 = vadd.f32 %v8326_v61, %v16746_v58  ;;  %v17024_v24 = vadd.f32 %v8681_v6, %v8453_v27  ;;  %v18017_v27 = vld [vmem:[#allocation127_spill] sm:$0xff] }
 0x68a   : > { %v12019_v37 = vpop.f32.mrf.mxu1  ;;  %v12104_v30 = vpop.f32.mrf.mxu0  ;;  %12205 = vmatmul.mubr.msk.bf16.gmra.mxu1 %vm5278_vm10, %v18016_v40 }
 0x68b   : > { %12208 = vmatprep.mubr.msk.bf16.mxu1 %vm12597_vm1, %v17582_v2 }
 0x68c   : > { %v8331_v56 = vpop.f32.mrf.mxu1  ;;  %v8684_v57 = vpop.f32.mrf.mxu0 }
 0x68d   : > { %v8455_v60 = vadd.f32 %v8331_v56, %v16755_v12  ;;  %v17029_v10 = vadd.f32 %v8684_v57, %v8454_v1 }
 0x68e   : > { %v12022_v9 = vpop.f32.mrf.mxu1  ;;  %v12105_v48 = vpop.f32.mrf.mxu0 }
 0x690   : > { %v8334_v26 = vpop.f32.mrf.mxu1  ;;  %v8689_v58 = vpop.f32.mrf.mxu0 }
 0x691   : > { %v8456_v28 = vadd.f32 %v8334_v26, %v16764_v44  ;;  %v17034_v45 = vadd.f32 %v8689_v58, %v8455_v60  ;;  %v9473_v44 = vld [vmem:[%s17384_s6 + $0x18] sm:$0xff]  ;;  %v18018_v60 = vld [vmem:[#allocation128_spill] sm:$0xff] }
 0x692   : > { %v12023_v36 = vpop.f32.mrf.mxu1  ;;  %v12108_v8 = vpop.f32.mrf.mxu0  ;;  %12209 = vmatmul.mubr.msk.bf16.gmra.mxu1 %vm5278_vm10, %v18017_v27  ;;  %12249 = vmatpush3.msra.mxu0 %v9473_v44 }
 0x693   : > { %12212 = vmatprep.mubr.msk.bf16.mxu1 %vm12597_vm1, %v17582_v2  ;;  %12250 = vmatprep.subr.mxu0 %v17582_v2 }
 0x694   : > { %v8339_v20 = vpop.f32.mrf.mxu1  ;;  %v8692_v11 = vpop.f32.mrf.mxu0 }
 0x695   : > { %v8457_v12 = vadd.f32 %v8339_v20, %v16773_v31  ;;  %v17039_v34 = vadd.f32 %v8692_v11, %v8456_v28 }
 0x696   : > { %v12026_v25 = vpop.f32.mrf.mxu1  ;;  %v12109_v61 = vpop.f32.mrf.mxu0 }
 0x697   : > { %v18019_v25 = vld [vmem:[#allocation129_spill] sm:$0xff] }
 0x698   : > { %v8342_v6 = vpop.f32.mrf.mxu1  ;;  %v8697_v1 = vpop.f32.mrf.mxu0 }
 0x699   : > { %v8458_v37 = vadd.f32 %v8342_v6, %v16782_v22  ;;  %v17048_v30 = vadd.f32 %v8697_v1, %v8457_v12 }
 0x69a   : > { %v12027_v31 = vpop.f32.mrf.mxu1  ;;  %v12112_v56 = vpop.f32.mrf.mxu0  ;;  %12213 = vmatmul.mubr.msk.bf16.gmra.mxu1 %vm5278_vm10, %v18018_v60 }
 0x69b   : > { %12216 = vmatprep.mubr.msk.bf16.mxu1 %vm12597_vm1, %v17582_v2 }
 0x69c   : > { %v8347_v57 = vpop.f32.mrf.mxu1  ;;  %v8700_v40 = vpop.f32.mrf.mxu0 }
 0x69d   : > { %v8459_v9 = vadd.f32 %v8347_v57, %v16791_v0  ;;  %v17053_v48 = vadd.f32 %v8700_v40, %v8458_v37 }
 0x69e   : > { %v12030_v26 = vpop.f32.mrf.mxu1  ;;  %v12113_v58 = vpop.f32.mrf.mxu0 }
 0x6a0   : > { %v8350_v28 = vpop.f32.mrf.mxu1  ;;  %v8705_v22 = vpop.f32.mrf.mxu0 }
 0x6a1   : > { %v8460_v36 = vadd.f32 %v8350_v28, %v16800_v17  ;;  %v17058_v8 = vadd.f32 %v8705_v22, %v8459_v9  ;;  %v18020_v9 = vld [vmem:[#allocation130_spill] sm:$0xff] }
 0x6a2   : > { %v12031_v20 = vpop.f32.mrf.mxu1  ;;  %v12116_v11 = vpop.f32.mrf.mxu0  ;;  %12217 = vmatmul.mubr.msk.bf16.gmra.mxu1 %vm5278_vm10, %v18019_v25 }
 0x6a3   : > { %12220 = vmatprep.mubr.msk.bf16.mxu1 %vm12597_vm1, %v17582_v2 }
 0x6a4   : > { %v8355_v27 = vpop.f32.mrf.mxu1  ;;  %v8708_v12 = vpop.f32.mrf.mxu0 }
 0x6a5   : > { %v8461_v0 = vadd.f32 %v8355_v27, %v16809_v7  ;;  %v17063_v61 = vadd.f32 %v8708_v12, %v8460_v36 }
 0x6a6   : > { %v12034_v44 = vpop.f32.mrf.mxu1  ;;  %v12117_v6 = vpop.f32.mrf.mxu0 }
 0x6a8   : > { %v8358_v1 = vpop.f32.mrf.mxu1  ;;  %v8713_v17 = vpop.f32.mrf.mxu0 }
 0x6a9   : > { %v8462_v37 = vadd.f32 %v8358_v1, %v16818_v39  ;;  %v17068_v31 = vadd.f32 %v8713_v17, %v8461_v0  ;;  %v18021_v0 = vld [vmem:[#allocation131_spill] sm:$0xff] }
 0x6aa   : > { %v12035_v56 = vpop.f32.mrf.mxu1  ;;  %v12120_v57 = vpop.f32.mrf.mxu0  ;;  %12221 = vmatmul.mubr.msk.bf16.gmra.mxu1 %vm5278_vm10, %v18020_v9 }
 0x6ab   : > { %12224 = vmatprep.mubr.msk.bf16.mxu1 %vm12597_vm1, %v17582_v2 }
 0x6ac   : > { %v8363_v40 = vpop.f32.mrf.mxu1  ;;  %v8716_v60 = vpop.f32.mrf.mxu0 }
 0x6ad   : > { %v8463_v7 = vadd.f32 %v8363_v40, %v16827_v53  ;;  %v17073_v26 = vadd.f32 %v8716_v60, %v8462_v37 }
 0x6ae   : > { %v12038_v58 = vpop.f32.mrf.mxu1  ;;  %v12121_v28 = vpop.f32.mrf.mxu0 }
 0x6b0   : > { %v8366_v22 = vpop.f32.mrf.mxu1  ;;  %v8721_v39 = vpop.f32.mrf.mxu0 }
 0x6b1   : > { %v8464_v36 = vadd.f32 %v8366_v22, %v16836_v55  ;;  %v17078_v20 = vadd.f32 %v8721_v39, %v8463_v7  ;;  %v18022_v7 = vld [vmem:[#allocation132_spill] sm:$0xff] }
 0x6b2   : > { %v12039_v11 = vpop.f32.mrf.mxu1  ;;  %v12124_v27 = vpop.f32.mrf.mxu0  ;;  %12225 = vmatmul.mubr.msk.bf16.gmra.mxu1 %vm5278_vm10, %v18021_v0 }
 0x6b3   : > { %12228 = vmatprep.mubr.msk.bf16.mxu1 %vm12597_vm1, %v17582_v2 }
 0x6b4   : > { %v8371_v12 = vpop.f32.mrf.mxu1  ;;  %v8724_v25 = vpop.f32.mrf.mxu0 }
 0x6b5   : > { %v8465_v53 = vadd.f32 %v8371_v12, %v16845_v5  ;;  %v17083_v44 = vadd.f32 %v8724_v25, %v8464_v36  ;;  %v9472_v25 = vld [vmem:[%s17384_s6 + $0x10] sm:$0xff] }
 0x6b6   : > { %v12042_v6 = vpop.f32.mrf.mxu1  ;;  %v12125_v1 = vpop.f32.mrf.mxu0  ;;  %12251 = vmatpush3.msra.mxu0 %v9472_v25 }
 0x6b7   : > { %v18023_v6 = vld [vmem:[#allocation133_spill] sm:$0xff]  ;;  %12252 = vmatprep.subr.mxu0 %v17582_v2 }
 0x6b8   : > { %v8374_v17 = vpop.f32.mrf.mxu1  ;;  %v8729_v55 = vpop.f32.mrf.mxu0 }
 0x6b9   : > { %v8466_v37 = vadd.f32 %v8374_v17, %v16854_v19  ;;  %v17088_v56 = vadd.f32 %v8729_v55, %v8465_v53 }
 0x6ba   : > { %v12043_v57 = vpop.f32.mrf.mxu1  ;;  %v12128_v40 = vpop.f32.mrf.mxu0  ;;  %12229 = vmatmul.mubr.msk.bf16.gmra.mxu1 %vm5278_vm10, %v18022_v7 }
 0x6bb   : > { %12232 = vmatprep.mubr.msk.bf16.mxu1 %vm12597_vm1, %v17582_v2 }
 0x6bc   : > { %v8379_v60 = vpop.f32.mrf.mxu1  ;;  %v8732_v9 = vpop.f32.mrf.mxu0 }
 0x6bd   : > { %v8467_v5 = vadd.f32 %v8379_v60, %v16863_v42  ;;  %v17093_v58 = vadd.f32 %v8732_v9, %v8466_v37  ;;  %v12489_v42 = vld [vmem:[#allocation2 + $0xb4] ss:$0 sps:$4 sm:$0xff]  }
 0x6be   : > { %v12046_v28 = vpop.f32.mrf.mxu1  ;;  %v12129_v22 = vpop.f32.mrf.mxu0  ;;  %v8932_v37 = vshrl.u32 %v12489_v42, 16  ;;  %v8935_v57 = vshll.u32 %v12489_v42, 16 }
 0x6c0   : > { %v8382_v39 = vpop.f32.mrf.mxu1  ;;  %v8737_v19 = vpop.f32.mrf.mxu0  ;;  %v8934_v22 = vrot.slane %v8932_v37, 1  ;;  %v18025_v37 = vld [vmem:[#allocation134_spill] sm:$0xff] }
 0x6c1   : > { %v8468_v36 = vadd.f32 %v8382_v39, %v16872_v13  ;;  %v17098_v11 = vadd.f32 %v8737_v19, %v8467_v5  ;;  %v8937_v39 = vrot.slane %v8935_v57, 2 }
 0x6c2   : > { %v12047_v27 = vpop.f32.mrf.mxu1  ;;  %v12132_v12 = vpop.f32.mrf.mxu0  ;;  %12233 = vmatmul.mubr.msk.bf16.gmra.mxu1 %vm5278_vm10, %v18023_v6 }
 0x6c3   : > { %12236 = vmatprep.mubr.msk.bf16.mxu1 %vm12597_vm1, %v17582_v2  ;;  %v8938_v42 = vor.u32 %v8937_v39, %v8934_v22 }
 0x6c4   : > { %v8387_v0 = vpop.f32.mrf.mxu1  ;;  %v8740_v53 = vpop.f32.mrf.mxu0 }
 0x6c5   : > { %v8469_v1 = vadd.f32 %v8387_v0, %v16881_v47  ;;  %v17107_v13 = vadd.f32 %v8740_v53, %v8468_v36  ;;  %v18024_v36 = vld [vmem:[#allocation135_spill] sm:$0xff]  ;;  %v8939_v57 = vsel %vm4087_vm8, %v18025_v37, %v8938_v42 }
 0x6c6   : > { %v12050_v17 = vpop.f32.mrf.mxu1  ;;  %v12133_v55 = vpop.f32.mrf.mxu0 }
 0x6c8   : > { %v8390_v40 = vpop.f32.mrf.mxu1  ;;  %v8745_v60 = vpop.f32.mrf.mxu0 }
 0x6c9   : > { %v8470_v9 = vadd.f32 %v8390_v40, %v16890_v21  ;;  %v17112_v7 = vadd.f32 %v8745_v60, %v8469_v1 }
 0x6ca   : > { %v12051_v5 = vpop.f32.mrf.mxu1  ;;  %v12136_v28 = vpop.f32.mrf.mxu0  ;;  %12237 = vmatmul.mubr.msk.bf16.gmra.mxu1 %vm5278_vm10, %v18024_v36 }
 0x6cb   : > { %12240 = vmatprep.mubr.msk.bf16.mxu1 %vm12597_vm1, %v17582_v2 }
 0x6cc   : > { %v8395_v47 = vpop.f32.mrf.mxu1  ;;  %v8748_v19 = vpop.f32.mrf.mxu0 }
 0x6cd   : > { %v8471_v27 = vadd.f32 %v8395_v47, %v16899_v35  ;;  %v17117_v12 = vadd.f32 %v8748_v19, %v8470_v9 }
 0x6ce   : > { %v12054_v25 = vpop.f32.mrf.mxu1  ;;  %v12137_v21 = vpop.f32.mrf.mxu0 }
 0x6d0   : > { %v8398_v0 = vpop.f32.mrf.mxu1  ;;  %v8753_v53 = vpop.f32.mrf.mxu0 }
 0x6d1   : > { %v8472_v6 = vadd.f32 %v8398_v0, %v16906_v43  ;;  %v17122_v1 = vadd.f32 %v8753_v53, %v8471_v27 }
 0x6d2   : > { %v12055_v17 = vpop.f32.mrf.mxu1  ;;  %v12140_v55 = vpop.f32.mrf.mxu0  ;;  %12241 = vmatmul.mubr.msk.bf16.gmra.mxu1 %vm5278_vm10, %v8939_v57 }
 0x6d3   : > { %12244 = vmatprep.mubr.msk.bf16.mxu1 %vm12597_vm1, %v17582_v2 }
 0x6d4   : > { %v8403_v35 = vpop.f32.mrf.mxu1  ;;  %v8756_v40 = vpop.f32.mrf.mxu0 }
 0x6d5   : > { %v8473_v60 = vadd.f32 %v8403_v35, %v16913_v33  ;;  %v17128_v9 = vadd.f32 %v8756_v40, %v8472_v6 }
 0x6d6   : > { %v12058_v5 = vpop.f32.mrf.mxu1  ;;  %v12141_v43 = vpop.f32.mrf.mxu0 }
 0x6d8   : > { %v8406_v28 = vpop.f32.mrf.mxu1  ;;  %v8761_v22 = vpop.f32.mrf.mxu0 }
 0x6d9   : > { %v8474_v39 = vadd.f32 %v8406_v28, %v16919_v52  ;;  %v17133_v47 = vadd.f32 %v8761_v22, %v8473_v60 }
 0x6da   : > { %v12059_v19 = vpop.f32.mrf.mxu1  ;;  %v12144_v36 = vpop.f32.mrf.mxu0  ;;  %12245 = vmatmul.mubr.msk.bf16.gmra.mxu1 %vm5278_vm10, %v8938_v42 }
 0x6db   : > { %v9471_v36 = vld [vmem:[%s17384_s6 + $0x8] sm:$0xff] }
 0x6dc   : > { %v8411_v27 = vpop.f32.mrf.mxu1  ;;  %v8764_v25 = vpop.f32.mrf.mxu0  ;;  %12253 = vmatpush3.msra.mxu0 %v9471_v36 }
 0x6dd   : > { %v8475_v33 = vadd.f32 %v8411_v27, %v16925_v29  ;;  %v17137_v21 = vadd.f32 %v8764_v25, %v8474_v39  ;;  %12254 = vmatprep.subr.mxu0 %v17582_v2 }
 0x6de   : > { %v12062_v0 = vpop.f32.mrf.mxu1  ;;  %v12145_v53 = vpop.f32.mrf.mxu0 }
 0x6e0   : > { %v8414_v6 = vpop.f32.mrf.mxu1  ;;  %v8769_v17 = vpop.f32.mrf.mxu0 }
 0x6e1   : > { %v8476_v55 = vadd.f32 %v8414_v6, %v16932_v46  ;;  %v17140_v37 = vadd.f32 %v8769_v17, %v8475_v33 }
 0x6e2   : > { %v12063_v52 = vpop.f32.mrf.mxu1  ;;  %v12148_v57 = vpop.f32.mrf.mxu0 }
 0x6e4   : > { %v8419_v35 = vpop.f32.mrf.mxu1  ;;  %v8772_v40 = vpop.f32.mrf.mxu0 }
 0x6e5   : > { %v8477_v60 = vadd.f32 %v8419_v35, %v16937_v32  ;;  %v17143_v5 = vadd.f32 %v8772_v40, %v8476_v55 }
 0x6e6   : > { %v12066_v42 = vpop.f32.mrf.mxu1  ;;  %v12149_v29 = vpop.f32.mrf.mxu0 }
 0x6e8   : > { %v8422_v43 = vpop.f32.mrf.mxu1  ;;  %v8777_v28 = vpop.f32.mrf.mxu0 }
 0x6e9   : > { %v8478_v22 = vadd.f32 %v8422_v43, %v16942_v41  ;;  %v17146_v39 = vadd.f32 %v8777_v28, %v8477_v60 }
 0x6ea   : > { %v12067_v19 = vpop.f32.mrf.mxu1  ;;  %v12152_v46 = vpop.f32.mrf.mxu0 }
 0x6ec   : > { %v8427_v27 = vpop.f32.mrf.mxu1  ;;  %v8780_v25 = vpop.f32.mrf.mxu0 }
 0x6ed   : > { %v8479_v32 = vadd.f32 %v8427_v27, %v16947_v18  ;;  %v17153_v33 = vadd.f32 %v8780_v25, %v8478_v22 }
 0x6ee   : > { %v12070_v0 = vpop.f32.mrf.mxu1  ;;  %v12153_v53 = vpop.f32.mrf.mxu0 }
 0x6f0   : > { %v8430_v41 = vpop.f32.mrf.mxu1  ;;  %v8785_v6 = vpop.f32.mrf.mxu0 }
 0x6f1   : > { %v8480_v17 = vadd.f32 %v8430_v41, %v16952_v14  ;;  %v17156_v55 = vadd.f32 %v8785_v6, %v8479_v32  ;;  %v17166_v14 = vld [vmem:[%s17383_s5] ss:$0 sm:$0xff] }
 0x6f2   : > { %v12071_v52 = vpop.f32.mrf.mxu1  ;;  %v12156_v57 = vpop.f32.mrf.mxu0 }
 0x6f3   : > { %v18026_v57 = vld [vmem:[#allocation24_spill] sm:$0xff] }
 0x6f4   : > { %v8435_v35 = vpop.f32.mrf.mxu1  ;;  %v8788_v40 = vpop.f32.mrf.mxu0 }
 0x6f5   : > { %v8481_v60 = vadd.f32 %v8435_v35, %v16956_v59  ;;  %v17159_v42 = vadd.f32 %v8788_v40, %v8480_v17 }
 0x6f6   : > { %v12074_v2 = vpop.f32.mrf.mxu1  ;;  %v12157_v18 = vpop.f32.mrf.mxu0 }
 0x6f8   : > { %v8438_v29 = vpop.f32.mrf.mxu1  ;;  %v8793_v43 = vpop.f32.mrf.mxu0 }
 0x6f9   : > { %v17161_v28 = vadd.f32 %v8793_v43, %v8481_v60 }
 0x6fa   : > { %v12075_v22 = vpop.f32.mrf.mxu1  ;;  %v12160_v19 = vpop.f32.mrf.mxu0 }
 0x6fc   : > { %v9043_v46 = vpop.f32.mrf.mxu1  ;;  %v8796_v36 = vpop.f32.mrf.mxu0 }
 0x6fd   : > { %v9209_v27 = vadd.f32 %v9043_v46, %v16964_v51  ;;  %v18027_v51 = vld [vmem:[#allocation22_spill] sm:$0xff] }
 0x6fe   : > { %v12166_v59 = vpop.f32.mrf.mxu1  ;;  %v12161_v25 = vpop.f32.mrf.mxu0 }
 0x6ff   : > { %v9257_v32 = vadd.f32 %v17166_v14, %v9209_v27  ;;  %v18028_v59 = vld [vmem:[#allocation26_spill] sm:$0xff] }
 0x700   : > { %v9046_v0 = vpop.f32.mrf.mxu1 }
 0x701   : > { %v9298_v53 = vmax.f32 %v9257_v32, 0.0  ;;  %v9210_v41 = vadd.f32 %v9046_v0, %v16969_v16 }
 0x702   : > { %v12167_v6 = vpop.f32.mrf.mxu1 }
 0x703   : > { %v9258_v17 = vadd.f32 %v17166_v14, %v9210_v41  ;;  %v9339_v35 = vmul.f32 %v9298_v53, %v18026_v57 }
 0x704   : > { %v9051_v52 = vpop.f32.mrf.mxu1 }
 0x705   : > { %v9299_v40 = vmax.f32 %v9258_v17, 0.0  ;;  %v9211_v60 = vadd.f32 %v9051_v52, %v16974_v62  ;;  %v9381_v22 = vsel %vm9380_vm12, %v9339_v35, 0.0  ;;  %v18029_v52 = vld [vmem:[#allocation27_spill] sm:$0xff] }
 0x706   : > { %v12170_v2 = vpop.f32.mrf.mxu1 }
 0x707   : > { %v9340_v18 = vmul.f32 %v9299_v40, %v18027_v51  ;;  %v9259_v29 = vadd.f32 %v17166_v14, %v9211_v60 }
 0x708   : > { %v9054_v43 = vpop.f32.mrf.mxu1 }
 0x709   : > { %v9382_v16 = vsel %vm9380_vm12, %v9340_v18, 0.0  ;;  %v9300_v19 = vmax.f32 %v9259_v29, 0.0  ;;  %v9212_v46 = vadd.f32 %v9054_v43, %v16979_v63  ;;  %v18030_v29 = vld [vmem:[#allocation30_spill] sm:$0xff] }
 0x70a   : > { %v9383_v36 = vadd.f32 %v9382_v16, %v9381_v22  ;;  %v12171_v27 = vpop.f32.mrf.mxu1 }
 0x70b   : > { %v9341_v25 = vmul.f32 %v9300_v19, %v18028_v59  ;;  %v9260_v62 = vadd.f32 %v17166_v14, %v9212_v46  ;;  %v9470_v59 = vld [vmem:[%s17384_s6] sm:$0xff] }
 0x70c   : > { %v9059_v32 = vpop.f32.mrf.mxu1  ;;  %12255 = vmatpush3.msra.mxu0 %v9470_v59 }
 0x70d   : > { %v9384_v0 = vsel %vm9380_vm12, %v9341_v25, 0.0  ;;  %v9301_v53 = vmax.f32 %v9260_v62, 0.0  ;;  %v9213_v41 = vadd.f32 %v9059_v32, %v16984_v50  ;;  %v18031_v25 = vld [vmem:[#allocation25_spill] sm:$0xff] }
 0x70e   : > { %v9385_v6 = vadd.f32 %v9384_v0, %v9383_v36  ;;  %v12174_v17 = vpop.f32.mrf.mxu1 }
 0x70f   : > { %v9342_v57 = vmul.f32 %v9301_v53, %v18029_v52  ;;  %v9261_v35 = vadd.f32 %v17166_v14, %v9213_v41 }
 0x710   : > { %v9062_v40 = vpop.f32.mrf.mxu1 }
 0x711   : > { %v9386_v63 = vsel %vm9380_vm12, %v9342_v57, 0.0  ;;  %v9302_v60 = vmax.f32 %v9261_v35, 0.0  ;;  %v9214_v2 = vadd.f32 %v9062_v40, %v16989_v3 }
 0x712   : > { %v9387_v51 = vadd.f32 %v9386_v63, %v9385_v6  ;;  %v12175_v18 = vpop.f32.mrf.mxu1 }
 0x713   : > { %v9343_v43 = vmul.f32 %v9302_v60, %v18030_v29  ;;  %v9262_v22 = vadd.f32 %v17166_v14, %v9214_v2  ;;  %v18033_v18 = vld [vmem:[#allocation32_spill] sm:$0xff] }
 0x714   : > { %v9067_v16 = vpop.f32.mrf.mxu1 }
 0x715   : > { %v9388_v50 = vsel %vm9380_vm12, %v9343_v43, 0.0  ;;  %v9303_v19 = vmax.f32 %v9262_v22, 0.0  ;;  %v9215_v46 = vadd.f32 %v9067_v16, %v16994_v54  ;;  %v18032_v54 = vld [vmem:[#allocation31_spill] sm:$0xff] }
 0x716   : > { %v9389_v36 = vadd.f32 %v9388_v50, %v9387_v51  ;;  %v12178_v27 = vpop.f32.mrf.mxu1 }
 0x717   : > { %v9344_v3 = vmul.f32 %v9303_v19, %v18031_v25  ;;  %v9263_v62 = vadd.f32 %v17166_v14, %v9215_v46 }
 0x718   : > { %v9070_v32 = vpop.f32.mrf.mxu1 }
 0x719   : > { %v9390_v0 = vsel %vm9380_vm12, %v9344_v3, 0.0  ;;  %v9304_v53 = vmax.f32 %v9263_v62, 0.0  ;;  %v9216_v41 = vadd.f32 %v9070_v32, %v16999_v49 }
 0x71a   : > { %v9391_v6 = vadd.f32 %v9390_v0, %v9389_v36  ;;  %v12179_v17 = vpop.f32.mrf.mxu1  ;;  %v18034_v36 = vld [vmem:[#allocation7_spill] sm:$0xff] }
 0x71b   : > { %v9345_v52 = vmul.f32 %v9304_v53, %v18032_v54  ;;  %v9264_v57 = vadd.f32 %v17166_v14, %v9216_v41  ;;  %v18035_v53 = vld [vmem:[#allocation8_spill] sm:$0xff] }
 0x71c   : > { %v9075_v35 = vpop.f32.mrf.mxu1 }
 0x71d   : > { %v9392_v40 = vsel %vm9380_vm12, %v9345_v52, 0.0  ;;  %v9305_v63 = vmax.f32 %v9264_v57, 0.0  ;;  %v9217_v60 = vadd.f32 %v9075_v35, %v17004_v23 }
 0x71e   : > { %v9393_v2 = vadd.f32 %v9392_v40, %v9391_v6  ;;  %v12182_v51 = vpop.f32.mrf.mxu1  ;;  %v18036_v40 = vld [vmem:[#allocation9_spill] sm:$0xff] }
 0x71f   : > { %v9346_v29 = vmul.f32 %v9305_v63, %v18033_v18  ;;  %v9265_v43 = vadd.f32 %v17166_v14, %v9217_v60 }
 0x720   : > { %v9078_v22 = vpop.f32.mrf.mxu1 }
 0x721   : > { %v9394_v49 = vsel %vm9380_vm12, %v9346_v29, 0.0  ;;  %v9306_v16 = vmax.f32 %v9265_v43, 0.0  ;;  %v9218_v50 = vadd.f32 %v9078_v22, %v17009_v15  ;;  %v18037_v22 = vld [vmem:[#allocation6_spill] sm:$0xff] }
 0x722   : > { %v9395_v19 = vadd.f32 %v9394_v49, %v9393_v2  ;;  %v12183_v46 = vpop.f32.mrf.mxu1 }
 0x723   : > { %v9347_v27 = vmul.f32 %v9306_v16, %v18034_v36  ;;  %v9266_v59 = vadd.f32 %v17166_v14, %v9218_v50 }
 0x724   : > { %v9083_v25 = vpop.f32.mrf.mxu1 }
 0x725   : > { %v9396_v23 = vsel %vm9380_vm12, %v9347_v27, 0.0  ;;  %v9307_v3 = vmax.f32 %v9266_v59, 0.0  ;;  %v9219_v62 = vadd.f32 %v9083_v25, %v17014_v4  ;;  %v18038_v59 = vld [vmem:[#allocation10_spill] sm:$0xff] }
 0x726   : > { %v9397_v32 = vadd.f32 %v9396_v23, %v9395_v19  ;;  %v12186_v0 = vpop.f32.mrf.mxu1 }
 0x727   : > { %v9348_v41 = vmul.f32 %v9307_v3, %v18035_v53  ;;  %v9267_v6 = vadd.f32 %v17166_v14, %v9219_v62 }
 0x728   : > { %v9086_v17 = vpop.f32.mrf.mxu1 }
 0x729   : > { %v9398_v15 = vsel %vm9380_vm12, %v9348_v41, 0.0  ;;  %v9308_v54 = vmax.f32 %v9267_v6, 0.0  ;;  %v9220_v52 = vadd.f32 %v9086_v17, %v17019_v38  ;;  %v18039_v41 = vld [vmem:[#allocation15_spill] sm:$0xff] }
 0x72a   : > { %v9399_v57 = vadd.f32 %v9398_v15, %v9397_v32  ;;  %v12187_v35 = vpop.f32.mrf.mxu1 }
 0x72b   : > { %v9349_v63 = vmul.f32 %v9308_v54, %v18036_v40  ;;  %v9268_v60 = vadd.f32 %v17166_v14, %v9220_v52  ;;  %v18040_v40 = vld [vmem:[#allocation17_spill] sm:$0xff] }
 0x72c   : > { %v9091_v2 = vpop.f32.mrf.mxu1 }
 0x72d   : > { %v9400_v4 = vsel %vm9380_vm12, %v9349_v63, 0.0  ;;  %v9309_v51 = vmax.f32 %v9268_v60, 0.0  ;;  %v9221_v18 = vadd.f32 %v9091_v2, %v17024_v24 }
 0x72e   : > { %v9401_v29 = vadd.f32 %v9400_v4, %v9399_v57  ;;  %v12190_v43 = vpop.f32.mrf.mxu1 }
 0x72f   : > { %v9350_v49 = vmul.f32 %v9309_v51, %v18037_v22  ;;  %v9269_v16 = vadd.f32 %v17166_v14, %v9221_v18  ;;  %v18041_v43 = vld [vmem:[#allocation18_spill] sm:$0xff] }
 0x730   : > { %v9094_v50 = vpop.f32.mrf.mxu1 }
 0x731   : > { %v9402_v38 = vsel %vm9380_vm12, %v9350_v49, 0.0  ;;  %v9310_v19 = vmax.f32 %v9269_v16, 0.0  ;;  %v9222_v46 = vadd.f32 %v9094_v50, %v17029_v10 }
 0x732   : > { %v9403_v36 = vadd.f32 %v9402_v38, %v9401_v29  ;;  %v12191_v27 = vpop.f32.mrf.mxu1 }
 0x733   : > { %v9351_v25 = vmul.f32 %v9310_v19, %v18038_v59  ;;  %v9270_v23 = vadd.f32 %v17166_v14, %v9222_v46 }
 0x734   : > { %v9099_v3 = vpop.f32.mrf.mxu1 }
 0x735   : > { %v9404_v24 = vsel %vm9380_vm12, %v9351_v25, 0.0  ;;  %v9311_v62 = vmax.f32 %v9270_v23, 0.0  ;;  %v9223_v32 = vadd.f32 %v9099_v3, %v17034_v45 }
 0x736   : > { %v9405_v0 = vadd.f32 %v9404_v24, %v9403_v36  ;;  %v12194_v53 = vpop.f32.mrf.mxu1  ;;  %v18042_v36 = vld [vmem:[#allocation20_spill] sm:$0xff] }
 0x737   : > { %v9352_v6 = vmul.f32 %v9311_v62, %v18039_v41  ;;  %v9271_v17 = vadd.f32 %v17166_v14, %v9223_v32  ;;  %v18043_v32 = vld [vmem:[#allocation21_spill] sm:$0xff] }
 0x738   : > { %v9102_v15 = vpop.f32.mrf.mxu1 }
 0x739   : > { %v9406_v10 = vsel %vm9380_vm12, %v9352_v6, 0.0  ;;  %v9312_v54 = vmax.f32 %v9271_v17, 0.0  ;;  %v9224_v52 = vadd.f32 %v9102_v15, %v17039_v34 }
 0x73a   : > { %v9407_v57 = vadd.f32 %v9406_v10, %v9405_v0  ;;  %v12195_v35 = vpop.f32.mrf.mxu1 }
 0x73b   : > { %v9353_v63 = vmul.f32 %v9312_v54, %v18040_v40  ;;  %v9272_v60 = vadd.f32 %v17166_v14, %v9224_v52  ;;  %v18044_v54 = vld [vmem:[#allocation23_spill] sm:$0xff] }
 0x73c   : > { %v9107_v2 = vpop.f32.mrf.mxu1 }
 0x73d   : > { %v9408_v45 = vsel %vm9380_vm12, %v9353_v63, 0.0  ;;  %v9313_v4 = vmax.f32 %v9272_v60, 0.0  ;;  %v9225_v51 = vadd.f32 %v9107_v2, %v17048_v30 }
 0x73e   : > { %v9409_v18 = vadd.f32 %v9408_v45, %v9407_v57  ;;  %v12198_v29 = vpop.f32.mrf.mxu1  ;;  %v18045_v45 = vld [vmem:[#allocation33_spill] sm:$0xff] }
 0x73f   : > { %v9354_v22 = vmul.f32 %v9313_v4, %v18041_v43  ;;  %v9273_v49 = vadd.f32 %v17166_v14, %v9225_v51 }
 0x740   : > { %v9110_v16 = vpop.f32.mrf.mxu1 }
 0x741   : > { %v9410_v34 = vsel %vm9380_vm12, %v9354_v22, 0.0  ;;  %v9314_v50 = vmax.f32 %v9273_v49, 0.0  ;;  %v9226_v38 = vadd.f32 %v9110_v16, %v17053_v48  ;;  %v18046_v16 = vld [vmem:[#allocation35_spill] sm:$0xff] }
 0x742   : > { %v9411_v19 = vadd.f32 %v9410_v34, %v9409_v18  ;;  %v12199_v46 = vpop.f32.mrf.mxu1 }
 0x743   : > { %v9355_v27 = vmul.f32 %v9314_v50, %v18042_v36  ;;  %v9274_v59 = vadd.f32 %v17166_v14, %v9226_v38 }
 0x744   : > { %v9115_v25 = vpop.f32.mrf.mxu1 }
 0x745   : > { %v9412_v30 = vsel %vm9380_vm12, %v9355_v27, 0.0  ;;  %v9315_v23 = vmax.f32 %v9274_v59, 0.0  ;;  %v9227_v3 = vadd.f32 %v9115_v25, %v17058_v8  ;;  %v18047_v59 = vld [vmem:[#allocation36_spill] sm:$0xff] }
 0x746   : > { %v9413_v24 = vadd.f32 %v9412_v30, %v9411_v19  ;;  %v12202_v62 = vpop.f32.mrf.mxu1 }
 0x747   : > { %v9356_v0 = vmul.f32 %v9315_v23, %v18043_v32  ;;  %v9275_v53 = vadd.f32 %v17166_v14, %v9227_v3 }
 0x748   : > { %v9118_v41 = vpop.f32.mrf.mxu1 }
 0x749   : > { %v9414_v48 = vsel %vm9380_vm12, %v9356_v0, 0.0  ;;  %v9316_v6 = vmax.f32 %v9275_v53, 0.0  ;;  %v9228_v17 = vadd.f32 %v9118_v41, %v17063_v61  ;;  %v18048_v0 = vld [vmem:[#allocation38_spill] sm:$0xff] }
 0x74a   : > { %v9415_v15 = vadd.f32 %v9414_v48, %v9413_v24  ;;  %v12203_v10 = vpop.f32.mrf.mxu1 }
 0x74b   : > { %v9357_v52 = vmul.f32 %v9316_v6, %v18044_v54  ;;  %v9276_v57 = vadd.f32 %v17166_v14, %v9228_v17  ;;  %v18049_v54 = vld [vmem:[#allocation39_spill] sm:$0xff] }
 0x74c   : > { %v9123_v35 = vpop.f32.mrf.mxu1 }
 0x74d   : > { %v9416_v8 = vsel %vm9380_vm12, %v9357_v52, 0.0  ;;  %v9317_v40 = vmax.f32 %v9276_v57, 0.0  ;;  %v9229_v63 = vadd.f32 %v9123_v35, %v17068_v31 }
 0x74e   : > { %v9417_v60 = vadd.f32 %v9416_v8, %v9415_v15  ;;  %v12206_v2 = vpop.f32.mrf.mxu1 }
 0x74f   : > { %v9358_v4 = vmul.f32 %v9317_v40, %v18045_v45  ;;  %v9277_v51 = vadd.f32 %v17166_v14, %v9229_v63  ;;  %v18050_v2 = vld [vmem:[#allocation41_spill] sm:$0xff] }
 0x750   : > { %v9126_v18 = vpop.f32.mrf.mxu1 }
 0x751   : > { %v9418_v61 = vsel %vm9380_vm12, %v9358_v4, 0.0  ;;  %v9318_v29 = vmax.f32 %v9277_v51, 0.0  ;;  %v9230_v43 = vadd.f32 %v9126_v18, %v17073_v26 }
 0x752   : > { %v9419_v22 = vadd.f32 %v9418_v61, %v9417_v60  ;;  %v12207_v49 = vpop.f32.mrf.mxu1 }
 0x753   : > { %v9359_v34 = vmul.f32 %v9318_v29, %v18046_v16  ;;  %v9278_v50 = vadd.f32 %v17166_v14, %v9230_v43 }
 0x754   : > { %v9131_v38 = vpop.f32.mrf.mxu1 }
 0x755   : > { %v9420_v31 = vsel %vm9380_vm12, %v9359_v34, 0.0  ;;  %v9319_v19 = vmax.f32 %v9278_v50, 0.0  ;;  %v9231_v46 = vadd.f32 %v9131_v38, %v17078_v20 }
 0x756   : > { %v9421_v36 = vadd.f32 %v9420_v31, %v9419_v22  ;;  %v12210_v27 = vpop.f32.mrf.mxu1  ;;  %v18051_v22 = vld [vmem:[#allocation42_spill] sm:$0xff] }
 0x757   : > { %v9360_v25 = vmul.f32 %v9319_v19, %v18047_v59  ;;  %v9279_v30 = vadd.f32 %v17166_v14, %v9231_v46  ;;  %v18052_v46 = vld [vmem:[#allocation44_spill] sm:$0xff] }
 0x758   : > { %v9134_v23 = vpop.f32.mrf.mxu1 }
 0x759   : > { %v9422_v26 = vsel %vm9380_vm12, %v9360_v25, 0.0  ;;  %v9320_v3 = vmax.f32 %v9279_v30, 0.0  ;;  %v9232_v24 = vadd.f32 %v9134_v23, %v17083_v44 }
 0x75a   : > { %v9423_v62 = vadd.f32 %v9422_v26, %v9421_v36  ;;  %v12211_v32 = vpop.f32.mrf.mxu1 }
 0x75b   : > { %v9361_v53 = vmul.f32 %v9320_v3, %v18048_v0  ;;  %v9280_v41 = vadd.f32 %v17166_v14, %v9232_v24  ;;  %v18053_v3 = vld [vmem:[#allocation45_spill] sm:$0xff] }
 0x75c   : > { %v9139_v48 = vpop.f32.mrf.mxu1 }
 0x75d   : > { %v9424_v20 = vsel %vm9380_vm12, %v9361_v53, 0.0  ;;  %v9321_v6 = vmax.f32 %v9280_v41, 0.0  ;;  %v9233_v17 = vadd.f32 %v9139_v48, %v17088_v56 }
 0x75e   : > { %v9425_v15 = vadd.f32 %v9424_v20, %v9423_v62  ;;  %v12214_v10 = vpop.f32.mrf.mxu1  ;;  %v18054_v20 = vld [vmem:[#allocation47_spill] sm:$0xff] }
 0x75f   : > { %v9362_v52 = vmul.f32 %v9321_v6, %v18049_v54  ;;  %v9281_v57 = vadd.f32 %v17166_v14, %v9233_v17 }
 0x760   : > { %v9142_v35 = vpop.f32.mrf.mxu1 }
 0x761   : > { %v9426_v44 = vsel %vm9380_vm12, %v9362_v52, 0.0  ;;  %v9322_v8 = vmax.f32 %v9281_v57, 0.0  ;;  %v9234_v40 = vadd.f32 %v9142_v35, %v17093_v58  ;;  %v18055_v35 = vld [vmem:[#allocation48_spill] sm:$0xff] }
 0x762   : > { %v9427_v63 = vadd.f32 %v9426_v44, %v9425_v15  ;;  %v12215_v60 = vpop.f32.mrf.mxu1 }
 0x763   : > { %v9363_v45 = vmul.f32 %v9322_v8, %v18050_v2  ;;  %v9282_v4 = vadd.f32 %v17166_v14, %v9234_v40 }
 0x764   : > { %v9147_v51 = vpop.f32.mrf.mxu1 }
 0x765   : > { %v9428_v56 = vsel %vm9380_vm12, %v9363_v45, 0.0  ;;  %v9323_v18 = vmax.f32 %v9282_v4, 0.0  ;;  %v9235_v61 = vadd.f32 %v9147_v51, %v17098_v11  ;;  %v18056_v4 = vld [vmem:[#allocation50_spill] sm:$0xff] }
 0x766   : > { %v9429_v29 = vadd.f32 %v9428_v56, %v9427_v63  ;;  %v12218_v43 = vpop.f32.mrf.mxu1 }
 0x767   : > { %v9364_v49 = vmul.f32 %v9323_v18, %v18051_v22  ;;  %v9283_v16 = vadd.f32 %v17166_v14, %v9235_v61 }
 0x768   : > { %v9150_v34 = vpop.f32.mrf.mxu1 }
 0x769   : > { %v9430_v58 = vsel %vm9380_vm12, %v9364_v49, 0.0  ;;  %v9324_v50 = vmax.f32 %v9283_v16, 0.0  ;;  %v9236_v38 = vadd.f32 %v9150_v34, %v17107_v13  ;;  %v18057_v49 = vld [vmem:[#allocation51_spill] sm:$0xff] }
 0x76a   : > { %v9431_v31 = vadd.f32 %v9430_v58, %v9429_v29  ;;  %v12219_v19 = vpop.f32.mrf.mxu1 }
 0x76b   : > { %v9365_v36 = vmul.f32 %v9324_v50, %v18052_v46  ;;  %v9284_v27 = vadd.f32 %v17166_v14, %v9236_v38  ;;  %v18058_v46 = vld [vmem:[#allocation53_spill] sm:$0xff] }
 0x76c   : > { %v9155_v59 = vpop.f32.mrf.mxu1 }
 0x76d   : > { %v9432_v11 = vsel %vm9380_vm12, %v9365_v36, 0.0  ;;  %v9325_v25 = vmax.f32 %v9284_v27, 0.0  ;;  %v9237_v30 = vadd.f32 %v9155_v59, %v17112_v7 }
 0x76e   : > { %v9433_v23 = vadd.f32 %v9432_v11, %v9431_v31  ;;  %v12222_v26 = vpop.f32.mrf.mxu1 }
 0x76f   : > { %v9366_v24 = vmul.f32 %v9325_v25, %v18053_v3  ;;  %v9285_v62 = vadd.f32 %v17166_v14, %v9237_v30  ;;  %v18059_v26 = vld [vmem:[#allocation54_spill] sm:$0xff] }
 0x770   : > { %v9158_v32 = vpop.f32.mrf.mxu1 }
 0x771   : > { %v9434_v13 = vsel %vm9380_vm12, %v9366_v24, 0.0  ;;  %v9326_v0 = vmax.f32 %v9285_v62, 0.0  ;;  %v9238_v53 = vadd.f32 %v9158_v32, %v17117_v12 }
 0x772   : > { %v9435_v41 = vadd.f32 %v9434_v13, %v9433_v23  ;;  %v12223_v48 = vpop.f32.mrf.mxu1 }
 0x773   : > { %v9367_v6 = vmul.f32 %v9326_v0, %v18054_v20  ;;  %v9286_v17 = vadd.f32 %v17166_v14, %v9238_v53 }
 0x774   : > { %v9163_v15 = vpop.f32.mrf.mxu1 }
 0x775   : > { %v9436_v7 = vsel %vm9380_vm12, %v9367_v6, 0.0  ;;  %v9327_v10 = vmax.f32 %v9286_v17, 0.0  ;;  %v9239_v54 = vadd.f32 %v9163_v15, %v17122_v1 }
 0x776   : > { %v9437_v52 = vadd.f32 %v9436_v7, %v9435_v41  ;;  %v12226_v57 = vpop.f32.mrf.mxu1  ;;  %v18060_v41 = vld [vmem:[#allocation57_spill] sm:$0xff] }
 0x777   : > { %v9368_v44 = vmul.f32 %v9327_v10, %v18055_v35  ;;  %v9287_v8 = vadd.f32 %v17166_v14, %v9239_v54  ;;  %v18061_v54 = vld [vmem:[#allocation58_spill] sm:$0xff] }
 0x778   : > { %v9166_v40 = vpop.f32.mrf.mxu1 }
 0x779   : > { %v9438_v12 = vsel %vm9380_vm12, %v9368_v44, 0.0  ;;  %v9328_v63 = vmax.f32 %v9287_v8, 0.0  ;;  %v9240_v60 = vadd.f32 %v9166_v40, %v17128_v9 }
 0x77a   : > { %v9439_v2 = vadd.f32 %v9438_v12, %v9437_v52  ;;  %v12227_v45 = vpop.f32.mrf.mxu1 }
 0x77b   : > { %v9369_v51 = vmul.f32 %v9328_v63, %v18056_v4  ;;  %v9288_v56 = vadd.f32 %v17166_v14, %v9240_v60  ;;  %v18062_v63 = vld [vmem:[#allocation61_spill] sm:$0xff] }
 0x77c   : > { %v9171_v18 = vpop.f32.mrf.mxu1 }
 0x77d   : > { %v9440_v1 = vsel %vm9380_vm12, %v9369_v51, 0.0  ;;  %v9329_v61 = vmax.f32 %v9288_v56, 0.0  ;;  %v9241_v29 = vadd.f32 %v9171_v18, %v17133_v47 }
 0x77e   : > { %v9441_v43 = vadd.f32 %v9440_v1, %v9439_v2  ;;  %v12230_v22 = vpop.f32.mrf.mxu1  ;;  %v18063_v1 = vld [vmem:[#allocation62_spill] sm:$0xff] }
 0x77f   : > { %v9370_v16 = vmul.f32 %v9329_v61, %v18057_v49  ;;  %v9289_v34 = vadd.f32 %v17166_v14, %v9241_v29 }
 0x780   : > { %v9174_v58 = vpop.f32.mrf.mxu1 }
 0x781   : > { %v9442_v9 = vsel %vm9380_vm12, %v9370_v16, 0.0  ;;  %v9330_v50 = vmax.f32 %v9289_v34, 0.0  ;;  %v9242_v38 = vadd.f32 %v9174_v58, %v17137_v21  ;;  %v18064_v58 = vld [vmem:[#allocation65_spill] sm:$0xff] }
 0x782   : > { %v9443_v31 = vadd.f32 %v9442_v9, %v9441_v43  ;;  %v12231_v19 = vpop.f32.mrf.mxu1 }
 0x783   : > { %v9371_v36 = vmul.f32 %v9330_v50, %v18058_v46  ;;  %v9290_v27 = vadd.f32 %v17166_v14, %v9242_v38 }
 0x784   : > { %v9179_v59 = vpop.f32.mrf.mxu1 }
 0x785   : > { %v9444_v47 = vsel %vm9380_vm12, %v9371_v36, 0.0  ;;  %v9331_v11 = vmax.f32 %v9290_v27, 0.0  ;;  %v9243_v25 = vadd.f32 %v9179_v59, %v17140_v37  ;;  %v18065_v27 = vld [vmem:[#allocation66_spill] sm:$0xff] }
 0x786   : > { %v9445_v30 = vadd.f32 %v9444_v47, %v9443_v31  ;;  %v12234_v23 = vpop.f32.mrf.mxu1 }
 0x787   : > { %v9372_v3 = vmul.f32 %v9331_v11, %v18059_v26  ;;  %v9291_v24 = vadd.f32 %v17166_v14, %v9243_v25  ;;  %v18066_v26 = vld [vmem:[#allocation69_spill] sm:$0xff] }
 0x788   : > { %v9182_v62 = vpop.f32.mrf.mxu1 }
 0x789   : > { %v9446_v21 = vsel %vm9380_vm12, %v9372_v3, 0.0  ;;  %v9332_v32 = vmax.f32 %v9291_v24, 0.0  ;;  %v9244_v13 = vadd.f32 %v9182_v62, %v17143_v5 }
 0x78a   : > { %v9447_v0 = vadd.f32 %v9446_v21, %v9445_v30  ;;  %v12235_v53 = vpop.f32.mrf.mxu1 }
 0x78b   : > { %v9373_v48 = vmul.f32 %v9332_v32, %v18060_v41  ;;  %v9292_v20 = vadd.f32 %v17166_v14, %v9244_v13  ;;  %v9474_v41 = vld [vmem:[%s17385_s7] sm:$0x1] }
 0x78c   : > { %v9187_v6 = vpop.f32.mrf.mxu1 }
 0x78d   : > { %v9448_v37 = vsel %vm9380_vm12, %v9373_v48, 0.0  ;;  %v9333_v17 = vmax.f32 %v9292_v20, 0.0  ;;  %v9245_v15 = vadd.f32 %v9187_v6, %v17146_v39 }
 0x78e   : > { %v9449_v7 = vadd.f32 %v9448_v37, %v9447_v0  ;;  %v12238_v10 = vpop.f32.mrf.mxu1 }
 0x78f   : > { %v9374_v52 = vmul.f32 %v9333_v17, %v18061_v54  ;;  %v9293_v57 = vadd.f32 %v17166_v14, %v9245_v15 }
 0x790   : > { %v9190_v35 = vpop.f32.mrf.mxu1 }
 0x791   : > { %v9450_v5 = vsel %vm9380_vm12, %v9374_v52, 0.0  ;;  %v9334_v44 = vmax.f32 %v9293_v57, 0.0  ;;  %v9246_v8 = vadd.f32 %v9190_v35, %v17153_v33 }
 0x792   : > { %v9451_v40 = vadd.f32 %v9450_v5, %v9449_v7  ;;  %v12239_v12 = vpop.f32.mrf.mxu1 }
 0x793   : > { %v9375_v60 = vmul.f32 %v9334_v44, %v18062_v63  ;;  %v9294_v2 = vadd.f32 %v17166_v14, %v9246_v8 }
 0x794   : > { %v9195_v45 = vpop.f32.mrf.mxu1 }
 0x795   : > { %v9452_v39 = vsel %vm9380_vm12, %v9375_v60, 0.0  ;;  %v9335_v4 = vmax.f32 %v9294_v2, 0.0  ;;  %v9247_v51 = vadd.f32 %v9195_v45, %v17156_v55 }
 0x796   : > { %v9453_v56 = vadd.f32 %v9452_v39, %v9451_v40  ;;  %v12242_v18 = vpop.f32.mrf.mxu1 }
 0x797   : > { %v9376_v61 = vmul.f32 %v9335_v4, %v18063_v1  ;;  %v9295_v29 = vadd.f32 %v17166_v14, %v9247_v51 }
 0x798   : > { %v9198_v43 = vpop.f32.mrf.mxu1 }
 0x799   : > { %v9454_v33 = vsel %vm9380_vm12, %v9376_v61, 0.0  ;;  %v9336_v22 = vmax.f32 %v9295_v29, 0.0  ;;  %v9248_v49 = vadd.f32 %v9198_v43, %v17159_v42 }
 0x79a   : > { %v9455_v16 = vadd.f32 %v9454_v33, %v9453_v56  ;;  %v12243_v34 = vpop.f32.mrf.mxu1 }
 0x79b   : > { %v9377_v9 = vmul.f32 %v9336_v22, %v18064_v58  ;;  %v9296_v50 = vadd.f32 %v17166_v14, %v9248_v49 }
 0x79c   : > { %v9203_v38 = vpop.f32.mrf.mxu1 }
 0x79d   : > { %v9456_v55 = vsel %vm9380_vm12, %v9377_v9, 0.0  ;;  %v9337_v31 = vmax.f32 %v9296_v50, 0.0  ;;  %v9249_v19 = vadd.f32 %v9203_v38, %v17161_v28 }
 0x79e   : > { %v9457_v46 = vadd.f32 %v9456_v55, %v9455_v16  ;;  %v12246_v36 = vpop.f32.mrf.mxu1 }
 0x79f   : > { %v9378_v59 = vmul.f32 %v9337_v31, %v18065_v27  ;;  %v9297_v47 = vadd.f32 %v17166_v14, %v9249_v19 }
 0x7a0   : > { %v9206_v11 = vpop.f32.mrf.mxu1 }
 0x7a1   : > { %v9458_v42 = vsel %vm9380_vm12, %v9378_v59, 0.0  ;;  %v9338_v25 = vmax.f32 %v9297_v47, 0.0 }
 0x7a2   : > { %v9459_v30 = vadd.f32 %v9458_v42, %v9457_v46  ;;  %v12247_v23 = vpop.f32.mrf.mxu1 }
 0x7a3   : > { %v9379_v3 = vmul.f32 %v9338_v25, %v18066_v26 }
 0x7a5   : > { %v9461_v24 = vsel %vm9460_vm13, %v9379_v3, 0.0 }
 0x7a6   : > { %v9462_v62 = vadd.f32 %v9461_v24, %v9459_v30 }
 0x7a8   : > { %v9463_v28 = vrot.slane %v9462_v62, 4 }
 0x7aa   : > { %v9464_v21 = vadd.f32 %v9463_v28, %v9462_v62 }
 0x7ac   : > { %v9465_v32 = vrot.slane %v9464_v21, 2 }
 0x7ae   : > { %v9466_v13 = vadd.f32 %v9465_v32, %v9464_v21 }
 0x7b0   : > { %v9467_v0 = vrot.slane %v9466_v13, 1 }
 0x7b2   : > { %v9468_v53 = vadd.f32 %v9467_v0, %v9466_v13 }
 0x7b4   : > { %v9469_v14 = vmul.f32 0.00390625, %v9468_v53 }
 0x7b6   : > { %12257 = vmatmul.mubr.msk.f32.vlgmr.msra.gmra.mxu0 %vm9380_vm12, %v9469_v14 }
 0x876   : > { %v9544_v48 = vpop.f32.mrf.mxu0 }
 0x877   : > { %v9545_v20 = vadd.f32 %v9544_v48, %v9474_v41 }
 0x878   : > { %v12258_v6 = vpop.f32.mrf.mxu0 }
 0x879   : > { %9548 = vst [vmem:[%s297_s22] sm:$0x1] %v9545_v20 }
 0x87a   : > { %12547 = shalt.err (!%p12544_p3)
}
 0x87b   : > { %s12548_s19 = scalar_lea.hbm %s17343_s10, 16  ;;  %s12552_s21 = scalar_lea.hbm %s17386_s8, 32 }
 0x87c   : > { %p12549_p4 = scmp.ne.s32.totalorder %s17343_s10, %s12548_s19  ;;  %p12553_p9 = scmp.lt.s32.totalorder %s17343_s10, %s17386_s8 }
 0x87d   : > { %p12554_p10 = scmp.lt.s32.totalorder %s12552_s21, %s12548_s19 }
 0x87e   : > { %p12550_p7 = pnand %p12549_p4, %p12683_p5 }
 0x87f   : > { %p12555_p11 = por %p12554_p10, %p12553_p9 }
 0x880   : > { %p12551_p8 = pneg %p12550_p7 }
 0x882   : > { %p12556_p12 = pnand %p12555_p11, %p12551_p8 }
 0x884   : > { %12559 = shalt.err (!%p12556_p12)
}
 0x885   : > { %12260 = dma.vmem_to_hbm [thread:$0]  (%p12683_p5), %s9563_s23, 16, %s17343_s10, %s9550_s12  }
 0x886 PF: > { %p12266_p13 = scmp.ge.s32.totalorder %s12594_s30, 2  ;;  %s9574_s26 = sand.u32 1, %s12582_s27  }
 0x887   : > { %s9575_s13 = scalar_lea.sflag [#allocation4], %s9574_s26 }
 0x888   : > { %p12263_p0 = pnand %p12266_p13, %p12687_p6 }
 0x88a   : > { %p12264_p1 = pneg %p12263_p0 }
 0x88c   : > { %12577 = dma.done.wait (%p12264_p1), %s9575_s13, 16  }
 0x88d   : > { %12579 = vsyncadd (%p12264_p1), %s9575_s13, 4294967280  ;;  %p18_p2 = scmp.ge.s32.totalorder %s12670_s11, 4   ;;  %s18067_s27 = smov %s12586_s28 }
 0x88e   : > { %s18068_s28 = smov %s12590_s29  ;;  %s18069_s29 = smov %s12681_s14 }
 0x88f   : > { %s18070_s30 = smov %s12670_s11  ;;  %20 = sbr.rel (!%p18_p2) target bundleno = 3 (0x3), region = 103 }
 0x894   :  { %9579 = vsyncpa [#allocation4], 1 }
 0x895   :  { %9581 = vsyncpa [#allocation4 + $0x1], 1 }

</bundles_post_ra>
